<compile_context>
chip_gen: v7x
topology: tpu7x:2x2x1
jax: 0.10.0
libtpu: 0.0.40
codegen_flags: <defaults>
</compile_context>

<pallas_src>
import math
import numpy as np
import jax
import jax.numpy as jnp
from jax.experimental import pallas as pl
from jax.experimental.pallas import tpu as pltpu

# ---- module hyper-parameters (from NGP_mb.__init__) -------------------------
L_MB = 8                      # n_levels
F_MB = 2                      # n_features_per_level
LOG2_T = 19                   # log2_hashmap_size
T_SIZE = 1 << LOG2_T
N_MIN = 32                    # base_resolution
FEAT_DIM = L_MB * F_MB        # 16  (= mb_encoder.n_output_dims)
FEAT128 = 8 * L_MB * F_MB     # 128 (corners folded into the row axis)
HIDDEN = 32
TILE_N = 2048                 # samples per grid step (lane-dense, multiple of 128)

_CORNERS = np.array([[0, 0, 0], [0, 0, 1], [0, 1, 0], [0, 1, 1],
                     [1, 0, 0], [1, 0, 1], [1, 1, 0], [1, 1, 1]], dtype=np.int32)
_PRIMES = np.array([1, 2654435761, 805459861], dtype=np.uint32)


# ---------------------------- Pallas kernel ----------------------------------
def mb_kernel(x01_ref, cf_mb_ref, cf_g_ref, res16_ref,
              w1m_ref, b1m_ref, w2m_ref, b2m_ref,
              w1g_ref, b1g_ref, w2g_ref, b2g_ref, out_ref):
    # x01: (3, T) f32 in [0,1]; cf_*: (128, T) bf16 corner features, rows = c*16 + l*2 + f
    res16 = res16_ref[...]                           # (16, 1) f32, rows = level*2 + f
    x = x01_ref[...]                                 # (3, T) f32
    t = x.shape[1]

    # per-axis, per-level fractional coordinates (16, T) -- recomputed in-kernel so no
    # frac stream is needed from HBM (bit-identical to the glue's floor/frac).
    def frac16(axis):
        p = x[axis:axis + 1, :] * res16              # (1,T)*(16,1) -> (16, T)
        return p - jnp.floor(p)

    fx, fy, fz = frac16(0), frac16(1), frac16(2)
    ox, oy, oz = 1.0 - fx, 1.0 - fy, 1.0 - fz

    # trilinear interpolation: accumulate weighted corner features directly into a
    # (16, T) f32 accumulator per table (corner weights shared by both tables).
    f_mb = jnp.zeros((FEAT_DIM, t), jnp.float32)
    f_g = jnp.zeros((FEAT_DIM, t), jnp.float32)
    for c, (bx, by, bz) in enumerate(_CORNERS.tolist()):   # static 8-corner loop
        w = (fx if bx else ox) * (fy if by else oy) * (fz if bz else oz)   # (16, T)
        lo = c * FEAT_DIM
        f_mb = f_mb + cf_mb_ref[lo:lo + FEAT_DIM, :].astype(jnp.float32) * w
        f_g = f_g + cf_g_ref[lo:lo + FEAT_DIM, :].astype(jnp.float32) * w

    # two tiny per-head MLPs (no zero blocks, no big concats)
    h_m = jnp.maximum(jnp.dot(w1m_ref[...], f_mb, preferred_element_type=jnp.float32)
                      + b1m_ref[...], 0.0)           # (32, T)
    h_g = jnp.maximum(jnp.dot(w1g_ref[...], f_g, preferred_element_type=jnp.float32)
                      + b1g_ref[...], 0.0)           # (32, T)
    o_m = jnp.dot(w2m_ref[...], h_m, preferred_element_type=jnp.float32) + b2m_ref[...]  # (1, T)
    o_g = jnp.dot(w2g_ref[...], h_g, preferred_element_type=jnp.float32) + b2g_ref[...]  # (1, T)
    o = jnp.concatenate([o_m, o_g], axis=0)          # (2, T) -- tiny
    out_ref[...] = 1.0 / (1.0 + jnp.exp(-o))         # row 0: alpha, row 1: rgb


def ngp_mb_pallas(x01_t, cf_mb_t, cf_g_t, prep):
    n_pad = x01_t.shape[1]
    grid = (n_pad // TILE_N,)

    def tile_spec(rows):
        return pl.BlockSpec((rows, TILE_N), lambda i: (0, i))

    def const_spec(arr):
        return pl.BlockSpec(arr.shape, lambda i: (0, 0))

    consts = (prep['res16'],
              prep['w1m_t'], prep['b1m_c'], prep['w2m_t'], prep['b2m_c'],
              prep['w1g_t'], prep['b1g_c'], prep['w2g_t'], prep['b2g_c'])

    out = pl.pallas_call(
        mb_kernel,
        out_shape=jax.ShapeDtypeStruct((2, n_pad), jnp.float32),
        grid=grid,
        in_specs=[tile_spec(3), tile_spec(FEAT128), tile_spec(FEAT128)]
                 + [const_spec(c) for c in consts],
        out_specs=pl.BlockSpec((2, TILE_N), lambda i: (0, i)),
        compiler_params=pltpu.CompilerParams(
            dimension_semantics=("parallel",),
            vmem_limit_bytes=32 * 1024 * 1024),
    )(x01_t, cf_mb_t, cf_g_t, *consts)
    return out


# -------------------------- hash-grid encoding (JAX glue) ---------------------
def rotate_points(x, r_inv):
    """(R_inv @ x_i) per sample, written with explicit elementwise ops so the kernel
    path and the reference path produce bit-identical coordinates (floor-safe)."""
    return (x[:, 0:1] * r_inv[:, 0][None, :]
            + x[:, 1:2] * r_inv[:, 1][None, :]
            + x[:, 2:3] * r_inv[:, 2][None, :])                        # (N, 3)


def encode_for_kernel(x01_t, mb_flat, grey_flat, res_levels):
    """x01_t: (3, Np). Single flat gather -> lane-dense (128, Np) bf16 corner-feature
    slabs for both tables, rows = corner*16 + level*2 + f (no transposes)."""
    n = x01_t.shape[1]
    corners = jnp.asarray(_CORNERS)                                    # (8, 3) int32
    primes = jnp.asarray(_PRIMES)                                      # (3,) uint32
    res = jnp.asarray(res_levels, jnp.float32)                         # (L,)

    pos = x01_t[None, :, :] * res[:, None, None]                       # (L, 3, Np)
    pos0 = jnp.floor(pos).astype(jnp.int32)                            # (L, 3, Np)
    gu = (pos0[None, :, :, :] + corners[:, None, :, None]).astype(jnp.uint32)   # (8, L, 3, Np)
    idx = (gu[:, :, 0, :] * primes[0]) ^ (gu[:, :, 1, :] * primes[1]) ^ (gu[:, :, 2, :] * primes[2])
    idx = (idx % jnp.uint32(T_SIZE)).astype(jnp.int32)                 # (8, L, Np)

    lvl_off = (jnp.arange(L_MB, dtype=jnp.int32) * T_SIZE)[None, :, None]       # (1, L, 1)
    base = (idx + lvl_off) * F_MB                                      # (8, L, Np)
    full_idx = base[:, :, None, :] + jnp.arange(F_MB, dtype=jnp.int32)[None, None, :, None]
    full_idx = full_idx.reshape(FEAT128, n)                            # rows = c*16 + l*2 + f

    return mb_flat[full_idx], grey_flat[full_idx]                      # (128, Np) bf16 each


def encode_ref(x01, table, res_levels):
    """Plain-JAX interpolated features (N, 16) — independent f32 reference path."""
    corners = jnp.asarray(_CORNERS)
    primes = jnp.asarray(_PRIMES)
    feats = []
    for level in range(L_MB):
        pos = x01 * float(res_levels[level])
        pos0 = jnp.floor(pos)
        frac = pos - pos0                                              # (N, 3)
        gu = (pos0.astype(jnp.int32)[:, None, :] + corners[None]).astype(jnp.uint32)  # (N,8,3)
        idx = (gu[..., 0] * primes[0]) ^ (gu[..., 1] * primes[1]) ^ (gu[..., 2] * primes[2])
        idx = (idx % jnp.uint32(T_SIZE)).astype(jnp.int32)             # (N, 8)
        f = table[level][idx]                                          # (N, 8, 2)
        w = jnp.prod(jnp.where(corners[None, :, :] == 1,
                               frac[:, None, :], 1.0 - frac[:, None, :]), axis=-1)    # (N, 8)
        feats.append(jnp.sum(f * w[..., None], axis=1))                # (N, 2)
    return jnp.concatenate(feats, axis=-1)                             # (N, 16)


# ------------------------------ parameters -----------------------------------
def init_params(key, scale):
    ks = jax.random.split(key, 6)

    def linear(k, fan_in, fan_out):
        kw, kb = jax.random.split(k)
        lim = 1.0 / math.sqrt(fan_in)
        w = jax.random.uniform(kw, (fan_in, fan_out), jnp.float32, -lim, lim)
        b = jax.random.uniform(kb, (fan_out,), jnp.float32, -lim, lim)
        return w, b

    w1m, b1m = linear(ks[0], FEAT_DIM, HIDDEN)
    w2m, b2m = linear(ks[1], HIDDEN, 1)
    w1g, b1g = linear(ks[2], FEAT_DIM, HIDDEN)
    w2g, b2g = linear(ks[3], HIDDEN, 1)

    # deterministic R_inv: rotation about z by 0.3 rad
    c, s = math.cos(0.3), math.sin(0.3)
    r_inv = jnp.array([[c, -s, 0.0], [s, c, 0.0], [0.0, 0.0, 1.0]], jnp.float32)

    return dict(
        R_inv=r_inv,
        mb_table=jax.random.uniform(ks[4], (L_MB, T_SIZE, F_MB), jnp.float32, -1e-4, 1e-4),
        grey_table=jax.random.uniform(ks[5], (L_MB, T_SIZE, F_MB), jnp.float32, -1e-4, 1e-4),
        w1m=w1m, b1m=b1m, w2m=w2m, b2m=b2m,
        w1g=w1g, b1g=b1g, w2g=w2g, b2g=b2g,
    )


def prepare_module(params, per_level_scale):
    """One-time repack: bf16-flattened hash tables (halves streamed bytes), transposed
    head weights, and per-level resolutions for the in-kernel frac recompute."""
    res_levels = np.floor(N_MIN * per_level_scale ** np.arange(L_MB)).astype(np.float32)
    return dict(
        R_inv=params['R_inv'],
        mb_flat=params['mb_table'].reshape(-1).astype(jnp.bfloat16),       # flat idx = (l*T + h)*F + f
        grey_flat=params['grey_table'].reshape(-1).astype(jnp.bfloat16),
        res_levels=jnp.asarray(res_levels),
        res16=jnp.asarray(np.repeat(res_levels, F_MB).reshape(FEAT_DIM, 1)),
        w1m_t=params['w1m'].T, b1m_c=params['b1m'].reshape(HIDDEN, 1),
        w2m_t=params['w2m'].T, b2m_c=params['b2m'].reshape(1, 1),
        w1g_t=params['w1g'].T, b1g_c=params['b1g'].reshape(HIDDEN, 1),
        w2g_t=params['w2g'].T, b2g_c=params['b2g'].reshape(1, 1),
    )


# ------------------------------ forward pass ----------------------------------
def ngp_mb_forward(x, prep, scale):
    # x: (N, 3) in [-scale, scale]
    n = x.shape[0]
    x01 = (rotate_points(x, prep['R_inv']) + scale) / (2.0 * scale)     # (N, 3) in [0,1]
    x01_t = x01.T                                                       # (3, N) lane-dense
    n_pad = ((n + TILE_N - 1) // TILE_N) * TILE_N
    if n_pad != n:                                                      # pad at SAMPLE level (12 B/sample)
        x01_t = jnp.pad(x01_t, ((0, 0), (0, n_pad - n)))
    cf_mb_t, cf_g_t = encode_for_kernel(x01_t, prep['mb_flat'], prep['grey_flat'],
                                        prep['res_levels'])
    out = ngp_mb_pallas(x01_t, cf_mb_t, cf_g_t, prep)                   # (2, n_pad)
    return out[0, :n], out[1, :n]                                       # alphas, rgbs


def ngp_mb_forward_ref(x, params, scale, per_level_scale):
    """Pure-JAX f32 reference (independent interpolation / MLP path)."""
    res_levels = np.floor(N_MIN * per_level_scale ** np.arange(L_MB)).astype(np.float32)
    x01 = (rotate_points(x, params['R_inv']) + scale) / (2.0 * scale)
    f_mb = encode_ref(x01, params['mb_table'], res_levels)
    f_g = encode_ref(x01, params['grey_table'], res_levels)
    h = jnp.maximum(f_mb @ params['w1m'] + params['b1m'], 0.0)
    a = (h @ params['w2m'])[:, 0] + params['b2m'][0]
    h = jnp.maximum(f_g @ params['w1g'] + params['b1g'], 0.0)
    r = (h @ params['w2g'])[:, 0] + params['b2g'][0]
    return jax.nn.sigmoid(a), jax.nn.sigmoid(r)


if __name__ == "__main__":
    key = jax.random.PRNGKey(0)
    scale = 0.5
    per_level_scale = float(np.exp(np.log(2048 * scale / N_MIN) / (L_MB - 1)))

    k_param, k_x = jax.random.split(key)
    params = init_params(k_param, scale)
    prep = prepare_module(params, per_level_scale)

    # Non-multiple of TILE_N: exercises sample-level padding (pads to 4096 -> 2 grid
    # steps, so the 'parallel' sample axis can shard across both v7x TensorCores).
    N = 3000
    x = jax.random.uniform(k_x, (N, 3), jnp.float32, -scale, scale)

    forward = jax.jit(ngp_mb_forward, static_argnums=(2,))
    alphas, rgbs = forward(x, prep, scale)
    jax.block_until_ready((alphas, rgbs))

    a_ref, r_ref = ngp_mb_forward_ref(x, params, scale, per_level_scale)
    # Tolerance relaxed vs the f32 version because corner features are streamed in bf16
    # (table values ~1e-4 -> output error ~1e-6, well inside this budget).
    np.testing.assert_allclose(np.asarray(alphas), np.asarray(a_ref), rtol=1e-3, atol=1e-4)
    np.testing.assert_allclose(np.asarray(rgbs), np.asarray(r_ref), rtol=1e-3, atol=1e-4)
    assert alphas.shape == (N,) and rgbs.shape == (N,)

    print("KERNEL_OK")
</pallas_src>

<mosaic_0001>
module attributes {stable_mosaic.version = 11 : i64} {
  func.func private @main(%arg0: i32) attributes {dimension_semantics = [#tpu.dimension_semantics<core_parallel>], iteration_bounds = array<i64: 2>, tpu.core_type = #tpu.core_type<sc_scalar_subcore>, window_params = []} {
    return
  }
}

module attributes {stable_mosaic.version = 11 : i64} {
  func.func private @main(%arg0: i32) attributes {dimension_semantics = [#tpu.dimension_semantics<core_parallel>], iteration_bounds = array<i64: 2>, tpu.core_type = #tpu.core_type<sc_scalar_subcore>, window_params = []} {
    return
  }
}

module attributes {stable_mosaic.version = 11 : i64} {
  func.func @mb_kernel(%arg0: i32, %arg1: memref<3x2048xf32, #tpu.memory_space<vmem>>, %arg2: memref<128x2048xbf16, #tpu.memory_space<vmem>>, %arg3: memref<128x2048xbf16, #tpu.memory_space<vmem>>, %arg4: memref<16x1xf32, #tpu.memory_space<vmem>>, %arg5: memref<32x16xf32, #tpu.memory_space<vmem>>, %arg6: memref<32x1xf32, #tpu.memory_space<vmem>>, %arg7: memref<1x32xf32, #tpu.memory_space<vmem>>, %arg8: memref<1x1xf32, #tpu.memory_space<vmem>>, %arg9: memref<32x16xf32, #tpu.memory_space<vmem>>, %arg10: memref<32x1xf32, #tpu.memory_space<vmem>>, %arg11: memref<1x32xf32, #tpu.memory_space<vmem>>, %arg12: memref<1x1xf32, #tpu.memory_space<vmem>>, %arg13: memref<2x2048xf32, #tpu.memory_space<vmem>>) attributes {dimension_semantics = [#tpu.dimension_semantics<parallel>], iteration_bounds = array<i64: 2>, scalar_prefetch = 0 : i64, scratch_operands = 0 : i64, tpu.core_type = #tpu.core_type<tc>, window_params = [{transform_indices = @transform_0, window_bounds = array<i64: 3, 2048>}, {transform_indices = @transform_1, window_bounds = array<i64: 128, 2048>}, {transform_indices = @transform_2, window_bounds = array<i64: 128, 2048>}, {pipeline_mode = #tpu.pipeline_mode<synchronous>, transform_indices = @transform_3, window_bounds = array<i64: 16, 1>}, {pipeline_mode = #tpu.pipeline_mode<synchronous>, transform_indices = @transform_4, window_bounds = array<i64: 32, 16>}, {pipeline_mode = #tpu.pipeline_mode<synchronous>, transform_indices = @transform_5, window_bounds = array<i64: 32, 1>}, {pipeline_mode = #tpu.pipeline_mode<synchronous>, transform_indices = @transform_6, window_bounds = array<i64: 1, 32>}, {pipeline_mode = #tpu.pipeline_mode<synchronous>, transform_indices = @transform_7, window_bounds = array<i64: 1, 1>}, {pipeline_mode = #tpu.pipeline_mode<synchronous>, transform_indices = @transform_8, window_bounds = array<i64: 32, 16>}, {pipeline_mode = #tpu.pipeline_mode<synchronous>, transform_indices = @transform_9, window_bounds = array<i64: 32, 1>}, {pipeline_mode = #tpu.pipeline_mode<synchronous>, transform_indices = @transform_10, window_bounds = array<i64: 1, 32>}, {pipeline_mode = #tpu.pipeline_mode<synchronous>, transform_indices = @transform_11, window_bounds = array<i64: 1, 1>}, {transform_indices = @transform_12, window_bounds = array<i64: 2, 2048>}]} {
    %c0 = arith.constant 0 : index
    %c0_0 = arith.constant 0 : index
    %0 = vector.load %arg4[%c0, %c0_0] : memref<16x1xf32, #tpu.memory_space<vmem>>, vector<16x1xf32>
    %c0_1 = arith.constant 0 : index
    %c0_2 = arith.constant 0 : index
    %1 = vector.load %arg1[%c0_1, %c0_2] : memref<3x2048xf32, #tpu.memory_space<vmem>>, vector<3x2048xf32>
    %2 = vector.extract_strided_slice %1 {offsets = [0, 0], sizes = [1, 2048], strides = [1, 1]} : vector<3x2048xf32> to vector<1x2048xf32>
    %3 = vector.broadcast %2 : vector<1x2048xf32> to vector<16x2048xf32>
    %4 = vector.broadcast %0 : vector<16x1xf32> to vector<16x2048xf32>
    %5 = arith.mulf %3, %4 : vector<16x2048xf32>
    %6 = math.floor %5 : vector<16x2048xf32>
    %7 = arith.subf %5, %6 : vector<16x2048xf32>
    %8 = vector.extract_strided_slice %1 {offsets = [1, 0], sizes = [1, 2048], strides = [1, 1]} : vector<3x2048xf32> to vector<1x2048xf32>
    %9 = vector.broadcast %8 : vector<1x2048xf32> to vector<16x2048xf32>
    %10 = vector.broadcast %0 : vector<16x1xf32> to vector<16x2048xf32>
    %11 = arith.mulf %9, %10 : vector<16x2048xf32>
    %12 = math.floor %11 : vector<16x2048xf32>
    %13 = arith.subf %11, %12 : vector<16x2048xf32>
    %14 = vector.extract_strided_slice %1 {offsets = [2, 0], sizes = [1, 2048], strides = [1, 1]} : vector<3x2048xf32> to vector<1x2048xf32>
    %15 = vector.broadcast %14 : vector<1x2048xf32> to vector<16x2048xf32>
    %16 = vector.broadcast %0 : vector<16x1xf32> to vector<16x2048xf32>
    %17 = arith.mulf %15, %16 : vector<16x2048xf32>
    %18 = math.floor %17 : vector<16x2048xf32>
    %19 = arith.subf %17, %18 : vector<16x2048xf32>
    %cst = arith.constant 1.000000e+00 : f32
    %20 = vector.broadcast %cst : f32 to vector<16x2048xf32>
    %21 = arith.subf %20, %7 : vector<16x2048xf32>
    %cst_3 = arith.constant 1.000000e+00 : f32
    %22 = vector.broadcast %cst_3 : f32 to vector<16x2048xf32>
    %23 = arith.subf %22, %13 : vector<16x2048xf32>
    %cst_4 = arith.constant 1.000000e+00 : f32
    %24 = vector.broadcast %cst_4 : f32 to vector<16x2048xf32>
    %25 = arith.subf %24, %19 : vector<16x2048xf32>
    %cst_5 = arith.constant 0.000000e+00 : f32
    %26 = vector.broadcast %cst_5 : f32 to vector<16x2048xf32>
    %cst_6 = arith.constant 0.000000e+00 : f32
    %27 = vector.broadcast %cst_6 : f32 to vector<16x2048xf32>
    %28 = arith.mulf %21, %23 : vector<16x2048xf32>
    %29 = arith.mulf %28, %25 : vector<16x2048xf32>
    %c0_7 = arith.constant 0 : index
    %c0_8 = arith.constant 0 : index
    %30 = vector.load %arg2[%c0_7, %c0_8] : memref<128x2048xbf16, #tpu.memory_space<vmem>>, vector<16x2048xbf16>
    %31 = arith.extf %30 : vector<16x2048xbf16> to vector<16x2048xf32>
    %32 = arith.mulf %31, %29 : vector<16x2048xf32>
    %33 = arith.addf %26, %32 : vector<16x2048xf32>
    %c0_9 = arith.constant 0 : index
    %c0_10 = arith.constant 0 : index
    %34 = vector.load %arg3[%c0_9, %c0_10] : memref<128x2048xbf16, #tpu.memory_space<vmem>>, vector<16x2048xbf16>
    %35 = arith.extf %34 : vector<16x2048xbf16> to vector<16x2048xf32>
    %36 = arith.mulf %35, %29 : vector<16x2048xf32>
    %37 = arith.addf %27, %36 : vector<16x2048xf32>
    %38 = arith.mulf %21, %23 : vector<16x2048xf32>
    %39 = arith.mulf %38, %19 : vector<16x2048xf32>
    %c16 = arith.constant 16 : index
    %c0_11 = arith.constant 0 : index
    %40 = vector.load %arg2[%c16, %c0_11] : memref<128x2048xbf16, #tpu.memory_space<vmem>>, vector<16x2048xbf16>
    %41 = arith.extf %40 : vector<16x2048xbf16> to vector<16x2048xf32>
    %42 = arith.mulf %41, %39 : vector<16x2048xf32>
    %43 = arith.addf %33, %42 : vector<16x2048xf32>
    %c16_12 = arith.constant 16 : index
    %c0_13 = arith.constant 0 : index
    %44 = vector.load %arg3[%c16_12, %c0_13] : memref<128x2048xbf16, #tpu.memory_space<vmem>>, vector<16x2048xbf16>
    %45 = arith.extf %44 : vector<16x2048xbf16> to vector<16x2048xf32>
    %46 = arith.mulf %45, %39 : vector<16x2048xf32>
    %47 = arith.addf %37, %46 : vector<16x2048xf32>
    %48 = arith.mulf %21, %13 : vector<16x2048xf32>
    %49 = arith.mulf %48, %25 : vector<16x2048xf32>
    %c32 = arith.constant 32 : index
    %c0_14 = arith.constant 0 : index
    %50 = vector.load %arg2[%c32, %c0_14] : memref<128x2048xbf16, #tpu.memory_space<vmem>>, vector<16x2048xbf16>
    %51 = arith.extf %50 : vector<16x2048xbf16> to vector<16x2048xf32>
    %52 = arith.mulf %51, %49 : vector<16x2048xf32>
    %53 = arith.addf %43, %52 : vector<16x2048xf32>
    %c32_15 = arith.constant 32 : index
    %c0_16 = arith.constant 0 : index
    %54 = vector.load %arg3[%c32_15, %c0_16] : memref<128x2048xbf16, #tpu.memory_space<vmem>>, vector<16x2048xbf16>
    %55 = arith.extf %54 : vector<16x2048xbf16> to vector<16x2048xf32>
    %56 = arith.mulf %55, %49 : vector<16x2048xf32>
    %57 = arith.addf %47, %56 : vector<16x2048xf32>
    %58 = arith.mulf %21, %13 : vector<16x2048xf32>
    %59 = arith.mulf %58, %19 : vector<16x2048xf32>
    %c48 = arith.constant 48 : index
    %c0_17 = arith.constant 0 : index
    %60 = vector.load %arg2[%c48, %c0_17] : memref<128x2048xbf16, #tpu.memory_space<vmem>>, vector<16x2048xbf16>
    %61 = arith.extf %60 : vector<16x2048xbf16> to vector<16x2048xf32>
    %62 = arith.mulf %61, %59 : vector<16x2048xf32>
    %63 = arith.addf %53, %62 : vector<16x2048xf32>
    %c48_18 = arith.constant 48 : index
    %c0_19 = arith.constant 0 : index
    %64 = vector.load %arg3[%c48_18, %c0_19] : memref<128x2048xbf16, #tpu.memory_space<vmem>>, vector<16x2048xbf16>
    %65 = arith.extf %64 : vector<16x2048xbf16> to vector<16x2048xf32>
    %66 = arith.mulf %65, %59 : vector<16x2048xf32>
    %67 = arith.addf %57, %66 : vector<16x2048xf32>
    %68 = arith.mulf %7, %23 : vector<16x2048xf32>
    %69 = arith.mulf %68, %25 : vector<16x2048xf32>
    %c64 = arith.constant 64 : index
    %c0_20 = arith.constant 0 : index
    %70 = vector.load %arg2[%c64, %c0_20] : memref<128x2048xbf16, #tpu.memory_space<vmem>>, vector<16x2048xbf16>
    %71 = arith.extf %70 : vector<16x2048xbf16> to vector<16x2048xf32>
    %72 = arith.mulf %71, %69 : vector<16x2048xf32>
    %73 = arith.addf %63, %72 : vector<16x2048xf32>
    %c64_21 = arith.constant 64 : index
    %c0_22 = arith.constant 0 : index
    %74 = vector.load %arg3[%c64_21, %c0_22] : memref<128x2048xbf16, #tpu.memory_space<vmem>>, vector<16x2048xbf16>
    %75 = arith.extf %74 : vector<16x2048xbf16> to vector<16x2048xf32>
    %76 = arith.mulf %75, %69 : vector<16x2048xf32>
    %77 = arith.addf %67, %76 : vector<16x2048xf32>
    %78 = arith.mulf %7, %23 : vector<16x2048xf32>
    %79 = arith.mulf %78, %19 : vector<16x2048xf32>
    %c80 = arith.constant 80 : index
    %c0_23 = arith.constant 0 : index
    %80 = vector.load %arg2[%c80, %c0_23] : memref<128x2048xbf16, #tpu.memory_space<vmem>>, vector<16x2048xbf16>
    %81 = arith.extf %80 : vector<16x2048xbf16> to vector<16x2048xf32>
    %82 = arith.mulf %81, %79 : vector<16x2048xf32>
    %83 = arith.addf %73, %82 : vector<16x2048xf32>
    %c80_24 = arith.constant 80 : index
    %c0_25 = arith.constant 0 : index
    %84 = vector.load %arg3[%c80_24, %c0_25] : memref<128x2048xbf16, #tpu.memory_space<vmem>>, vector<16x2048xbf16>
    %85 = arith.extf %84 : vector<16x2048xbf16> to vector<16x2048xf32>
    %86 = arith.mulf %85, %79 : vector<16x2048xf32>
    %87 = arith.addf %77, %86 : vector<16x2048xf32>
    %88 = arith.mulf %7, %13 : vector<16x2048xf32>
    %89 = arith.mulf %88, %25 : vector<16x2048xf32>
    %c96 = arith.constant 96 : index
    %c0_26 = arith.constant 0 : index
    %90 = vector.load %arg2[%c96, %c0_26] : memref<128x2048xbf16, #tpu.memory_space<vmem>>, vector<16x2048xbf16>
    %91 = arith.extf %90 : vector<16x2048xbf16> to vector<16x2048xf32>
    %92 = arith.mulf %91, %89 : vector<16x2048xf32>
    %93 = arith.addf %83, %92 : vector<16x2048xf32>
    %c96_27 = arith.constant 96 : index
    %c0_28 = arith.constant 0 : index
    %94 = vector.load %arg3[%c96_27, %c0_28] : memref<128x2048xbf16, #tpu.memory_space<vmem>>, vector<16x2048xbf16>
    %95 = arith.extf %94 : vector<16x2048xbf16> to vector<16x2048xf32>
    %96 = arith.mulf %95, %89 : vector<16x2048xf32>
    %97 = arith.addf %87, %96 : vector<16x2048xf32>
    %98 = arith.mulf %7, %13 : vector<16x2048xf32>
    %99 = arith.mulf %98, %19 : vector<16x2048xf32>
    %c112 = arith.constant 112 : index
    %c0_29 = arith.constant 0 : index
    %100 = vector.load %arg2[%c112, %c0_29] : memref<128x2048xbf16, #tpu.memory_space<vmem>>, vector<16x2048xbf16>
    %101 = arith.extf %100 : vector<16x2048xbf16> to vector<16x2048xf32>
    %102 = arith.mulf %101, %99 : vector<16x2048xf32>
    %103 = arith.addf %93, %102 : vector<16x2048xf32>
    %c112_30 = arith.constant 112 : index
    %c0_31 = arith.constant 0 : index
    %104 = vector.load %arg3[%c112_30, %c0_31] : memref<128x2048xbf16, #tpu.memory_space<vmem>>, vector<16x2048xbf16>
    %105 = arith.extf %104 : vector<16x2048xbf16> to vector<16x2048xf32>
    %106 = arith.mulf %105, %99 : vector<16x2048xf32>
    %107 = arith.addf %97, %106 : vector<16x2048xf32>
    %c0_32 = arith.constant 0 : index
    %c0_33 = arith.constant 0 : index
    %108 = vector.load %arg5[%c0_32, %c0_33] : memref<32x16xf32, #tpu.memory_space<vmem>>, vector<32x16xf32>
    %cst_34 = arith.constant dense<0.000000e+00> : vector<32x2048xf32>
    %109 = tpu.matmul %108, %103, %cst_34 {dimension_numbers = #tpu.dot_dimension_numbers<[1], [0], [0], [1], [0, 0, 1, 1], [], []>} : vector<32x16xf32>, vector<16x2048xf32>, vector<32x2048xf32> -> vector<32x2048xf32>
    %c0_35 = arith.constant 0 : index
    %c0_36 = arith.constant 0 : index
    %110 = vector.load %arg6[%c0_35, %c0_36] : memref<32x1xf32, #tpu.memory_space<vmem>>, vector<32x1xf32>
    %111 = vector.broadcast %110 : vector<32x1xf32> to vector<32x2048xf32>
    %112 = arith.addf %109, %111 : vector<32x2048xf32>
    %cst_37 = arith.constant 0.000000e+00 : f32
    %113 = vector.broadcast %cst_37 : f32 to vector<32x2048xf32>
    %114 = arith.maximumf %112, %113 : vector<32x2048xf32>
    %c0_38 = arith.constant 0 : index
    %c0_39 = arith.constant 0 : index
    %115 = vector.load %arg9[%c0_38, %c0_39] : memref<32x16xf32, #tpu.memory_space<vmem>>, vector<32x16xf32>
    %cst_40 = arith.constant dense<0.000000e+00> : vector<32x2048xf32>
    %116 = tpu.matmul %115, %107, %cst_40 {dimension_numbers = #tpu.dot_dimension_numbers<[1], [0], [0], [1], [0, 0, 1, 1], [], []>} : vector<32x16xf32>, vector<16x2048xf32>, vector<32x2048xf32> -> vector<32x2048xf32>
    %c0_41 = arith.constant 0 : index
    %c0_42 = arith.constant 0 : index
    %117 = vector.load %arg10[%c0_41, %c0_42] : memref<32x1xf32, #tpu.memory_space<vmem>>, vector<32x1xf32>
    %118 = vector.broadcast %117 : vector<32x1xf32> to vector<32x2048xf32>
    %119 = arith.addf %116, %118 : vector<32x2048xf32>
    %cst_43 = arith.constant 0.000000e+00 : f32
    %120 = vector.broadcast %cst_43 : f32 to vector<32x2048xf32>
    %121 = arith.maximumf %119, %120 : vector<32x2048xf32>
    %c0_44 = arith.constant 0 : index
    %c0_45 = arith.constant 0 : index
    %122 = vector.load %arg7[%c0_44, %c0_45] : memref<1x32xf32, #tpu.memory_space<vmem>>, vector<1x32xf32>
    %cst_46 = arith.constant dense<0.000000e+00> : vector<1x2048xf32>
    %123 = tpu.matmul %122, %114, %cst_46 {dimension_numbers = #tpu.dot_dimension_numbers<[1], [0], [0], [1], [0, 0, 1, 1], [], []>} : vector<1x32xf32>, vector<32x2048xf32>, vector<1x2048xf32> -> vector<1x2048xf32>
    %c0_47 = arith.constant 0 : index
    %c0_48 = arith.constant 0 : index
    %124 = vector.load %arg8[%c0_47, %c0_48] : memref<1x1xf32, #tpu.memory_space<vmem>>, vector<1x1xf32>
    %125 = vector.broadcast %124 : vector<1x1xf32> to vector<1x2048xf32>
    %126 = arith.addf %123, %125 : vector<1x2048xf32>
    %c0_49 = arith.constant 0 : index
    %c0_50 = arith.constant 0 : index
    %127 = vector.load %arg11[%c0_49, %c0_50] : memref<1x32xf32, #tpu.memory_space<vmem>>, vector<1x32xf32>
    %cst_51 = arith.constant dense<0.000000e+00> : vector<1x2048xf32>
    %128 = tpu.matmul %127, %121, %cst_51 {dimension_numbers = #tpu.dot_dimension_numbers<[1], [0], [0], [1], [0, 0, 1, 1], [], []>} : vector<1x32xf32>, vector<32x2048xf32>, vector<1x2048xf32> -> vector<1x2048xf32>
    %c0_52 = arith.constant 0 : index
    %c0_53 = arith.constant 0 : index
    %129 = vector.load %arg12[%c0_52, %c0_53] : memref<1x1xf32, #tpu.memory_space<vmem>>, vector<1x1xf32>
    %130 = vector.broadcast %129 : vector<1x1xf32> to vector<1x2048xf32>
    %131 = arith.addf %128, %130 : vector<1x2048xf32>
    %132 = tpu.concatenate %126, %131 in 0 : vector<1x2048xf32>, vector<1x2048xf32> -> vector<2x2048xf32>
    %cst_54 = arith.constant 0.000000e+00 : f32
    %133 = vector.broadcast %cst_54 : f32 to vector<2x2048xf32>
    %134 = arith.subf %133, %132 : vector<2x2048xf32>
    %135 = math.exp %134 : vector<2x2048xf32>
    %cst_55 = arith.constant 1.000000e+00 : f32
    %136 = vector.broadcast %cst_55 : f32 to vector<2x2048xf32>
    %137 = arith.addf %136, %135 : vector<2x2048xf32>
    %cst_56 = arith.constant 1.000000e+00 : f32
    %138 = vector.broadcast %cst_56 : f32 to vector<2x2048xf32>
    %139 = arith.divf %138, %137 : vector<2x2048xf32>
    %c0_57 = arith.constant 0 : index
    %c0_58 = arith.constant 0 : index
    %140 = vector.load %arg13[%c0_57, %c0_58] : memref<2x2048xf32, #tpu.memory_space<vmem>>, vector<2x2048xf32>
    tpu.vector_store %arg13[%c0_57, %c0_58], %139 {strides = array<i32>} : memref<2x2048xf32, #tpu.memory_space<vmem>>, vector<2x2048xf32>,
    return
  }
  func.func @transform_0(%arg0: i32) -> (i32, i32) {
    %c0_i32 = arith.constant 0 : i32
    %c0_i32_0 = arith.constant 0 : i32
    return %c0_i32, %arg0 : i32, i32
  }
  func.func @transform_1(%arg0: i32) -> (i32, i32) {
    %c0_i32 = arith.constant 0 : i32
    %c0_i32_0 = arith.constant 0 : i32
    return %c0_i32, %arg0 : i32, i32
  }
  func.func @transform_2(%arg0: i32) -> (i32, i32) {
    %c0_i32 = arith.constant 0 : i32
    %c0_i32_0 = arith.constant 0 : i32
    return %c0_i32, %arg0 : i32, i32
  }
  func.func @transform_3(%arg0: i32) -> (i32, i32) {
    %c0_i32 = arith.constant 0 : i32
    %c0_i32_0 = arith.constant 0 : i32
    %c0_i32_1 = arith.constant 0 : i32
    return %c0_i32, %c0_i32_0 : i32, i32
  }
  func.func @transform_4(%arg0: i32) -> (i32, i32) {
    %c0_i32 = arith.constant 0 : i32
    %c0_i32_0 = arith.constant 0 : i32
    %c0_i32_1 = arith.constant 0 : i32
    return %c0_i32, %c0_i32_0 : i32, i32
  }
  func.func @transform_5(%arg0: i32) -> (i32, i32) {
    %c0_i32 = arith.constant 0 : i32
    %c0_i32_0 = arith.constant 0 : i32
    %c0_i32_1 = arith.constant 0 : i32
    return %c0_i32, %c0_i32_0 : i32, i32
  }
  func.func @transform_6(%arg0: i32) -> (i32, i32) {
    %c0_i32 = arith.constant 0 : i32
    %c0_i32_0 = arith.constant 0 : i32
    %c0_i32_1 = arith.constant 0 : i32
    return %c0_i32, %c0_i32_0 : i32, i32
  }
  func.func @transform_7(%arg0: i32) -> (i32, i32) {
    %c0_i32 = arith.constant 0 : i32
    %c0_i32_0 = arith.constant 0 : i32
    %c0_i32_1 = arith.constant 0 : i32
    return %c0_i32, %c0_i32_0 : i32, i32
  }
  func.func @transform_8(%arg0: i32) -> (i32, i32) {
    %c0_i32 = arith.constant 0 : i32
    %c0_i32_0 = arith.constant 0 : i32
    %c0_i32_1 = arith.constant 0 : i32
    return %c0_i32, %c0_i32_0 : i32, i32
  }
  func.func @transform_9(%arg0: i32) -> (i32, i32) {
    %c0_i32 = arith.constant 0 : i32
    %c0_i32_0 = arith.constant 0 : i32
    %c0_i32_1 = arith.constant 0 : i32
    return %c0_i32, %c0_i32_0 : i32, i32
  }
  func.func @transform_10(%arg0: i32) -> (i32, i32) {
    %c0_i32 = arith.constant 0 : i32
    %c0_i32_0 = arith.constant 0 : i32
    %c0_i32_1 = arith.constant 0 : i32
    return %c0_i32, %c0_i32_0 : i32, i32
  }
  func.func @transform_11(%arg0: i32) -> (i32, i32) {
    %c0_i32 = arith.constant 0 : i32
    %c0_i32_0 = arith.constant 0 : i32
    %c0_i32_1 = arith.constant 0 : i32
    return %c0_i32, %c0_i32_0 : i32, i32
  }
  func.func @transform_12(%arg0: i32) -> (i32, i32) {
    %c0_i32 = arith.constant 0 : i32
    %c0_i32_0 = arith.constant 0 : i32
    return %c0_i32, %arg0 : i32, i32
  }
}

</mosaic_0001>

<bundles_post_ra>
// kernel: ngp_mb_forward.1
= control target key start
LH: loop header
LB: loop body
LE: loop exit
PB: predicated region body
PF: predicated region fallthrough
CT: control target
= control target key end

     0   :  { %s12657_s0 = inlined_call_operand.vmem [shape: f32[3,4096], index: 0, kind: input, shape index: {}]   ;;  %s12658_s1 = inlined_call_operand.vmem [shape: bf16[128,4096], index: 1, kind: input, shape index: {}]   ;;  %s12659_s2 = inlined_call_operand.vmem [shape: bf16[128,4096], index: 2, kind: input, shape index: {}]   ;;  %s12660_s3 = inlined_call_operand.vmem [shape: f32[16,1], index: 3, kind: input, shape index: {}]   ;;  %s12661_s4 = inlined_call_operand.vmem [shape: f32[32,16], index: 4, kind: input, shape index: {}]   ;;  %s12662_s5 = inlined_call_operand.vmem [shape: f32[32,1], index: 5, kind: input, shape index: {}]   ;;  %s12663_s6 = inlined_call_operand.vmem [shape: f32[1,32], index: 6, kind: input, shape index: {}]   ;;  %s12664_s7 = inlined_call_operand.<no memory space> [shape: f32[1,1], index: 7, kind: input, shape index: {}]   ;;  %s12665_s8 = inlined_call_operand.vmem [shape: f32[32,16], index: 8, kind: input, shape index: {}]   ;;  %s12666_s9 = inlined_call_operand.vmem [shape: f32[32,1], index: 9, kind: input, shape index: {}]   ;;  %s12667_s10 = inlined_call_operand.vmem [shape: f32[1,32], index: 10, kind: input, shape index: {}]   ;;  %s12668_s12 = inlined_call_operand.vmem [shape: f32[2,4096], index: 12, kind: output, shape index: {}]   ;;  %s12669_s11 = inlined_call_operand.<no memory space> [shape: f32[1,1], index: 11, kind: input, shape index: {}]  }
   0x1   :  { %v17_v0 = vstv %s12664_s7  ;;  %v19_v1 = vstv %s12669_s11 }
   0x2   :  { %18 = vst [vmem:[#allocation2] sm:$0x1] %v17_v0  ;;  %20 = vst [vmem:[#allocation3] sm:$0x1] %v19_v1 }
   0x3   :  { %s7703_s25 = smov 0   ;;  %s7705_s26 = smov 0  }
   0x4   :  { %s7707_s27 = smov 0  }
   0x5 LB: > { %s7174_s7 = sadd.s32 4294967295, %s7627_s27   ;;  %s7720_s11 = sadd.s32 1, %s7627_s27   ;;  %s7627_s27 = sphi %s7707_s27, %s14227_s27   ;;  %s7623_s26 = sphi %s7705_s26, %s14226_s26   ;;  %s7619_s25 = sphi %s7703_s25, %s14225_s25  }
   0x6   : > { %s56_s28 = ssub.s32 %s7627_s27, %s7720_s11  ;;  %s59_s29 = sadd.s32 1, %s7623_s26 }
   0x7   : > { %p57_p0 = scmp.eq.s32.totalorder %s56_s28, 0  ;;  %p66_p1 = scmp.ne.s32.totalorder %s7623_s26, %s7619_s25 }
   0x8   : > { %p67_p2 = scmp.eq.s32.totalorder %s7627_s27, 0  ;;  %p7177_p4 = scmp.ge.s32.totalorder %s7627_s27, 2 }
   0x9   : > { %s7729_s30 = scalar_select %p57_p0, %s7623_s26, %s59_s29  }
   0xa   : > { %p7731_p3 = por %p67_p2, %p66_p1  ;;  %360 = sbr.rel (%p7177_p4) target bundleno = 153 (0x99), region = 52 }
  0x11   : > { %372 = sbr.rel (!%p7731_p3) target bundleno = 85 (0x55), region = 60  ;;  %s374_s14 = sand.u32 (%p7731_p3), 1, %s7623_s26  }
  0x12   : > { %s7273_s15 = sshll.u32 (%p7731_p3), %s7627_s27, 6  ;;  %s7178_s16 = sshll.u32 (%p7731_p3), %s374_s14, 10 }
  0x13   : > { %s7743_s19 = scalar_lea.vmem (%p7731_p3), %s12658_s1, %s7273_s15  ;;  %s7748_s20 = scalar_lea.vmem (%p7731_p3), [#allocation4], %s7178_s16 }
  0x14   : > { %v392_v2 = vld [vmem:[%s7743_s19] sm:$0xff] (%p7731_p3)  ;;  %v394_v3 = vld [vmem:[%s7743_s19 + $0x8] sm:$0xff] (%p7731_p3)  ;;  %v396_v4 = vld [vmem:[%s7743_s19 + $0x10] sm:$0xff] (%p7731_p3) }
  0x15   : > { %393 = vst [vmem:[%s7748_s20] sm:$0xff] (%p7731_p3), %v392_v2  ;;  %395 = vst [vmem:[%s7748_s20 + $0x8] sm:$0xff] (%p7731_p3), %v394_v3  ;;  %v398_v5 = vld [vmem:[%s7743_s19 + $0x18] sm:$0xff] (%p7731_p3)  ;;  %v400_v6 = vld [vmem:[%s7743_s19 + $0x20] sm:$0xff] (%p7731_p3) }
  0x16   : > { %397 = vst [vmem:[%s7748_s20 + $0x10] sm:$0xff] (%p7731_p3), %v396_v4  ;;  %v402_v7 = vld [vmem:[%s7743_s19 + $0x28] sm:$0xff] (%p7731_p3)  ;;  %399 = vst [vmem:[%s7748_s20 + $0x18] sm:$0xff] (%p7731_p3), %v398_v5  ;;  %v404_v8 = vld [vmem:[%s7743_s19 + $0x30] sm:$0xff] (%p7731_p3) }
  0x17   : > { %401 = vst [vmem:[%s7748_s20 + $0x20] sm:$0xff] (%p7731_p3), %v400_v6  ;;  %403 = vst [vmem:[%s7748_s20 + $0x28] sm:$0xff] (%p7731_p3), %v402_v7  ;;  %v406_v9 = vld [vmem:[%s7743_s19 + $0x38] sm:$0xff] (%p7731_p3)  ;;  %v408_v10 = vld [vmem:[%s7743_s19 + $0x80] sm:$0xff] (%p7731_p3) }
  0x18   : > { %405 = vst [vmem:[%s7748_s20 + $0x30] sm:$0xff] %v404_v8  ;;  %407 = vst [vmem:[%s7748_s20 + $0x38] sm:$0xff] %v406_v9  ;;  %v410_v11 = vld [vmem:[%s7743_s19 + $0x88] sm:$0xff]  ;;  %v412_v12 = vld [vmem:[%s7743_s19 + $0x90] sm:$0xff] }
  0x19   : > { %409 = vst [vmem:[%s7748_s20 + $0x40] sm:$0xff] %v408_v10  ;;  %v414_v13 = vld [vmem:[%s7743_s19 + $0x98] sm:$0xff]  ;;  %411 = vst [vmem:[%s7748_s20 + $0x48] sm:$0xff] %v410_v11  ;;  %v416_v14 = vld [vmem:[%s7743_s19 + $0xa0] sm:$0xff] }
  0x1a   : > { %413 = vst [vmem:[%s7748_s20 + $0x50] sm:$0xff] %v412_v12  ;;  %415 = vst [vmem:[%s7748_s20 + $0x58] sm:$0xff] %v414_v13  ;;  %v418_v15 = vld [vmem:[%s7743_s19 + $0xa8] sm:$0xff]  ;;  %v420_v16 = vld [vmem:[%s7743_s19 + $0xb0] sm:$0xff] }
  0x1b   : > { %417 = vst [vmem:[%s7748_s20 + $0x60] sm:$0xff] %v416_v14  ;;  %419 = vst [vmem:[%s7748_s20 + $0x68] sm:$0xff] %v418_v15  ;;  %v422_v17 = vld [vmem:[%s7743_s19 + $0xb8] sm:$0xff]  ;;  %v424_v18 = vld [vmem:[%s7743_s19 + $0x100] sm:$0xff] }
  0x1c   : > { %421 = vst [vmem:[%s7748_s20 + $0x70] sm:$0xff] %v420_v16  ;;  %v426_v19 = vld [vmem:[%s7743_s19 + $0x108] sm:$0xff]  ;;  %423 = vst [vmem:[%s7748_s20 + $0x78] sm:$0xff] %v422_v17  ;;  %v428_v20 = vld [vmem:[%s7743_s19 + $0x110] sm:$0xff] }
  0x1d   : > { %425 = vst [vmem:[%s7748_s20 + $0x80] sm:$0xff] %v424_v18  ;;  %427 = vst [vmem:[%s7748_s20 + $0x88] sm:$0xff] %v426_v19  ;;  %v430_v21 = vld [vmem:[%s7743_s19 + $0x118] sm:$0xff]  ;;  %v432_v22 = vld [vmem:[%s7743_s19 + $0x120] sm:$0xff] }
  0x1e   : > { %429 = vst [vmem:[%s7748_s20 + $0x90] sm:$0xff] %v428_v20  ;;  %431 = vst [vmem:[%s7748_s20 + $0x98] sm:$0xff] %v430_v21  ;;  %v434_v23 = vld [vmem:[%s7743_s19 + $0x128] sm:$0xff]  ;;  %v436_v24 = vld [vmem:[%s7743_s19 + $0x130] sm:$0xff] }
  0x1f   : > { %433 = vst [vmem:[%s7748_s20 + $0xa0] sm:$0xff] %v432_v22  ;;  %v438_v25 = vld [vmem:[%s7743_s19 + $0x138] sm:$0xff]  ;;  %435 = vst [vmem:[%s7748_s20 + $0xa8] sm:$0xff] %v434_v23  ;;  %v440_v26 = vld [vmem:[%s7743_s19 + $0x180] sm:$0xff] }
  0x20   : > { %437 = vst [vmem:[%s7748_s20 + $0xb0] sm:$0xff] %v436_v24  ;;  %439 = vst [vmem:[%s7748_s20 + $0xb8] sm:$0xff] %v438_v25  ;;  %v442_v27 = vld [vmem:[%s7743_s19 + $0x188] sm:$0xff]  ;;  %v444_v28 = vld [vmem:[%s7743_s19 + $0x190] sm:$0xff] }
  0x21   : > { %441 = vst [vmem:[%s7748_s20 + $0xc0] sm:$0xff] %v440_v26  ;;  %443 = vst [vmem:[%s7748_s20 + $0xc8] sm:$0xff] %v442_v27  ;;  %v446_v29 = vld [vmem:[%s7743_s19 + $0x198] sm:$0xff]  ;;  %v448_v30 = vld [vmem:[%s7743_s19 + $0x1a0] sm:$0xff] }
  0x22   : > { %445 = vst [vmem:[%s7748_s20 + $0xd0] sm:$0xff] %v444_v28  ;;  %v450_v31 = vld [vmem:[%s7743_s19 + $0x1a8] sm:$0xff]  ;;  %447 = vst [vmem:[%s7748_s20 + $0xd8] sm:$0xff] %v446_v29  ;;  %v452_v32 = vld [vmem:[%s7743_s19 + $0x1b0] sm:$0xff] }
  0x23   : > { %449 = vst [vmem:[%s7748_s20 + $0xe0] sm:$0xff] %v448_v30  ;;  %451 = vst [vmem:[%s7748_s20 + $0xe8] sm:$0xff] %v450_v31  ;;  %v454_v33 = vld [vmem:[%s7743_s19 + $0x1b8] sm:$0xff]  ;;  %v456_v34 = vld [vmem:[%s7743_s19 + $0x200] sm:$0xff] }
  0x24   : > { %453 = vst [vmem:[%s7748_s20 + $0xf0] sm:$0xff] %v452_v32  ;;  %455 = vst [vmem:[%s7748_s20 + $0xf8] sm:$0xff] %v454_v33  ;;  %v458_v35 = vld [vmem:[%s7743_s19 + $0x208] sm:$0xff]  ;;  %v460_v36 = vld [vmem:[%s7743_s19 + $0x210] sm:$0xff] }
  0x25   : > { %457 = vst [vmem:[%s7748_s20 + $0x100] sm:$0xff] %v456_v34  ;;  %v462_v37 = vld [vmem:[%s7743_s19 + $0x218] sm:$0xff]  ;;  %459 = vst [vmem:[%s7748_s20 + $0x108] sm:$0xff] %v458_v35  ;;  %v464_v38 = vld [vmem:[%s7743_s19 + $0x220] sm:$0xff] }
  0x26   : > { %461 = vst [vmem:[%s7748_s20 + $0x110] sm:$0xff] %v460_v36  ;;  %463 = vst [vmem:[%s7748_s20 + $0x118] sm:$0xff] %v462_v37  ;;  %v466_v39 = vld [vmem:[%s7743_s19 + $0x228] sm:$0xff]  ;;  %v468_v40 = vld [vmem:[%s7743_s19 + $0x230] sm:$0xff] }
  0x27   : > { %465 = vst [vmem:[%s7748_s20 + $0x120] sm:$0xff] %v464_v38  ;;  %467 = vst [vmem:[%s7748_s20 + $0x128] sm:$0xff] %v466_v39  ;;  %v470_v41 = vld [vmem:[%s7743_s19 + $0x238] sm:$0xff]  ;;  %v472_v42 = vld [vmem:[%s7743_s19 + $0x280] sm:$0xff] }
  0x28   : > { %469 = vst [vmem:[%s7748_s20 + $0x130] sm:$0xff] %v468_v40  ;;  %v474_v43 = vld [vmem:[%s7743_s19 + $0x288] sm:$0xff]  ;;  %471 = vst [vmem:[%s7748_s20 + $0x138] sm:$0xff] %v470_v41  ;;  %v476_v44 = vld [vmem:[%s7743_s19 + $0x290] sm:$0xff] }
  0x29   : > { %473 = vst [vmem:[%s7748_s20 + $0x140] sm:$0xff] %v472_v42  ;;  %475 = vst [vmem:[%s7748_s20 + $0x148] sm:$0xff] %v474_v43  ;;  %v478_v45 = vld [vmem:[%s7743_s19 + $0x298] sm:$0xff]  ;;  %v480_v46 = vld [vmem:[%s7743_s19 + $0x2a0] sm:$0xff] }
  0x2a   : > { %477 = vst [vmem:[%s7748_s20 + $0x150] sm:$0xff] %v476_v44  ;;  %479 = vst [vmem:[%s7748_s20 + $0x158] sm:$0xff] %v478_v45  ;;  %v482_v47 = vld [vmem:[%s7743_s19 + $0x2a8] sm:$0xff]  ;;  %v484_v48 = vld [vmem:[%s7743_s19 + $0x2b0] sm:$0xff] }
  0x2b   : > { %481 = vst [vmem:[%s7748_s20 + $0x160] sm:$0xff] %v480_v46  ;;  %v486_v49 = vld [vmem:[%s7743_s19 + $0x2b8] sm:$0xff]  ;;  %483 = vst [vmem:[%s7748_s20 + $0x168] sm:$0xff] %v482_v47  ;;  %v488_v50 = vld [vmem:[%s7743_s19 + $0x300] sm:$0xff] }
  0x2c   : > { %485 = vst [vmem:[%s7748_s20 + $0x170] sm:$0xff] %v484_v48  ;;  %487 = vst [vmem:[%s7748_s20 + $0x178] sm:$0xff] %v486_v49  ;;  %v490_v51 = vld [vmem:[%s7743_s19 + $0x308] sm:$0xff]  ;;  %v492_v52 = vld [vmem:[%s7743_s19 + $0x310] sm:$0xff] }
  0x2d   : > { %489 = vst [vmem:[%s7748_s20 + $0x180] sm:$0xff] %v488_v50  ;;  %491 = vst [vmem:[%s7748_s20 + $0x188] sm:$0xff] %v490_v51  ;;  %v494_v53 = vld [vmem:[%s7743_s19 + $0x318] sm:$0xff]  ;;  %v496_v54 = vld [vmem:[%s7743_s19 + $0x320] sm:$0xff] }
  0x2e   : > { %493 = vst [vmem:[%s7748_s20 + $0x190] sm:$0xff] %v492_v52  ;;  %v498_v55 = vld [vmem:[%s7743_s19 + $0x328] sm:$0xff]  ;;  %495 = vst [vmem:[%s7748_s20 + $0x198] sm:$0xff] %v494_v53  ;;  %v500_v56 = vld [vmem:[%s7743_s19 + $0x330] sm:$0xff] }
  0x2f   : > { %497 = vst [vmem:[%s7748_s20 + $0x1a0] sm:$0xff] %v496_v54  ;;  %499 = vst [vmem:[%s7748_s20 + $0x1a8] sm:$0xff] %v498_v55  ;;  %v502_v57 = vld [vmem:[%s7743_s19 + $0x338] sm:$0xff]  ;;  %v504_v58 = vld [vmem:[%s7743_s19 + $0x380] sm:$0xff] }
  0x30   : > { %501 = vst [vmem:[%s7748_s20 + $0x1b0] sm:$0xff] %v500_v56  ;;  %503 = vst [vmem:[%s7748_s20 + $0x1b8] sm:$0xff] %v502_v57  ;;  %v506_v59 = vld [vmem:[%s7743_s19 + $0x388] sm:$0xff]  ;;  %v508_v60 = vld [vmem:[%s7743_s19 + $0x390] sm:$0xff] }
  0x31   : > { %505 = vst [vmem:[%s7748_s20 + $0x1c0] sm:$0xff] %v504_v58  ;;  %v510_v61 = vld [vmem:[%s7743_s19 + $0x398] sm:$0xff]  ;;  %507 = vst [vmem:[%s7748_s20 + $0x1c8] sm:$0xff] %v506_v59  ;;  %v512_v62 = vld [vmem:[%s7743_s19 + $0x3a0] sm:$0xff] }
  0x32   : > { %509 = vst [vmem:[%s7748_s20 + $0x1d0] sm:$0xff] %v508_v60  ;;  %511 = vst [vmem:[%s7748_s20 + $0x1d8] sm:$0xff] %v510_v61  ;;  %v514_v63 = vld [vmem:[%s7743_s19 + $0x3a8] sm:$0xff]  ;;  %v516_v0 = vld [vmem:[%s7743_s19 + $0x3b0] sm:$0xff] }
  0x33   : > { %513 = vst [vmem:[%s7748_s20 + $0x1e0] sm:$0xff] %v512_v62  ;;  %515 = vst [vmem:[%s7748_s20 + $0x1e8] sm:$0xff] %v514_v63  ;;  %v518_v1 = vld [vmem:[%s7743_s19 + $0x3b8] sm:$0xff]  ;;  %v520_v2 = vld [vmem:[%s7743_s19 + $0x400] sm:$0xff] }
  0x34   : > { %517 = vst [vmem:[%s7748_s20 + $0x1f0] sm:$0xff] %v516_v0  ;;  %v522_v3 = vld [vmem:[%s7743_s19 + $0x408] sm:$0xff]  ;;  %519 = vst [vmem:[%s7748_s20 + $0x1f8] sm:$0xff] %v518_v1  ;;  %v524_v4 = vld [vmem:[%s7743_s19 + $0x410] sm:$0xff] }
  0x35   : > { %521 = vst [vmem:[%s7748_s20 + $0x200] sm:$0xff] %v520_v2  ;;  %523 = vst [vmem:[%s7748_s20 + $0x208] sm:$0xff] %v522_v3  ;;  %v526_v5 = vld [vmem:[%s7743_s19 + $0x418] sm:$0xff]  ;;  %v528_v6 = vld [vmem:[%s7743_s19 + $0x420] sm:$0xff] }
  0x36   : > { %525 = vst [vmem:[%s7748_s20 + $0x210] sm:$0xff] %v524_v4  ;;  %527 = vst [vmem:[%s7748_s20 + $0x218] sm:$0xff] %v526_v5  ;;  %v530_v7 = vld [vmem:[%s7743_s19 + $0x428] sm:$0xff]  ;;  %v532_v8 = vld [vmem:[%s7743_s19 + $0x430] sm:$0xff] }
  0x37   : > { %529 = vst [vmem:[%s7748_s20 + $0x220] sm:$0xff] %v528_v6  ;;  %v534_v9 = vld [vmem:[%s7743_s19 + $0x438] sm:$0xff]  ;;  %531 = vst [vmem:[%s7748_s20 + $0x228] sm:$0xff] %v530_v7  ;;  %v536_v10 = vld [vmem:[%s7743_s19 + $0x480] sm:$0xff] }
  0x38   : > { %533 = vst [vmem:[%s7748_s20 + $0x230] sm:$0xff] %v532_v8  ;;  %535 = vst [vmem:[%s7748_s20 + $0x238] sm:$0xff] %v534_v9  ;;  %v538_v11 = vld [vmem:[%s7743_s19 + $0x488] sm:$0xff]  ;;  %v540_v12 = vld [vmem:[%s7743_s19 + $0x490] sm:$0xff] }
  0x39   : > { %537 = vst [vmem:[%s7748_s20 + $0x240] sm:$0xff] %v536_v10  ;;  %539 = vst [vmem:[%s7748_s20 + $0x248] sm:$0xff] %v538_v11  ;;  %v542_v13 = vld [vmem:[%s7743_s19 + $0x498] sm:$0xff]  ;;  %v544_v14 = vld [vmem:[%s7743_s19 + $0x4a0] sm:$0xff] }
  0x3a   : > { %541 = vst [vmem:[%s7748_s20 + $0x250] sm:$0xff] %v540_v12  ;;  %v546_v15 = vld [vmem:[%s7743_s19 + $0x4a8] sm:$0xff]  ;;  %543 = vst [vmem:[%s7748_s20 + $0x258] sm:$0xff] %v542_v13  ;;  %v548_v16 = vld [vmem:[%s7743_s19 + $0x4b0] sm:$0xff] }
  0x3b   : > { %545 = vst [vmem:[%s7748_s20 + $0x260] sm:$0xff] %v544_v14  ;;  %547 = vst [vmem:[%s7748_s20 + $0x268] sm:$0xff] %v546_v15  ;;  %v550_v17 = vld [vmem:[%s7743_s19 + $0x4b8] sm:$0xff]  ;;  %v552_v18 = vld [vmem:[%s7743_s19 + $0x500] sm:$0xff] }
  0x3c   : > { %549 = vst [vmem:[%s7748_s20 + $0x270] sm:$0xff] %v548_v16  ;;  %551 = vst [vmem:[%s7748_s20 + $0x278] sm:$0xff] %v550_v17  ;;  %v554_v19 = vld [vmem:[%s7743_s19 + $0x508] sm:$0xff]  ;;  %v556_v20 = vld [vmem:[%s7743_s19 + $0x510] sm:$0xff] }
  0x3d   : > { %553 = vst [vmem:[%s7748_s20 + $0x280] sm:$0xff] %v552_v18  ;;  %v558_v21 = vld [vmem:[%s7743_s19 + $0x518] sm:$0xff]  ;;  %555 = vst [vmem:[%s7748_s20 + $0x288] sm:$0xff] %v554_v19  ;;  %v560_v22 = vld [vmem:[%s7743_s19 + $0x520] sm:$0xff] }
  0x3e   : > { %557 = vst [vmem:[%s7748_s20 + $0x290] sm:$0xff] %v556_v20  ;;  %559 = vst [vmem:[%s7748_s20 + $0x298] sm:$0xff] %v558_v21  ;;  %v562_v23 = vld [vmem:[%s7743_s19 + $0x528] sm:$0xff]  ;;  %v564_v24 = vld [vmem:[%s7743_s19 + $0x530] sm:$0xff] }
  0x3f   : > { %561 = vst [vmem:[%s7748_s20 + $0x2a0] sm:$0xff] %v560_v22  ;;  %563 = vst [vmem:[%s7748_s20 + $0x2a8] sm:$0xff] %v562_v23  ;;  %v566_v25 = vld [vmem:[%s7743_s19 + $0x538] sm:$0xff]  ;;  %v568_v26 = vld [vmem:[%s7743_s19 + $0x580] sm:$0xff] }
  0x40   : > { %565 = vst [vmem:[%s7748_s20 + $0x2b0] sm:$0xff] %v564_v24  ;;  %v570_v27 = vld [vmem:[%s7743_s19 + $0x588] sm:$0xff]  ;;  %567 = vst [vmem:[%s7748_s20 + $0x2b8] sm:$0xff] %v566_v25  ;;  %v572_v28 = vld [vmem:[%s7743_s19 + $0x590] sm:$0xff] }
  0x41   : > { %569 = vst [vmem:[%s7748_s20 + $0x2c0] sm:$0xff] %v568_v26  ;;  %571 = vst [vmem:[%s7748_s20 + $0x2c8] sm:$0xff] %v570_v27  ;;  %v574_v29 = vld [vmem:[%s7743_s19 + $0x598] sm:$0xff]  ;;  %v576_v30 = vld [vmem:[%s7743_s19 + $0x5a0] sm:$0xff] }
  0x42   : > { %573 = vst [vmem:[%s7748_s20 + $0x2d0] sm:$0xff] %v572_v28  ;;  %575 = vst [vmem:[%s7748_s20 + $0x2d8] sm:$0xff] %v574_v29  ;;  %v578_v31 = vld [vmem:[%s7743_s19 + $0x5a8] sm:$0xff]  ;;  %v580_v32 = vld [vmem:[%s7743_s19 + $0x5b0] sm:$0xff] }
  0x43   : > { %577 = vst [vmem:[%s7748_s20 + $0x2e0] sm:$0xff] %v576_v30  ;;  %v582_v33 = vld [vmem:[%s7743_s19 + $0x5b8] sm:$0xff]  ;;  %579 = vst [vmem:[%s7748_s20 + $0x2e8] sm:$0xff] %v578_v31  ;;  %v584_v34 = vld [vmem:[%s7743_s19 + $0x600] sm:$0xff] }
  0x44   : > { %581 = vst [vmem:[%s7748_s20 + $0x2f0] sm:$0xff] %v580_v32  ;;  %583 = vst [vmem:[%s7748_s20 + $0x2f8] sm:$0xff] %v582_v33  ;;  %v586_v35 = vld [vmem:[%s7743_s19 + $0x608] sm:$0xff]  ;;  %v588_v36 = vld [vmem:[%s7743_s19 + $0x610] sm:$0xff] }
  0x45   : > { %585 = vst [vmem:[%s7748_s20 + $0x300] sm:$0xff] %v584_v34  ;;  %587 = vst [vmem:[%s7748_s20 + $0x308] sm:$0xff] %v586_v35  ;;  %v590_v37 = vld [vmem:[%s7743_s19 + $0x618] sm:$0xff]  ;;  %v592_v38 = vld [vmem:[%s7743_s19 + $0x620] sm:$0xff] }
  0x46   : > { %589 = vst [vmem:[%s7748_s20 + $0x310] sm:$0xff] %v588_v36  ;;  %v594_v39 = vld [vmem:[%s7743_s19 + $0x628] sm:$0xff]  ;;  %591 = vst [vmem:[%s7748_s20 + $0x318] sm:$0xff] %v590_v37  ;;  %v596_v40 = vld [vmem:[%s7743_s19 + $0x630] sm:$0xff] }
  0x47   : > { %593 = vst [vmem:[%s7748_s20 + $0x320] sm:$0xff] %v592_v38  ;;  %595 = vst [vmem:[%s7748_s20 + $0x328] sm:$0xff] %v594_v39  ;;  %v598_v41 = vld [vmem:[%s7743_s19 + $0x638] sm:$0xff]  ;;  %v600_v42 = vld [vmem:[%s7743_s19 + $0x680] sm:$0xff] }
  0x48   : > { %597 = vst [vmem:[%s7748_s20 + $0x330] sm:$0xff] %v596_v40  ;;  %599 = vst [vmem:[%s7748_s20 + $0x338] sm:$0xff] %v598_v41  ;;  %v602_v43 = vld [vmem:[%s7743_s19 + $0x688] sm:$0xff]  ;;  %v604_v44 = vld [vmem:[%s7743_s19 + $0x690] sm:$0xff] }
  0x49   : > { %601 = vst [vmem:[%s7748_s20 + $0x340] sm:$0xff] %v600_v42  ;;  %v606_v45 = vld [vmem:[%s7743_s19 + $0x698] sm:$0xff]  ;;  %603 = vst [vmem:[%s7748_s20 + $0x348] sm:$0xff] %v602_v43  ;;  %v608_v46 = vld [vmem:[%s7743_s19 + $0x6a0] sm:$0xff] }
  0x4a   : > { %605 = vst [vmem:[%s7748_s20 + $0x350] sm:$0xff] %v604_v44  ;;  %607 = vst [vmem:[%s7748_s20 + $0x358] sm:$0xff] %v606_v45  ;;  %v610_v47 = vld [vmem:[%s7743_s19 + $0x6a8] sm:$0xff]  ;;  %v612_v48 = vld [vmem:[%s7743_s19 + $0x6b0] sm:$0xff] }
  0x4b   : > { %609 = vst [vmem:[%s7748_s20 + $0x360] sm:$0xff] %v608_v46  ;;  %611 = vst [vmem:[%s7748_s20 + $0x368] sm:$0xff] %v610_v47  ;;  %v614_v49 = vld [vmem:[%s7743_s19 + $0x6b8] sm:$0xff]  ;;  %v616_v50 = vld [vmem:[%s7743_s19 + $0x700] sm:$0xff] }
  0x4c   : > { %613 = vst [vmem:[%s7748_s20 + $0x370] sm:$0xff] %v612_v48  ;;  %v618_v51 = vld [vmem:[%s7743_s19 + $0x708] sm:$0xff]  ;;  %615 = vst [vmem:[%s7748_s20 + $0x378] sm:$0xff] %v614_v49  ;;  %v620_v52 = vld [vmem:[%s7743_s19 + $0x710] sm:$0xff] }
  0x4d   : > { %617 = vst [vmem:[%s7748_s20 + $0x380] sm:$0xff] %v616_v50  ;;  %619 = vst [vmem:[%s7748_s20 + $0x388] sm:$0xff] %v618_v51  ;;  %v622_v53 = vld [vmem:[%s7743_s19 + $0x718] sm:$0xff]  ;;  %v624_v54 = vld [vmem:[%s7743_s19 + $0x720] sm:$0xff] }
  0x4e   : > { %621 = vst [vmem:[%s7748_s20 + $0x390] sm:$0xff] %v620_v52  ;;  %623 = vst [vmem:[%s7748_s20 + $0x398] sm:$0xff] %v622_v53  ;;  %v626_v55 = vld [vmem:[%s7743_s19 + $0x728] sm:$0xff]  ;;  %v628_v56 = vld [vmem:[%s7743_s19 + $0x730] sm:$0xff] }
  0x4f   : > { %625 = vst [vmem:[%s7748_s20 + $0x3a0] sm:$0xff] %v624_v54  ;;  %v630_v57 = vld [vmem:[%s7743_s19 + $0x738] sm:$0xff]  ;;  %627 = vst [vmem:[%s7748_s20 + $0x3a8] sm:$0xff] %v626_v55  ;;  %v632_v58 = vld [vmem:[%s7743_s19 + $0x780] sm:$0xff] }
  0x50   : > { %629 = vst [vmem:[%s7748_s20 + $0x3b0] sm:$0xff] %v628_v56  ;;  %631 = vst [vmem:[%s7748_s20 + $0x3b8] sm:$0xff] %v630_v57  ;;  %v634_v59 = vld [vmem:[%s7743_s19 + $0x788] sm:$0xff]  ;;  %v636_v60 = vld [vmem:[%s7743_s19 + $0x790] sm:$0xff] }
  0x51   : > { %633 = vst [vmem:[%s7748_s20 + $0x3c0] sm:$0xff] %v632_v58  ;;  %635 = vst [vmem:[%s7748_s20 + $0x3c8] sm:$0xff] %v634_v59  ;;  %v638_v61 = vld [vmem:[%s7743_s19 + $0x798] sm:$0xff]  ;;  %v640_v62 = vld [vmem:[%s7743_s19 + $0x7a0] sm:$0xff] }
  0x52   : > { %637 = vst [vmem:[%s7748_s20 + $0x3d0] sm:$0xff] %v636_v60  ;;  %v642_v63 = vld [vmem:[%s7743_s19 + $0x7a8] sm:$0xff]  ;;  %639 = vst [vmem:[%s7748_s20 + $0x3d8] sm:$0xff] %v638_v61  ;;  %v644_v0 = vld [vmem:[%s7743_s19 + $0x7b0] sm:$0xff] }
  0x53   : > { %641 = vst [vmem:[%s7748_s20 + $0x3e0] sm:$0xff] %v640_v62  ;;  %643 = vst [vmem:[%s7748_s20 + $0x3e8] sm:$0xff] %v642_v63  ;;  %v646_v1 = vld [vmem:[%s7743_s19 + $0x7b8] sm:$0xff] }
  0x54   : > { %645 = vst [vmem:[%s7748_s20 + $0x3f0] sm:$0xff] %v644_v0  ;;  %647 = vst [vmem:[%s7748_s20 + $0x3f8] sm:$0xff] %v646_v1 }
  0x55 PF: > { %653 = sbr.rel (!%p7731_p3) target bundleno = 153 (0x99), region = 83  ;;  %s655_s21 = sand.u32 (%p7731_p3), 1, %s7623_s26  }
  0x56   : > { %s7274_s22 = sshll.u32 (%p7731_p3), %s7627_s27, 6  ;;  %s7181_s23 = sshll.u32 (%p7731_p3), %s655_s21, 10 }
  0x57   : > { %s8010_s29 = scalar_lea.vmem (%p7731_p3), %s12659_s2, %s7274_s22  ;;  %s8015_s13 = scalar_lea.vmem (%p7731_p3), [#allocation5], %s7181_s23 }
  0x58   : > { %v673_v2 = vld [vmem:[%s8010_s29] sm:$0xff] (%p7731_p3)  ;;  %v675_v3 = vld [vmem:[%s8010_s29 + $0x8] sm:$0xff] (%p7731_p3)  ;;  %v677_v4 = vld [vmem:[%s8010_s29 + $0x10] sm:$0xff] (%p7731_p3) }
  0x59   : > { %674 = vst [vmem:[%s8015_s13] sm:$0xff] (%p7731_p3), %v673_v2  ;;  %676 = vst [vmem:[%s8015_s13 + $0x8] sm:$0xff] (%p7731_p3), %v675_v3  ;;  %v679_v5 = vld [vmem:[%s8010_s29 + $0x18] sm:$0xff] (%p7731_p3)  ;;  %v681_v6 = vld [vmem:[%s8010_s29 + $0x20] sm:$0xff] (%p7731_p3) }
  0x5a   : > { %678 = vst [vmem:[%s8015_s13 + $0x10] sm:$0xff] (%p7731_p3), %v677_v4  ;;  %v683_v7 = vld [vmem:[%s8010_s29 + $0x28] sm:$0xff] (%p7731_p3)  ;;  %680 = vst [vmem:[%s8015_s13 + $0x18] sm:$0xff] (%p7731_p3), %v679_v5  ;;  %v685_v8 = vld [vmem:[%s8010_s29 + $0x30] sm:$0xff] (%p7731_p3) }
  0x5b   : > { %682 = vst [vmem:[%s8015_s13 + $0x20] sm:$0xff] (%p7731_p3), %v681_v6  ;;  %684 = vst [vmem:[%s8015_s13 + $0x28] sm:$0xff] (%p7731_p3), %v683_v7  ;;  %v687_v9 = vld [vmem:[%s8010_s29 + $0x38] sm:$0xff] (%p7731_p3)  ;;  %v689_v10 = vld [vmem:[%s8010_s29 + $0x80] sm:$0xff] (%p7731_p3) }
  0x5c   : > { %686 = vst [vmem:[%s8015_s13 + $0x30] sm:$0xff] %v685_v8  ;;  %688 = vst [vmem:[%s8015_s13 + $0x38] sm:$0xff] %v687_v9  ;;  %v691_v11 = vld [vmem:[%s8010_s29 + $0x88] sm:$0xff]  ;;  %v693_v12 = vld [vmem:[%s8010_s29 + $0x90] sm:$0xff] }
  0x5d   : > { %690 = vst [vmem:[%s8015_s13 + $0x40] sm:$0xff] %v689_v10  ;;  %v695_v13 = vld [vmem:[%s8010_s29 + $0x98] sm:$0xff]  ;;  %692 = vst [vmem:[%s8015_s13 + $0x48] sm:$0xff] %v691_v11  ;;  %v697_v14 = vld [vmem:[%s8010_s29 + $0xa0] sm:$0xff] }
  0x5e   : > { %694 = vst [vmem:[%s8015_s13 + $0x50] sm:$0xff] %v693_v12  ;;  %696 = vst [vmem:[%s8015_s13 + $0x58] sm:$0xff] %v695_v13  ;;  %v699_v15 = vld [vmem:[%s8010_s29 + $0xa8] sm:$0xff]  ;;  %v701_v16 = vld [vmem:[%s8010_s29 + $0xb0] sm:$0xff] }
  0x5f   : > { %698 = vst [vmem:[%s8015_s13 + $0x60] sm:$0xff] %v697_v14  ;;  %700 = vst [vmem:[%s8015_s13 + $0x68] sm:$0xff] %v699_v15  ;;  %v703_v17 = vld [vmem:[%s8010_s29 + $0xb8] sm:$0xff]  ;;  %v705_v18 = vld [vmem:[%s8010_s29 + $0x100] sm:$0xff] }
  0x60   : > { %702 = vst [vmem:[%s8015_s13 + $0x70] sm:$0xff] %v701_v16  ;;  %v707_v19 = vld [vmem:[%s8010_s29 + $0x108] sm:$0xff]  ;;  %704 = vst [vmem:[%s8015_s13 + $0x78] sm:$0xff] %v703_v17  ;;  %v709_v20 = vld [vmem:[%s8010_s29 + $0x110] sm:$0xff] }
  0x61   : > { %706 = vst [vmem:[%s8015_s13 + $0x80] sm:$0xff] %v705_v18  ;;  %708 = vst [vmem:[%s8015_s13 + $0x88] sm:$0xff] %v707_v19  ;;  %v711_v21 = vld [vmem:[%s8010_s29 + $0x118] sm:$0xff]  ;;  %v713_v22 = vld [vmem:[%s8010_s29 + $0x120] sm:$0xff] }
  0x62   : > { %710 = vst [vmem:[%s8015_s13 + $0x90] sm:$0xff] %v709_v20  ;;  %712 = vst [vmem:[%s8015_s13 + $0x98] sm:$0xff] %v711_v21  ;;  %v715_v23 = vld [vmem:[%s8010_s29 + $0x128] sm:$0xff]  ;;  %v717_v24 = vld [vmem:[%s8010_s29 + $0x130] sm:$0xff] }
  0x63   : > { %714 = vst [vmem:[%s8015_s13 + $0xa0] sm:$0xff] %v713_v22  ;;  %v719_v25 = vld [vmem:[%s8010_s29 + $0x138] sm:$0xff]  ;;  %716 = vst [vmem:[%s8015_s13 + $0xa8] sm:$0xff] %v715_v23  ;;  %v721_v26 = vld [vmem:[%s8010_s29 + $0x180] sm:$0xff] }
  0x64   : > { %718 = vst [vmem:[%s8015_s13 + $0xb0] sm:$0xff] %v717_v24  ;;  %720 = vst [vmem:[%s8015_s13 + $0xb8] sm:$0xff] %v719_v25  ;;  %v723_v27 = vld [vmem:[%s8010_s29 + $0x188] sm:$0xff]  ;;  %v725_v28 = vld [vmem:[%s8010_s29 + $0x190] sm:$0xff] }
  0x65   : > { %722 = vst [vmem:[%s8015_s13 + $0xc0] sm:$0xff] %v721_v26  ;;  %724 = vst [vmem:[%s8015_s13 + $0xc8] sm:$0xff] %v723_v27  ;;  %v727_v29 = vld [vmem:[%s8010_s29 + $0x198] sm:$0xff]  ;;  %v729_v30 = vld [vmem:[%s8010_s29 + $0x1a0] sm:$0xff] }
  0x66   : > { %726 = vst [vmem:[%s8015_s13 + $0xd0] sm:$0xff] %v725_v28  ;;  %v731_v31 = vld [vmem:[%s8010_s29 + $0x1a8] sm:$0xff]  ;;  %728 = vst [vmem:[%s8015_s13 + $0xd8] sm:$0xff] %v727_v29  ;;  %v733_v32 = vld [vmem:[%s8010_s29 + $0x1b0] sm:$0xff] }
  0x67   : > { %730 = vst [vmem:[%s8015_s13 + $0xe0] sm:$0xff] %v729_v30  ;;  %732 = vst [vmem:[%s8015_s13 + $0xe8] sm:$0xff] %v731_v31  ;;  %v735_v33 = vld [vmem:[%s8010_s29 + $0x1b8] sm:$0xff]  ;;  %v737_v34 = vld [vmem:[%s8010_s29 + $0x200] sm:$0xff] }
  0x68   : > { %734 = vst [vmem:[%s8015_s13 + $0xf0] sm:$0xff] %v733_v32  ;;  %736 = vst [vmem:[%s8015_s13 + $0xf8] sm:$0xff] %v735_v33  ;;  %v739_v35 = vld [vmem:[%s8010_s29 + $0x208] sm:$0xff]  ;;  %v741_v36 = vld [vmem:[%s8010_s29 + $0x210] sm:$0xff] }
  0x69   : > { %738 = vst [vmem:[%s8015_s13 + $0x100] sm:$0xff] %v737_v34  ;;  %v743_v37 = vld [vmem:[%s8010_s29 + $0x218] sm:$0xff]  ;;  %740 = vst [vmem:[%s8015_s13 + $0x108] sm:$0xff] %v739_v35  ;;  %v745_v38 = vld [vmem:[%s8010_s29 + $0x220] sm:$0xff] }
  0x6a   : > { %742 = vst [vmem:[%s8015_s13 + $0x110] sm:$0xff] %v741_v36  ;;  %744 = vst [vmem:[%s8015_s13 + $0x118] sm:$0xff] %v743_v37  ;;  %v747_v39 = vld [vmem:[%s8010_s29 + $0x228] sm:$0xff]  ;;  %v749_v40 = vld [vmem:[%s8010_s29 + $0x230] sm:$0xff] }
  0x6b   : > { %746 = vst [vmem:[%s8015_s13 + $0x120] sm:$0xff] %v745_v38  ;;  %748 = vst [vmem:[%s8015_s13 + $0x128] sm:$0xff] %v747_v39  ;;  %v751_v41 = vld [vmem:[%s8010_s29 + $0x238] sm:$0xff]  ;;  %v753_v42 = vld [vmem:[%s8010_s29 + $0x280] sm:$0xff] }
  0x6c   : > { %750 = vst [vmem:[%s8015_s13 + $0x130] sm:$0xff] %v749_v40  ;;  %v755_v43 = vld [vmem:[%s8010_s29 + $0x288] sm:$0xff]  ;;  %752 = vst [vmem:[%s8015_s13 + $0x138] sm:$0xff] %v751_v41  ;;  %v757_v44 = vld [vmem:[%s8010_s29 + $0x290] sm:$0xff] }
  0x6d   : > { %754 = vst [vmem:[%s8015_s13 + $0x140] sm:$0xff] %v753_v42  ;;  %756 = vst [vmem:[%s8015_s13 + $0x148] sm:$0xff] %v755_v43  ;;  %v759_v45 = vld [vmem:[%s8010_s29 + $0x298] sm:$0xff]  ;;  %v761_v46 = vld [vmem:[%s8010_s29 + $0x2a0] sm:$0xff] }
  0x6e   : > { %758 = vst [vmem:[%s8015_s13 + $0x150] sm:$0xff] %v757_v44  ;;  %760 = vst [vmem:[%s8015_s13 + $0x158] sm:$0xff] %v759_v45  ;;  %v763_v47 = vld [vmem:[%s8010_s29 + $0x2a8] sm:$0xff]  ;;  %v765_v48 = vld [vmem:[%s8010_s29 + $0x2b0] sm:$0xff] }
  0x6f   : > { %762 = vst [vmem:[%s8015_s13 + $0x160] sm:$0xff] %v761_v46  ;;  %v767_v49 = vld [vmem:[%s8010_s29 + $0x2b8] sm:$0xff]  ;;  %764 = vst [vmem:[%s8015_s13 + $0x168] sm:$0xff] %v763_v47  ;;  %v769_v50 = vld [vmem:[%s8010_s29 + $0x300] sm:$0xff] }
  0x70   : > { %766 = vst [vmem:[%s8015_s13 + $0x170] sm:$0xff] %v765_v48  ;;  %768 = vst [vmem:[%s8015_s13 + $0x178] sm:$0xff] %v767_v49  ;;  %v771_v51 = vld [vmem:[%s8010_s29 + $0x308] sm:$0xff]  ;;  %v773_v52 = vld [vmem:[%s8010_s29 + $0x310] sm:$0xff] }
  0x71   : > { %770 = vst [vmem:[%s8015_s13 + $0x180] sm:$0xff] %v769_v50  ;;  %772 = vst [vmem:[%s8015_s13 + $0x188] sm:$0xff] %v771_v51  ;;  %v775_v53 = vld [vmem:[%s8010_s29 + $0x318] sm:$0xff]  ;;  %v777_v54 = vld [vmem:[%s8010_s29 + $0x320] sm:$0xff] }
  0x72   : > { %774 = vst [vmem:[%s8015_s13 + $0x190] sm:$0xff] %v773_v52  ;;  %v779_v55 = vld [vmem:[%s8010_s29 + $0x328] sm:$0xff]  ;;  %776 = vst [vmem:[%s8015_s13 + $0x198] sm:$0xff] %v775_v53  ;;  %v781_v56 = vld [vmem:[%s8010_s29 + $0x330] sm:$0xff] }
  0x73   : > { %778 = vst [vmem:[%s8015_s13 + $0x1a0] sm:$0xff] %v777_v54  ;;  %780 = vst [vmem:[%s8015_s13 + $0x1a8] sm:$0xff] %v779_v55  ;;  %v783_v57 = vld [vmem:[%s8010_s29 + $0x338] sm:$0xff]  ;;  %v785_v58 = vld [vmem:[%s8010_s29 + $0x380] sm:$0xff] }
  0x74   : > { %782 = vst [vmem:[%s8015_s13 + $0x1b0] sm:$0xff] %v781_v56  ;;  %784 = vst [vmem:[%s8015_s13 + $0x1b8] sm:$0xff] %v783_v57  ;;  %v787_v59 = vld [vmem:[%s8010_s29 + $0x388] sm:$0xff]  ;;  %v789_v60 = vld [vmem:[%s8010_s29 + $0x390] sm:$0xff] }
  0x75   : > { %786 = vst [vmem:[%s8015_s13 + $0x1c0] sm:$0xff] %v785_v58  ;;  %v791_v61 = vld [vmem:[%s8010_s29 + $0x398] sm:$0xff]  ;;  %788 = vst [vmem:[%s8015_s13 + $0x1c8] sm:$0xff] %v787_v59  ;;  %v793_v62 = vld [vmem:[%s8010_s29 + $0x3a0] sm:$0xff] }
  0x76   : > { %790 = vst [vmem:[%s8015_s13 + $0x1d0] sm:$0xff] %v789_v60  ;;  %792 = vst [vmem:[%s8015_s13 + $0x1d8] sm:$0xff] %v791_v61  ;;  %v795_v63 = vld [vmem:[%s8010_s29 + $0x3a8] sm:$0xff]  ;;  %v797_v0 = vld [vmem:[%s8010_s29 + $0x3b0] sm:$0xff] }
  0x77   : > { %794 = vst [vmem:[%s8015_s13 + $0x1e0] sm:$0xff] %v793_v62  ;;  %796 = vst [vmem:[%s8015_s13 + $0x1e8] sm:$0xff] %v795_v63  ;;  %v799_v1 = vld [vmem:[%s8010_s29 + $0x3b8] sm:$0xff]  ;;  %v801_v2 = vld [vmem:[%s8010_s29 + $0x400] sm:$0xff] }
  0x78   : > { %798 = vst [vmem:[%s8015_s13 + $0x1f0] sm:$0xff] %v797_v0  ;;  %v803_v3 = vld [vmem:[%s8010_s29 + $0x408] sm:$0xff]  ;;  %800 = vst [vmem:[%s8015_s13 + $0x1f8] sm:$0xff] %v799_v1  ;;  %v805_v4 = vld [vmem:[%s8010_s29 + $0x410] sm:$0xff] }
  0x79   : > { %802 = vst [vmem:[%s8015_s13 + $0x200] sm:$0xff] %v801_v2  ;;  %804 = vst [vmem:[%s8015_s13 + $0x208] sm:$0xff] %v803_v3  ;;  %v807_v5 = vld [vmem:[%s8010_s29 + $0x418] sm:$0xff]  ;;  %v809_v6 = vld [vmem:[%s8010_s29 + $0x420] sm:$0xff] }
  0x7a   : > { %806 = vst [vmem:[%s8015_s13 + $0x210] sm:$0xff] %v805_v4  ;;  %808 = vst [vmem:[%s8015_s13 + $0x218] sm:$0xff] %v807_v5  ;;  %v811_v7 = vld [vmem:[%s8010_s29 + $0x428] sm:$0xff]  ;;  %v813_v8 = vld [vmem:[%s8010_s29 + $0x430] sm:$0xff] }
  0x7b   : > { %810 = vst [vmem:[%s8015_s13 + $0x220] sm:$0xff] %v809_v6  ;;  %v815_v9 = vld [vmem:[%s8010_s29 + $0x438] sm:$0xff]  ;;  %812 = vst [vmem:[%s8015_s13 + $0x228] sm:$0xff] %v811_v7  ;;  %v817_v10 = vld [vmem:[%s8010_s29 + $0x480] sm:$0xff] }
  0x7c   : > { %814 = vst [vmem:[%s8015_s13 + $0x230] sm:$0xff] %v813_v8  ;;  %816 = vst [vmem:[%s8015_s13 + $0x238] sm:$0xff] %v815_v9  ;;  %v819_v11 = vld [vmem:[%s8010_s29 + $0x488] sm:$0xff]  ;;  %v821_v12 = vld [vmem:[%s8010_s29 + $0x490] sm:$0xff] }
  0x7d   : > { %818 = vst [vmem:[%s8015_s13 + $0x240] sm:$0xff] %v817_v10  ;;  %820 = vst [vmem:[%s8015_s13 + $0x248] sm:$0xff] %v819_v11  ;;  %v823_v13 = vld [vmem:[%s8010_s29 + $0x498] sm:$0xff]  ;;  %v825_v14 = vld [vmem:[%s8010_s29 + $0x4a0] sm:$0xff] }
  0x7e   : > { %822 = vst [vmem:[%s8015_s13 + $0x250] sm:$0xff] %v821_v12  ;;  %v827_v15 = vld [vmem:[%s8010_s29 + $0x4a8] sm:$0xff]  ;;  %824 = vst [vmem:[%s8015_s13 + $0x258] sm:$0xff] %v823_v13  ;;  %v829_v16 = vld [vmem:[%s8010_s29 + $0x4b0] sm:$0xff] }
  0x7f   : > { %826 = vst [vmem:[%s8015_s13 + $0x260] sm:$0xff] %v825_v14  ;;  %828 = vst [vmem:[%s8015_s13 + $0x268] sm:$0xff] %v827_v15  ;;  %v831_v17 = vld [vmem:[%s8010_s29 + $0x4b8] sm:$0xff]  ;;  %v833_v18 = vld [vmem:[%s8010_s29 + $0x500] sm:$0xff] }
  0x80   : > { %830 = vst [vmem:[%s8015_s13 + $0x270] sm:$0xff] %v829_v16  ;;  %832 = vst [vmem:[%s8015_s13 + $0x278] sm:$0xff] %v831_v17  ;;  %v835_v19 = vld [vmem:[%s8010_s29 + $0x508] sm:$0xff]  ;;  %v837_v20 = vld [vmem:[%s8010_s29 + $0x510] sm:$0xff] }
  0x81   : > { %834 = vst [vmem:[%s8015_s13 + $0x280] sm:$0xff] %v833_v18  ;;  %v839_v21 = vld [vmem:[%s8010_s29 + $0x518] sm:$0xff]  ;;  %836 = vst [vmem:[%s8015_s13 + $0x288] sm:$0xff] %v835_v19  ;;  %v841_v22 = vld [vmem:[%s8010_s29 + $0x520] sm:$0xff] }
  0x82   : > { %838 = vst [vmem:[%s8015_s13 + $0x290] sm:$0xff] %v837_v20  ;;  %840 = vst [vmem:[%s8015_s13 + $0x298] sm:$0xff] %v839_v21  ;;  %v843_v23 = vld [vmem:[%s8010_s29 + $0x528] sm:$0xff]  ;;  %v845_v24 = vld [vmem:[%s8010_s29 + $0x530] sm:$0xff] }
  0x83   : > { %842 = vst [vmem:[%s8015_s13 + $0x2a0] sm:$0xff] %v841_v22  ;;  %844 = vst [vmem:[%s8015_s13 + $0x2a8] sm:$0xff] %v843_v23  ;;  %v847_v25 = vld [vmem:[%s8010_s29 + $0x538] sm:$0xff]  ;;  %v849_v26 = vld [vmem:[%s8010_s29 + $0x580] sm:$0xff] }
  0x84   : > { %846 = vst [vmem:[%s8015_s13 + $0x2b0] sm:$0xff] %v845_v24  ;;  %v851_v27 = vld [vmem:[%s8010_s29 + $0x588] sm:$0xff]  ;;  %848 = vst [vmem:[%s8015_s13 + $0x2b8] sm:$0xff] %v847_v25  ;;  %v853_v28 = vld [vmem:[%s8010_s29 + $0x590] sm:$0xff] }
  0x85   : > { %850 = vst [vmem:[%s8015_s13 + $0x2c0] sm:$0xff] %v849_v26  ;;  %852 = vst [vmem:[%s8015_s13 + $0x2c8] sm:$0xff] %v851_v27  ;;  %v855_v29 = vld [vmem:[%s8010_s29 + $0x598] sm:$0xff]  ;;  %v857_v30 = vld [vmem:[%s8010_s29 + $0x5a0] sm:$0xff] }
  0x86   : > { %854 = vst [vmem:[%s8015_s13 + $0x2d0] sm:$0xff] %v853_v28  ;;  %856 = vst [vmem:[%s8015_s13 + $0x2d8] sm:$0xff] %v855_v29  ;;  %v859_v31 = vld [vmem:[%s8010_s29 + $0x5a8] sm:$0xff]  ;;  %v861_v32 = vld [vmem:[%s8010_s29 + $0x5b0] sm:$0xff] }
  0x87   : > { %858 = vst [vmem:[%s8015_s13 + $0x2e0] sm:$0xff] %v857_v30  ;;  %v863_v33 = vld [vmem:[%s8010_s29 + $0x5b8] sm:$0xff]  ;;  %860 = vst [vmem:[%s8015_s13 + $0x2e8] sm:$0xff] %v859_v31  ;;  %v865_v34 = vld [vmem:[%s8010_s29 + $0x600] sm:$0xff] }
  0x88   : > { %862 = vst [vmem:[%s8015_s13 + $0x2f0] sm:$0xff] %v861_v32  ;;  %864 = vst [vmem:[%s8015_s13 + $0x2f8] sm:$0xff] %v863_v33  ;;  %v867_v35 = vld [vmem:[%s8010_s29 + $0x608] sm:$0xff]  ;;  %v869_v36 = vld [vmem:[%s8010_s29 + $0x610] sm:$0xff] }
  0x89   : > { %866 = vst [vmem:[%s8015_s13 + $0x300] sm:$0xff] %v865_v34  ;;  %868 = vst [vmem:[%s8015_s13 + $0x308] sm:$0xff] %v867_v35  ;;  %v871_v37 = vld [vmem:[%s8010_s29 + $0x618] sm:$0xff]  ;;  %v873_v38 = vld [vmem:[%s8010_s29 + $0x620] sm:$0xff] }
  0x8a   : > { %870 = vst [vmem:[%s8015_s13 + $0x310] sm:$0xff] %v869_v36  ;;  %v875_v39 = vld [vmem:[%s8010_s29 + $0x628] sm:$0xff]  ;;  %872 = vst [vmem:[%s8015_s13 + $0x318] sm:$0xff] %v871_v37  ;;  %v877_v40 = vld [vmem:[%s8010_s29 + $0x630] sm:$0xff] }
  0x8b   : > { %874 = vst [vmem:[%s8015_s13 + $0x320] sm:$0xff] %v873_v38  ;;  %876 = vst [vmem:[%s8015_s13 + $0x328] sm:$0xff] %v875_v39  ;;  %v879_v41 = vld [vmem:[%s8010_s29 + $0x638] sm:$0xff]  ;;  %v881_v42 = vld [vmem:[%s8010_s29 + $0x680] sm:$0xff] }
  0x8c   : > { %878 = vst [vmem:[%s8015_s13 + $0x330] sm:$0xff] %v877_v40  ;;  %880 = vst [vmem:[%s8015_s13 + $0x338] sm:$0xff] %v879_v41  ;;  %v883_v43 = vld [vmem:[%s8010_s29 + $0x688] sm:$0xff]  ;;  %v885_v44 = vld [vmem:[%s8010_s29 + $0x690] sm:$0xff] }
  0x8d   : > { %882 = vst [vmem:[%s8015_s13 + $0x340] sm:$0xff] %v881_v42  ;;  %v887_v45 = vld [vmem:[%s8010_s29 + $0x698] sm:$0xff]  ;;  %884 = vst [vmem:[%s8015_s13 + $0x348] sm:$0xff] %v883_v43  ;;  %v889_v46 = vld [vmem:[%s8010_s29 + $0x6a0] sm:$0xff] }
  0x8e   : > { %886 = vst [vmem:[%s8015_s13 + $0x350] sm:$0xff] %v885_v44  ;;  %888 = vst [vmem:[%s8015_s13 + $0x358] sm:$0xff] %v887_v45  ;;  %v891_v47 = vld [vmem:[%s8010_s29 + $0x6a8] sm:$0xff]  ;;  %v893_v48 = vld [vmem:[%s8010_s29 + $0x6b0] sm:$0xff] }
  0x8f   : > { %890 = vst [vmem:[%s8015_s13 + $0x360] sm:$0xff] %v889_v46  ;;  %892 = vst [vmem:[%s8015_s13 + $0x368] sm:$0xff] %v891_v47  ;;  %v895_v49 = vld [vmem:[%s8010_s29 + $0x6b8] sm:$0xff]  ;;  %v897_v50 = vld [vmem:[%s8010_s29 + $0x700] sm:$0xff] }
  0x90   : > { %894 = vst [vmem:[%s8015_s13 + $0x370] sm:$0xff] %v893_v48  ;;  %v899_v51 = vld [vmem:[%s8010_s29 + $0x708] sm:$0xff]  ;;  %896 = vst [vmem:[%s8015_s13 + $0x378] sm:$0xff] %v895_v49  ;;  %v901_v52 = vld [vmem:[%s8010_s29 + $0x710] sm:$0xff] }
  0x91   : > { %898 = vst [vmem:[%s8015_s13 + $0x380] sm:$0xff] %v897_v50  ;;  %900 = vst [vmem:[%s8015_s13 + $0x388] sm:$0xff] %v899_v51  ;;  %v903_v53 = vld [vmem:[%s8010_s29 + $0x718] sm:$0xff]  ;;  %v905_v54 = vld [vmem:[%s8010_s29 + $0x720] sm:$0xff] }
  0x92   : > { %902 = vst [vmem:[%s8015_s13 + $0x390] sm:$0xff] %v901_v52  ;;  %904 = vst [vmem:[%s8015_s13 + $0x398] sm:$0xff] %v903_v53  ;;  %v907_v55 = vld [vmem:[%s8010_s29 + $0x728] sm:$0xff]  ;;  %v909_v56 = vld [vmem:[%s8010_s29 + $0x730] sm:$0xff] }
  0x93   : > { %906 = vst [vmem:[%s8015_s13 + $0x3a0] sm:$0xff] %v905_v54  ;;  %v911_v57 = vld [vmem:[%s8010_s29 + $0x738] sm:$0xff]  ;;  %908 = vst [vmem:[%s8015_s13 + $0x3a8] sm:$0xff] %v907_v55  ;;  %v913_v58 = vld [vmem:[%s8010_s29 + $0x780] sm:$0xff] }
  0x94   : > { %910 = vst [vmem:[%s8015_s13 + $0x3b0] sm:$0xff] %v909_v56  ;;  %912 = vst [vmem:[%s8015_s13 + $0x3b8] sm:$0xff] %v911_v57  ;;  %v915_v59 = vld [vmem:[%s8010_s29 + $0x788] sm:$0xff]  ;;  %v917_v60 = vld [vmem:[%s8010_s29 + $0x790] sm:$0xff] }
  0x95   : > { %914 = vst [vmem:[%s8015_s13 + $0x3c0] sm:$0xff] %v913_v58  ;;  %916 = vst [vmem:[%s8015_s13 + $0x3c8] sm:$0xff] %v915_v59  ;;  %v919_v61 = vld [vmem:[%s8010_s29 + $0x798] sm:$0xff]  ;;  %v921_v62 = vld [vmem:[%s8010_s29 + $0x7a0] sm:$0xff] }
  0x96   : > { %918 = vst [vmem:[%s8015_s13 + $0x3d0] sm:$0xff] %v917_v60  ;;  %v923_v63 = vld [vmem:[%s8010_s29 + $0x7a8] sm:$0xff]  ;;  %920 = vst [vmem:[%s8015_s13 + $0x3d8] sm:$0xff] %v919_v61  ;;  %v925_v0 = vld [vmem:[%s8010_s29 + $0x7b0] sm:$0xff] }
  0x97   : > { %922 = vst [vmem:[%s8015_s13 + $0x3e0] sm:$0xff] %v921_v62  ;;  %924 = vst [vmem:[%s8015_s13 + $0x3e8] sm:$0xff] %v923_v63  ;;  %v927_v1 = vld [vmem:[%s8010_s29 + $0x7b8] sm:$0xff] }
  0x98   : > { %926 = vst [vmem:[%s8015_s13 + $0x3f0] sm:$0xff] %v925_v0  ;;  %928 = vst [vmem:[%s8015_s13 + $0x3f8] sm:$0xff] %v927_v1 }
  0x99 PF: > { %p7184_p5 = scmp.ge.s32.totalorder %s7627_s27, 1  ;;  %p933_p6 = scmp.lt.s32.totalorder %s7627_s27, 3 }
  0x9b   : > { %p934_p7 = pnand %p7184_p5, %p933_p6 }
  0x9d   : > { %937 = sbr.rel (%p934_p7) target bundleno = 1415 (0x587), region = 106 }
  0xa4   : > { %v1011_v2 = vld [vmem:[%s12660_s3] sm:$0xff]  ;;  %v7629_v3 = vmov 0   ;;  %v1012_v4 = vld [vmem:[%s12660_s3 + $0x8] sm:$0xff]  ;;  %v4037_v5 = vld [vmem:[%s12662_s5 + $0x10] sm:$0xff]  ;;  %s7187_s24 = sshll.u32 %s7174_s7, 4  ;;  %v1029_v9 = vlaneseq  ;;  %s940_s29 = sand.u32 1, %s7619_s25  }
  0xa5   : > { %7494 = vset.pattern.permute.xlu0 %v7629_v3  ;;  %7495 = vset.pattern.permute.xlu1 %v7629_v3  ;;  %v4852_v6 = vld [vmem:[%s12666_s9] sm:$0xff]  ;;  %v4854_v7 = vld [vmem:[%s12666_s9 + $0x10] sm:$0xff]  ;;  %p998_p8 = scmp.lt.s32.totalorder %s7187_s24, 31  ;;  %s8309_s27 = sshll.u32 %s940_s29, 10  ;;  %vm4059_vm0 = vcmask 130048   ;;  %vm5675_vm1 = vcmask 261120  }
  0xa6   : > { %1175 = vperm.xlu0 %7494, %v1011_v2   ;;  %v6248_v8 = vld [vmem:[#allocation3] sm:$0x1]  ;;  %v8292_v10 = vshrl.u32 %v1029_v9, 7  ;;  %s8326_s25 = scalar_lea.vmem [#allocation4], %s8309_s27  ;;  %s8500_s7 = scalar_lea.vmem [#allocation5], %s8309_s27  ;;  %vm6877_vm2 = vcmask 1040384  }
  0xa7   : > { %s14229_s24 = smov (!%p998_p8, %s7187_s24), 31  ;;  %v8329_v20 = vld [vmem:[%s8326_s25] sm:$0xff]  ;;  %v8419_v57 = vld [vmem:[%s8326_s25 + $0x8] sm:$0xff] }
  0xa8   : > { %s7188_s28 = sshll.u32 %s14229_s24, 2  ;;  %13065 = vst [vmem:[#allocation6_spill] sm:$0xff] %v8292_v10  ;;  %v8301_v11 = vsub.s32 4, %v8292_v10  ;;  %v8304_v12 = vsub.s32 5, %v8292_v10  ;;  %v8307_v13 = vsub.s32 6, %v8292_v10  ;;  %13069 = vst [vmem:[#allocation10_spill] sm:$0xff] %v8329_v20 }
  0xa9   : > { %s8298_s15 = scalar_lea.vmem %s12657_s0, %s7188_s28  ;;  %v8334_v22 = vsub.s32 0, %v8292_v10  ;;  %v8337_v23 = vsub.s32 1, %v8292_v10  ;;  %v8340_v24 = vsub.s32 2, %v8292_v10  ;;  %v8343_v25 = vld [vmem:[%s8326_s25 + $0x80] sm:$0xff]  ;;  %v8422_v58 = vld [vmem:[%s8326_s25 + $0x88] sm:$0xff]  ;;  %s7190_s28 = sshll.u32 %s14229_s24, 1 }
  0xaa   : > { %1180 = vperm.xlu0 %7494, %v1012_v4   ;;  %13066 = vst [vmem:[#allocation7_spill] sm:$0xff] %v8301_v11  ;;  %13067 = vst [vmem:[#allocation8_spill] sm:$0xff] %v8304_v12  ;;  %v8312_v14 = vld [vmem:[%s8298_s15] sm:$0x77]  ;;  %v8315_v15 = vld [vmem:[%s8298_s15 + $0x8] sm:$0x77]  ;;  %s12595_s14 = scalar_lea.vmem %s12668_s12, %s7190_s28 }
  0xab   : > { %13068 = vst [vmem:[#allocation9_spill] sm:$0xff] %v8307_v13  ;;  %v1036_v16 = vrot.slane %v8312_v14, %v8301_v11  ;;  %v1286_v17 = vrot.slane %v8312_v14, %v8304_v12  ;;  %v1526_v18 = vrot.slane %v8312_v14, %v8307_v13  ;;  %v1044_v19 = vrot.slane %v8315_v15, %v8301_v11  ;;  %v8346_v26 = vld [vmem:[%s8326_s25 + $0x100] sm:$0xff]  ;;  %v8425_v59 = vld [vmem:[%s8326_s25 + $0x108] sm:$0xff] }
  0xac   : > { %v1294_v21 = vrot.slane %v8315_v15, %v8304_v12  ;;  %13070 = vst [vmem:[#allocation11_spill] sm:$0xff] %v8334_v22  ;;  %13071 = vst [vmem:[#allocation12_spill] sm:$0xff] %v8337_v23  ;;  %v8349_v27 = vld [vmem:[%s8326_s25 + $0x180] sm:$0xff]  ;;  %v1534_v28 = vrot.slane %v8315_v15, %v8307_v13  ;;  %v1032_v52 = vrot.slane %v8312_v14, %v8334_v22  ;;  %v8431_v63 = vld [vmem:[%s8326_s25 + $0x48] sm:$0xff] }
  0xad   : > { %13072 = vst [vmem:[#allocation13_spill] sm:$0xff] %v8340_v24  ;;  %v8354_v29 = vld [vmem:[%s8326_s25 + $0x40] sm:$0xff]  ;;  %v8363_v32 = vrot.slane %v1036_v16, %v8334_v22  ;;  %v8366_v33 = vrot.slane %v1286_v17, %v8337_v23  ;;  %v8369_v34 = vrot.slane %v1526_v18, %v8340_v24  ;;  %v8381_v38 = vrot.slane %v1044_v19, %v8334_v22  ;;  %v8434_v0 = vld [vmem:[%s8326_s25 + $0xc8] sm:$0xff] }
  0xae   : > { %4051 = vperm.xlu0 %7494, %v4037_v5   ;;  %v8357_v30 = vld [vmem:[%s8326_s25 + $0xc0] sm:$0xff]  ;;  %v8396_v45 = vrot.slane %v1294_v21, %v8337_v23  ;;  %v8410_v51 = vrot.slane %v1534_v28, %v8340_v24  ;;  %v8437_v1 = vld [vmem:[%s8326_s25 + $0x188] sm:$0xff]  ;;  %v1282_v2 = vrot.slane %v8312_v14, %v8337_v23  ;;  %v1522_v9 = vrot.slane %v8312_v14, %v8340_v24 }
  0xaf   : > { %v8360_v31 = vld [vmem:[%s8326_s25 + $0x200] sm:$0xff]  ;;  %v8459_v19 = vld [vmem:[%s8326_s25 + $0x248] sm:$0xff]  ;;  %v8468_v4 = vrot.slane %v1032_v52, %v8334_v22  ;;  %v1040_v3 = vrot.slane %v8315_v15, %v8334_v22  ;;  %v1290_v40 = vrot.slane %v8315_v15, %v8337_v23 }
  0xb0   : > { %v8372_v35 = vld [vmem:[%s8326_s25 + $0x140] sm:$0xff]  ;;  %v8462_v21 = vld [vmem:[%s8326_s25 + $0x288] sm:$0xff]  ;;  %v8491_v14 = vrot.slane %v1282_v2, %v8337_v23  ;;  %v8497_v47 = vrot.slane %v1522_v9, %v8340_v24 }
  0xb1   : > { %v8375_v36 = vld [vmem:[%s8326_s25 + $0x1c0] sm:$0xff]  ;;  %v8465_v28 = vld [vmem:[%s8326_s25 + $0x308] sm:$0xff]  ;;  %13074 = vst [vmem:[#allocation15_spill] sm:$0xff] %v8468_v4  ;;  %v8531_v16 = vrot.slane %v1040_v3, %v8334_v22 }
  0xb2   : > { %4858 = vperm.xlu0 %7494, %v4852_v6   ;;  %v8378_v37 = vld [vmem:[%s8326_s25 + $0x240] sm:$0xff]  ;;  %v8445_v6 = vld [vmem:[%s8326_s25 + $0x148] sm:$0xff]  ;;  %13073 = vst [vmem:[#allocation14_spill] sm:$0xff] %v8465_v28  ;;  %13078 = vst [vmem:[#allocation19_spill] sm:$0xff] %v8491_v14 }
  0xb3   : > { %v8387_v42 = vld [vmem:[%s8326_s25 + $0x280] sm:$0xff]  ;;  %v8474_v17 = vld [vmem:[%s8326_s25 + $0x2c8] sm:$0xff]  ;;  %13079 = vst [vmem:[#allocation20_spill] sm:$0xff] %v8497_v47  ;;  %13087 = vst [vmem:[#allocation28_spill] sm:$0xff] %v8531_v16 }
  0xb4   : > { %v8390_v43 = vld [vmem:[%s8326_s25 + $0x300] sm:$0xff]  ;;  %v8477_v62 = vld [vmem:[%s8326_s25 + $0x348] sm:$0xff] }
  0xb5   : > { %v8393_v44 = vld [vmem:[%s8326_s25 + $0x380] sm:$0xff]  ;;  %13075 = vst [vmem:[#allocation16_spill] sm:$0xff] %v8477_v62  ;;  %v8480_v18 = vld [vmem:[%s8326_s25 + $0x388] sm:$0xff] }
  0xb6   : > { %4868 = vperm.xlu0 %7494, %v4854_v7   ;;  %v8401_v48 = vld [vmem:[%s8326_s25 + $0x2c0] sm:$0xff]  ;;  %v8448_v7 = vld [vmem:[%s8326_s25 + $0x1c8] sm:$0xff]  ;;  %13076 = vst [vmem:[#allocation17_spill] sm:$0xff] %v8480_v18 }
  0xb7   : > { %v8404_v49 = vld [vmem:[%s8326_s25 + $0x340] sm:$0xff]  ;;  %v8488_v60 = vld [vmem:[%s8326_s25 + $0x3c8] sm:$0xff] }
  0xb8   : > { %v8407_v50 = vld [vmem:[%s8326_s25 + $0x3c0] sm:$0xff]  ;;  %13077 = vst [vmem:[#allocation18_spill] sm:$0xff] %v8488_v60  ;;  %v8597_v54 = vld [vmem:[%s8500_s7 + $0x88] sm:$0xff] }
  0xb9   : > { %v8503_v2 = vld [vmem:[%s8500_s7] sm:$0xff]  ;;  %13099 = vst [vmem:[#allocation40_spill] sm:$0xff] %v8597_v54  ;;  %v8605_v53 = vld [vmem:[%s8500_s7 + $0x108] sm:$0xff] }
  0xba   : > { %6251 = vperm.xlu0 %7494, %v6248_v8   ;;  %v8451_v8 = vld [vmem:[%s8326_s25 + $0x208] sm:$0xff]  ;;  %13080 = vst [vmem:[#allocation21_spill] sm:$0xff] %v8503_v2  ;;  %v8506_v5 = vld [vmem:[%s8500_s7 + $0x80] sm:$0xff]  ;;  %13101 = vst [vmem:[#allocation42_spill] sm:$0xff] %v8605_v53 }
  0xbb   : > { %13081 = vst [vmem:[#allocation22_spill] sm:$0xff] %v8506_v5  ;;  %v8513_v52 = vld [vmem:[%s8500_s7 + $0x100] sm:$0xff]  ;;  %v8594_v2 = vld [vmem:[%s8500_s7 + $0x8] sm:$0xff]  ;;  %v8693_v53 = vld [vmem:[%s8326_s25 + $0x10] sm:$0xff] }
  0xbc   : > { %13082 = vst [vmem:[#allocation23_spill] sm:$0xff] %v8513_v52  ;;  %v8516_v61 = vld [vmem:[%s8500_s7 + $0x180] sm:$0xff]  ;;  %v1530_v52 = vrot.slane %v8315_v15, %v8340_v24  ;;  %13098 = vst [vmem:[#allocation39_spill] sm:$0xff] %v8594_v2  ;;  %v8616_v39 = vld [vmem:[%s8500_s7 + $0x48] sm:$0xff] }
  0xbd   : > { %13083 = vst [vmem:[#allocation24_spill] sm:$0xff] %v8516_v61  ;;  %v8522_v56 = vld [vmem:[%s8500_s7 + $0x40] sm:$0xff]  ;;  %v8580_v61 = vld [vmem:[%s8298_s15 + $0x10] sm:$0x77]  ;;  %13103 = vst [vmem:[#allocation44_spill] sm:$0xff] %v8616_v39 }
  0xbe   : > { %13084 = vst [vmem:[#allocation25_spill] sm:$0xff] %v8522_v56  ;;  %v8525_v55 = vld [vmem:[%s8500_s7 + $0xc0] sm:$0xff]  ;;  %13096 = vst [vmem:[#allocation37_spill] sm:$0xff] %v8580_v61  ;;  %v1052_v15 = vrot.slane %v8580_v61, %v8301_v11  ;;  %v8639_v2 = vld [vmem:[%s8500_s7 + $0x208] sm:$0xff] }
  0xbf   : > { %13085 = vst [vmem:[#allocation26_spill] sm:$0xff] %v8525_v55  ;;  %v8528_v41 = vld [vmem:[%s8500_s7 + $0x140] sm:$0xff]  ;;  %13108 = vst [vmem:[#allocation49_spill] sm:$0xff] %v8639_v2  ;;  %v8644_v54 = vld [vmem:[%s8500_s7 + $0x288] sm:$0xff] }
  0xc0   : > { %13086 = vst [vmem:[#allocation27_spill] sm:$0xff] %v8528_v41  ;;  %v8538_v46 = vld [vmem:[%s8500_s7 + $0x1c0] sm:$0xff]  ;;  %13109 = vst [vmem:[#allocation50_spill] sm:$0xff] %v8644_v54  ;;  %v8679_v39 = vld [vmem:[%s8500_s7 + $0x388] sm:$0xff] }
  0xc1   : > { %13088 = vst [vmem:[#allocation29_spill] sm:$0xff] %v8538_v46  ;;  %v8545_v47 = vld [vmem:[%s8500_s7 + $0x200] sm:$0xff]  ;;  %v8602_v46 = vrot.slane %v1290_v40, %v8337_v23  ;;  %v8619_v40 = vld [vmem:[%s8500_s7 + $0x188] sm:$0xff]  ;;  %13115 = vst [vmem:[#allocation56_spill] sm:$0xff] %v8679_v39 }
  0xc2   : > { %13089 = vst [vmem:[#allocation30_spill] sm:$0xff] %v8545_v47  ;;  %v8548_v9 = vld [vmem:[%s8500_s7 + $0x280] sm:$0xff]  ;;  %13104 = vst [vmem:[#allocation45_spill] sm:$0xff] %v8619_v40  ;;  %v8647_v47 = vrot.slane %v1052_v15, %v8334_v22  ;;  %v8659_v40 = vld [vmem:[%s8500_s7 + $0x248] sm:$0xff] }
  0xc3   : > { %13090 = vst [vmem:[#allocation31_spill] sm:$0xff] %v8548_v9  ;;  %v8555_v10 = vld [vmem:[%s8500_s7 + $0x240] sm:$0xff]  ;;  %13100 = vst [vmem:[#allocation41_spill] sm:$0xff] %v8602_v46  ;;  %v8662_v15 = vld [vmem:[%s8500_s7 + $0x308] sm:$0xff]  ;;  %v1542_v46 = vrot.slane %v8580_v61, %v8307_v13 }
  0xc4   : > { %13091 = vst [vmem:[#allocation32_spill] sm:$0xff] %v8555_v10  ;;  %v8558_v3 = vld [vmem:[%s8500_s7 + $0x300] sm:$0xff]  ;;  %13110 = vst [vmem:[#allocation51_spill] sm:$0xff] %v8647_v47  ;;  %v8668_v10 = vld [vmem:[%s8500_s7 + $0x2c8] sm:$0xff] }
  0xc5   : > { %13092 = vst [vmem:[#allocation33_spill] sm:$0xff] %v8558_v3  ;;  %v8564_v5 = vld [vmem:[%s8500_s7 + $0x2c0] sm:$0xff]  ;;  %v8612_v3 = vrot.slane %v1530_v52, %v8340_v24  ;;  %v8629_v52 = vld [vmem:[%s8500_s7 + $0x148] sm:$0xff]  ;;  %13111 = vst [vmem:[#allocation52_spill] sm:$0xff] %v8659_v40  ;;  %v8709_v54 = vrot.slane %v1542_v46, %v8340_v24 }
  0xc6   : > { %13093 = vst [vmem:[#allocation34_spill] sm:$0xff] %v8564_v5  ;;  %v8572_v41 = vld [vmem:[%s8500_s7 + $0x340] sm:$0xff]  ;;  %13106 = vst [vmem:[#allocation47_spill] sm:$0xff] %v8629_v52  ;;  %v8700_v40 = vld [vmem:[%s8326_s25 + $0x50] sm:$0xff] }
  0xc7   : > { %13094 = vst [vmem:[#allocation35_spill] sm:$0xff] %v8572_v41  ;;  %v8575_v16 = vld [vmem:[%s8500_s7 + $0x380] sm:$0xff]  ;;  %13102 = vst [vmem:[#allocation43_spill] sm:$0xff] %v8612_v3  ;;  %v8625_v41 = vld [vmem:[%s8500_s7 + $0xc8] sm:$0xff] }
  0xc8   : > { %13095 = vst [vmem:[#allocation36_spill] sm:$0xff] %v8575_v16  ;;  %v8587_v55 = vld [vmem:[%s8500_s7 + $0x3c0] sm:$0xff]  ;;  %13105 = vst [vmem:[#allocation46_spill] sm:$0xff] %v8625_v41  ;;  %v8636_v16 = vld [vmem:[%s8500_s7 + $0x1c8] sm:$0xff] }
  0xc9   : > { %13097 = vst [vmem:[#allocation38_spill] sm:$0xff] %v8587_v55  ;;  %13107 = vst [vmem:[#allocation48_spill] sm:$0xff] %v8636_v16  ;;  %v1302_v55 = vrot.slane %v8580_v61, %v8304_v12  ;;  %v8652_v3 = vld [vmem:[%s8298_s15 + $0x18] sm:$0x77]  ;;  %v8676_v41 = vld [vmem:[%s8500_s7 + $0x348] sm:$0xff] }
  0xca   : > { %13112 = vst [vmem:[#allocation53_spill] sm:$0xff] %v8662_v15  ;;  %13113 = vst [vmem:[#allocation54_spill] sm:$0xff] %v8668_v10  ;;  %v1060_v5 = vrot.slane %v8652_v3, %v8301_v11  ;;  %v8687_v16 = vld [vmem:[%s8500_s7 + $0x3c8] sm:$0xff]  ;;  %v8703_v56 = vld [vmem:[%s8326_s25 + $0x90] sm:$0xff]  ;;  %v1310_v46 = vrot.slane %v8652_v3, %v8304_v12 }
  0xcb   : > { %13114 = vst [vmem:[#allocation55_spill] sm:$0xff] %v8676_v41  ;;  %13116 = vst [vmem:[#allocation57_spill] sm:$0xff] %v8687_v16  ;;  %v8690_v9 = vrot.slane %v1302_v55, %v8337_v23  ;;  %v8712_v11 = vld [vmem:[%s8326_s25 + $0xd0] sm:$0xff]  ;;  %v8811_v2 = vld [vmem:[%s8326_s25 + $0x58] sm:$0xff] }
  0xcc   : > { %13118 = vst [vmem:[#allocation59_spill] sm:$0xff] %v8693_v53  ;;  %13119 = vst [vmem:[#allocation60_spill] sm:$0xff] %v8700_v40  ;;  %v8715_v47 = vld [vmem:[%s8326_s25 + $0x110] sm:$0xff]  ;;  %v8726_v55 = vrot.slane %v1060_v5, %v8334_v22  ;;  %v1298_v53 = vrot.slane %v8580_v61, %v8337_v23 }
  0xcd   : > { %13117 = vst [vmem:[#allocation58_spill] sm:$0xff] %v8690_v9  ;;  %13120 = vst [vmem:[#allocation61_spill] sm:$0xff] %v8703_v56  ;;  %v8720_v52 = vld [vmem:[%s8326_s25 + $0x190] sm:$0xff]  ;;  %v1048_v9 = vrot.slane %v8580_v61, %v8334_v22 }
  0xce   : > { %13121 = vst [vmem:[#allocation62_spill] sm:$0xff] %v8709_v54  ;;  %13122 = vst [vmem:[#allocation63_spill] sm:$0xff] %v8712_v11  ;;  %v8723_v15 = vld [vmem:[%s8326_s25 + $0x210] sm:$0xff]  ;;  %v8791_v11 = vld [vmem:[%s8326_s25 + $0x98] sm:$0xff] }
  0xcf   : > { %13123 = vst [vmem:[#allocation64_spill] sm:$0xff] %v8715_v47  ;;  %13124 = vst [vmem:[#allocation65_spill] sm:$0xff] %v8720_v52  ;;  %v8735_v16 = vld [vmem:[%s8326_s25 + $0x150] sm:$0xff]  ;;  %v8797_v52 = vrot.slane %v1310_v46, %v8337_v23  ;;  %v8817_v46 = vrot.slane %v1048_v9, %v8334_v22  ;;  %v8864_v22 = vld [vmem:[%s8326_s25 + $0x398] sm:$0xff] }
  0xd0   : > { %13125 = vst [vmem:[#allocation66_spill] sm:$0xff] %v8723_v15  ;;  %13126 = vst [vmem:[#allocation67_spill] sm:$0xff] %v8726_v55  ;;  %v8738_v39 = vld [vmem:[%s8326_s25 + $0x290] sm:$0xff]  ;;  %v1550_v55 = vrot.slane %v8652_v3, %v8307_v13  ;;  %v8788_v15 = vld [vmem:[%s8326_s25 + $0x18] sm:$0xff] }
  0xd1   : > { %13127 = vst [vmem:[#allocation68_spill] sm:$0xff] %v8735_v16  ;;  %13128 = vst [vmem:[#allocation69_spill] sm:$0xff] %v8738_v39  ;;  %v8745_v54 = vld [vmem:[%s8326_s25 + $0x310] sm:$0xff]  ;;  %v8800_v3 = vld [vmem:[%s8326_s25 + $0x118] sm:$0xff] }
  0xd2   : > { %13129 = vst [vmem:[#allocation70_spill] sm:$0xff] %v8745_v54  ;;  %v8749_v40 = vld [vmem:[%s8326_s25 + $0x1d0] sm:$0xff]  ;;  %13136 = vst [vmem:[#allocation77_spill] sm:$0xff] %v8788_v15  ;;  %v8803_v13 = vld [vmem:[%s8326_s25 + $0x198] sm:$0xff]  ;;  %v8808_v10 = vrot.slane %v1550_v55, %v8340_v24 }
  0xd3   : > { %13130 = vst [vmem:[#allocation71_spill] sm:$0xff] %v8749_v40  ;;  %v8755_v5 = vld [vmem:[%s8326_s25 + $0x390] sm:$0xff]  ;;  %13137 = vst [vmem:[#allocation78_spill] sm:$0xff] %v8791_v11  ;;  %v8814_v54 = vld [vmem:[%s8326_s25 + $0xd8] sm:$0xff] }
  0xd4   : > { %13131 = vst [vmem:[#allocation72_spill] sm:$0xff] %v8755_v5  ;;  %v8759_v12 = vld [vmem:[%s8326_s25 + $0x250] sm:$0xff]  ;;  %13138 = vst [vmem:[#allocation79_spill] sm:$0xff] %v8797_v52  ;;  %v8827_v55 = vld [vmem:[%s8326_s25 + $0x1d8] sm:$0xff] }
  0xd5   : > { %13132 = vst [vmem:[#allocation73_spill] sm:$0xff] %v8759_v12  ;;  %v8763_v47 = vld [vmem:[%s8326_s25 + $0x2d0] sm:$0xff]  ;;  %13139 = vst [vmem:[#allocation80_spill] sm:$0xff] %v8800_v3  ;;  %v8837_v52 = vld [vmem:[%s8326_s25 + $0x298] sm:$0xff] }
  0xd6   : > { %13133 = vst [vmem:[#allocation74_spill] sm:$0xff] %v8763_v47  ;;  %v8769_v41 = vld [vmem:[%s8326_s25 + $0x350] sm:$0xff]  ;;  %13140 = vst [vmem:[#allocation81_spill] sm:$0xff] %v8803_v13  ;;  %v8844_v15 = vld [vmem:[%s8326_s25 + $0x318] sm:$0xff] }
  0xd7   : > { %13134 = vst [vmem:[#allocation75_spill] sm:$0xff] %v8769_v41  ;;  %v8780_v39 = vld [vmem:[%s8326_s25 + $0x3d0] sm:$0xff]  ;;  %13141 = vst [vmem:[#allocation82_spill] sm:$0xff] %v8808_v10  ;;  %v8851_v3 = vld [vmem:[%s8326_s25 + $0x258] sm:$0xff] }
  0xd8   : > { %13135 = vst [vmem:[#allocation76_spill] sm:$0xff] %v8780_v39  ;;  %13142 = vst [vmem:[#allocation83_spill] sm:$0xff] %v8811_v2  ;;  %v8824_v39 = vld [vmem:[%s8326_s25 + $0x158] sm:$0xff] }
  0xd9   : > { %13143 = vst [vmem:[#allocation84_spill] sm:$0xff] %v8814_v54  ;;  %13144 = vst [vmem:[#allocation85_spill] sm:$0xff] %v8817_v46  ;;  %v8834_v46 = vld [vmem:[%s8326_s25 + $0x218] sm:$0xff] }
  0xda   : > { %13145 = vst [vmem:[#allocation86_spill] sm:$0xff] %v8824_v39  ;;  %13146 = vst [vmem:[#allocation87_spill] sm:$0xff] %v8827_v55  ;;  %v8854_v16 = vld [vmem:[%s8326_s25 + $0x2d8] sm:$0xff] }
  0xdb   : > { %13147 = vst [vmem:[#allocation88_spill] sm:$0xff] %v8834_v46  ;;  %13148 = vst [vmem:[#allocation89_spill] sm:$0xff] %v8837_v52  ;;  %v8861_v2 = vld [vmem:[%s8326_s25 + $0x358] sm:$0xff] }
  0xdc   : > { %13149 = vst [vmem:[#allocation90_spill] sm:$0xff] %v8844_v15  ;;  %13150 = vst [vmem:[#allocation91_spill] sm:$0xff] %v8851_v3 }
  0xdd   : > { %13151 = vst [vmem:[#allocation92_spill] sm:$0xff] %v8854_v16  ;;  %13152 = vst [vmem:[#allocation93_spill] sm:$0xff] %v8861_v2  ;;  %v8907_v16 = vrot.slane %v1298_v53, %v8337_v23 }
  0xde   : > { %13153 = vst [vmem:[#allocation94_spill] sm:$0xff] %v8864_v22 }
  0xdf   : > { %13157 = vst [vmem:[#allocation98_spill] sm:$0xff] %v8907_v16 }
 0x125   : > { %v8876_v46 = vpop.permute.xlu0 %1175 }
 0x126   : > { %13154 = vst [vmem:[#allocation95_spill] sm:$0xff] %v8876_v46  ;;  %v1184_v5 = vmul.f32 %v8876_v46, %v8363_v32  ;;  %v1424_v11 = vmul.f32 %v8366_v33, %v8876_v46  ;;  %v1664_v54 = vmul.f32 %v8369_v34, %v8876_v46  ;;  %v1186_v52 = vmul.f32 %v8876_v46, %v8381_v38 }
 0x127   : > { %v8892_v9 = vmul.f32 %v8396_v45, %v8876_v46  ;;  %v8896_v15 = vmul.f32 %v8410_v51, %v8876_v46  ;;  %v8900_v55 = vmul.f32 %v8876_v46, %v8468_v4  ;;  %v8904_v13 = vmul.f32 %v8491_v14, %v8876_v46 }
 0x128   : > { %v1216_v10 = vfloor.f32 %v1184_v5  ;;  %v1456_v22 = vfloor.f32 %v1424_v11  ;;  %v1696_v2 = vfloor.f32 %v1664_v54  ;;  %v1218_v39 = vfloor.f32 %v1186_v52 }
 0x129   : > { %13155 = vst [vmem:[#allocation96_spill] sm:$0xff] %v8900_v55  ;;  %13156 = vst [vmem:[#allocation97_spill] sm:$0xff] %v8904_v13  ;;  %v8909_v3 = vpop.permute.xlu0 %1180 }
 0x12a   : > { %v1200_v40 = vmul.f32 %v8909_v3, %v8363_v32  ;;  %v1248_v56 = vsub.f32 %v1184_v5, %v1216_v10  ;;  %v1440_v61 = vmul.f32 %v8366_v33, %v8909_v3  ;;  %v1488_v24 = vsub.f32 %v1424_v11, %v1456_v22 }
 0x12b   : > { %v1680_v53 = vmul.f32 %v8369_v34, %v8909_v3  ;;  %v1728_v23 = vsub.f32 %v1664_v54, %v1696_v2  ;;  %v1202_v16 = vmul.f32 %v8909_v3, %v8381_v38  ;;  %v8923_v5 = vsub.f32 %v1186_v52, %v1218_v39 }
 0x12c   : > { %v1232_v12 = vfloor.f32 %v1200_v40  ;;  %v1472_v46 = vfloor.f32 %v1440_v61  ;;  %v1760_v47 = vsub.f32 1.0, %v1248_v56  ;;  %v1792_v14 = vsub.f32 1.0, %v1488_v24 }
 0x12d   : > { %v1712_v60 = vfloor.f32 %v1680_v53  ;;  %v1824_v32 = vsub.f32 1.0, %v1728_v23  ;;  %v3488_v10 = vmul.f32 %v1488_v24, %v1248_v56  ;;  %v1234_v38 = vfloor.f32 %v1202_v16 }
 0x12e   : > { %v1264_v33 = vsub.f32 %v1200_v40, %v1232_v12  ;;  %v1504_v11 = vsub.f32 %v1440_v61, %v1472_v46  ;;  %v1856_v22 = vmul.f32 %v1792_v14, %v1760_v47  ;;  %v2400_v55 = vmul.f32 %v1760_v47, %v1488_v24 }
 0x12f   : > { %v1744_v34 = vsub.f32 %v1680_v53, %v1712_v60  ;;  %v2944_v54 = vmul.f32 %v1792_v14, %v1248_v56  ;;  %v8925_v2 = vmul.f32 %v3488_v10, %v1824_v32  ;;  %v13164_v24 = vunpack.c.h.bf16 %v8329_v20 }
 0x130   : > { %v1776_v4 = vsub.f32 1.0, %v1264_v33  ;;  %v1808_v41 = vsub.f32 1.0, %v1504_v11  ;;  %v8927_v13 = vmul.f32 %v1856_v22, %v1824_v32  ;;  %v8929_v18 = vmul.f32 %v1856_v22, %v1728_v23 }
 0x131   : > { %13158 = vst [vmem:[#allocation99_spill] sm:$0xff] %v8925_v2  ;;  %v1840_v62 = vsub.f32 1.0, %v1744_v34  ;;  %v8931_v28 = vmul.f32 %v2400_v55, %v1824_v32  ;;  %v8933_v39 = vmul.f32 %v2400_v55, %v1728_v23  ;;  %v8935_v12 = vmul.f32 %v2944_v54, %v1824_v32 }
 0x132   : > { %13159 = vst [vmem:[#allocation100_spill] sm:$0xff] %v8927_v13  ;;  %13160 = vst [vmem:[#allocation101_spill] sm:$0xff] %v8929_v18  ;;  %v1872_v61 = vmul.f32 %v1808_v41, %v1776_v4  ;;  %v1968_v47 = vmul.f32 %v13164_v24, %v8927_v13  ;;  %v13165_v56 = vunpack.c.h.bf16 %v8343_v25  ;;  %v2416_v14 = vmul.f32 %v1776_v4, %v1504_v11 }
 0x133   : > { %13161 = vst [vmem:[#allocation102_spill] sm:$0xff] %v8931_v28  ;;  %13162 = vst [vmem:[#allocation103_spill] sm:$0xff] %v8933_v39  ;;  %v13166_v40 = vunpack.c.h.bf16 %v8346_v26  ;;  %v13167_v46 = vunpack.c.h.bf16 %v8349_v27  ;;  %v2960_v53 = vmul.f32 %v1808_v41, %v1264_v33  ;;  %v8949_v32 = vmul.f32 %v3488_v10, %v1728_v23 }
 0x134   : > { %13163 = vst [vmem:[#allocation104_spill] sm:$0xff] %v8935_v12  ;;  %v2224_v60 = vmul.f32 %v13165_v56, %v8929_v18  ;;  %v8951_v22 = vmul.f32 %v1872_v61, %v1840_v62  ;;  %v8953_v20 = vmul.f32 %v1872_v61, %v1744_v34  ;;  %v8955_v13 = vmul.f32 %v2416_v14, %v1840_v62 }
 0x135   : > { %v2512_v52 = vmul.f32 %v13166_v40, %v8931_v28  ;;  %v2768_v55 = vmul.f32 %v13167_v46, %v8933_v39  ;;  %13168 = vst [vmem:[#allocation105_spill] sm:$0xff] %v8949_v32  ;;  %v8957_v56 = vmul.f32 %v2416_v14, %v1744_v34  ;;  %v8959_v4 = vmul.f32 %v2960_v53, %v1840_v62 }
 0x136   : > { %13169 = vst [vmem:[#allocation106_spill] sm:$0xff] %v8951_v22  ;;  %13170 = vst [vmem:[#allocation107_spill] sm:$0xff] %v8953_v20  ;;  %v2256_v24 = vadd.f32 %v2224_v60, %v1968_v47  ;;  %v8961_v18 = vmul.f32 %v2944_v54, %v1728_v23  ;;  %v8963_v40 = vmul.f32 %v2960_v53, %v1744_v34  ;;  %v13176_v41 = vunpack.c.h.bf16 %v8354_v29 }
 0x137   : > { %13171 = vst [vmem:[#allocation108_spill] sm:$0xff] %v8955_v13  ;;  %13172 = vst [vmem:[#allocation109_spill] sm:$0xff] %v8957_v56  ;;  %v13177_v46 = vunpack.c.h.bf16 %v8357_v30  ;;  %v13178_v47 = vunpack.c.h.bf16 %v8360_v31  ;;  %v13179_v14 = vunpack.c.h.bf16 %v8372_v35  ;;  %v13180_v54 = vunpack.c.h.bf16 %v8375_v36 }
 0x138   : > { %13173 = vst [vmem:[#allocation110_spill] sm:$0xff] %v8959_v4  ;;  %13174 = vst [vmem:[#allocation111_spill] sm:$0xff] %v8961_v18  ;;  %v1984_v10 = vmul.f32 %v13176_v41, %v8951_v22  ;;  %v2544_v39 = vadd.f32 %v2512_v52, %v2256_v24  ;;  %v13181_v41 = vunpack.c.h.bf16 %v8378_v37  ;;  %v3504_v22 = vmul.f32 %v1504_v11, %v1264_v33 }
 0x139   : > { %13175 = vst [vmem:[#allocation112_spill] sm:$0xff] %v8963_v40  ;;  %v2240_v61 = vmul.f32 %v13177_v46, %v8953_v20  ;;  %v3056_v60 = vmul.f32 %v13178_v47, %v8935_v12  ;;  %v2528_v23 = vmul.f32 %v13179_v14, %v8955_v13  ;;  %v2784_v53 = vmul.f32 %v13180_v54, %v8957_v56 }
 0x13a   : > { %v3072_v28 = vmul.f32 %v13181_v41, %v8959_v4  ;;  %v13182_v46 = vunpack.c.h.bf16 %v8387_v42  ;;  %v2800_v20 = vadd.f32 %v2768_v55, %v2544_v39  ;;  %v13183_v47 = vunpack.c.h.bf16 %v8401_v48 }
 0x13b   : > { %v2272_v24 = vadd.f32 %v2240_v61, %v1984_v10  ;;  %v13184_v14 = vunpack.c.h.bf16 %v8390_v43  ;;  %v13185_v54 = vunpack.c.h.bf16 %v8393_v44  ;;  %v1266_v41 = vsub.f32 %v1202_v16, %v1234_v38 }
 0x13c   : > { %v3312_v52 = vmul.f32 %v13182_v46, %v8961_v18  ;;  %v3328_v12 = vmul.f32 %v13183_v47, %v8963_v40  ;;  %v1442_v4 = vmul.f32 %v8396_v45, %v8909_v3  ;;  %v3088_v10 = vadd.f32 %v3056_v60, %v2800_v20 }
 0x13d   : > { %v3600_v13 = vmul.f32 %v13184_v14, %v8925_v2  ;;  %v3856_v56 = vmul.f32 %v13185_v54, %v8949_v32  ;;  %v2560_v46 = vadd.f32 %v2528_v23, %v2272_v24  ;;  %v8997_v39 = vmul.f32 %v3504_v22, %v1840_v62 }
 0x13e   : > { %v13187_v55 = vfloor.f32 %v8892_v9  ;;  %v9002_v11 = vmul.f32 %v3504_v22, %v1744_v34  ;;  %v1474_v61 = vfloor.f32 %v1442_v4  ;;  %v1682_v47 = vmul.f32 %v8410_v51, %v8909_v3 }
 0x13f   : > { %13186 = vst [vmem:[#allocation113_spill] sm:$0xff] %v8997_v39  ;;  %v13189_v14 = vfloor.f32 %v8896_v15  ;;  %v2816_v38 = vadd.f32 %v2784_v53, %v2560_v46  ;;  %v3344_v45 = vadd.f32 %v3312_v52, %v3088_v10  ;;  %v13190_v20 = vunpack.c.h.bf16 %v8404_v49 }
 0x140   : > { %v1490_v33 = vsub.f32 %v8892_v9, %v13187_v55  ;;  %13188 = vst [vmem:[#allocation114_spill] sm:$0xff] %v9002_v11  ;;  %v1762_v60 = vsub.f32 1.0, %v8923_v5  ;;  %v13191_v9 = vunpack.c.h.bf16 %v8407_v50  ;;  %v1506_v22 = vsub.f32 %v1442_v4, %v1474_v61 }
 0x141   : > { %v1730_v16 = vsub.f32 %v8896_v15, %v13189_v14  ;;  %v3616_v62 = vmul.f32 %v13190_v20, %v8997_v39  ;;  %v1714_v23 = vfloor.f32 %v1682_v47  ;;  %v1778_v24 = vsub.f32 1.0, %v1266_v41 }
 0x142   : > { %v3872_v34 = vmul.f32 %v13191_v9, %v9002_v11  ;;  %v3104_v51 = vadd.f32 %v3072_v28, %v2816_v38  ;;  %v3632_v54 = vadd.f32 %v3600_v13, %v3344_v45  ;;  %v1794_v55 = vsub.f32 1.0, %v1490_v33  ;;  %v13236_v11 = vld [vmem:[#allocation13_spill] sm:$0xff] }
 0x143   : > { %v1826_v32 = vsub.f32 1.0, %v1730_v16  ;;  %v1746_v15 = vsub.f32 %v1682_v47, %v1714_v23  ;;  %v1810_v53 = vsub.f32 1.0, %v1506_v22  ;;  %v2402_v52 = vmul.f32 %v1762_v60, %v1490_v33 }
 0x144   : > { %v2418_v46 = vmul.f32 %v1778_v24, %v1506_v22  ;;  %v3360_v10 = vadd.f32 %v3328_v12, %v3104_v51  ;;  %v3888_v14 = vadd.f32 %v3856_v56, %v3632_v54  ;;  %v1858_v20 = vmul.f32 %v1794_v55, %v1762_v60 }
 0x145   : > { %v2946_v39 = vmul.f32 %v1794_v55, %v8923_v5  ;;  %v1842_v2 = vsub.f32 1.0, %v1746_v15  ;;  %v1874_v40 = vmul.f32 %v1810_v53, %v1778_v24  ;;  %v9017_v18 = vmul.f32 %v2402_v52, %v1826_v32 }
 0x146   : > { %v9019_v4 = vmul.f32 %v2402_v52, %v1730_v16  ;;  %v3648_v61 = vadd.f32 %v3616_v62, %v3360_v10  ;;  %v9021_v28 = vmul.f32 %v1858_v20, %v1826_v32  ;;  %v9023_v13 = vmul.f32 %v1858_v20, %v1730_v16 }
 0x147   : > { %13192 = vst [vmem:[#allocation115_spill] sm:$0xff] %v9017_v18  ;;  %v9025_v47 = vmul.f32 %v2418_v46, %v1746_v15  ;;  %v9027_v38 = vmul.f32 %v1874_v40, %v1842_v2  ;;  %v9029_v12 = vmul.f32 %v1874_v40, %v1746_v15  ;;  %v9031_v56 = vmul.f32 %v2418_v46, %v1842_v2 }
 0x148   : > { %13193 = vst [vmem:[#allocation116_spill] sm:$0xff] %v9019_v4  ;;  %13194 = vst [vmem:[#allocation117_spill] sm:$0xff] %v9021_v28  ;;  %v13200_v45 = vunpack.c.h.bf16 %v8425_v59  ;;  %v3904_v9 = vadd.f32 %v3872_v34, %v3648_v61  ;;  %v13201_v62 = vunpack.c.h.bf16 %v8419_v57  ;;  %v13202_v24 = vunpack.c.h.bf16 %v8422_v58 }
 0x149   : > { %13195 = vst [vmem:[#allocation118_spill] sm:$0xff] %v9023_v13  ;;  %13196 = vst [vmem:[#allocation119_spill] sm:$0xff] %v9025_v47  ;;  %v13203_v54 = vunpack.c.h.bf16 %v8437_v1  ;;  %v13204_v55 = vunpack.c.h.bf16 %v8431_v63  ;;  %v13205_v46 = vunpack.c.h.bf16 %v8434_v0  ;;  %v13206_v10 = vunpack.c.h.bf16 %v8445_v6 }
 0x14a   : > { %13197 = vst [vmem:[#allocation120_spill] sm:$0xff] %v9027_v38  ;;  %13198 = vst [vmem:[#allocation121_spill] sm:$0xff] %v9029_v12  ;;  %v2514_v60 = vmul.f32 %v13200_v45, %v9017_v18  ;;  %v1970_v23 = vmul.f32 %v13201_v62, %v9021_v28  ;;  %v2226_v51 = vmul.f32 %v13202_v24, %v9023_v13  ;;  %v13207_v61 = vunpack.c.h.bf16 %v8448_v7 }
 0x14b   : > { %13199 = vst [vmem:[#allocation122_spill] sm:$0xff] %v9031_v56  ;;  %v2770_v40 = vmul.f32 %v13203_v54, %v9019_v4  ;;  %v1986_v52 = vmul.f32 %v13204_v55, %v9027_v38  ;;  %v2242_v34 = vmul.f32 %v13205_v46, %v9029_v12  ;;  %v2530_v20 = vmul.f32 %v13206_v10, %v9031_v56 }
 0x14c   : > { %v2786_v45 = vmul.f32 %v13207_v61, %v9025_v47  ;;  %v7275_v62 = vpack.c.bf16 %v3904_v9, %v3888_v14  ;;  %v2258_v24 = vadd.f32 %v2226_v51, %v1970_v23  ;;  %v2962_v18 = vmul.f32 %v1810_v53, %v1266_v41  ;;  %v13219_v51 = vld [vmem:[#allocation14_spill] sm:$0xff] }
 0x14d   : > { %v9057_v54 = vmul.f32 %v2946_v39, %v1826_v32  ;;  %v2274_v4 = vadd.f32 %v2242_v34, %v1986_v52  ;;  %v9059_v13 = vmul.f32 %v2946_v39, %v1730_v16  ;;  %v3490_v55 = vmul.f32 %v1490_v33, %v8923_v5 }
 0x14e   : > { %v3506_v38 = vmul.f32 %v1506_v22, %v1266_v41  ;;  %7276 = vmatprep.subr.bf16.mxu0 %v7275_v62  ;;  %v2546_v46 = vadd.f32 %v2514_v60, %v2258_v24  ;;  %v9062_v12 = vmul.f32 %v2962_v18, %v1842_v2  ;;  %v13211_v10 = vunpack.c.h.bf16 %v8451_v8  ;;  %v13224_v24 = vld [vmem:[#allocation17_spill] sm:$0xff] }
 0x14f   : > { %13208 = vst [vmem:[#allocation123_spill] sm:$0xff] %v9057_v54  ;;  %13209 = vst [vmem:[#allocation124_spill] sm:$0xff] %v9059_v13  ;;  %v9067_v61 = vmul.f32 %v2962_v18, %v1746_v15  ;;  %v2562_v14 = vadd.f32 %v2530_v20, %v2274_v4  ;;  %v13213_v53 = vunpack.c.h.bf16 %v8462_v21  ;;  %v9072_v39 = vmul.f32 %v3490_v55, %v1826_v32  ;;  %v13221_v32 = vld [vmem:[#allocation16_spill] sm:$0xff] }
 0x150   : > { %13210 = vst [vmem:[#allocation125_spill] sm:$0xff] %v9062_v12  ;;  %v3058_v56 = vmul.f32 %v13211_v10, %v9057_v54  ;;  %v9074_v23 = vmul.f32 %v3506_v38, %v1842_v2  ;;  %v2802_v5 = vadd.f32 %v2770_v40, %v2546_v46  ;;  %v13216_v41 = vunpack.c.h.bf16 %v8459_v19 }
 0x151   : > { %13212 = vst [vmem:[#allocation126_spill] sm:$0xff] %v9067_v61  ;;  %v3314_v9 = vmul.f32 %v13213_v53, %v9059_v13  ;;  %13214 = vst [vmem:[#allocation127_spill] sm:$0xff] %v9072_v39  ;;  %v13217_v22 = vunpack.c.h.bf16 %v8474_v17  ;;  %v9082_v18 = vmul.f32 %v3490_v55, %v1730_v16  ;;  %v2818_v4 = vadd.f32 %v2786_v45, %v2562_v14  ;;  %v13226_v53 = vld [vmem:[#allocation15_spill] sm:$0xff]  ;;  %v13227_v55 = vld [vmem:[#allocation96_spill] sm:$0xff] }
 0x152   : > { %13215 = vst [vmem:[#allocation128_spill] sm:$0xff] %v9074_v23  ;;  %v3074_v33 = vmul.f32 %v13216_v41, %v9062_v12  ;;  %v13220_v52 = vunpack.c.h.bf16 %v13219_v51  ;;  %v13222_v2 = vunpack.c.h.bf16 %v13221_v32  ;;  %v9090_v40 = vmul.f32 %v3506_v38, %v1746_v15  ;;  %v13231_v15 = vld [vmem:[#allocation19_spill] sm:$0xff] }
 0x153   : > { %v3330_v60 = vmul.f32 %v13217_v22, %v9067_v61  ;;  %13218 = vst [vmem:[#allocation129_spill] sm:$0xff] %v9082_v18  ;;  %v3090_v62 = vadd.f32 %v3058_v56, %v2802_v5  ;;  %v13225_v46 = vunpack.c.h.bf16 %v13224_v24  ;;  %v1199_v16 = vmul.f32 %v8909_v3, %v13226_v53  ;;  %v13229_v22 = vld [vmem:[#allocation18_spill] sm:$0xff]  ;;  %v13232_v56 = vld [vmem:[#allocation97_spill] sm:$0xff]  ;;  %v13235_v53 = vld [vmem:[#allocation20_spill] sm:$0xff] }
 0x154   : > { %v3602_v34 = vmul.f32 %v13220_v52, %v9072_v39  ;;  %v3618_v20 = vmul.f32 %v13222_v2, %v9074_v23  ;;  %13223 = vst [vmem:[#allocation14_spill] sm:$0xff] %v9090_v40  ;;  %v13228_v45 = vfloor.f32 %v13227_v55  ;;  %v3106_v41 = vadd.f32 %v3074_v33, %v2818_v4  ;;  %v13234_v23 = vld [vmem:[#allocation95_spill] sm:$0xff] }
 0x155   : > { %v3858_v10 = vmul.f32 %v13225_v46, %v9082_v18  ;;  %v13230_v52 = vunpack.c.h.bf16 %v13229_v22  ;;  %v1439_v38 = vmul.f32 %v13231_v15, %v8909_v3  ;;  %v13233_v5 = vfloor.f32 %v13232_v56  ;;  %v13237_v22 = vld [vmem:[#allocation37_spill] sm:$0xff] }
 0x156   : > { %v1247_v14 = vsub.f32 %v13227_v55, %v13228_v45  ;;  %v3346_v46 = vadd.f32 %v3314_v9, %v3090_v62  ;;  %v1231_v18 = vfloor.f32 %v1199_v16  ;;  %v1663_v61 = vmul.f32 %v13235_v53, %v13234_v23 }
 0x157   : > { %v3874_v39 = vmul.f32 %v13230_v52, %v9090_v40  ;;  %v1487_v2 = vsub.f32 %v13232_v56, %v13233_v5  ;;  %v1679_v55 = vmul.f32 %v13235_v53, %v8909_v3  ;;  %v3362_v33 = vadd.f32 %v3330_v60, %v3106_v41 }
 0x158   : > { %v1471_v4 = vfloor.f32 %v1439_v38  ;;  %v1759_v45 = vsub.f32 1.0, %v1247_v14  ;;  %v3634_v52 = vadd.f32 %v3602_v34, %v3346_v46  ;;  %v1263_v40 = vsub.f32 %v1199_v16, %v1231_v18 }
 0x159   : > { %v1791_v13 = vsub.f32 1.0, %v1487_v2  ;;  %v1695_v12 = vfloor.f32 %v1663_v61  ;;  %v1711_v15 = vfloor.f32 %v1679_v55  ;;  %v3650_v54 = vadd.f32 %v3618_v20, %v3362_v33 }
 0x15a   : > { %v1503_v47 = vsub.f32 %v1439_v38, %v1471_v4  ;;  %v2399_v56 = vmul.f32 %v1759_v45, %v1487_v2  ;;  %v1775_v5 = vsub.f32 1.0, %v1263_v40  ;;  %v13238_v60 = vrot.slane %v13237_v22, %v13236_v11 }
 0x15b   : > { %v1855_v28 = vmul.f32 %v1791_v13, %v1759_v45  ;;  %v9112_v9 = vsub.f32 %v1663_v61, %v1695_v12  ;;  %v9114_v62 = vsub.f32 %v1679_v55, %v1711_v15  ;;  %v3890_v53 = vadd.f32 %v3858_v10, %v3634_v52 }
 0x15c   : > { %v9120_v41 = vrot.slane %v13238_v60, %v13236_v11  ;;  %v3906_v34 = vadd.f32 %v3874_v39, %v3650_v54  ;;  %v1807_v18 = vsub.f32 1.0, %v1503_v47  ;;  %v2943_v16 = vmul.f32 %v1791_v13, %v1247_v14 }
 0x15d   : > { %v1823_v20 = vsub.f32 1.0, %v9112_v9  ;;  %v2143_v38 = vmul.f32 %v1855_v28, %v9112_v9  ;;  %v2415_v46 = vmul.f32 %v1775_v5, %v1503_v47  ;;  %v3487_v12 = vmul.f32 %v1487_v2, %v1247_v14  ;;  %v13241_v14 = vld [vmem:[#allocation10_spill] sm:$0xff] }
 0x15e   : > { %13239 = vst [vmem:[#allocation16_spill] sm:$0xff] %v9120_v41  ;;  %v7279_v61 = vpack.c.bf16 %v3906_v34, %v3890_v53  ;;  %v1839_v55 = vsub.f32 1.0, %v9114_v62  ;;  %v1871_v33 = vmul.f32 %v1807_v18, %v1775_v5  ;;  %v2687_v4 = vmul.f32 %v2399_v56, %v9112_v9  ;;  %v13243_v34 = vld [vmem:[#allocation21_spill] sm:$0xff] }
 0x15f   : > { %v1887_v45 = vmul.f32 %v1855_v28, %v1823_v20  ;;  %v13240_v22 = vunpack.c.l.bf16 %v8343_v25  ;;  %v2431_v10 = vmul.f32 %v2399_v56, %v1823_v20  ;;  %v2959_v54 = vmul.f32 %v1807_v18, %v1263_v40  ;;  %v13246_v28 = vld [vmem:[#allocation22_spill] sm:$0xff] }
 0x160   : > { %7280 = vmatprep.subr.bf16.mxu1 %v7279_v61  ;;  %v1903_v13 = vmul.f32 %v1871_v33, %v1839_v55  ;;  %v2159_v39 = vmul.f32 %v1871_v33, %v9114_v62  ;;  %v2447_v52 = vmul.f32 %v2415_v46, %v1839_v55  ;;  %v2703_v60 = vmul.f32 %v2415_v46, %v9114_v62 }
 0x161   : > { %v2223_v15 = vmul.f32 %v13240_v22, %v2143_v38  ;;  %v13242_v2 = vunpack.c.l.bf16 %v13241_v14  ;;  %v13244_v5 = vunpack.c.l.bf16 %v13243_v34  ;;  %v13247_v41 = vunpack.c.l.bf16 %v13246_v28  ;;  %v13251_v22 = vld [vmem:[#allocation25_spill] sm:$0xff]  ;;  %v13255_v34 = vld [vmem:[#allocation23_spill] sm:$0xff] }
 0x162   : > { %v13249_v56 = vunpack.c.l.bf16 %v8346_v26  ;;  %v13250_v61 = vunpack.c.l.bf16 %v8354_v29  ;;  %v13252_v24 = vunpack.c.l.bf16 %v13251_v22  ;;  %v13254_v14 = vunpack.c.l.bf16 %v8357_v30 }
 0x163   : > { %v1967_v53 = vmul.f32 %v13242_v2, %v1887_v45  ;;  %v9134_v11 = vmul.f32 %v13244_v5, %v1887_v45  ;;  %v9138_v25 = vmul.f32 %v13247_v41, %v2143_v38  ;;  %v13256_v45 = vunpack.c.l.bf16 %v13255_v34  ;;  %v13258_v41 = vld [vmem:[#allocation26_spill] sm:$0xff]  ;;  %v13267_v34 = vld [vmem:[#allocation24_spill] sm:$0xff] }
 0x164   : > { %v2511_v18 = vmul.f32 %v13249_v56, %v2431_v10  ;;  %v1983_v33 = vmul.f32 %v13250_v61, %v1903_v13  ;;  %v9146_v46 = vmul.f32 %v13252_v24, %v1903_v13  ;;  %v2239_v2 = vmul.f32 %v13254_v14, %v2159_v39  ;;  %v13262_v56 = vld [vmem:[#allocation27_spill] sm:$0xff] }
 0x165   : > { %13245 = vst [vmem:[#allocation15_spill] sm:$0xff] %v9134_v11  ;;  %13248 = vst [vmem:[#allocation96_spill] sm:$0xff] %v9138_v25  ;;  %v9152_v5 = vmul.f32 %v13256_v45, %v2431_v10  ;;  %v2255_v28 = vadd.f32 %v2223_v15, %v1967_v53  ;;  %v13259_v38 = vunpack.c.l.bf16 %v13258_v41  ;;  %v13261_v26 = vunpack.c.l.bf16 %v8372_v35 }
 0x166   : > { %13253 = vst [vmem:[#allocation19_spill] sm:$0xff] %v9146_v46  ;;  %v13263_v61 = vunpack.c.l.bf16 %v13262_v56  ;;  %v2271_v24 = vadd.f32 %v2239_v2, %v1983_v33  ;;  %v13265_v30 = vunpack.c.l.bf16 %v8349_v27  ;;  %v13266_v14 = vunpack.c.l.bf16 %v8375_v36  ;;  %v13270_v27 = vld [vmem:[#allocation29_spill] sm:$0xff] }
 0x167   : > { %13257 = vst [vmem:[#allocation97_spill] sm:$0xff] %v9152_v5  ;;  %v9156_v25 = vmul.f32 %v13259_v38, %v2159_v39  ;;  %v2527_v29 = vmul.f32 %v13261_v26, %v2447_v52  ;;  %v13268_v15 = vunpack.c.l.bf16 %v13267_v34  ;;  %v2543_v39 = vadd.f32 %v2511_v18, %v2255_v28 }
 0x168   : > { %v9162_v22 = vmul.f32 %v13263_v61, %v2447_v52  ;;  %v2767_v13 = vmul.f32 %v13265_v30, %v2687_v4  ;;  %v2783_v10 = vmul.f32 %v13266_v14, %v2703_v60  ;;  %v2975_v45 = vmul.f32 %v2943_v16, %v1823_v20  ;;  %v13275_v14 = vld [vmem:[#allocation30_spill] sm:$0xff] }
 0x169   : > { %13260 = vst [vmem:[#allocation95_spill] sm:$0xff] %v9156_v25  ;;  %v9170_v53 = vmul.f32 %v13268_v15, %v2687_v4  ;;  %v2991_v41 = vmul.f32 %v2959_v54, %v1839_v55  ;;  %v3231_v35 = vmul.f32 %v2943_v16, %v9112_v9  ;;  %v2559_v38 = vadd.f32 %v2527_v29, %v2271_v24  ;;  %v13278_v29 = vld [vmem:[#allocation32_spill] sm:$0xff] }
 0x16a   : > { %13264 = vst [vmem:[#allocation20_spill] sm:$0xff] %v9162_v22  ;;  %v3247_v52 = vmul.f32 %v2959_v54, %v9114_v62  ;;  %v3503_v26 = vmul.f32 %v1503_v47, %v1263_v40  ;;  %v3519_v33 = vmul.f32 %v3487_v12, %v1823_v20  ;;  %v2799_v2 = vadd.f32 %v2767_v13, %v2543_v39  ;;  %v13283_v13 = vld [vmem:[#allocation31_spill] sm:$0xff] }
 0x16b   : > { %13269 = vst [vmem:[#allocation37_spill] sm:$0xff] %v9170_v53  ;;  %v13271_v56 = vunpack.c.l.bf16 %v13270_v27  ;;  %v13273_v36 = vunpack.c.l.bf16 %v8360_v31  ;;  %v13274_v4 = vunpack.c.l.bf16 %v8378_v37  ;;  %v2815_v28 = vadd.f32 %v2783_v10, %v2559_v38  ;;  %v13286_v38 = vld [vmem:[#allocation34_spill] sm:$0xff] }
 0x16c   : > { %v13276_v34 = vunpack.c.l.bf16 %v13275_v14  ;;  %v13279_v54 = vunpack.c.l.bf16 %v13278_v29  ;;  %v13281_v40 = vunpack.c.l.bf16 %v8387_v42  ;;  %v13282_v24 = vunpack.c.l.bf16 %v8401_v48  ;;  %v13298_v29 = vld [vmem:[#allocation28_spill] sm:$0xff] }
 0x16d   : > { %v9176_v61 = vmul.f32 %v13271_v56, %v2703_v60  ;;  %v3055_v30 = vmul.f32 %v13273_v36, %v2975_v45  ;;  %v3071_v18 = vmul.f32 %v13274_v4, %v2991_v41  ;;  %v13284_v15 = vunpack.c.l.bf16 %v13283_v13 }
 0x16e   : > { %v9184_v16 = vmul.f32 %v13276_v34, %v2975_v45  ;;  %v9188_v47 = vmul.f32 %v13279_v54, %v2991_v41  ;;  %v3311_v20 = vmul.f32 %v13281_v40, %v3231_v35  ;;  %v3327_v31 = vmul.f32 %v13282_v24, %v3247_v52  ;;  %v13300_v40 = vld [vmem:[#allocation36_spill] sm:$0xff]  ;;  %v13303_v24 = vld [vmem:[#allocation41_spill] sm:$0xff] }
 0x16f   : > { %13272 = vst [vmem:[#allocation10_spill] sm:$0xff] %v9176_v61  ;;  %v3087_v60 = vadd.f32 %v3055_v30, %v2799_v2  ;;  %v9196_v37 = vmul.f32 %v13284_v15, %v3231_v35  ;;  %v3535_v10 = vmul.f32 %v3503_v26, %v1839_v55  ;;  %v3103_v39 = vadd.f32 %v3071_v18, %v2815_v28  ;;  %v13291_v30 = vld [vmem:[#allocation33_spill] sm:$0xff]  ;;  %v13294_v18 = vld [vmem:[#allocation35_spill] sm:$0xff] }
 0x170   : > { %13277 = vst [vmem:[#allocation21_spill] sm:$0xff] %v9184_v16  ;;  %13280 = vst [vmem:[#allocation22_spill] sm:$0xff] %v9188_v47  ;;  %v13287_v45 = vunpack.c.l.bf16 %v13286_v38  ;;  %v13289_v41 = vunpack.c.l.bf16 %v8390_v43  ;;  %v3775_v42 = vmul.f32 %v3487_v12, %v9112_v9  ;;  %v13290_v2 = vunpack.c.l.bf16 %v8404_v49 }
 0x171   : > { %13285 = vst [vmem:[#allocation25_spill] sm:$0xff] %v9196_v37  ;;  %v3343_v36 = vadd.f32 %v3311_v20, %v3087_v60  ;;  %v13292_v4 = vunpack.c.l.bf16 %v13291_v30  ;;  %v3791_v55 = vmul.f32 %v3503_v26, %v9114_v62  ;;  %v3359_v35 = vadd.f32 %v3327_v31, %v3103_v39 }
 0x172   : > { %v9200_v27 = vmul.f32 %v13287_v45, %v3247_v52  ;;  %v3599_v56 = vmul.f32 %v13289_v41, %v3519_v33  ;;  %v3615_v48 = vmul.f32 %v13290_v2, %v3535_v10  ;;  %v13295_v28 = vunpack.c.l.bf16 %v13294_v18 }
 0x173   : > { %v9209_v14 = vmul.f32 %v13292_v4, %v3519_v33  ;;  %v13297_v43 = vunpack.c.l.bf16 %v8393_v44  ;;  %v1185_v9 = vmul.f32 %v13234_v23, %v13298_v29  ;;  %v13299_v49 = vunpack.c.l.bf16 %v8407_v50  ;;  %v13304_v50 = vld [vmem:[#allocation43_spill] sm:$0xff] }
 0x174   : > { %13288 = vst [vmem:[#allocation23_spill] sm:$0xff] %v9200_v27  ;;  %v9214_v52 = vmul.f32 %v13295_v28, %v3535_v10  ;;  %v3631_v12 = vadd.f32 %v3599_v56, %v3343_v36  ;;  %v13301_v33 = vunpack.c.l.bf16 %v13300_v40  ;;  %v1201_v62 = vmul.f32 %v8909_v3, %v13298_v29 }
 0x175   : > { %13293 = vst [vmem:[#allocation26_spill] sm:$0xff] %v9209_v14  ;;  %v3855_v34 = vmul.f32 %v13297_v43, %v3775_v42  ;;  %v3871_v54 = vmul.f32 %v13299_v49, %v3791_v55  ;;  %v3647_v26 = vadd.f32 %v3615_v48, %v3359_v35  ;;  %v1217_v60 = vfloor.f32 %v1185_v9  ;;  %v13308_v49 = vld [vmem:[#allocation51_spill] sm:$0xff] }
 0x176   : > { %13296 = vst [vmem:[#allocation27_spill] sm:$0xff] %v9214_v52  ;;  %v9224_v20 = vmul.f32 %v13301_v33, %v3775_v42  ;;  %v1425_v44 = vmul.f32 %v13303_v24, %v13234_v23  ;;  %v1441_v31 = vmul.f32 %v13303_v24, %v8909_v3  ;;  %v1233_v15 = vfloor.f32 %v1201_v62  ;;  %v13305_v42 = vld [vmem:[#allocation38_spill] sm:$0xff]  ;;  %v13396_v52 = vld [vmem:[#allocation60_spill] sm:$0xff] }
 0x177   : > { %v3887_v13 = vadd.f32 %v3855_v34, %v3631_v12  ;;  %v1665_v10 = vmul.f32 %v13304_v50, %v13234_v23  ;;  %v1681_v39 = vmul.f32 %v13304_v50, %v8909_v3  ;;  %v3903_v38 = vadd.f32 %v3871_v54, %v3647_v26 }
 0x178   : > { %13302 = vst [vmem:[#allocation24_spill] sm:$0xff] %v9224_v20  ;;  %v1249_v45 = vsub.f32 %v1185_v9, %v1217_v60  ;;  %v1457_v41 = vfloor.f32 %v1425_v44  ;;  %v1473_v56 = vfloor.f32 %v1441_v31  ;;  %v13306_v36 = vunpack.c.l.bf16 %v13305_v42 }
 0x179   : > { %v1265_v48 = vsub.f32 %v1201_v62, %v1233_v15  ;;  %v1697_v30 = vfloor.f32 %v1665_v10  ;;  %v1713_v4 = vfloor.f32 %v1681_v39  ;;  %v7277_v35 = vpack.c.bf16 %v3903_v38, %v3887_v13 }
 0x17a   : > { %v9238_v2 = vmul.f32 %v13306_v36, %v3791_v55  ;;  %v1489_v18 = vsub.f32 %v1425_v44, %v1457_v41  ;;  %v1505_v28 = vsub.f32 %v1441_v31, %v1473_v56  ;;  %v1761_v43 = vsub.f32 1.0, %v1249_v45 }
 0x17b   : > { %v9240_v34 = vsub.f32 %v1665_v10, %v1697_v30  ;;  %v9242_v29 = vsub.f32 %v1681_v39, %v1713_v4  ;;  %v1777_v12 = vsub.f32 1.0, %v1265_v48  ;;  %v9246_v9 = vmul.f32 %v13234_v23, %v13308_v49  ;;  %7278 = vmatpush1.bf16.msra.mxu0 %v7277_v35 }
 0x17c   : > { %13307 = vst [vmem:[#allocation29_spill] sm:$0xff] %v9238_v2  ;;  %v1793_v54 = vsub.f32 1.0, %v1489_v18  ;;  %v1809_v55 = vsub.f32 1.0, %v1505_v28  ;;  %v2401_v40 = vmul.f32 %v1761_v43, %v1489_v18  ;;  %v9250_v33 = vmul.f32 %v8909_v3, %v13308_v49 }
 0x17d   : > { %v1825_v62 = vsub.f32 1.0, %v9240_v34  ;;  %v1841_v26 = vsub.f32 1.0, %v9242_v29  ;;  %v2417_v60 = vmul.f32 %v1777_v12, %v1505_v28  ;;  %v3489_v24 = vmul.f32 %v1489_v18, %v1249_v45 }
 0x17e   : > { %v1857_v44 = vmul.f32 %v1793_v54, %v1761_v43  ;;  %v1873_v31 = vmul.f32 %v1809_v55, %v1777_v12  ;;  %v2689_v13 = vmul.f32 %v2401_v40, %v9240_v34  ;;  %v3505_v15 = vmul.f32 %v1505_v28, %v1265_v48  ;;  %v13311_v43 = vld [vmem:[#allocation42_spill] sm:$0xff] }
 0x17f   : > { %v2433_v50 = vmul.f32 %v2401_v40, %v1825_v62  ;;  %v2449_v10 = vmul.f32 %v2417_v60, %v1841_v26  ;;  %v2705_v39 = vmul.f32 %v2417_v60, %v9242_v29  ;;  %v2945_v38 = vmul.f32 %v1793_v54, %v1249_v45 }
 0x180   : > { %v1889_v41 = vmul.f32 %v1857_v44, %v1825_v62  ;;  %v1905_v56 = vmul.f32 %v1873_v31, %v1841_v26  ;;  %v2145_v42 = vmul.f32 %v1857_v44, %v9240_v34  ;;  %v2161_v36 = vmul.f32 %v1873_v31, %v9242_v29  ;;  %v13316_v44 = vld [vmem:[#allocation39_spill] sm:$0xff] }
 0x181   : > { %v13309_v30 = vunpack.c.l.bf16 %v8425_v59  ;;  %v13310_v35 = vunpack.c.l.bf16 %v8445_v6  ;;  %v13312_v12 = vunpack.c.l.bf16 %v13311_v43  ;;  %v2961_v49 = vmul.f32 %v1809_v55, %v1265_v48  ;;  %v13319_v59 = vld [vmem:[#allocation47_spill] sm:$0xff]  ;;  %v13322_v6 = vld [vmem:[#allocation44_spill] sm:$0xff] }
 0x182   : > { %v13314_v40 = vunpack.c.l.bf16 %v8419_v57  ;;  %v13315_v54 = vunpack.c.l.bf16 %v8431_v63  ;;  %v13317_v2 = vunpack.c.l.bf16 %v13316_v44  ;;  %v13325_v48 = vunpack.c.l.bf16 %v8422_v58  ;;  %v13327_v63 = vld [vmem:[#allocation40_spill] sm:$0xff] }
 0x183   : > { %v2513_v4 = vmul.f32 %v13309_v30, %v2433_v50  ;;  %v2529_v18 = vmul.f32 %v13310_v35, %v2449_v10  ;;  %v9264_v28 = vmul.f32 %v13312_v12, %v2433_v50  ;;  %v13320_v30 = vunpack.c.l.bf16 %v13319_v59 }
 0x184   : > { %v1969_v45 = vmul.f32 %v13314_v40, %v1889_v41  ;;  %v1985_v60 = vmul.f32 %v13315_v54, %v1905_v56  ;;  %v9272_v31 = vmul.f32 %v13317_v2, %v1889_v41  ;;  %v13323_v35 = vunpack.c.l.bf16 %v13322_v6  ;;  %v13330_v2 = vld [vmem:[#allocation46_spill] sm:$0xff] }
 0x185   : > { %13313 = vst [vmem:[#allocation30_spill] sm:$0xff] %v9264_v28  ;;  %v9276_v20 = vmul.f32 %v13320_v30, %v2449_v10  ;;  %v2225_v55 = vmul.f32 %v13325_v48, %v2145_v42  ;;  %v13326_v57 = vunpack.c.l.bf16 %v8434_v0  ;;  %v13328_v12 = vunpack.c.l.bf16 %v13327_v63  ;;  %v13335_v30 = vld [vmem:[#allocation45_spill] sm:$0xff] }
 0x186   : > { %13318 = vst [vmem:[#allocation32_spill] sm:$0xff] %v9272_v31  ;;  %v9280_v43 = vmul.f32 %v13323_v35, %v1905_v56  ;;  %v13331_v41 = vunpack.c.l.bf16 %v13330_v2  ;;  %v13333_v10 = vunpack.c.l.bf16 %v8437_v1  ;;  %v13334_v56 = vunpack.c.l.bf16 %v8448_v7 }
 0x187   : > { %13321 = vst [vmem:[#allocation31_spill] sm:$0xff] %v9276_v20  ;;  %v2241_v50 = vmul.f32 %v13326_v57, %v2161_v36  ;;  %v9288_v40 = vmul.f32 %v13328_v12, %v2145_v42  ;;  %v13336_v58 = vunpack.c.l.bf16 %v13335_v30  ;;  %v2257_v0 = vadd.f32 %v2225_v55, %v1969_v45  ;;  %v13343_v55 = vld [vmem:[#allocation49_spill] sm:$0xff] }
 0x188   : > { %13324 = vst [vmem:[#allocation34_spill] sm:$0xff] %v9280_v43  ;;  %v9292_v54 = vmul.f32 %v13331_v41, %v2161_v36  ;;  %v2769_v44 = vmul.f32 %v13333_v10, %v2689_v13  ;;  %v2785_v59 = vmul.f32 %v13334_v56, %v2705_v39  ;;  %v2977_v48 = vmul.f32 %v2945_v38, %v1825_v62  ;;  %v13338_v41 = vld [vmem:[#allocation48_spill] sm:$0xff] }
 0x189   : > { %13329 = vst [vmem:[#allocation33_spill] sm:$0xff] %v9288_v40  ;;  %v9300_v6 = vmul.f32 %v13336_v58, %v2689_v13  ;;  %v2273_v35 = vadd.f32 %v2241_v50, %v1985_v60  ;;  %v2993_v57 = vmul.f32 %v2961_v49, %v1841_v26  ;;  %v3233_v42 = vmul.f32 %v2945_v38, %v9240_v34  ;;  %v13346_v38 = vld [vmem:[#allocation52_spill] sm:$0xff] }
 0x18a   : > { %13332 = vst [vmem:[#allocation35_spill] sm:$0xff] %v9292_v54  ;;  %v3249_v63 = vmul.f32 %v2961_v49, %v9242_v29  ;;  %v3521_v36 = vmul.f32 %v3489_v24, %v1825_v62  ;;  %v3537_v12 = vmul.f32 %v3505_v15, %v1841_v26  ;;  %v2545_v2 = vadd.f32 %v2513_v4, %v2257_v0  ;;  %v13351_v0 = vld [vmem:[#allocation50_spill] sm:$0xff] }
 0x18b   : > { %13337 = vst [vmem:[#allocation28_spill] sm:$0xff] %v9300_v6  ;;  %v2561_v1 = vadd.f32 %v2529_v18, %v2273_v35  ;;  %v13339_v10 = vunpack.c.l.bf16 %v13338_v41  ;;  %v13341_v56 = vunpack.c.l.bf16 %v8451_v8  ;;  %v13342_v45 = vunpack.c.l.bf16 %v8459_v19  ;;  %v13354_v41 = vld [vmem:[#allocation54_spill] sm:$0xff] }
 0x18c   : > { %v13344_v50 = vunpack.c.l.bf16 %v13343_v55  ;;  %v13347_v49 = vunpack.c.l.bf16 %v13346_v38  ;;  %v13349_v26 = vunpack.c.l.bf16 %v8462_v21  ;;  %v2801_v18 = vadd.f32 %v2769_v44, %v2545_v2  ;;  %v13359_v55 = vld [vmem:[#allocation53_spill] sm:$0xff] }
 0x18d   : > { %v9306_v7 = vmul.f32 %v13339_v10, %v2705_v39  ;;  %v3057_v13 = vmul.f32 %v13341_v56, %v2977_v48  ;;  %v3073_v60 = vmul.f32 %v13342_v45, %v2993_v57  ;;  %v2817_v39 = vadd.f32 %v2785_v59, %v2561_v1 }
 0x18e   : > { %v9314_v30 = vmul.f32 %v13344_v50, %v2977_v48  ;;  %v9318_v62 = vmul.f32 %v13347_v49, %v2993_v57  ;;  %v3313_v4 = vmul.f32 %v13349_v26, %v3233_v42  ;;  %v13350_v58 = vunpack.c.l.bf16 %v8474_v17  ;;  %v13364_v26 = vld [vmem:[#allocation55_spill] sm:$0xff] }
 0x18f   : > { %13340 = vst [vmem:[#allocation36_spill] sm:$0xff] %v9306_v7  ;;  %v13352_v35 = vunpack.c.l.bf16 %v13351_v0  ;;  %v13355_v10 = vunpack.c.l.bf16 %v13354_v41  ;;  %v13357_v56 = vunpack.c.l.bf16 %v13219_v51  ;;  %v13358_v45 = vunpack.c.l.bf16 %v13221_v32  ;;  %v13363_v51 = vld [vmem:[#allocation58_spill] sm:$0xff] }
 0x190   : > { %13345 = vst [vmem:[#allocation41_spill] sm:$0xff] %v9314_v30  ;;  %13348 = vst [vmem:[#allocation43_spill] sm:$0xff] %v9318_v62  ;;  %v3329_v8 = vmul.f32 %v13350_v58, %v3249_v63  ;;  %v13360_v44 = vunpack.c.l.bf16 %v13359_v55  ;;  %v3089_v17 = vadd.f32 %v3057_v13, %v2801_v18  ;;  %v3105_v2 = vadd.f32 %v3073_v60, %v2817_v39  ;;  %v13371_v58 = vld [vmem:[#allocation56_spill] sm:$0xff] }
 0x191   : > { %v9326_v19 = vmul.f32 %v13352_v35, %v3233_v42  ;;  %v9330_v48 = vmul.f32 %v13355_v10, %v3249_v63  ;;  %v3601_v57 = vmul.f32 %v13357_v56, %v3521_v36  ;;  %v3617_v21 = vmul.f32 %v13358_v45, %v3537_v12  ;;  %v13374_v45 = vld [vmem:[#allocation62_spill] sm:$0xff] }
 0x192   : > { %v9338_v59 = vmul.f32 %v13360_v44, %v3521_v36  ;;  %v3777_v1 = vmul.f32 %v3489_v24, %v9240_v34  ;;  %v9342_v42 = vmul.f32 %v3505_v15, %v9242_v29  ;;  %v1220_v63 = vfloor.f32 %v9246_v9  ;;  %v13367_v34 = vld [vmem:[#allocation17_spill] sm:$0xff]  ;;  %v13369_v15 = vld [vmem:[#allocation18_spill] sm:$0xff] }
 0x193   : > { %13353 = vst [vmem:[#allocation38_spill] sm:$0xff] %v9326_v19  ;;  %13356 = vst [vmem:[#allocation51_spill] sm:$0xff] %v9330_v48  ;;  %v1236_v50 = vfloor.f32 %v9250_v33  ;;  %v1428_v38 = vmul.f32 %v13363_v51, %v13234_v23  ;;  %v1444_v32 = vmul.f32 %v13363_v51, %v8909_v3  ;;  %v3345_v49 = vadd.f32 %v3313_v4, %v3089_v17 }
 0x194   : > { %13361 = vst [vmem:[#allocation42_spill] sm:$0xff] %v9338_v59  ;;  %13362 = vst [vmem:[#allocation39_spill] sm:$0xff] %v9342_v42  ;;  %v3361_v36 = vadd.f32 %v3329_v8, %v3105_v2  ;;  %v13365_v13 = vunpack.c.l.bf16 %v13364_v26  ;;  %v13368_v24 = vunpack.c.l.bf16 %v13367_v34  ;;  %v13370_v18 = vunpack.c.l.bf16 %v13369_v15 }
 0x195   : > { %v13372_v0 = vunpack.c.l.bf16 %v13371_v58  ;;  %v1252_v41 = vsub.f32 %v9246_v9, %v1220_v63  ;;  %v1268_v4 = vsub.f32 %v9250_v33, %v1236_v50  ;;  %v3633_v8 = vadd.f32 %v3601_v57, %v3345_v49  ;;  %v13375_v63 = vld [vmem:[#allocation67_spill] sm:$0xff] }
 0x196   : > { %v9352_v60 = vmul.f32 %v13365_v13, %v3537_v12  ;;  %v3857_v29 = vmul.f32 %v13368_v24, %v3777_v1  ;;  %v3873_v39 = vmul.f32 %v13370_v18, %v9342_v42  ;;  %v3649_v10 = vadd.f32 %v3617_v21, %v3361_v36 }
 0x197   : > { %v9361_v35 = vmul.f32 %v13372_v0, %v3777_v1  ;;  %v1460_v56 = vfloor.f32 %v1428_v38  ;;  %v1476_v12 = vfloor.f32 %v1444_v32  ;;  %v1668_v55 = vmul.f32 %v13374_v45, %v13234_v23 }
 0x198   : > { %13366 = vst [vmem:[#allocation47_spill] sm:$0xff] %v9352_v60  ;;  %v1684_v44 = vmul.f32 %v13374_v45, %v8909_v3  ;;  %v1764_v17 = vsub.f32 1.0, %v1252_v41  ;;  %v1780_v2 = vsub.f32 1.0, %v1268_v4  ;;  %v3889_v51 = vadd.f32 %v3857_v29, %v3633_v8 }
 0x199   : > { %13373 = vst [vmem:[#allocation44_spill] sm:$0xff] %v9361_v35  ;;  %v3905_v26 = vadd.f32 %v3873_v39, %v3649_v10  ;;  %v1492_v1 = vsub.f32 %v1428_v38, %v1460_v56  ;;  %v1508_v13 = vsub.f32 %v1444_v32, %v1476_v12  ;;  %v1700_v34 = vfloor.f32 %v1668_v55 }
 0x19a   : > { %v1716_v9 = vfloor.f32 %v1684_v44  ;;  %v1190_v33 = vmul.f32 %v13234_v23, %v13375_v63  ;;  %v1206_v57 = vmul.f32 %v8909_v3, %v13375_v63  ;;  %v13397_v48 = vunpack.c.h.bf16 %v13396_v52 }
 0x19b   : > { %v7281_v21 = vpack.c.bf16 %v3905_v26, %v3889_v51  ;;  %v1796_v50 = vsub.f32 1.0, %v1492_v1  ;;  %v1812_v49 = vsub.f32 1.0, %v1508_v13  ;;  %v2404_v36 = vmul.f32 %v1764_v17, %v1492_v1  ;;  %v13386_v26 = vld [vmem:[#allocation61_spill] sm:$0xff] }
 0x19c   : > { %v1732_v24 = vsub.f32 %v1668_v55, %v1700_v34  ;;  %v1748_v15 = vsub.f32 %v1684_v44, %v1716_v9  ;;  %v2420_v18 = vmul.f32 %v1780_v2, %v1508_v13  ;;  %v3492_v58 = vmul.f32 %v1492_v1, %v1252_v41  ;;  %v13388_v9 = vld [vmem:[#allocation63_spill] sm:$0xff] }
 0x19d   : > { %7282 = vmatpush1.bf16.msra.mxu1 %v7281_v21  ;;  %v1860_v29 = vmul.f32 %v1796_v50, %v1764_v17  ;;  %v1876_v38 = vmul.f32 %v1812_v49, %v1780_v2  ;;  %v2948_v32 = vmul.f32 %v1796_v50, %v1252_v41  ;;  %v2964_v39 = vmul.f32 %v1812_v49, %v1268_v4  ;;  %v13390_v50 = vld [vmem:[#allocation65_spill] sm:$0xff] }
 0x19e   : > { %v1828_v0 = vsub.f32 1.0, %v1732_v24  ;;  %v1844_v8 = vsub.f32 1.0, %v1748_v15  ;;  %v9373_v10 = vmul.f32 %v2404_v36, %v1732_v24  ;;  %v9375_v56 = vmul.f32 %v2420_v18, %v1748_v15 }
 0x19f   : > { %v9377_v12 = vmul.f32 %v1860_v29, %v1732_v24  ;;  %v9379_v45 = vmul.f32 %v1876_v38, %v1748_v15  ;;  %v9381_v51 = vmul.f32 %v2948_v32, %v1732_v24  ;;  %v9383_v55 = vmul.f32 %v2964_v39, %v1748_v15 }
 0x1a0   : > { %13376 = vst [vmem:[#allocation40_spill] sm:$0xff] %v9373_v10  ;;  %13377 = vst [vmem:[#allocation46_spill] sm:$0xff] %v9375_v56  ;;  %v9385_v44 = vmul.f32 %v1860_v29, %v1828_v0  ;;  %v9387_v17 = vmul.f32 %v1876_v38, %v1844_v8  ;;  %v9389_v41 = vmul.f32 %v2404_v36, %v1828_v0  ;;  %v13387_v1 = vunpack.c.h.bf16 %v13386_v26  ;;  %v13392_v29 = vld [vmem:[#allocation71_spill] sm:$0xff] }
 0x1a1   : > { %13378 = vst [vmem:[#allocation45_spill] sm:$0xff] %v9377_v12  ;;  %13379 = vst [vmem:[#allocation48_spill] sm:$0xff] %v9379_v45  ;;  %v9391_v2 = vmul.f32 %v2420_v18, %v1844_v8  ;;  %v13389_v63 = vunpack.c.h.bf16 %v13388_v9  ;;  %v13391_v49 = vunpack.c.h.bf16 %v13390_v50  ;;  %v13393_v38 = vunpack.c.h.bf16 %v13392_v29  ;;  %v13394_v36 = vld [vmem:[#allocation59_spill] sm:$0xff] }
 0x1a2   : > { %13380 = vst [vmem:[#allocation49_spill] sm:$0xff] %v9381_v51  ;;  %13381 = vst [vmem:[#allocation52_spill] sm:$0xff] %v9383_v55  ;;  %v2228_v34 = vmul.f32 %v13387_v1, %v9377_v12  ;;  %v13395_v18 = vunpack.c.h.bf16 %v13394_v36  ;;  %v1988_v1 = vmul.f32 %v13397_v48, %v9387_v17  ;;  %v13398_v12 = vld [vmem:[#allocation64_spill] sm:$0xff]  ;;  %v9419_v27 = vmul.f32 %v2964_v39, %v1844_v8  ;;  %v13411_v39 = vld [vmem:[#allocation73_spill] sm:$0xff] }
 0x1a3   : > { %13382 = vst [vmem:[#allocation50_spill] sm:$0xff] %v9385_v44  ;;  %13383 = vst [vmem:[#allocation54_spill] sm:$0xff] %v9387_v17  ;;  %v2244_v21 = vmul.f32 %v13389_v63, %v9379_v45  ;;  %v2772_v35 = vmul.f32 %v13391_v49, %v9373_v10  ;;  %v2788_v60 = vmul.f32 %v13393_v38, %v9375_v56  ;;  %v13399_v14 = vunpack.c.h.bf16 %v13398_v12  ;;  %v13400_v45 = vld [vmem:[#allocation68_spill] sm:$0xff]  ;;  %v13404_v38 = vld [vmem:[#allocation69_spill] sm:$0xff] }
 0x1a4   : > { %13384 = vst [vmem:[#allocation53_spill] sm:$0xff] %v9389_v41  ;;  %13385 = vst [vmem:[#allocation58_spill] sm:$0xff] %v9391_v2  ;;  %v1972_v59 = vmul.f32 %v13395_v18, %v9385_v44  ;;  %v13401_v19 = vunpack.c.h.bf16 %v13400_v45  ;;  %v9417_v10 = vmul.f32 %v2948_v32, %v1828_v0  ;;  %v13405_v56 = vunpack.c.h.bf16 %v13404_v38  ;;  %v13406_v44 = vld [vmem:[#allocation74_spill] sm:$0xff] }
 0x1a5   : > { %v2516_v63 = vmul.f32 %v13399_v14, %v9389_v41  ;;  %13403 = vst [vmem:[#allocation17_spill] sm:$0xff] %v9419_v27  ;;  %v13407_v62 = vunpack.c.h.bf16 %v13406_v44  ;;  %v2276_v37 = vadd.f32 %v2244_v21, %v1988_v1  ;;  %v3508_v30 = vmul.f32 %v1508_v13, %v1268_v4  ;;  %v13409_v41 = vld [vmem:[#allocation66_spill] sm:$0xff] }
 0x1a6   : > { %v2532_v49 = vmul.f32 %v13401_v19, %v9391_v2  ;;  %13402 = vst [vmem:[#allocation55_spill] sm:$0xff] %v9417_v10  ;;  %v3316_v18 = vmul.f32 %v13405_v56, %v9381_v51  ;;  %v2260_v17 = vadd.f32 %v2228_v34, %v1972_v59  ;;  %v9427_v14 = vmul.f32 %v3492_v58, %v1828_v0  ;;  %v13418_v0 = vld [vmem:[#allocation72_spill] sm:$0xff] }
 0x1a7   : > { %v3332_v48 = vmul.f32 %v13407_v62, %v9383_v55  ;;  %v13410_v19 = vunpack.c.h.bf16 %v13409_v41  ;;  %v13412_v2 = vunpack.c.h.bf16 %v13411_v39  ;;  %v9435_v7 = vmul.f32 %v3492_v58, %v1732_v24  ;;  %v13415_v62 = vld [vmem:[#allocation70_spill] sm:$0xff] }
 0x1a8   : > { %13408 = vst [vmem:[#allocation18_spill] sm:$0xff] %v9427_v14  ;;  %v1222_v56 = vfloor.f32 %v1190_v33  ;;  %v2548_v51 = vadd.f32 %v2516_v63, %v2260_v17  ;;  %v2564_v16 = vadd.f32 %v2532_v49, %v2276_v37  ;;  %v9437_v6 = vmul.f32 %v3508_v30, %v1844_v8  ;;  %v13420_v17 = vld [vmem:[#allocation75_spill] sm:$0xff] }
 0x1a9   : > { %v3060_v32 = vmul.f32 %v13410_v19, %v9417_v10  ;;  %v3076_v47 = vmul.f32 %v13412_v2, %v9419_v27  ;;  %13413 = vst [vmem:[#allocation56_spill] sm:$0xff] %v9435_v7  ;;  %v13416_v59 = vunpack.c.h.bf16 %v13415_v62  ;;  %v9442_v13 = vmul.f32 %v3508_v30, %v1748_v15  ;;  %v13422_v63 = vld [vmem:[#allocation79_spill] sm:$0xff]  ;;  %v13423_v19 = vld [vmem:[#allocation76_spill] sm:$0xff] }
 0x1aa   : > { %13414 = vst [vmem:[#allocation62_spill] sm:$0xff] %v9437_v6  ;;  %v13419_v34 = vunpack.c.h.bf16 %v13418_v0  ;;  %v1238_v1 = vfloor.f32 %v1206_v57  ;;  %v1254_v2 = vsub.f32 %v1190_v33, %v1222_v56  ;;  %v2804_v24 = vadd.f32 %v2772_v35, %v2548_v51  ;;  %v9462_v56 = vld [vmem:[%s8326_s25 + $0x3d8] sm:$0xff] }
 0x1ab   : > { %v3604_v4 = vmul.f32 %v13416_v59, %v9427_v14  ;;  %13417 = vst [vmem:[#allocation67_spill] sm:$0xff] %v9442_v13  ;;  %v2820_v58 = vadd.f32 %v2788_v60, %v2564_v16  ;;  %v13421_v37 = vunpack.c.h.bf16 %v13420_v17  ;;  %v1430_v49 = vmul.f32 %v13422_v63, %v13234_v23  ;;  %13426 = vst [vmem:[#allocation61_spill] sm:$0xff] %v9462_v56 }
 0x1ac   : > { %v3860_v21 = vmul.f32 %v13419_v34, %v9435_v7  ;;  %v13424_v30 = vunpack.c.h.bf16 %v13423_v19  ;;  %v1270_v59 = vsub.f32 %v1206_v57, %v1238_v1  ;;  %v1446_v14 = vmul.f32 %v13422_v63, %v8909_v3  ;;  %v13425_v34 = vld [vmem:[#allocation82_spill] sm:$0xff] }
 0x1ad   : > { %v3620_v8 = vmul.f32 %v13421_v37, %v9437_v6  ;;  %v1670_v33 = vmul.f32 %v13425_v34, %v13234_v23  ;;  %v3092_v35 = vadd.f32 %v3060_v32, %v2804_v24  ;;  %v3108_v16 = vadd.f32 %v3076_v47, %v2820_v58  ;;  %v13447_v47 = vld [vmem:[#allocation83_spill] sm:$0xff] }
 0x1ae   : > { %v3876_v15 = vmul.f32 %v13424_v30, %v9442_v13  ;;  %v1462_v60 = vfloor.f32 %v1430_v49  ;;  %v1686_v51 = vmul.f32 %v13425_v34, %v8909_v3  ;;  %v1478_v37 = vfloor.f32 %v1446_v14 }
 0x1af   : > { %v1702_v7 = vfloor.f32 %v1670_v33  ;;  %v1766_v6 = vsub.f32 1.0, %v1254_v2  ;;  %v1782_v55 = vsub.f32 1.0, %v1270_v59  ;;  %v3348_v30 = vadd.f32 %v3316_v18, %v3092_v35 }
 0x1b0   : > { %v3364_v57 = vadd.f32 %v3332_v48, %v3108_v16  ;;  %v1494_v1 = vsub.f32 %v1430_v49, %v1462_v60  ;;  %v1718_v13 = vfloor.f32 %v1686_v51  ;;  %v1510_v63 = vsub.f32 %v1446_v14, %v1478_v37 }
 0x1b1   : > { %v1734_v27 = vsub.f32 %v1670_v33, %v1702_v7  ;;  %v3636_v32 = vadd.f32 %v3604_v4, %v3348_v30 }
 0x1b2   : > { %v3652_v24 = vadd.f32 %v3620_v8, %v3364_v57  ;;  %v1750_v58 = vsub.f32 %v1686_v51, %v1718_v13  ;;  %v1798_v34 = vsub.f32 1.0, %v1494_v1  ;;  %v1814_v61 = vsub.f32 1.0, %v1510_v63 }
 0x1b3   : > { %v1830_v20 = vsub.f32 1.0, %v1734_v27  ;;  %v2406_v53 = vmul.f32 %v1766_v6, %v1494_v1  ;;  %v2422_v28 = vmul.f32 %v1782_v55, %v1510_v63  ;;  %v3892_v22 = vadd.f32 %v3860_v21, %v3636_v32  ;;  %v13443_v32 = vld [vmem:[#allocation86_spill] sm:$0xff] }
 0x1b4   : > { %v3908_v54 = vadd.f32 %v3876_v15, %v3652_v24  ;;  %v1846_v18 = vsub.f32 1.0, %v1750_v58  ;;  %v1862_v48 = vmul.f32 %v1798_v34, %v1766_v6  ;;  %v1878_v49 = vmul.f32 %v1814_v61, %v1782_v55  ;;  %v13435_v6 = vld [vmem:[#allocation80_spill] sm:$0xff] }
 0x1b5   : > { %v9466_v35 = vmul.f32 %v2406_v53, %v1830_v20  ;;  %v9468_v7 = vmul.f32 %v2406_v53, %v1734_v27  ;;  %v9470_v14 = vmul.f32 %v2422_v28, %v1750_v58  ;;  %v13436_v55 = vunpack.c.h.bf16 %v13435_v6  ;;  %v13437_v53 = vld [vmem:[#allocation81_spill] sm:$0xff] }
 0x1b6   : > { %v7283_v33 = vpack.c.bf16 %v3908_v54, %v3892_v22  ;;  %v9472_v4 = vmul.f32 %v1862_v48, %v1830_v20  ;;  %v9474_v13 = vmul.f32 %v1862_v48, %v1734_v27  ;;  %v9476_v8 = vmul.f32 %v2422_v28, %v1846_v18  ;;  %v13439_v22 = vld [vmem:[#allocation77_spill] sm:$0xff]  ;;  %v13441_v28 = vld [vmem:[#allocation78_spill] sm:$0xff] }
 0x1b7   : > { %13427 = vst [vmem:[#allocation63_spill] sm:$0xff] %v9466_v35  ;;  %13428 = vst [vmem:[#allocation65_spill] sm:$0xff] %v9468_v7  ;;  %v9478_v16 = vmul.f32 %v1878_v49, %v1846_v18  ;;  %v9480_v21 = vmul.f32 %v1878_v49, %v1750_v58  ;;  %v2518_v15 = vmul.f32 %v13436_v55, %v9466_v35  ;;  %v13438_v60 = vunpack.c.h.bf16 %v13437_v53  ;;  %v13445_v49 = vld [vmem:[#allocation87_spill] sm:$0xff] }
 0x1b8   : > { %13429 = vst [vmem:[#allocation71_spill] sm:$0xff] %v9470_v14  ;;  %13430 = vst [vmem:[#allocation59_spill] sm:$0xff] %v9472_v4  ;;  %7284 = vmatprep.subr.bf16.mxu0 %v7283_v33  ;;  %v13440_v54 = vunpack.c.h.bf16 %v13439_v22  ;;  %v13442_v30 = vunpack.c.h.bf16 %v13441_v28  ;;  %v13444_v24 = vunpack.c.h.bf16 %v13443_v32  ;;  %v13446_v55 = vunpack.c.h.bf16 %v13445_v49 }
 0x1b9   : > { %13431 = vst [vmem:[#allocation60_spill] sm:$0xff] %v9474_v13  ;;  %13432 = vst [vmem:[#allocation64_spill] sm:$0xff] %v9476_v8  ;;  %v2774_v51 = vmul.f32 %v13438_v60, %v9468_v7  ;;  %v13448_v60 = vunpack.c.h.bf16 %v13447_v47  ;;  %v13449_v7 = vld [vmem:[#allocation84_spill] sm:$0xff]  ;;  %v2966_v43 = vmul.f32 %v1814_v61, %v1270_v59 }
 0x1ba   : > { %13433 = vst [vmem:[#allocation68_spill] sm:$0xff] %v9478_v16  ;;  %13434 = vst [vmem:[#allocation69_spill] sm:$0xff] %v9480_v21  ;;  %v1974_v37 = vmul.f32 %v13440_v54, %v9472_v4  ;;  %v2230_v57 = vmul.f32 %v13442_v30, %v9474_v13  ;;  %v2534_v48 = vmul.f32 %v13444_v24, %v9476_v8  ;;  %v13450_v35 = vunpack.c.h.bf16 %v13449_v7 }
 0x1bb   : > { %v2790_v10 = vmul.f32 %v13446_v55, %v9470_v14  ;;  %v1990_v33 = vmul.f32 %v13448_v60, %v9478_v16  ;;  %v2950_v4 = vmul.f32 %v1798_v34, %v1254_v2  ;;  %v3494_v30 = vmul.f32 %v1494_v1, %v1254_v2  ;;  %v13459_v34 = vld [vmem:[#allocation91_spill] sm:$0xff] }
 0x1bc   : > { %v2246_v54 = vmul.f32 %v13450_v35, %v9480_v21  ;;  %v2262_v5 = vadd.f32 %v2230_v57, %v1974_v37  ;;  %v3510_v13 = vmul.f32 %v1510_v63, %v1270_v59  ;;  %v9508_v8 = vmul.f32 %v2966_v43, %v1846_v18  ;;  %v13457_v59 = vld [vmem:[#allocation88_spill] sm:$0xff]  ;;  %v13461_v57 = vld [vmem:[#allocation89_spill] sm:$0xff] }
 0x1bd   : > { %v9506_v24 = vmul.f32 %v2950_v4, %v1830_v20  ;;  %v9510_v55 = vmul.f32 %v2950_v4, %v1734_v27  ;;  %v12864_v14 = vmov 0.0   ;;  %v9513_v16 = vmul.f32 %v2966_v43, %v1750_v58 }
 0x1be   : > { %v2278_v40 = vadd.f32 %v2246_v54, %v1990_v33  ;;  %13452 = vst [vmem:[#allocation66_spill] sm:$0xff] %v9508_v8  ;;  %4136 = vmatprep.mubr.f32.mxu0 %v12864_v14  ;;  %v2550_v60 = vadd.f32 %v2518_v15, %v2262_v5  ;;  %v9515_v35 = vmul.f32 %v3494_v30, %v1830_v20  ;;  %v13458_v1 = vunpack.c.h.bf16 %v13457_v59  ;;  %v9532_v20 = vld [vmem:[%s12661_s4] sm:$0xff]  ;;  %v13464_v15 = vld [vmem:[#allocation92_spill] sm:$0xff] }
 0x1bf   : > { %13451 = vst [vmem:[#allocation74_spill] sm:$0xff] %v9506_v24  ;;  %13453 = vst [vmem:[#allocation73_spill] sm:$0xff] %v9510_v55  ;;  %v9517_v61 = vmul.f32 %v3510_v13, %v1846_v18  ;;  %4225 = vmatprep.mubr.f32.mxu1 %v12864_v14  ;;  %v13460_v4 = vunpack.c.h.bf16 %v13459_v34  ;;  %v13462_v5 = vunpack.c.h.bf16 %v13461_v57  ;;  %v9535_v18 = vld [vmem:[%s8326_s25 + $0x20] sm:$0xff]  ;;  %v13468_v14 = vld [vmem:[#allocation93_spill] sm:$0xff]  ;;  %v9548_v21 = vmul.f32 %v3510_v13, %v1750_v58 }
 0x1c0   : > { %13454 = vst [vmem:[#allocation70_spill] sm:$0xff] %v9513_v16  ;;  %13455 = vst [vmem:[#allocation72_spill] sm:$0xff] %v9515_v35  ;;  %v2566_v2 = vadd.f32 %v2534_v48, %v2278_v40  ;;  %v3062_v63 = vmul.f32 %v13458_v1, %v9506_v24  ;;  %v2806_v40 = vadd.f32 %v2774_v51, %v2550_v60  ;;  %v13465_v48 = vunpack.c.h.bf16 %v13464_v15  ;;  %v13466_v54 = vld [vmem:[#allocation90_spill] sm:$0xff]  ;;  %v13472_v51 = vld [vmem:[#allocation85_spill] sm:$0xff] }
 0x1c1   : > { %13456 = vst [vmem:[#allocation75_spill] sm:$0xff] %v9517_v61  ;;  %v3078_v37 = vmul.f32 %v13460_v4, %v9508_v8  ;;  %v3318_v43 = vmul.f32 %v13462_v5, %v9510_v55  ;;  %13463 = vst [vmem:[#allocation79_spill] sm:$0xff] %v9535_v18  ;;  %v13467_v1 = vunpack.c.h.bf16 %v13466_v54  ;;  %v13469_v8 = vunpack.c.h.bf16 %v13468_v14  ;;  %7191 = vmatmul.mubr.msk.f32.vlgmr.msra.gmra.mrb[0].mxu0 %vm4059_vm0, %v9532_v20  ;;  %v13473_v58 = vld [vmem:[#allocation94_spill] sm:$0xff] }
 0x1c2   : > { %v3334_v33 = vmul.f32 %v13465_v48, %v9513_v16  ;;  %v2822_v55 = vadd.f32 %v2790_v10, %v2566_v2  ;;  %v9546_v24 = vmul.f32 %v3494_v30, %v1734_v27  ;;  %13471 = vst [vmem:[#allocation82_spill] sm:$0xff] %v9548_v21  ;;  %v3094_v31 = vadd.f32 %v3062_v63, %v2806_v40  ;;  %v13476_v63 = vld [vmem:[#allocation98_spill] sm:$0xff] }
 0x1c3   : > { %v3606_v4 = vmul.f32 %v13467_v1, %v9515_v35  ;;  %v3622_v5 = vmul.f32 %v13469_v8, %v9517_v61  ;;  %7195 = vmatmul.mubr.msk.f32.vlgmr.msra.gmra.mrb[0].mxu1 %vm4059_vm0, %v9532_v20  ;;  %v1187_v60 = vmul.f32 %v13234_v23, %v13472_v51  ;;  %v1203_v48 = vmul.f32 %v8909_v3, %v13472_v51  ;;  %v9571_v51 = vld [vmem:[%s12661_s4 + $0x8] sm:$0xff] }
 0x1c4   : > { %13470 = vst [vmem:[#allocation76_spill] sm:$0xff] %v9546_v24  ;;  %v3110_v27 = vadd.f32 %v3078_v37, %v2822_v55  ;;  %v13474_v13 = vunpack.c.h.bf16 %v13473_v58  ;;  %v13475_v30 = vunpack.c.h.bf16 %v9462_v56  ;;  %v1427_v40 = vmul.f32 %v13476_v63, %v13234_v23 }
 0x1c5   : > { %v13477_v1 = vmov 0.0   ;;  %v3350_v10 = vadd.f32 %v3318_v43, %v3094_v31  ;;  %v1219_v55 = vfloor.f32 %v1187_v60  ;;  %v1235_v37 = vfloor.f32 %v1203_v48 }
 0x1c6   : > { %v3862_v8 = vmul.f32 %v13474_v13, %v9546_v24  ;;  %v3878_v2 = vmul.f32 %v13475_v30, %v9548_v21  ;;  %4142 = vmatprep.mubr.f32.mxu0 %v13477_v1  ;;  %v1443_v13 = vmul.f32 %v13476_v63, %v8909_v3  ;;  %4231 = vmatprep.mubr.f32.mxu1 %v13477_v1  ;;  %v1459_v30 = vfloor.f32 %v1427_v40  ;;  %v13478_v21 = vld [vmem:[#allocation16_spill] sm:$0xff] }
 0x1c7   : > { %v3366_v24 = vadd.f32 %v3334_v33, %v3110_v27  ;;  %v1667_v61 = vmul.f32 %v13478_v21, %v13234_v23  ;;  %v1683_v35 = vmul.f32 %v13478_v21, %v8909_v3  ;;  %v3638_v16 = vadd.f32 %v3606_v4, %v3350_v10  ;;  %7192 = vmatmul.mubr.msk.f32.gmra.mrb[2].mxu0 %vm4059_vm0, %v9571_v51  ;;  %v9589_v21 = vld [vmem:[%s12661_s4 + $0x10] sm:$0xff] }
 0x1c8   : > { %v1251_v25 = vsub.f32 %v1187_v60, %v1219_v55  ;;  %v1267_v46 = vsub.f32 %v1203_v48, %v1235_v37  ;;  %v1475_v11 = vfloor.f32 %v1443_v13  ;;  %7196 = vmatmul.mubr.msk.f32.gmra.mrb[2].mxu1 %vm4059_vm0, %v9571_v51  ;;  %v1491_v43 = vsub.f32 %v1427_v40, %v1459_v30  ;;  %4148 = vmatprep.mubr.f32.mxu0 %v13477_v1 }
 0x1c9   : > { %v3654_v31 = vadd.f32 %v3622_v5, %v3366_v24  ;;  %v1699_v33 = vfloor.f32 %v1667_v61  ;;  %v1715_v27 = vfloor.f32 %v1683_v35  ;;  %4237 = vmatprep.mubr.f32.mxu1 %v13477_v1  ;;  %v3894_v4 = vadd.f32 %v3862_v8, %v3638_v16 }
 0x1ca   : > { %v1507_v60 = vsub.f32 %v1443_v13, %v1475_v11  ;;  %v1763_v48 = vsub.f32 1.0, %v1251_v25  ;;  %v1779_v10 = vsub.f32 1.0, %v1267_v46  ;;  %v1795_v24 = vsub.f32 1.0, %v1491_v43 }
 0x1cb   : > { %v3910_v63 = vadd.f32 %v3878_v2, %v3654_v31  ;;  %v1731_v55 = vsub.f32 %v1667_v61, %v1699_v33  ;;  %v1747_v37 = vsub.f32 %v1683_v35, %v1715_v27  ;;  %v3491_v42 = vmul.f32 %v1491_v43, %v1251_v25  ;;  %7193 = vmatmul.mubr.msk.f32.gmra.mrb[4].mxu0 %vm4059_vm0, %v9589_v21  ;;  %v9600_v35 = vld [vmem:[%s12661_s4 + $0x18] sm:$0xff] }
 0x1cc   : > { %v1811_v5 = vsub.f32 1.0, %v1507_v60  ;;  %v2403_v40 = vmul.f32 %v1763_v48, %v1491_v43  ;;  %v2419_v30 = vmul.f32 %v1779_v10, %v1507_v60  ;;  %7197 = vmatmul.mubr.msk.f32.gmra.mrb[4].mxu1 %vm4059_vm0, %v9589_v21  ;;  %v1859_v11 = vmul.f32 %v1795_v24, %v1763_v48  ;;  %4154 = vmatprep.mubr.f32.mxu0 %v13477_v1 }
 0x1cd   : > { %v7287_v18 = vpack.c.bf16 %v3910_v63, %v3894_v4  ;;  %v1827_v56 = vsub.f32 1.0, %v1731_v55  ;;  %v1843_v16 = vsub.f32 1.0, %v1747_v37  ;;  %4243 = vmatprep.mubr.f32.mxu1 %v13477_v1  ;;  %v2947_v13 = vmul.f32 %v1795_v24, %v1251_v25 }
 0x1ce   : > { %v1875_v61 = vmul.f32 %v1811_v5, %v1779_v10  ;;  %v9602_v8 = vmul.f32 %v2403_v40, %v1731_v55  ;;  %v9604_v2 = vmul.f32 %v2419_v30, %v1747_v37  ;;  %v9608_v43 = vmul.f32 %v1859_v11, %v1731_v55 }
 0x1cf   : > { %7288 = vmatprep.subr.bf16.mxu1 %v7287_v18  ;;  %v9606_v31 = vmul.f32 %v1859_v11, %v1827_v56  ;;  %v9610_v33 = vmul.f32 %v2403_v40, %v1827_v56  ;;  %v9612_v27 = vmul.f32 %v2419_v30, %v1843_v16  ;;  %v13487_v10 = vunpack.c.l.bf16 %v13390_v50  ;;  %7194 = vmatmul.mubr.msk.f32.gmra.mrb[6].mxu0 %vm4059_vm0, %v9600_v35 }
 0x1d0   : > { %13479 = vst [vmem:[#allocation80_spill] sm:$0xff] %v9602_v8  ;;  %13480 = vst [vmem:[#allocation81_spill] sm:$0xff] %v9604_v2  ;;  %v9614_v4 = vmul.f32 %v1875_v61, %v1843_v16  ;;  %v9616_v48 = vmul.f32 %v1875_v61, %v1747_v37  ;;  %v13488_v25 = vunpack.c.l.bf16 %v13392_v29  ;;  %v13489_v24 = vunpack.c.l.bf16 %v13394_v36  ;;  %7198 = vmatmul.mubr.msk.f32.gmra.mrb[6].mxu1 %vm4059_vm0, %v9600_v35 }
 0x1d1   : > { %13481 = vst [vmem:[#allocation77_spill] sm:$0xff] %v9606_v31  ;;  %13482 = vst [vmem:[#allocation78_spill] sm:$0xff] %v9608_v43  ;;  %v2771_v63 = vmul.f32 %v13487_v10, %v9602_v8  ;;  %v13490_v30 = vunpack.c.l.bf16 %v13386_v26  ;;  %v13491_v61 = vunpack.c.l.bf16 %v13398_v12  ;;  %v13492_v10 = vunpack.c.l.bf16 %v13400_v45  ;;  %4314 = vmatprep.mubr.f32.mxu0 %v13477_v1  ;;  %4403 = vmatprep.mubr.f32.mxu1 %v13477_v1 }
 0x1d2   : > { %13483 = vst [vmem:[#allocation86_spill] sm:$0xff] %v9610_v33  ;;  %13484 = vst [vmem:[#allocation87_spill] sm:$0xff] %v9612_v27  ;;  %v2787_v18 = vmul.f32 %v13488_v25, %v9604_v2  ;;  %v1971_v40 = vmul.f32 %v13489_v24, %v9606_v31  ;;  %v13493_v25 = vunpack.c.l.bf16 %v13396_v52  ;;  %v13494_v24 = vunpack.c.l.bf16 %v13388_v9 }
 0x1d3   : > { %13485 = vst [vmem:[#allocation83_spill] sm:$0xff] %v9614_v4  ;;  %13486 = vst [vmem:[#allocation84_spill] sm:$0xff] %v9616_v48  ;;  %v2227_v11 = vmul.f32 %v13490_v30, %v9608_v43  ;;  %v2515_v50 = vmul.f32 %v13491_v61, %v9610_v33  ;;  %v2531_v29 = vmul.f32 %v13492_v10, %v9612_v27  ;;  %v13499_v9 = vunpack.c.l.bf16 %v13409_v41 }
 0x1d4   : > { %v1987_v36 = vmul.f32 %v13493_v25, %v9614_v4  ;;  %v2243_v26 = vmul.f32 %v13494_v24, %v9616_v48  ;;  %v2963_v30 = vmul.f32 %v1811_v5, %v1267_v46  ;;  %v9646_v2 = vmul.f32 %v2947_v13, %v1827_v56 }
 0x1d5   : > { %v2259_v12 = vadd.f32 %v2227_v11, %v1971_v40  ;;  %v9649_v61 = vmul.f32 %v2947_v13, %v1731_v55  ;;  %v3507_v45 = vmul.f32 %v1507_v60, %v1267_v46  ;;  %v9651_v10 = vmul.f32 %v3491_v42, %v1827_v56 }
 0x1d6   : > { %13495 = vst [vmem:[#allocation88_spill] sm:$0xff] %v9646_v2  ;;  %v2275_v52 = vadd.f32 %v2243_v26, %v1987_v36  ;;  %v9654_v25 = vmul.f32 %v2963_v30, %v1843_v16  ;;  %v3059_v5 = vmul.f32 %v13499_v9, %v9646_v2  ;;  %v9659_v24 = vmul.f32 %v2963_v30, %v1747_v37 }
 0x1d7   : > { %13496 = vst [vmem:[#allocation91_spill] sm:$0xff] %v9649_v61  ;;  %13497 = vst [vmem:[#allocation89_spill] sm:$0xff] %v9651_v10  ;;  %v2547_v8 = vadd.f32 %v2515_v50, %v2259_v12  ;;  %v13501_v13 = vunpack.c.l.bf16 %v13404_v38  ;;  %v9664_v46 = vmul.f32 %v3507_v45, %v1843_v16  ;;  %v13503_v56 = vunpack.c.l.bf16 %v13415_v62  ;;  %v9678_v12 = vld [vmem:[%s8298_s15 + $0x20] sm:$0x77] }
 0x1d8   : > { %13498 = vst [vmem:[#allocation92_spill] sm:$0xff] %v9654_v25  ;;  %13500 = vst [vmem:[#allocation90_spill] sm:$0xff] %v9659_v24  ;;  %v2563_v11 = vadd.f32 %v2531_v29, %v2275_v52  ;;  %v13504_v36 = vunpack.c.l.bf16 %v13411_v39  ;;  %v13505_v41 = vunpack.c.l.bf16 %v13406_v44  ;;  %v9675_v50 = vmul.f32 %v3491_v42, %v1731_v55  ;;  %v7560_v29 = vld [vmem:[%s8298_s15 + $0x18] sm:$0x77]  ;;  %v13509_v52 = vld [vmem:[#allocation11_spill] sm:$0xff] }
 0x1d9   : > { %v3315_v40 = vmul.f32 %v13501_v13, %v9649_v61  ;;  %13502 = vst [vmem:[#allocation93_spill] sm:$0xff] %v9664_v46  ;;  %v3603_v60 = vmul.f32 %v13503_v56, %v9651_v10  ;;  %v2803_v38 = vadd.f32 %v2771_v63, %v2547_v8  ;;  %v13507_v16 = vunpack.c.l.bf16 %v13420_v17  ;;  %v13512_v55 = vld [vmem:[#allocation13_spill] sm:$0xff]  ;;  %v13514_v63 = vld [vmem:[#allocation7_spill] sm:$0xff] }
 0x1da   : > { %v3075_v26 = vmul.f32 %v13504_v36, %v9654_v25  ;;  %v3331_v30 = vmul.f32 %v13505_v41, %v9659_v24  ;;  %13506 = vst [vmem:[#allocation85_spill] sm:$0xff] %v9675_v50  ;;  %v9683_v62 = vmul.f32 %v3507_v45, %v1747_v37  ;;  %v1056_v13 = vrot.slane %v7560_v29, %v13509_v52  ;;  %v13511_v36 = vld [vmem:[#allocation12_spill] sm:$0xff] }
 0x1db   : > { %v3619_v9 = vmul.f32 %v13507_v16, %v9664_v46  ;;  %v2819_v39 = vadd.f32 %v2787_v18, %v2563_v11  ;;  %v13510_v56 = vunpack.c.l.bf16 %v13418_v0  ;;  %v1306_v42 = vrot.slane %v7560_v29, %v13511_v36  ;;  %v13515_v11 = vld [vmem:[#allocation8_spill] sm:$0xff] }
 0x1dc   : > { %13508 = vst [vmem:[#allocation94_spill] sm:$0xff] %v9683_v62  ;;  %v1546_v41 = vrot.slane %v7560_v29, %v13512_v55  ;;  %v3091_v10 = vadd.f32 %v3059_v5, %v2803_v38  ;;  %v13513_v8 = vunpack.c.l.bf16 %v13423_v19  ;;  %v1136_v37 = vrot.slane %v1056_v13, %v13509_v52 }
 0x1dd   : > { %v3859_v44 = vmul.f32 %v13510_v56, %v9675_v50  ;;  %v1068_v45 = vrot.slane %v9678_v12, %v13514_v63  ;;  %v3107_v16 = vadd.f32 %v3075_v26, %v2819_v39  ;;  %v1386_v18 = vrot.slane %v1306_v42, %v13511_v36 }
 0x1de   : > { %v3875_v17 = vmul.f32 %v13513_v8, %v9683_v62  ;;  %v1626_v0 = vrot.slane %v1546_v41, %v13512_v55  ;;  %v3347_v50 = vadd.f32 %v3315_v40, %v3091_v10  ;;  %v1189_v5 = vmul.f32 %v13234_v23, %v1136_v37 }
 0x1df   : > { %v1205_v38 = vmul.f32 %v8909_v3, %v1136_v37  ;;  %v9705_v19 = vrot.slane %v1068_v45, %v13509_v52  ;;  %v3363_v29 = vadd.f32 %v3331_v30, %v3107_v16  ;;  %v1429_v13 = vmul.f32 %v1386_v18, %v13234_v23 }
 0x1e0   : > { %v1445_v26 = vmul.f32 %v1386_v18, %v8909_v3  ;;  %v1669_v39 = vmul.f32 %v1626_v0, %v13234_v23  ;;  %v3635_v42 = vadd.f32 %v3603_v60, %v3347_v50  ;;  %v1221_v41 = vfloor.f32 %v1189_v5 }
 0x1e1   : > { %v1237_v8 = vfloor.f32 %v1205_v38  ;;  %v1685_v56 = vmul.f32 %v1626_v0, %v8909_v3  ;;  %v3651_v10 = vadd.f32 %v3619_v9, %v3363_v29  ;;  %v1461_v40 = vfloor.f32 %v1429_v13 }
 0x1e2   : > { %v1477_v62 = vfloor.f32 %v1445_v26  ;;  %v1701_v46 = vfloor.f32 %v1669_v39  ;;  %v3891_v37 = vadd.f32 %v3859_v44, %v3635_v42  ;;  %v1253_v24 = vsub.f32 %v1189_v5, %v1221_v41 }
 0x1e3   : > { %v1269_v45 = vsub.f32 %v1205_v38, %v1237_v8  ;;  %v1717_v61 = vfloor.f32 %v1685_v56  ;;  %v3907_v30 = vadd.f32 %v3875_v17, %v3651_v10  ;;  %v1493_v16 = vsub.f32 %v1429_v13, %v1461_v40 }
 0x1e4   : > { %v1509_v25 = vsub.f32 %v1445_v26, %v1477_v62  ;;  %v1733_v2 = vsub.f32 %v1669_v39, %v1701_v46  ;;  %v1765_v27 = vsub.f32 1.0, %v1253_v24  ;;  %v1192_v60 = vmul.f32 %v13234_v23, %v9705_v19 }
 0x1e5   : > { %v1749_v18 = vsub.f32 %v1685_v56, %v1717_v61  ;;  %v1781_v33 = vsub.f32 1.0, %v1269_v45  ;;  %v7285_v50 = vpack.c.bf16 %v3907_v30, %v3891_v37  ;;  %v1797_v0 = vsub.f32 1.0, %v1493_v16 }
 0x1e6   : > { %v1813_v9 = vsub.f32 1.0, %v1509_v25  ;;  %v1829_v29 = vsub.f32 1.0, %v1733_v2  ;;  %v2405_v43 = vmul.f32 %v1765_v27, %v1493_v16  ;;  %v3493_v5 = vmul.f32 %v1493_v16, %v1253_v24 }
 0x1e7   : > { %v1845_v48 = vsub.f32 1.0, %v1749_v18  ;;  %v2421_v44 = vmul.f32 %v1781_v33, %v1509_v25  ;;  %7286 = vmatpush1.bf16.msra.mxu0 %v7285_v50  ;;  %v1861_v38 = vmul.f32 %v1797_v0, %v1765_v27  ;;  %v2949_v13 = vmul.f32 %v1797_v0, %v1253_v24 }
 0x1e8   : > { %v1877_v17 = vmul.f32 %v1813_v9, %v1781_v33  ;;  %v2965_v62 = vmul.f32 %v1813_v9, %v1269_v45  ;;  %v9713_v46 = vmul.f32 %v2405_v43, %v1829_v29  ;;  %v9717_v56 = vmul.f32 %v2405_v43, %v1733_v2 }
 0x1e9   : > { %v9715_v61 = vmul.f32 %v2421_v44, %v1845_v48  ;;  %v9719_v26 = vmul.f32 %v2421_v44, %v1749_v18  ;;  %v9721_v39 = vmul.f32 %v1861_v38, %v1829_v29  ;;  %v9725_v41 = vmul.f32 %v1861_v38, %v1733_v2 }
 0x1ea   : > { %13516 = vst [vmem:[#allocation98_spill] sm:$0xff] %v9713_v46  ;;  %13518 = vst [vmem:[#allocation12_spill] sm:$0xff] %v9717_v56  ;;  %v9723_v42 = vmul.f32 %v1877_v17, %v1845_v48  ;;  %v9727_v8 = vmul.f32 %v1877_v17, %v1749_v18  ;;  %v13524_v33 = vunpack.c.l.bf16 %v13435_v6  ;;  %v13525_v24 = vunpack.c.l.bf16 %v13443_v32  ;;  %7199 = vmatmul.mubr.msk.f32.vlgmr.msra.gmra.mrb[8].mxu0 %vm4059_vm0, %v9532_v20 }
 0x1eb   : > { %13517 = vst [vmem:[#allocation16_spill] sm:$0xff] %v9715_v61  ;;  %13519 = vst [vmem:[#allocation13_spill] sm:$0xff] %v9719_v26  ;;  %v13526_v43 = vunpack.c.l.bf16 %v13437_v53  ;;  %v13527_v37 = vunpack.c.l.bf16 %v13445_v49  ;;  %v13528_v16 = vunpack.c.l.bf16 %v13439_v22  ;;  %v13529_v50 = vunpack.c.l.bf16 %v13447_v47  ;;  %4320 = vmatprep.mubr.f32.mxu0 %v13477_v1 }
 0x1ec   : > { %13520 = vst [vmem:[#allocation7_spill] sm:$0xff] %v9721_v39  ;;  %13521 = vst [vmem:[#allocation8_spill] sm:$0xff] %v9723_v42  ;;  %v2517_v27 = vmul.f32 %v13524_v33, %v9713_v46  ;;  %v2533_v10 = vmul.f32 %v13525_v24, %v9715_v61  ;;  %v13530_v0 = vunpack.c.l.bf16 %v13441_v28  ;;  %v13531_v9 = vunpack.c.l.bf16 %v13449_v7  ;;  %v10056_v61 = vld [vmem:[%s8326_s25 + $0x168] sm:$0xff] }
 0x1ed   : > { %13522 = vst [vmem:[#allocation130_spill] sm:$0xff] %v9725_v41  ;;  %13523 = vst [vmem:[#allocation131_spill] sm:$0xff] %v9727_v8  ;;  %v2773_v40 = vmul.f32 %v13526_v43, %v9717_v56  ;;  %v2789_v30 = vmul.f32 %v13527_v37, %v9719_v26  ;;  %v1973_v6 = vmul.f32 %v13528_v16, %v9721_v39  ;;  %v13537_v28 = vunpack.c.l.bf16 %v13457_v59  ;;  %v9925_v26 = vld [vmem:[%s8326_s25 + $0x2a0] sm:$0xff] }
 0x1ee   : > { %v1989_v32 = vmul.f32 %v13529_v50, %v9723_v42  ;;  %v2229_v53 = vmul.f32 %v13530_v0, %v9725_v41  ;;  %v2245_v49 = vmul.f32 %v13531_v9, %v9727_v8  ;;  %v9756_v44 = vmul.f32 %v2949_v13, %v1829_v29  ;;  %7200 = vmatmul.mubr.msk.f32.gmra.mrb[10].mxu0 %vm4059_vm0, %v9571_v51 }
 0x1ef   : > { %v9758_v38 = vmul.f32 %v2965_v62, %v1845_v48  ;;  %v9760_v22 = vmul.f32 %v2949_v13, %v1733_v2  ;;  %v9762_v17 = vmul.f32 %v2965_v62, %v1749_v18  ;;  %v3509_v24 = vmul.f32 %v1509_v25, %v1269_v45  ;;  %4326 = vmatprep.mubr.f32.mxu0 %v13477_v1 }
 0x1f0   : > { %13532 = vst [vmem:[#allocation132_spill] sm:$0xff] %v9756_v44  ;;  %v2261_v47 = vadd.f32 %v2229_v53, %v1973_v6  ;;  %v2277_v33 = vadd.f32 %v2245_v49, %v1989_v32  ;;  %v9764_v43 = vmul.f32 %v3493_v5, %v1829_v29  ;;  %v3061_v7 = vmul.f32 %v13537_v28, %v9756_v44  ;;  %v9812_v28 = vld [vmem:[%s8326_s25 + $0x60] sm:$0xff] }
 0x1f1   : > { %13533 = vst [vmem:[#allocation133_spill] sm:$0xff] %v9758_v38  ;;  %13534 = vst [vmem:[#allocation134_spill] sm:$0xff] %v9760_v22  ;;  %v13538_v37 = vunpack.c.l.bf16 %v13459_v34  ;;  %v13539_v50 = vunpack.c.l.bf16 %v13461_v57  ;;  %v13540_v62 = vunpack.c.l.bf16 %v13464_v15  ;;  %v9780_v29 = vmul.f32 %v3509_v24, %v1845_v48 }
 0x1f2   : > { %13535 = vst [vmem:[#allocation135_spill] sm:$0xff] %v9762_v17  ;;  %13536 = vst [vmem:[#allocation136_spill] sm:$0xff] %v9764_v43  ;;  %v2549_v25 = vadd.f32 %v2517_v27, %v2261_v47  ;;  %v2565_v45 = vadd.f32 %v2533_v10, %v2277_v33  ;;  %v13542_v59 = vunpack.c.l.bf16 %v13466_v54  ;;  %v9786_v32 = vmul.f32 %v3493_v5, %v1733_v2  ;;  %v13548_v5 = vld [vmem:[#allocation61_spill] sm:$0xff] }
 0x1f3   : > { %v3077_v16 = vmul.f32 %v13538_v37, %v9758_v38  ;;  %v3317_v13 = vmul.f32 %v13539_v50, %v9760_v22  ;;  %v3333_v6 = vmul.f32 %v13540_v62, %v9762_v17  ;;  %13541 = vst [vmem:[#allocation137_spill] sm:$0xff] %v9780_v29  ;;  %v9788_v57 = vmul.f32 %v3509_v24, %v1749_v18  ;;  %v13550_v37 = vld [vmem:[#allocation9_spill] sm:$0xff]  ;;  %v13551_v62 = vld [vmem:[#allocation79_spill] sm:$0xff]  ;;  %v9898_v22 = vld [vmem:[%s8326_s25 + $0x220] sm:$0xff] }
 0x1f4   : > { %v3605_v34 = vmul.f32 %v13542_v59, %v9764_v43  ;;  %13543 = vst [vmem:[#allocation138_spill] sm:$0xff] %v9786_v32  ;;  %v1208_v15 = vmul.f32 %v8909_v3, %v9705_v19  ;;  %v1224_v0 = vfloor.f32 %v1192_v60  ;;  %v2805_v53 = vadd.f32 %v2773_v40, %v2549_v25  ;;  %7201 = vmatmul.mubr.msk.f32.gmra.mrb[12].mxu0 %vm4059_vm0, %v9589_v21 }
 0x1f5   : > { %13544 = vst [vmem:[#allocation139_spill] sm:$0xff] %v9788_v57  ;;  %v2821_v27 = vadd.f32 %v2789_v30, %v2565_v45  ;;  %v13545_v48 = vunpack.c.l.bf16 %v13468_v14  ;;  %v13546_v54 = vrot.slane %v9678_v12, %v13515_v11  ;;  %v13547_v2 = vunpack.c.l.bf16 %v13473_v58  ;;  %4332 = vmatprep.mubr.f32.mxu0 %v13477_v1  ;;  %13572 = vst [vmem:[#allocation157_spill] sm:$0xff] %v10056_v61 }
 0x1f6   : > { %v13549_v49 = vunpack.c.l.bf16 %v13548_v5  ;;  %v1240_v47 = vfloor.f32 %v1208_v15  ;;  %v9805_v40 = vsub.f32 %v1192_v60, %v1224_v0  ;;  %v3093_v14 = vadd.f32 %v3061_v7, %v2805_v53  ;;  %v9822_v0 = vld [vmem:[%s8326_s25 + $0xa0] sm:$0xff] }
 0x1f7   : > { %v3621_v10 = vmul.f32 %v13545_v48, %v9780_v29  ;;  %v1398_v9 = vrot.slane %v13546_v54, %v13511_v36  ;;  %v3861_v18 = vmul.f32 %v13547_v2, %v9786_v32  ;;  %v3109_v30 = vadd.f32 %v3077_v16, %v2821_v27  ;;  %v9835_v2 = vld [vmem:[%s8326_s25 + $0xe0] sm:$0xff] }
 0x1f8   : > { %v3877_v19 = vmul.f32 %v13549_v49, %v9788_v57  ;;  %v9815_v58 = vsub.f32 %v1208_v15, %v1240_v47  ;;  %v1558_v60 = vrot.slane %v9678_v12, %v13550_v37  ;;  %v1768_v50 = vsub.f32 1.0, %v9805_v40  ;;  %7202 = vmatmul.mubr.msk.f32.gmra.mrb[14].mxu0 %vm4059_vm0, %v9600_v35 }
 0x1f9   : > { %v1432_v33 = vmul.f32 %v1398_v9, %v13234_v23  ;;  %v1448_v24 = vmul.f32 %v1398_v9, %v8909_v3  ;;  %v3349_v7 = vadd.f32 %v3317_v13, %v3093_v14  ;;  %v3365_v16 = vadd.f32 %v3333_v6, %v3109_v30  ;;  %4492 = vmatprep.mubr.f32.mxu0 %v13477_v1 }
 0x1fa   : > { %v1638_v53 = vrot.slane %v1558_v60, %v13512_v55  ;;  %v1784_v27 = vsub.f32 1.0, %v9815_v58  ;;  %v1960_v48 = vunpack.c.h.bf16 %v9812_v28  ;;  %v2200_v14 = vunpack.c.h.bf16 %v9822_v0 }
 0x1fb   : > { %v1464_v45 = vfloor.f32 %v1432_v33  ;;  %v1480_v59 = vfloor.f32 %v1448_v24  ;;  %v3637_v54 = vadd.f32 %v3605_v34, %v3349_v7  ;;  %v3653_v9 = vadd.f32 %v3621_v10, %v3365_v16  ;;  %v9863_v16 = vld [vmem:[%s8326_s25 + $0x1e0] sm:$0xff] }
 0x1fc   : > { %v1672_v5 = vmul.f32 %v1638_v53, %v13234_v23  ;;  %v1688_v49 = vmul.f32 %v1638_v53, %v8909_v3  ;;  %v9853_v53 = vld [vmem:[%s8326_s25 + $0x1a0] sm:$0xff] }
 0x1fd   : > { %v9830_v13 = vsub.f32 %v1432_v33, %v1464_v45  ;;  %v9832_v6 = vsub.f32 %v1448_v24, %v1480_v59  ;;  %v3893_v34 = vadd.f32 %v3861_v18, %v3637_v54  ;;  %v3909_v10 = vadd.f32 %v3877_v19, %v3653_v9  ;;  %v9845_v24 = vld [vmem:[%s8326_s25 + $0x120] sm:$0xff] }
 0x1fe   : > { %v1704_v60 = vfloor.f32 %v1672_v5  ;;  %v1720_v7 = vfloor.f32 %v1688_v49  ;;  %v2216_v45 = vunpack.c.h.bf16 %v9835_v2  ;;  %v9850_v59 = vld [vmem:[%s8326_s25 + $0x160] sm:$0xff]  ;;  %v2488_v32 = vunpack.c.h.bf16 %v9845_v24 }
 0x1ff   : > { %v1800_v30 = vsub.f32 1.0, %v9830_v13  ;;  %v1816_v33 = vsub.f32 1.0, %v9832_v6  ;;  %v7289_v15 = vpack.c.bf16 %v3909_v10, %v3893_v34  ;;  %v2408_v54 = vmul.f32 %v1768_v50, %v9830_v13 }
 0x200   : > { %v9856_v9 = vsub.f32 %v1672_v5, %v1704_v60  ;;  %v9858_v47 = vsub.f32 %v1688_v49, %v1720_v7  ;;  %v2424_v25 = vmul.f32 %v1784_v27, %v9832_v6  ;;  %v2504_v10 = vunpack.c.h.bf16 %v9850_v59 }
 0x201   : > { %v1864_v18 = vmul.f32 %v1800_v30, %v1768_v50  ;;  %v1880_v19 = vmul.f32 %v1816_v33, %v1784_v27  ;;  %7290 = vmatpush1.bf16.msra.mxu1 %v7289_v15  ;;  %v2744_v50 = vunpack.c.h.bf16 %v9853_v53 }
 0x202   : > { %v9870_v5 = vsub.f32 1.0, %v9856_v9  ;;  %v9873_v49 = vsub.f32 1.0, %v9858_v47  ;;  %v9882_v60 = vmul.f32 %v2408_v54, %v9856_v9  ;;  %v9885_v7 = vmul.f32 %v2424_v25, %v9858_v47 }
 0x203   : > { %v9876_v27 = vmul.f32 %v1864_v18, %v9856_v9  ;;  %v9879_v15 = vmul.f32 %v1880_v19, %v9858_v47 }
 0x204   : > { %13554 = vst [vmem:[#allocation140_spill] sm:$0xff] %v9882_v60  ;;  %13555 = vst [vmem:[#allocation141_spill] sm:$0xff] %v9885_v7  ;;  %v9890_v57 = vmul.f32 %v1864_v18, %v9870_v5  ;;  %v9893_v29 = vmul.f32 %v1880_v19, %v9873_v49  ;;  %7203 = vmatmul.mubr.msk.f32.vlgmr.msra.gmra.mrb[8].mxu1 %vm4059_vm0, %v9532_v20  ;;  %v9903_v38 = vmul.f32 %v2408_v54, %v9870_v5 }
 0x205   : > { %13552 = vst [vmem:[#allocation61_spill] sm:$0xff] %v9876_v27  ;;  %13553 = vst [vmem:[#allocation79_spill] sm:$0xff] %v9879_v15  ;;  %v2232_v43 = vmul.f32 %v2200_v14, %v9876_v27  ;;  %v2248_v17 = vmul.f32 %v2216_v45, %v9879_v15  ;;  %v9906_v34 = vmul.f32 %v2424_v25, %v9873_v49  ;;  %v2760_v18 = vunpack.c.h.bf16 %v9863_v16  ;;  %v9918_v27 = vld [vmem:[%s8326_s25 + $0x260] sm:$0xff] }
 0x206   : > { %13556 = vst [vmem:[#allocation142_spill] sm:$0xff] %v9890_v57  ;;  %13557 = vst [vmem:[#allocation143_spill] sm:$0xff] %v9893_v29  ;;  %v2776_v19 = vmul.f32 %v2744_v50, %v9882_v60  ;;  %4409 = vmatprep.mubr.f32.mxu1 %v13477_v1  ;;  %v13560_v14 = vunpack.c.h.bf16 %v13551_v62  ;;  %v1992_v15 = vmul.f32 %v1960_v48, %v9893_v29 }
 0x207   : > { %13558 = vst [vmem:[#allocation144_spill] sm:$0xff] %v9903_v38  ;;  %13559 = vst [vmem:[#allocation145_spill] sm:$0xff] %v9906_v34  ;;  %v2952_v20 = vmul.f32 %v1800_v30, %v9805_v40  ;;  %v2968_v54 = vmul.f32 %v1816_v33, %v9815_v58  ;;  %v2520_v25 = vmul.f32 %v2488_v32, %v9903_v38  ;;  %v9934_v33 = vld [vmem:[%s8326_s25 + $0x2e0] sm:$0xff]  ;;  %v3032_v32 = vunpack.c.h.bf16 %v9898_v22 }
 0x208   : > { %v1976_v45 = vmul.f32 %v13560_v14, %v9890_v57  ;;  %v2536_v44 = vmul.f32 %v2504_v10, %v9906_v34  ;;  %v2792_v50 = vmul.f32 %v2760_v18, %v9885_v7  ;;  %v2280_v57 = vadd.f32 %v2248_v17, %v1992_v15  ;;  %7204 = vmatmul.mubr.msk.f32.gmra.mrb[10].mxu1 %vm4059_vm0, %v9571_v51  ;;  %v9950_v51 = vld [vmem:[%s8326_s25 + $0x320] sm:$0xff] }
 0x209   : > { %v9928_v48 = vmul.f32 %v2952_v20, %v9870_v5  ;;  %v9931_v30 = vmul.f32 %v2968_v54, %v9873_v49  ;;  %v3048_v18 = vunpack.c.h.bf16 %v9918_v27  ;;  %v9942_v17 = vmul.f32 %v2952_v20, %v9856_v9  ;;  %4415 = vmatprep.mubr.f32.mxu1 %v13477_v1 }
 0x20a   : > { %v2264_v14 = vadd.f32 %v2232_v43, %v1976_v45  ;;  %v2568_v15 = vadd.f32 %v2536_v44, %v2280_v57  ;;  %v9946_v45 = vmul.f32 %v2968_v54, %v9858_v47  ;;  %v3288_v34 = vunpack.c.h.bf16 %v9925_v26  ;;  %v9960_v54 = vld [vmem:[%s8326_s25 + $0x360] sm:$0xff] }
 0x20b   : > { %13561 = vst [vmem:[#allocation146_spill] sm:$0xff] %v9928_v48  ;;  %13562 = vst [vmem:[#allocation147_spill] sm:$0xff] %v9931_v30  ;;  %v3064_v7 = vmul.f32 %v3032_v32, %v9928_v48  ;;  %v3080_v10 = vmul.f32 %v3048_v18, %v9931_v30  ;;  %v3304_v44 = vunpack.c.h.bf16 %v9934_v33  ;;  %v3496_v57 = vmul.f32 %v9830_v13, %v9805_v40 }
 0x20c   : > { %13563 = vst [vmem:[#allocation148_spill] sm:$0xff] %v9942_v17  ;;  %v2552_v43 = vadd.f32 %v2520_v25, %v2264_v14  ;;  %13564 = vst [vmem:[#allocation149_spill] sm:$0xff] %v9946_v45  ;;  %v2824_v25 = vadd.f32 %v2792_v50, %v2568_v15  ;;  %7205 = vmatmul.mubr.msk.f32.gmra.mrb[12].mxu1 %vm4059_vm0, %v9589_v21  ;;  %v3320_v14 = vmul.f32 %v3288_v34, %v9942_v17  ;;  %v9975_v21 = vld [vmem:[%s8326_s25 + $0x3a0] sm:$0xff] }
 0x20d   : > { %v3512_v32 = vmul.f32 %v9832_v6, %v9815_v58  ;;  %v3576_v50 = vunpack.c.h.bf16 %v9950_v51  ;;  %4421 = vmatprep.mubr.f32.mxu1 %v13477_v1  ;;  %v3336_v13 = vmul.f32 %v3304_v44, %v9946_v45  ;;  %v9978_v34 = vld [vmem:[%s8326_s25 + $0x3e0] sm:$0xff]  ;;  %v3592_v15 = vunpack.c.h.bf16 %v9960_v54  ;;  %v9996_v44 = vld [vmem:[%s8326_s25 + $0x28] sm:$0xff] }
 0x20e   : > { %v2808_v38 = vadd.f32 %v2776_v19, %v2552_v43  ;;  %v3112_v40 = vadd.f32 %v3080_v10, %v2824_v25  ;;  %v9972_v43 = vmul.f32 %v3496_v57, %v9870_v5  ;;  %v9986_v20 = vmul.f32 %v3496_v57, %v9856_v9  ;;  %13569 = vst [vmem:[#allocation154_spill] sm:$0xff] %v9996_v44  ;;  %v10022_v6 = vld [vmem:[%s8326_s25 + $0xa8] sm:$0xff] }
 0x20f   : > { %v9981_v58 = vmul.f32 %v3512_v32, %v9873_v49  ;;  %v9993_v25 = vmul.f32 %v3512_v32, %v9858_v47  ;;  %v3832_v57 = vunpack.c.h.bf16 %v9975_v21  ;;  %v3848_v47 = vunpack.c.h.bf16 %v9978_v34 }
 0x210   : > { %v3096_v18 = vadd.f32 %v3064_v7, %v2808_v38  ;;  %13565 = vst [vmem:[#allocation150_spill] sm:$0xff] %v9972_v43  ;;  %13567 = vst [vmem:[#allocation152_spill] sm:$0xff] %v9986_v20  ;;  %v9989_v38 = vld [vmem:[%s8298_s15 + $0x28] sm:$0x77]  ;;  %v3368_v5 = vadd.f32 %v3336_v13, %v3112_v40  ;;  %v3608_v10 = vmul.f32 %v3576_v50, %v9972_v43  ;;  %7206 = vmatmul.mubr.msk.f32.gmra.mrb[14].mxu1 %vm4059_vm0, %v9600_v35 }
 0x211   : > { %13566 = vst [vmem:[#allocation151_spill] sm:$0xff] %v9981_v58  ;;  %13568 = vst [vmem:[#allocation153_spill] sm:$0xff] %v9993_v25  ;;  %v3624_v49 = vmul.f32 %v3592_v15, %v9981_v58  ;;  %4581 = vmatprep.mubr.f32.mxu1 %v13477_v1  ;;  %v1076_v32 = vrot.slane %v9989_v38, %v13514_v63  ;;  %v1326_v35 = vrot.slane %v9989_v38, %v13515_v11 }
 0x212   : > { %v3352_v7 = vadd.f32 %v3320_v14, %v3096_v18  ;;  %v10011_v18 = vld [vmem:[%s8326_s25 + $0x68] sm:$0xff]  ;;  %v3864_v13 = vmul.f32 %v3832_v57, %v9986_v20  ;;  %v1566_v15 = vrot.slane %v9989_v38, %v13550_v37  ;;  %v1946_v60 = vunpack.c.h.bf16 %v9996_v44 }
 0x213   : > { %13570 = vst [vmem:[#allocation155_spill] sm:$0xff] %v10011_v18  ;;  %v3656_v40 = vadd.f32 %v3624_v49, %v3368_v5  ;;  %v1406_v9 = vrot.slane %v1326_v35, %v13511_v36  ;;  %v1962_v57 = vunpack.c.h.bf16 %v10011_v18  ;;  %v2202_v17 = vunpack.c.h.bf16 %v10022_v6  ;;  %v10118_v44 = vld [vmem:[%s8326_s25 + $0x268] sm:$0xff] }
 0x214   : > { %v3640_v50 = vadd.f32 %v3608_v10, %v3352_v7  ;;  %v3880_v7 = vmul.f32 %v3848_v47, %v9993_v25  ;;  %v1156_v10 = vrot.slane %v1076_v32, %v13509_v52  ;;  %v1646_v5 = vrot.slane %v1566_v15, %v13512_v55 }
 0x215   : > { %v1434_v32 = vmul.f32 %v1406_v9, %v13234_v23  ;;  %v1450_v35 = vmul.f32 %v1406_v9, %v8909_v3  ;;  %v10039_v9 = vld [vmem:[%s8326_s25 + $0x128] sm:$0xff] }
 0x216   : > { %v3896_v19 = vadd.f32 %v3864_v13, %v3640_v50  ;;  %v3912_v20 = vadd.f32 %v3880_v7, %v3656_v40  ;;  %v1194_v14 = vmul.f32 %v13234_v23, %v1156_v10  ;;  %v1210_v47 = vmul.f32 %v8909_v3, %v1156_v10  ;;  %v10034_v13 = vld [vmem:[%s8326_s25 + $0xe8] sm:$0xff]  ;;  %13571 = vst [vmem:[#allocation156_spill] sm:$0xff] %v10039_v9 }
 0x217   : > { %v1674_v25 = vmul.f32 %v1646_v5, %v13234_v23  ;;  %v1690_v50 = vmul.f32 %v1646_v5, %v8909_v3  ;;  %v1466_v7 = vfloor.f32 %v1434_v32  ;;  %v1482_v43 = vfloor.f32 %v1450_v35 }
 0x218   : > { %v7291_v49 = vpack.c.bf16 %v3912_v20, %v3896_v19  ;;  %v1226_v58 = vfloor.f32 %v1194_v14  ;;  %v1242_v40 = vfloor.f32 %v1210_v47  ;;  %v2218_v56 = vunpack.c.h.bf16 %v10034_v13 }
 0x219   : > { %v1706_v45 = vfloor.f32 %v1674_v25  ;;  %v1722_v10 = vfloor.f32 %v1690_v50  ;;  %v10045_v48 = vsub.f32 %v1434_v32, %v1466_v7  ;;  %v10048_v19 = vsub.f32 %v1450_v35, %v1482_v43  ;;  %v10063_v32 = vld [vmem:[%s8326_s25 + $0x1a8] sm:$0xff] }
 0x21a   : > { %7292 = vmatprep.subr.bf16.mxu0 %v7291_v49  ;;  %v10041_v30 = vsub.f32 %v1194_v14, %v1226_v58  ;;  %v10043_v5 = vsub.f32 %v1210_v47, %v1242_v40  ;;  %v2490_v35 = vunpack.c.h.bf16 %v10039_v9  ;;  %v2506_v20 = vunpack.c.h.bf16 %v10056_v61  ;;  %v10111_v9 = vld [vmem:[%s8326_s25 + $0x228] sm:$0xff] }
 0x21b   : > { %v10050_v15 = vsub.f32 %v1674_v25, %v1706_v45  ;;  %v10052_v29 = vsub.f32 %v1690_v50, %v1722_v10  ;;  %v1802_v14 = vsub.f32 1.0, %v10045_v48  ;;  %v1818_v43 = vsub.f32 1.0, %v10048_v19 }
 0x21c   : > { %v1770_v49 = vsub.f32 1.0, %v10041_v30  ;;  %v1786_v58 = vsub.f32 1.0, %v10043_v5  ;;  %v2746_v8 = vunpack.c.h.bf16 %v10063_v32 }
 0x21d   : > { %v10067_v45 = vsub.f32 1.0, %v10050_v15  ;;  %v10070_v25 = vsub.f32 1.0, %v10052_v29 }
 0x21e   : > { %v1866_v50 = vmul.f32 %v1802_v14, %v1770_v49  ;;  %v2410_v40 = vmul.f32 %v1770_v49, %v10045_v48  ;;  %v2426_v7 = vmul.f32 %v1786_v58, %v10048_v19  ;;  %v1882_v47 = vmul.f32 %v1818_v43, %v1786_v58  ;;  %v10092_v58 = vld [vmem:[%s8326_s25 + $0x1e8] sm:$0xff] }
 0x220   : > { %v10080_v41 = vmul.f32 %v1866_v50, %v10067_v45  ;;  %v10083_v42 = vmul.f32 %v1866_v50, %v10050_v15  ;;  %v10086_v49 = vmul.f32 %v2410_v40, %v10067_v45  ;;  %v10089_v10 = vmul.f32 %v2426_v7, %v10070_v25 }
 0x221   : > { %v10095_v39 = vmul.f32 %v1882_v47, %v10070_v25  ;;  %v10098_v46 = vmul.f32 %v1882_v47, %v10052_v29  ;;  %v10101_v4 = vmul.f32 %v2410_v40, %v10050_v15  ;;  %v10104_v50 = vmul.f32 %v2426_v7, %v10052_v29  ;;  %v10127_v40 = vld [vmem:[%s8326_s25 + $0x2a8] sm:$0xff] }
 0x222   : > { %13573 = vst [vmem:[#allocation158_spill] sm:$0xff] %v10080_v41  ;;  %13574 = vst [vmem:[#allocation159_spill] sm:$0xff] %v10083_v42  ;;  %v1978_v31 = vmul.f32 %v1946_v60, %v10080_v41  ;;  %v2234_v37 = vmul.f32 %v2202_v17, %v10083_v42  ;;  %v2522_v1 = vmul.f32 %v2490_v35, %v10086_v49  ;;  %v2762_v7 = vunpack.c.h.bf16 %v10092_v58 }
 0x223   : > { %13575 = vst [vmem:[#allocation160_spill] sm:$0xff] %v10086_v49  ;;  %13576 = vst [vmem:[#allocation161_spill] sm:$0xff] %v10089_v10  ;;  %v2538_v61 = vmul.f32 %v2506_v20, %v10089_v10  ;;  %v1994_v47 = vmul.f32 %v1962_v57, %v10095_v39  ;;  %v2250_v18 = vmul.f32 %v2218_v56, %v10098_v46  ;;  %v3034_v56 = vunpack.c.h.bf16 %v10111_v9 }
 0x224   : > { %13577 = vst [vmem:[#allocation162_spill] sm:$0xff] %v10095_v39  ;;  %13578 = vst [vmem:[#allocation163_spill] sm:$0xff] %v10098_v46  ;;  %v2266_v60 = vadd.f32 %v2234_v37, %v1978_v31  ;;  %v2778_v17 = vmul.f32 %v2746_v8, %v10101_v4  ;;  %v2954_v35 = vmul.f32 %v1802_v14, %v10041_v30  ;;  %v10137_v37 = vld [vmem:[%s8326_s25 + $0x2e8] sm:$0xff]  ;;  %v3050_v14 = vunpack.c.h.bf16 %v10118_v44 }
 0x225   : > { %13579 = vst [vmem:[#allocation164_spill] sm:$0xff] %v10101_v4  ;;  %13580 = vst [vmem:[#allocation165_spill] sm:$0xff] %v10104_v50  ;;  %v2970_v20 = vmul.f32 %v1818_v43, %v10043_v5  ;;  %v2282_v10 = vadd.f32 %v2250_v18, %v1994_v47  ;;  %v2794_v49 = vmul.f32 %v2762_v7, %v10104_v50  ;;  %v3290_v57 = vunpack.c.h.bf16 %v10127_v40  ;;  %v10150_v8 = vld [vmem:[%s8326_s25 + $0x328] sm:$0xff] }
 0x226   : > { %v2554_v46 = vadd.f32 %v2522_v1, %v2266_v60  ;;  %v10130_v42 = vmul.f32 %v2954_v35, %v10067_v45  ;;  %13583 = vst [vmem:[#allocation168_spill] sm:$0xff] %v10137_v37  ;;  %v10141_v43 = vmul.f32 %v2954_v35, %v10050_v15  ;;  %13586 = vst [vmem:[#allocation171_spill] sm:$0xff] %v10150_v8  ;;  %v3306_v50 = vunpack.c.h.bf16 %v10137_v37  ;;  %v10167_v35 = vld [vmem:[%s8326_s25 + $0x3a8] sm:$0xff] }
 0x227   : > { %v10133_v31 = vmul.f32 %v2970_v20, %v10070_v25  ;;  %v2570_v18 = vadd.f32 %v2538_v61, %v2282_v10  ;;  %v10144_v47 = vmul.f32 %v2970_v20, %v10052_v29  ;;  %v10156_v20 = vld [vmem:[%s8326_s25 + $0x368] sm:$0xff]  ;;  %v3514_v60 = vmul.f32 %v10048_v19, %v10043_v5  ;;  %13588 = vst [vmem:[#allocation173_spill] sm:$0xff] %v10167_v35 }
 0x228   : > { %13581 = vst [vmem:[#allocation166_spill] sm:$0xff] %v10130_v42  ;;  %13584 = vst [vmem:[#allocation169_spill] sm:$0xff] %v10141_v43  ;;  %v2810_v1 = vadd.f32 %v2778_v17, %v2554_v46  ;;  %v3066_v7 = vmul.f32 %v3034_v56, %v10130_v42  ;;  %v3322_v17 = vmul.f32 %v3290_v57, %v10141_v43  ;;  %v3594_v19 = vunpack.c.h.bf16 %v10156_v20 }
 0x229   : > { %13582 = vst [vmem:[#allocation167_spill] sm:$0xff] %v10133_v31  ;;  %13585 = vst [vmem:[#allocation170_spill] sm:$0xff] %v10144_v47  ;;  %v2826_v61 = vadd.f32 %v2794_v49, %v2570_v18  ;;  %v3082_v10 = vmul.f32 %v3050_v14, %v10133_v31  ;;  %v3498_v56 = vmul.f32 %v10045_v48, %v10041_v30  ;;  %v3578_v14 = vunpack.c.h.bf16 %v10150_v8  ;;  %v10170_v31 = vld [vmem:[%s8326_s25 + $0x3e8] sm:$0xff] }
 0x22a   : > { %13587 = vst [vmem:[#allocation172_spill] sm:$0xff] %v10156_v20  ;;  %v3098_v46 = vadd.f32 %v3066_v7, %v2810_v1  ;;  %v3338_v49 = vmul.f32 %v3306_v50, %v10144_v47  ;;  %13589 = vst [vmem:[#allocation174_spill] sm:$0xff] %v10170_v31  ;;  %v10176_v48 = vmul.f32 %v3514_v60, %v10070_v25 }
 0x22b   : > { %v3114_v42 = vadd.f32 %v3082_v10, %v2826_v61  ;;  %v10173_v57 = vmul.f32 %v3498_v56, %v10067_v45  ;;  %v10181_v50 = vmul.f32 %v3498_v56, %v10050_v15  ;;  %v10184_v7 = vmul.f32 %v3514_v60, %v10052_v29 }
 0x22c   : > { %v3354_v1 = vadd.f32 %v3322_v17, %v3098_v46  ;;  %13591 = vst [vmem:[#allocation176_spill] sm:$0xff] %v10176_v48  ;;  %v3834_v45 = vunpack.c.h.bf16 %v10167_v35  ;;  %v3626_v46 = vmul.f32 %v3594_v19, %v10176_v48  ;;  %v1064_v17 = vrot.slane %v9678_v12, %v13509_v52 }
 0x22d   : > { %13590 = vst [vmem:[#allocation175_spill] sm:$0xff] %v10173_v57  ;;  %v3370_v5 = vadd.f32 %v3338_v49, %v3114_v42  ;;  %13592 = vst [vmem:[#allocation177_spill] sm:$0xff] %v10181_v50  ;;  %v3610_v61 = vmul.f32 %v3578_v14, %v10173_v57  ;;  %v3850_v42 = vunpack.c.h.bf16 %v10170_v31  ;;  %v1314_v15 = vrot.slane %v9678_v12, %v13511_v36 }
 0x22e   : > { %13593 = vst [vmem:[#allocation178_spill] sm:$0xff] %v10184_v7  ;;  %v3866_v60 = vmul.f32 %v3834_v45, %v10181_v50  ;;  %v1554_v56 = vrot.slane %v9678_v12, %v13512_v55  ;;  %v1072_v49 = vrot.slane %v9989_v38, %v13509_v52  ;;  %v1144_v25 = vrot.slane %v1064_v17, %v13509_v52 }
 0x22f   : > { %v3642_v29 = vadd.f32 %v3610_v61, %v3354_v1  ;;  %v3658_v14 = vadd.f32 %v3626_v46, %v3370_v5  ;;  %v3882_v19 = vmul.f32 %v3850_v42, %v10184_v7  ;;  %v1394_v10 = vrot.slane %v1314_v15, %v13511_v36 }
 0x230   : > { %v1634_v18 = vrot.slane %v1554_v56, %v13512_v55  ;;  %v1152_v1 = vrot.slane %v1072_v49, %v13509_v52  ;;  %v1191_v12 = vmul.f32 %v13234_v23, %v1144_v25  ;;  %v1207_v50 = vmul.f32 %v8909_v3, %v1144_v25 }
 0x231   : > { %v3898_v30 = vadd.f32 %v3866_v60, %v3642_v29  ;;  %v3914_v45 = vadd.f32 %v3882_v19, %v3658_v14  ;;  %v1431_v5 = vmul.f32 %v1394_v10, %v13234_v23  ;;  %v1447_v46 = vmul.f32 %v1394_v10, %v8909_v3 }
 0x232   : > { %v1671_v42 = vmul.f32 %v1634_v18, %v13234_v23  ;;  %v1687_v17 = vmul.f32 %v1634_v18, %v8909_v3  ;;  %v10215_v15 = vmul.f32 %v13234_v23, %v1152_v1  ;;  %v1223_v60 = vfloor.f32 %v1191_v12 }
 0x233   : > { %v7295_v29 = vpack.c.bf16 %v3914_v45, %v3898_v30  ;;  %v1239_v56 = vfloor.f32 %v1207_v50  ;;  %v1463_v49 = vfloor.f32 %v1431_v5  ;;  %v1479_v14 = vfloor.f32 %v1447_v46 }
 0x234   : > { %v1703_v19 = vfloor.f32 %v1671_v42  ;;  %v1719_v61 = vfloor.f32 %v1687_v17  ;;  %v1209_v25 = vmul.f32 %v8909_v3, %v1152_v1  ;;  %v1255_v7 = vsub.f32 %v1191_v12, %v1223_v60 }
 0x235   : > { %7296 = vmatprep.subr.bf16.mxu1 %v7295_v29  ;;  %v1271_v48 = vsub.f32 %v1207_v50, %v1239_v56  ;;  %v1495_v10 = vsub.f32 %v1431_v5, %v1463_v49  ;;  %v1225_v57 = vfloor.f32 %v10215_v15  ;;  %v1511_v47 = vsub.f32 %v1447_v46, %v1479_v14 }
 0x236   : > { %v1735_v18 = vsub.f32 %v1671_v42, %v1703_v19  ;;  %v1751_v43 = vsub.f32 %v1687_v17, %v1719_v61  ;;  %v1241_v4 = vfloor.f32 %v1209_v25  ;;  %v1767_v39 = vsub.f32 1.0, %v1255_v7 }
 0x237   : > { %v1783_v30 = vsub.f32 1.0, %v1271_v48  ;;  %v1799_v45 = vsub.f32 1.0, %v1495_v10  ;;  %v3495_v41 = vmul.f32 %v1495_v10, %v1255_v7  ;;  %v1815_v31 = vsub.f32 1.0, %v1511_v47 }
 0x238   : > { %v1831_v35 = vsub.f32 1.0, %v1735_v18  ;;  %v1847_v20 = vsub.f32 1.0, %v1751_v43  ;;  %v3511_v8 = vmul.f32 %v1511_v47, %v1271_v48  ;;  %v2407_v1 = vmul.f32 %v1767_v39, %v1495_v10 }
 0x239   : > { %v1863_v37 = vmul.f32 %v1799_v45, %v1767_v39  ;;  %v2423_v29 = vmul.f32 %v1783_v30, %v1511_v47  ;;  %v2951_v12 = vmul.f32 %v1799_v45, %v1255_v7  ;;  %v1879_v50 = vmul.f32 %v1815_v31, %v1783_v30 }
 0x23a   : > { %v2967_v5 = vmul.f32 %v1815_v31, %v1271_v48  ;;  %v10219_v60 = vmul.f32 %v3495_v41, %v1831_v35  ;;  %v10221_v46 = vmul.f32 %v3511_v8, %v1847_v20  ;;  %v10227_v17 = vmul.f32 %v2407_v1, %v1831_v35 }
 0x23b   : > { %v10223_v61 = vmul.f32 %v1863_v37, %v1831_v35  ;;  %v10225_v42 = vmul.f32 %v1863_v37, %v1735_v18  ;;  %v10229_v56 = vmul.f32 %v2423_v29, %v1847_v20  ;;  %v10231_v49 = vmul.f32 %v1879_v50, %v1847_v20 }
 0x23c   : > { %13594 = vst [vmem:[#allocation179_spill] sm:$0xff] %v10219_v60  ;;  %13595 = vst [vmem:[#allocation180_spill] sm:$0xff] %v10221_v46  ;;  %v10233_v14 = vmul.f32 %v1879_v50, %v1751_v43  ;;  %v10235_v39 = vmul.f32 %v2407_v1, %v1735_v18  ;;  %v10237_v47 = vmul.f32 %v2423_v29, %v1751_v43  ;;  %v13604_v31 = vunpack.c.l.bf16 %v13551_v62 }
 0x23d   : > { %13596 = vst [vmem:[#allocation181_spill] sm:$0xff] %v10223_v61  ;;  %13597 = vst [vmem:[#allocation182_spill] sm:$0xff] %v10225_v42  ;;  %v13605_v37 = vunpack.c.l.bf16 %v9822_v0  ;;  %v13606_v19 = vunpack.c.l.bf16 %v9845_v24  ;;  %v13607_v30 = vunpack.c.l.bf16 %v9850_v59  ;;  %v13608_v1 = vunpack.c.l.bf16 %v9812_v28 }
 0x23e   : > { %13598 = vst [vmem:[#allocation183_spill] sm:$0xff] %v10227_v17  ;;  %13599 = vst [vmem:[#allocation184_spill] sm:$0xff] %v10229_v56  ;;  %v1975_v48 = vmul.f32 %v13604_v31, %v10223_v61  ;;  %v13609_v62 = vunpack.c.l.bf16 %v9835_v2  ;;  %v13610_v0 = vunpack.c.l.bf16 %v9853_v53  ;;  %v13611_v24 = vunpack.c.l.bf16 %v9863_v16 }
 0x23f   : > { %13600 = vst [vmem:[#allocation185_spill] sm:$0xff] %v10231_v49  ;;  %13601 = vst [vmem:[#allocation186_spill] sm:$0xff] %v10233_v14  ;;  %v2231_v7 = vmul.f32 %v13605_v37, %v10225_v42  ;;  %v2519_v10 = vmul.f32 %v13606_v19, %v10227_v17  ;;  %v2535_v45 = vmul.f32 %v13607_v30, %v10229_v56  ;;  %v13616_v2 = vunpack.c.l.bf16 %v9950_v51 }
 0x240   : > { %13602 = vst [vmem:[#allocation187_spill] sm:$0xff] %v10235_v39  ;;  %13603 = vst [vmem:[#allocation188_spill] sm:$0xff] %v10237_v47  ;;  %v1991_v29 = vmul.f32 %v13608_v1, %v10231_v49  ;;  %v2247_v50 = vmul.f32 %v13609_v62, %v10233_v14  ;;  %v2775_v31 = vmul.f32 %v13610_v0, %v10235_v39  ;;  %v13617_v62 = vunpack.c.l.bf16 %v9960_v54 }
 0x241   : > { %v2791_v37 = vmul.f32 %v13611_v24, %v10237_v47  ;;  %v2263_v19 = vadd.f32 %v2231_v7, %v1975_v48  ;;  %v10263_v17 = vmul.f32 %v2951_v12, %v1831_v35  ;;  %v10265_v59 = vmul.f32 %v2967_v5, %v1847_v20  ;;  %v10699_v47 = vld [vmem:[%s8326_s25 + $0x178] sm:$0xff] }
 0x242   : > { %v10267_v30 = vmul.f32 %v2951_v12, %v1735_v18  ;;  %v2279_v28 = vadd.f32 %v2247_v50, %v1991_v29  ;;  %v10269_v1 = vmul.f32 %v2967_v5, %v1751_v43  ;;  %v3607_v53 = vmul.f32 %v13616_v2, %v10219_v60  ;;  %v10543_v60 = vld [vmem:[%s8326_s25 + $0x230] sm:$0xff]  ;;  %13691 = vst [vmem:[#allocation222_spill] sm:$0xff] %v10699_v47 }
 0x243   : > { %13612 = vst [vmem:[#allocation189_spill] sm:$0xff] %v10263_v17  ;;  %13613 = vst [vmem:[#allocation190_spill] sm:$0xff] %v10265_v59  ;;  %v3623_v16 = vmul.f32 %v13617_v62, %v10221_v46  ;;  %v2551_v0 = vadd.f32 %v2519_v10, %v2263_v19  ;;  %v13618_v35 = vunpack.c.l.bf16 %v9898_v22  ;;  %v13619_v12 = vunpack.c.l.bf16 %v9918_v27 }
 0x244   : > { %13614 = vst [vmem:[#allocation191_spill] sm:$0xff] %v10267_v30  ;;  %13615 = vst [vmem:[#allocation192_spill] sm:$0xff] %v10269_v1  ;;  %v13620_v5 = vunpack.c.l.bf16 %v9925_v26  ;;  %v2567_v29 = vadd.f32 %v2535_v45, %v2279_v28  ;;  %v13621_v51 = vunpack.c.l.bf16 %v9934_v33  ;;  %v10289_v54 = vmul.f32 %v3495_v41, %v1735_v18  ;;  %v10303_v45 = vld [vmem:[%s8298_s15 + $0x30] sm:$0x77] }
 0x245   : > { %v3063_v20 = vmul.f32 %v13618_v35, %v10263_v17  ;;  %v3079_v48 = vmul.f32 %v13619_v12, %v10265_v59  ;;  %v10291_v10 = vmul.f32 %v3511_v8, %v1751_v43  ;;  %v2807_v24 = vadd.f32 %v2775_v31, %v2551_v0 }
 0x246   : > { %v3319_v7 = vmul.f32 %v13620_v5, %v10267_v30  ;;  %v3335_v50 = vmul.f32 %v13621_v51, %v10269_v1  ;;  %13622 = vst [vmem:[#allocation193_spill] sm:$0xff] %v10289_v54  ;;  %v10294_v22 = vsub.f32 %v10215_v15, %v1225_v57  ;;  %v10296_v19 = vsub.f32 %v1209_v25, %v1241_v4 }
 0x247   : > { %13623 = vst [vmem:[#allocation194_spill] sm:$0xff] %v10291_v10  ;;  %v13624_v26 = vrot.slane %v9989_v38, %v13511_v36  ;;  %v2823_v28 = vadd.f32 %v2791_v37, %v2567_v29  ;;  %v13625_v41 = vunpack.c.l.bf16 %v9975_v21  ;;  %v13626_v8 = vunpack.c.l.bf16 %v9978_v34 }
 0x248   : > { %v1562_v4 = vrot.slane %v9989_v38, %v13512_v55  ;;  %v3095_v57 = vadd.f32 %v3063_v20, %v2807_v24  ;;  %v1769_v18 = vsub.f32 1.0, %v10294_v22  ;;  %v1785_v21 = vsub.f32 1.0, %v10296_v19 }
 0x249   : > { %v1402_v27 = vrot.slane %v13624_v26, %v13511_v36  ;;  %v3863_v33 = vmul.f32 %v13625_v41, %v10289_v54  ;;  %v3879_v43 = vmul.f32 %v13626_v8, %v10291_v10  ;;  %v3111_v31 = vadd.f32 %v3079_v48, %v2823_v28 }
 0x24a   : > { %v1642_v37 = vrot.slane %v1562_v4, %v13512_v55  ;;  %v1084_v2 = vrot.slane %v10303_v45, %v13514_v63  ;;  %v3351_v34 = vadd.f32 %v3319_v7, %v3095_v57  ;;  %v1334_v38 = vrot.slane %v10303_v45, %v13515_v11 }
 0x24b   : > { %v1433_v15 = vmul.f32 %v1402_v27, %v13234_v23  ;;  %v1449_v25 = vmul.f32 %v1402_v27, %v8909_v3  ;;  %v3367_v35 = vadd.f32 %v3335_v50, %v3111_v31 }
 0x24c   : > { %v1673_v20 = vmul.f32 %v1642_v37, %v13234_v23  ;;  %v1689_v12 = vmul.f32 %v1642_v37, %v8909_v3  ;;  %v1164_v48 = vrot.slane %v1084_v2, %v13509_v52  ;;  %v3639_v5 = vadd.f32 %v3607_v53, %v3351_v34 }
 0x24d   : > { %v1465_v62 = vfloor.f32 %v1433_v15  ;;  %v1481_v0 = vfloor.f32 %v1449_v25  ;;  %v10326_v24 = vrot.slane %v1334_v38, %v13511_v36  ;;  %v3655_v26 = vadd.f32 %v3623_v16, %v3367_v35 }
 0x24e   : > { %v1705_v7 = vfloor.f32 %v1673_v20  ;;  %v1721_v27 = vfloor.f32 %v1689_v12  ;;  %v10329_v28 = vmul.f32 %v13234_v23, %v1164_v48  ;;  %v3895_v41 = vadd.f32 %v3863_v33, %v3639_v5 }
 0x24f   : > { %v1497_v29 = vsub.f32 %v1433_v15, %v1465_v62  ;;  %v1513_v51 = vsub.f32 %v1449_v25, %v1481_v0  ;;  %v3911_v57 = vadd.f32 %v3879_v43, %v3655_v26  ;;  %v13636_v26 = vunpack.c.l.bf16 %v10022_v6 }
 0x250   : > { %v1737_v31 = vsub.f32 %v1673_v20, %v1705_v7  ;;  %v1753_v37 = vsub.f32 %v1689_v12, %v1721_v27  ;;  %v13637_v27 = vunpack.c.l.bf16 %v10034_v13 }
 0x251   : > { %v1801_v50 = vsub.f32 1.0, %v1497_v29  ;;  %v1817_v8 = vsub.f32 1.0, %v1513_v51  ;;  %v2409_v4 = vmul.f32 %v1769_v18, %v1497_v29  ;;  %v2425_v2 = vmul.f32 %v1785_v21, %v1513_v51 }
 0x252   : > { %v7293_v16 = vpack.c.bf16 %v3911_v57, %v3895_v41  ;;  %v1833_v62 = vsub.f32 1.0, %v1737_v31  ;;  %v1849_v0 = vsub.f32 1.0, %v1753_v37  ;;  %v13639_v57 = vunpack.c.l.bf16 %v10092_v58 }
 0x253   : > { %v1865_v53 = vmul.f32 %v1801_v50, %v1769_v18  ;;  %v1881_v15 = vmul.f32 %v1817_v8, %v1785_v21  ;;  %v2953_v25 = vmul.f32 %v1801_v50, %v10294_v22  ;;  %v2969_v34 = vmul.f32 %v1817_v8, %v10296_v19 }
 0x254   : > { %v10333_v38 = vmul.f32 %v2409_v4, %v1737_v31  ;;  %v10339_v5 = vmul.f32 %v2425_v2, %v1753_v37  ;;  %7294 = vmatpush1.bf16.msra.mxu0 %v7293_v16  ;;  %v10347_v20 = vmul.f32 %v2409_v4, %v1833_v62  ;;  %v10349_v12 = vmul.f32 %v2425_v2, %v1849_v0  ;;  %v13640_v4 = vld [vmem:[#allocation154_spill] sm:$0xff]  ;;  %v13642_v16 = vld [vmem:[#allocation155_spill] sm:$0xff] }
 0x255   : > { %v10335_v35 = vmul.f32 %v1865_v53, %v1737_v31  ;;  %v10337_v33 = vmul.f32 %v1881_v15, %v1753_v37  ;;  %v10341_v43 = vmul.f32 %v2953_v25, %v1737_v31  ;;  %v10343_v18 = vmul.f32 %v1865_v53, %v1833_v62 }
 0x256   : > { %13627 = vst [vmem:[#allocation195_spill] sm:$0xff] %v10333_v38  ;;  %13630 = vst [vmem:[#allocation198_spill] sm:$0xff] %v10339_v5  ;;  %v10345_v21 = vmul.f32 %v1881_v15, %v1849_v0  ;;  %v13638_v50 = vunpack.c.l.bf16 %v10063_v32  ;;  %v2793_v53 = vmul.f32 %v13639_v57, %v10339_v5  ;;  %v13641_v2 = vunpack.c.l.bf16 %v13640_v4 }
 0x257   : > { %13628 = vst [vmem:[#allocation196_spill] sm:$0xff] %v10335_v35  ;;  %13629 = vst [vmem:[#allocation197_spill] sm:$0xff] %v10337_v33  ;;  %v2233_v7 = vmul.f32 %v13636_v26, %v10335_v35  ;;  %v2249_v41 = vmul.f32 %v13637_v27, %v10337_v33  ;;  %v13643_v6 = vunpack.c.l.bf16 %v13642_v16  ;;  %v13644_v35 = vld [vmem:[#allocation156_spill] sm:$0xff]  ;;  %v13646_v33 = vld [vmem:[#allocation157_spill] sm:$0xff]  ;;  %v10377_v58 = vmul.f32 %v2969_v34, %v1849_v0 }
 0x258   : > { %13631 = vst [vmem:[#allocation199_spill] sm:$0xff] %v10341_v43  ;;  %13632 = vst [vmem:[#allocation200_spill] sm:$0xff] %v10343_v18  ;;  %v2777_v8 = vmul.f32 %v13638_v50, %v10333_v38  ;;  %v1977_v15 = vmul.f32 %v13641_v2, %v10343_v18  ;;  %v13645_v13 = vunpack.c.l.bf16 %v13644_v35  ;;  %v13647_v32 = vunpack.c.l.bf16 %v13646_v33  ;;  %v10387_v16 = vld [vmem:[%s12661_s4] sm:$0xff] }
 0x259   : > { %13633 = vst [vmem:[#allocation201_spill] sm:$0xff] %v10345_v21  ;;  %13634 = vst [vmem:[#allocation202_spill] sm:$0xff] %v10347_v20  ;;  %v1993_v26 = vmul.f32 %v13643_v6, %v10345_v21  ;;  %v10375_v38 = vmul.f32 %v2953_v25, %v1833_v62  ;;  %v10379_v57 = vmul.f32 %v2969_v34, %v1753_v37  ;;  %v13651_v4 = vunpack.c.l.bf16 %v10127_v40 }
 0x25a   : > { %13635 = vst [vmem:[#allocation203_spill] sm:$0xff] %v10349_v12  ;;  %v2521_v27 = vmul.f32 %v13645_v13, %v10347_v20  ;;  %v2537_v50 = vmul.f32 %v13647_v32, %v10349_v12  ;;  %13649 = vst [vmem:[#allocation155_spill] sm:$0xff] %v10377_v58  ;;  %7207 = vmatmul.mubr.msk.f32.vlgmr.msra.gmra.mrb[16].mxu0 %vm4059_vm0, %v10387_v16  ;;  %v2265_v35 = vadd.f32 %v2233_v7, %v1977_v15  ;;  %v13653_v34 = vmov 0.0  }
 0x25b   : > { %13648 = vst [vmem:[#allocation154_spill] sm:$0xff] %v10375_v38  ;;  %13650 = vst [vmem:[#allocation156_spill] sm:$0xff] %v10379_v57  ;;  %v3321_v2 = vmul.f32 %v13651_v4, %v10341_v43  ;;  %v2281_v33 = vadd.f32 %v2249_v41, %v1993_v26  ;;  %v3497_v25 = vmul.f32 %v1497_v29, %v10294_v22  ;;  %4498 = vmatprep.mubr.f32.mxu0 %v13653_v34  ;;  %v13656_v43 = vld [vmem:[#allocation168_spill] sm:$0xff] }
 0x25c   : > { %13652 = vst [vmem:[#allocation157_spill] sm:$0xff] %v10387_v16  ;;  %v3513_v6 = vmul.f32 %v1513_v51, %v10296_v19  ;;  %v13654_v40 = vunpack.c.l.bf16 %v10111_v9  ;;  %v13655_v32 = vunpack.c.l.bf16 %v10118_v44  ;;  %v13657_v5 = vunpack.c.l.bf16 %v13656_v43 }
 0x25d   : > { %v1212_v7 = vmul.f32 %v8909_v3, %v1164_v48  ;;  %v2553_v22 = vadd.f32 %v2521_v27, %v2265_v35  ;;  %v2569_v29 = vadd.f32 %v2537_v50, %v2281_v33  ;;  %v10404_v19 = vmul.f32 %v3497_v25, %v1833_v62  ;;  %v10427_v50 = vld [vmem:[%s8326_s25 + $0x30] sm:$0xff]  ;;  %v13667_v35 = vld [vmem:[#allocation173_spill] sm:$0xff] }
 0x25e   : > { %v3065_v13 = vmul.f32 %v13654_v40, %v10375_v38  ;;  %v3081_v4 = vmul.f32 %v13655_v32, %v10377_v58  ;;  %v3337_v12 = vmul.f32 %v13657_v5, %v10379_v57  ;;  %v10406_v51 = vmul.f32 %v3513_v6, %v1849_v0  ;;  %v10416_v5 = vld [vmem:[%s12661_s4 + $0x8] sm:$0xff]  ;;  %v10498_v57 = vld [vmem:[%s8326_s25 + $0x1b0] sm:$0xff] }
 0x25f   : > { %13658 = vst [vmem:[#allocation168_spill] sm:$0xff] %v10404_v19  ;;  %v10408_v41 = vmul.f32 %v3497_v25, %v1737_v31  ;;  %v10410_v9 = vmul.f32 %v3513_v6, %v1753_v37  ;;  %v1228_v44 = vfloor.f32 %v10329_v28  ;;  %v1244_v15 = vfloor.f32 %v1212_v7  ;;  %13662 = vst [vmem:[#allocation207_spill] sm:$0xff] %v10416_v5  ;;  %7208 = vmatmul.mubr.msk.f32.gmra.mrb[18].mxu0 %vm4059_vm0, %v10416_v5  ;;  %v13663_v0 = vld [vmem:[#allocation171_spill] sm:$0xff]  ;;  %v13665_v37 = vld [vmem:[#allocation172_spill] sm:$0xff] }
 0x260   : > { %13659 = vst [vmem:[#allocation204_spill] sm:$0xff] %v10406_v51  ;;  %v2809_v48 = vadd.f32 %v2777_v8, %v2553_v22  ;;  %v2825_v62 = vadd.f32 %v2793_v53, %v2569_v29  ;;  %v13664_v31 = vunpack.c.l.bf16 %v13663_v0  ;;  %v13666_v26 = vunpack.c.l.bf16 %v13665_v37  ;;  %4504 = vmatprep.mubr.f32.mxu0 %v13653_v34  ;;  %v13669_v6 = vld [vmem:[#allocation174_spill] sm:$0xff]  ;;  %v10446_v37 = vld [vmem:[%s8326_s25 + $0x70] sm:$0xff] }
 0x261   : > { %13660 = vst [vmem:[#allocation205_spill] sm:$0xff] %v10408_v41  ;;  %13661 = vst [vmem:[#allocation206_spill] sm:$0xff] %v10410_v9  ;;  %v13668_v33 = vunpack.c.l.bf16 %v13667_v35  ;;  %v13670_v8 = vunpack.c.l.bf16 %v13669_v6  ;;  %v10437_v40 = vsub.f32 %v10329_v28, %v1228_v44  ;;  %v10439_v32 = vsub.f32 %v1212_v7, %v1244_v15 }
 0x262   : > { %v3609_v43 = vmul.f32 %v13664_v31, %v10404_v19  ;;  %v3625_v27 = vmul.f32 %v13666_v26, %v10406_v51  ;;  %v3097_v22 = vadd.f32 %v3065_v13, %v2809_v48  ;;  %v3113_v29 = vadd.f32 %v3081_v4, %v2825_v62  ;;  %v13671_v26 = vld [vmem:[#allocation9_spill] sm:$0xff]  ;;  %v10456_v13 = vld [vmem:[%s12661_s4 + $0x10] sm:$0xff] }
 0x263   : > { %v3865_v25 = vmul.f32 %v13668_v33, %v10408_v41  ;;  %v3881_v53 = vmul.f32 %v13670_v8, %v10410_v9  ;;  %v1436_v0 = vmul.f32 %v10326_v24, %v13234_v23  ;;  %v1452_v31 = vmul.f32 %v10326_v24, %v8909_v3  ;;  %13672 = vst [vmem:[#allocation171_spill] sm:$0xff] %v10456_v13  ;;  %v10461_v48 = vld [vmem:[%s8326_s25 + $0xb0] sm:$0xff] }
 0x264   : > { %v1574_v35 = vrot.slane %v10303_v45, %v13671_v26  ;;  %v1772_v33 = vsub.f32 1.0, %v10437_v40  ;;  %v1788_v28 = vsub.f32 1.0, %v10439_v32  ;;  %7209 = vmatmul.mubr.msk.f32.gmra.mrb[20].mxu0 %vm4059_vm0, %v10456_v13  ;;  %v3353_v24 = vadd.f32 %v3321_v2, %v3097_v22  ;;  %v10473_v2 = vld [vmem:[%s8326_s25 + $0xf0] sm:$0xff] }
 0x265   : > { %v3369_v4 = vadd.f32 %v3337_v12, %v3113_v29  ;;  %v1468_v44 = vfloor.f32 %v1436_v0  ;;  %v1484_v15 = vfloor.f32 %v1452_v31  ;;  %4510 = vmatprep.mubr.f32.mxu0 %v13653_v34  ;;  %v1948_v6 = vunpack.c.h.bf16 %v10427_v50  ;;  %v10495_v19 = vld [vmem:[%s8326_s25 + $0x170] sm:$0xff] }
 0x266   : > { %v1654_v62 = vrot.slane %v1574_v35, %v13512_v55  ;;  %v1964_v7 = vunpack.c.h.bf16 %v10446_v37  ;;  %v3641_v9 = vadd.f32 %v3609_v43, %v3353_v24  ;;  %v2204_v8 = vunpack.c.h.bf16 %v10461_v48  ;;  %v10482_v43 = vld [vmem:[%s12661_s4 + $0x18] sm:$0xff] }
 0x267   : > { %v3657_v41 = vadd.f32 %v3625_v27, %v3369_v4  ;;  %v10468_v51 = vsub.f32 %v1436_v0, %v1468_v44  ;;  %v10470_v12 = vsub.f32 %v1452_v31, %v1484_v15  ;;  %13673 = vst [vmem:[#allocation172_spill] sm:$0xff] %v10482_v43  ;;  %v10489_v4 = vld [vmem:[%s8326_s25 + $0x130] sm:$0xff]  ;;  %v2220_v35 = vunpack.c.h.bf16 %v10473_v2 }
 0x268   : > { %v1676_v22 = vmul.f32 %v1654_v62, %v13234_v23  ;;  %v1692_v29 = vmul.f32 %v1654_v62, %v8909_v3  ;;  %7210 = vmatmul.mubr.msk.f32.gmra.mrb[22].mxu0 %vm4059_vm0, %v10482_v43  ;;  %v3897_v27 = vadd.f32 %v3865_v25, %v3641_v9  ;;  %v10508_v62 = vld [vmem:[%s8326_s25 + $0x1f0] sm:$0xff]  ;;  %v2492_v10 = vunpack.c.h.bf16 %v10489_v4 }
 0x269   : > { %v3913_v0 = vadd.f32 %v3881_v53, %v3657_v41  ;;  %v1804_v31 = vsub.f32 1.0, %v10468_v51  ;;  %v1820_v24 = vsub.f32 1.0, %v10470_v12  ;;  %4670 = vmatprep.mubr.f32.mxu0 %v13653_v34  ;;  %v2412_v53 = vmul.f32 %v1772_v33, %v10468_v51 }
 0x26a   : > { %v1708_v44 = vfloor.f32 %v1676_v22  ;;  %v1724_v15 = vfloor.f32 %v1692_v29  ;;  %v2428_v20 = vmul.f32 %v1788_v28, %v10470_v12 }
 0x26b   : > { %v7297_v41 = vpack.c.bf16 %v3913_v0, %v3897_v27  ;;  %v1868_v9 = vmul.f32 %v1804_v31, %v1772_v33  ;;  %v1884_v25 = vmul.f32 %v1820_v24, %v1788_v28  ;;  %v2508_v0 = vunpack.c.h.bf16 %v10495_v19 }
 0x26c   : > { %v10501_v58 = vsub.f32 %v1676_v22, %v1708_v44  ;;  %v10503_v38 = vsub.f32 %v1692_v29, %v1724_v15  ;;  %v2748_v33 = vunpack.c.h.bf16 %v10498_v57 }
 0x26d   : > { %7298 = vmatpush1.bf16.msra.mxu1 %v7297_v41 }
 0x26e   : > { %v10515_v22 = vsub.f32 1.0, %v10501_v58  ;;  %v10518_v29 = vsub.f32 1.0, %v10503_v38  ;;  %v10521_v28 = vmul.f32 %v1868_v9, %v10501_v58  ;;  %v10524_v44 = vmul.f32 %v1884_v25, %v10503_v38 }
 0x26f   : > { %v10527_v15 = vmul.f32 %v2412_v53, %v10501_v58  ;;  %v10530_v41 = vmul.f32 %v2428_v20, %v10503_v38 }
 0x270   : > { %13674 = vst [vmem:[#allocation173_spill] sm:$0xff] %v10521_v28  ;;  %13675 = vst [vmem:[#allocation174_spill] sm:$0xff] %v10524_v44  ;;  %v10535_v21 = vmul.f32 %v1868_v9, %v10515_v22  ;;  %v10538_v18 = vmul.f32 %v1884_v25, %v10518_v29  ;;  %v2236_v54 = vmul.f32 %v2204_v8, %v10521_v28  ;;  %7211 = vmatmul.mubr.msk.f32.vlgmr.msra.gmra.mrb[16].mxu1 %vm4059_vm0, %v10387_v16  ;;  %v10754_v16 = vld [vmem:[%s8326_s25 + $0x238] sm:$0xff] }
 0x271   : > { %13676 = vst [vmem:[#allocation9_spill] sm:$0xff] %v10527_v15  ;;  %13677 = vst [vmem:[#allocation208_spill] sm:$0xff] %v10530_v41  ;;  %v2252_v46 = vmul.f32 %v2220_v35, %v10524_v44  ;;  %v10548_v1 = vmul.f32 %v2412_v53, %v10515_v22  ;;  %v10551_v27 = vmul.f32 %v2428_v20, %v10518_v29  ;;  %v2764_v9 = vunpack.c.h.bf16 %v10508_v62  ;;  %v10561_v53 = vld [vmem:[%s8326_s25 + $0x270] sm:$0xff] }
 0x272   : > { %13678 = vst [vmem:[#allocation209_spill] sm:$0xff] %v10535_v21  ;;  %13679 = vst [vmem:[#allocation210_spill] sm:$0xff] %v10538_v18  ;;  %v2780_v25 = vmul.f32 %v2748_v33, %v10527_v15  ;;  %4587 = vmatprep.mubr.f32.mxu1 %v13653_v34  ;;  %v1980_v8 = vmul.f32 %v1948_v6, %v10535_v21  ;;  %v1996_v35 = vmul.f32 %v1964_v7, %v10538_v18  ;;  %v10568_v15 = vld [vmem:[%s8326_s25 + $0x2b0] sm:$0xff] }
 0x273   : > { %13680 = vst [vmem:[#allocation211_spill] sm:$0xff] %v10548_v1  ;;  %13681 = vst [vmem:[#allocation212_spill] sm:$0xff] %v10551_v27  ;;  %v2956_v44 = vmul.f32 %v1804_v31, %v10437_v40  ;;  %v2972_v28 = vmul.f32 %v1820_v24, %v10439_v32  ;;  %v2524_v20 = vmul.f32 %v2492_v10, %v10548_v1  ;;  %v10577_v24 = vld [vmem:[%s8326_s25 + $0x2f0] sm:$0xff]  ;;  %v3036_v10 = vunpack.c.h.bf16 %v10543_v60 }
 0x274   : > { %v2540_v30 = vmul.f32 %v2508_v0, %v10551_v27  ;;  %v2796_v59 = vmul.f32 %v2764_v9, %v10530_v41  ;;  %v2268_v6 = vadd.f32 %v2236_v54, %v1980_v8  ;;  %v2284_v21 = vadd.f32 %v2252_v46, %v1996_v35  ;;  %7212 = vmatmul.mubr.msk.f32.gmra.mrb[18].mxu1 %vm4059_vm0, %v10416_v5  ;;  %v10593_v41 = vld [vmem:[%s8326_s25 + $0x330] sm:$0xff] }
 0x275   : > { %v10571_v7 = vmul.f32 %v2956_v44, %v10515_v22  ;;  %v10574_v31 = vmul.f32 %v2972_v28, %v10518_v29  ;;  %v3052_v9 = vunpack.c.h.bf16 %v10561_v53  ;;  %v10585_v46 = vmul.f32 %v2956_v44, %v10501_v58  ;;  %4593 = vmatprep.mubr.f32.mxu1 %v13653_v34 }
 0x276   : > { %v2556_v54 = vadd.f32 %v2524_v20, %v2268_v6  ;;  %v2572_v8 = vadd.f32 %v2540_v30, %v2284_v21  ;;  %v10589_v35 = vmul.f32 %v2972_v28, %v10503_v38  ;;  %v3292_v1 = vunpack.c.h.bf16 %v10568_v15  ;;  %v10603_v28 = vld [vmem:[%s8326_s25 + $0x370] sm:$0xff] }
 0x277   : > { %13682 = vst [vmem:[#allocation213_spill] sm:$0xff] %v10571_v7  ;;  %13683 = vst [vmem:[#allocation214_spill] sm:$0xff] %v10574_v31  ;;  %v3068_v27 = vmul.f32 %v3036_v10, %v10571_v7  ;;  %v3084_v0 = vmul.f32 %v3052_v9, %v10574_v31  ;;  %v3308_v30 = vunpack.c.h.bf16 %v10577_v24  ;;  %v3500_v21 = vmul.f32 %v10468_v51, %v10437_v40 }
 0x278   : > { %13684 = vst [vmem:[#allocation215_spill] sm:$0xff] %v10585_v46  ;;  %13685 = vst [vmem:[#allocation216_spill] sm:$0xff] %v10589_v35  ;;  %v2812_v18 = vadd.f32 %v2780_v25, %v2556_v54  ;;  %v2828_v20 = vadd.f32 %v2796_v59, %v2572_v8  ;;  %7213 = vmatmul.mubr.msk.f32.gmra.mrb[20].mxu1 %vm4059_vm0, %v10456_v13  ;;  %v3324_v6 = vmul.f32 %v3292_v1, %v10585_v46  ;;  %v10618_v8 = vld [vmem:[%s8326_s25 + $0x3b0] sm:$0xff] }
 0x279   : > { %v3516_v10 = vmul.f32 %v10470_v12, %v10439_v32  ;;  %v3580_v59 = vunpack.c.h.bf16 %v10593_v41  ;;  %4599 = vmatprep.mubr.f32.mxu1 %v13653_v34  ;;  %v3340_v40 = vmul.f32 %v3308_v30, %v10589_v35  ;;  %v10615_v54 = vmul.f32 %v3500_v21, %v10515_v22  ;;  %v10621_v1 = vld [vmem:[%s8326_s25 + $0x3f0] sm:$0xff]  ;;  %v10639_v30 = vld [vmem:[%s8326_s25 + $0x38] sm:$0xff] }
 0x27a   : > { %v3100_v9 = vadd.f32 %v3068_v27, %v2812_v18  ;;  %v3116_v51 = vadd.f32 %v3084_v0, %v2828_v20  ;;  %v3596_v44 = vunpack.c.h.bf16 %v10603_v28  ;;  %v10629_v33 = vmul.f32 %v3500_v21, %v10501_v58  ;;  %v10632_v18 = vld [vmem:[%s8298_s15 + $0x38] sm:$0x77] }
 0x27b   : > { %13686 = vst [vmem:[#allocation217_spill] sm:$0xff] %v10615_v54  ;;  %v10624_v32 = vmul.f32 %v3516_v10, %v10518_v29  ;;  %v3612_v0 = vmul.f32 %v3580_v59, %v10615_v54  ;;  %v10636_v20 = vmul.f32 %v3516_v10, %v10503_v38  ;;  %v3836_v21 = vunpack.c.h.bf16 %v10618_v8 }
 0x27c   : > { %13688 = vst [vmem:[#allocation219_spill] sm:$0xff] %v10629_v33  ;;  %v3356_v27 = vadd.f32 %v3324_v6, %v3100_v9  ;;  %v3372_v22 = vadd.f32 %v3340_v40, %v3116_v51  ;;  %7214 = vmatmul.mubr.msk.f32.gmra.mrb[22].mxu1 %vm4059_vm0, %v10482_v43  ;;  %v3852_v38 = vunpack.c.h.bf16 %v10621_v1  ;;  %v1092_v10 = vrot.slane %v10632_v18, %v13514_v63  ;;  %v10654_v51 = vld [vmem:[%s8326_s25 + $0x78] sm:$0xff] }
 0x27d   : > { %13687 = vst [vmem:[#allocation218_spill] sm:$0xff] %v10624_v32  ;;  %13689 = vst [vmem:[#allocation220_spill] sm:$0xff] %v10636_v20  ;;  %v3628_v29 = vmul.f32 %v3596_v44, %v10624_v32  ;;  %4759 = vmatprep.mubr.f32.mxu1 %v13653_v34  ;;  %v1342_v9 = vrot.slane %v10632_v18, %v13515_v11  ;;  %v3868_v40 = vmul.f32 %v3836_v21, %v10629_v33  ;;  %v10665_v11 = vld [vmem:[%s8326_s25 + $0xb8] sm:$0xff] }
 0x27e   : > { %v3644_v59 = vadd.f32 %v3612_v0, %v3356_v27  ;;  %v1582_v58 = vrot.slane %v10632_v18, %v13671_v26  ;;  %v3884_v27 = vmul.f32 %v3852_v38, %v10636_v20  ;;  %v1172_v0 = vrot.slane %v1092_v10, %v13509_v52 }
 0x27f   : > { %v3660_v44 = vadd.f32 %v3628_v29, %v3372_v22  ;;  %v1422_v63 = vrot.slane %v1342_v9, %v13511_v36  ;;  %v1950_v12 = vunpack.c.h.bf16 %v10639_v30  ;;  %v1966_v26 = vunpack.c.h.bf16 %v10654_v51 }
 0x280   : > { %v3900_v25 = vadd.f32 %v3868_v40, %v3644_v59  ;;  %v1662_v22 = vrot.slane %v1582_v58, %v13512_v55  ;;  %v1198_v6 = vmul.f32 %v13234_v23, %v1172_v0  ;;  %v1214_v38 = vmul.f32 %v8909_v3, %v1172_v0  ;;  %v10677_v40 = vld [vmem:[%s8326_s25 + $0xf8] sm:$0xff] }
 0x281   : > { %v3916_v21 = vadd.f32 %v3884_v27, %v3660_v44  ;;  %v1438_v10 = vmul.f32 %v1422_v63, %v13234_v23  ;;  %v1454_v9 = vmul.f32 %v1422_v63, %v8909_v3  ;;  %v2206_v35 = vunpack.c.h.bf16 %v10665_v11  ;;  %v10682_v63 = vld [vmem:[%s8326_s25 + $0x138] sm:$0xff] }
 0x282   : > { %v1678_v20 = vmul.f32 %v1662_v22, %v13234_v23  ;;  %v1694_v59 = vmul.f32 %v1662_v22, %v8909_v3  ;;  %v1230_v33 = vfloor.f32 %v1198_v6  ;;  %v1246_v44 = vfloor.f32 %v1214_v38  ;;  %13690 = vst [vmem:[#allocation221_spill] sm:$0xff] %v10682_v63 }
 0x283   : > { %v7299_v29 = vpack.c.bf16 %v3916_v21, %v3900_v25  ;;  %v1470_v27 = vfloor.f32 %v1438_v10  ;;  %v1486_v32 = vfloor.f32 %v1454_v9  ;;  %v2222_v17 = vunpack.c.h.bf16 %v10677_v40 }
 0x284   : > { %v1710_v54 = vfloor.f32 %v1678_v20  ;;  %v1726_v0 = vfloor.f32 %v1694_v59  ;;  %v10684_v46 = vsub.f32 %v1198_v6, %v1230_v33  ;;  %v10686_v22 = vsub.f32 %v1214_v38, %v1246_v44 }
 0x285   : > { %7300 = vmatprep.subr.bf16.mxu0 %v7299_v29  ;;  %v10688_v31 = vsub.f32 %v1438_v10, %v1470_v27  ;;  %v10691_v21 = vsub.f32 %v1454_v9, %v1486_v32  ;;  %v10706_v10 = vld [vmem:[%s8326_s25 + $0x1b8] sm:$0xff]  ;;  %v2494_v9 = vunpack.c.h.bf16 %v10682_v63  ;;  %v2510_v25 = vunpack.c.h.bf16 %v10699_v47 }
 0x286   : > { %v10693_v58 = vsub.f32 %v1678_v20, %v1710_v54  ;;  %v10695_v7 = vsub.f32 %v1694_v59, %v1726_v0  ;;  %v1774_v29 = vsub.f32 1.0, %v10684_v46  ;;  %v1790_v33 = vsub.f32 1.0, %v10686_v22  ;;  %v10761_v63 = vld [vmem:[%s8326_s25 + $0x278] sm:$0xff] }
 0x287   : > { %v1806_v6 = vsub.f32 1.0, %v10688_v31  ;;  %v1822_v32 = vsub.f32 1.0, %v10691_v21  ;;  %v2750_v56 = vunpack.c.h.bf16 %v10706_v10 }
 0x288   : > { %v10710_v54 = vsub.f32 1.0, %v10693_v58  ;;  %v10713_v20 = vsub.f32 1.0, %v10695_v7  ;;  %v2414_v44 = vmul.f32 %v1774_v29, %v10688_v31  ;;  %v2430_v27 = vmul.f32 %v1790_v33, %v10691_v21 }
 0x289   : > { %v1870_v59 = vmul.f32 %v1806_v6, %v1774_v29  ;;  %v1886_v38 = vmul.f32 %v1822_v32, %v1790_v33  ;;  %v10735_v33 = vld [vmem:[%s8326_s25 + $0x1f8] sm:$0xff] }
 0x28a   : > { %v10729_v29 = vmul.f32 %v2414_v44, %v10710_v54  ;;  %v10732_v0 = vmul.f32 %v2430_v27, %v10713_v20  ;;  %v10744_v61 = vmul.f32 %v2414_v44, %v10693_v58  ;;  %v10770_v44 = vld [vmem:[%s8326_s25 + $0x2b8] sm:$0xff] }
 0x28b   : > { %v10723_v14 = vmul.f32 %v1870_v59, %v10710_v54  ;;  %v10726_v42 = vmul.f32 %v1870_v59, %v10693_v58  ;;  %v10738_v49 = vmul.f32 %v1886_v38, %v10713_v20  ;;  %v10741_v39 = vmul.f32 %v1886_v38, %v10695_v7 }
 0x28c   : > { %13694 = vst [vmem:[#allocation225_spill] sm:$0xff] %v10729_v29  ;;  %13695 = vst [vmem:[#allocation226_spill] sm:$0xff] %v10732_v0  ;;  %v10747_v59 = vmul.f32 %v2430_v27, %v10695_v7  ;;  %v2526_v5 = vmul.f32 %v2494_v9, %v10729_v29  ;;  %v2542_v34 = vmul.f32 %v2510_v25, %v10732_v0  ;;  %v2766_v27 = vunpack.c.h.bf16 %v10735_v33 }
 0x28d   : > { %13692 = vst [vmem:[#allocation223_spill] sm:$0xff] %v10723_v14  ;;  %13693 = vst [vmem:[#allocation224_spill] sm:$0xff] %v10726_v42  ;;  %v1982_v43 = vmul.f32 %v1950_v12, %v10723_v14  ;;  %v2238_v13 = vmul.f32 %v2206_v35, %v10726_v42  ;;  %v1998_v38 = vmul.f32 %v1966_v26, %v10738_v49  ;;  %v3294_v26 = vunpack.c.h.bf16 %v10770_v44 }
 0x28e   : > { %13696 = vst [vmem:[#allocation227_spill] sm:$0xff] %v10738_v49  ;;  %13697 = vst [vmem:[#allocation228_spill] sm:$0xff] %v10741_v39  ;;  %v2254_v47 = vmul.f32 %v2222_v17, %v10741_v39  ;;  %v2782_v35 = vmul.f32 %v2750_v56, %v10744_v61  ;;  %v2958_v9 = vmul.f32 %v1806_v6, %v10684_v46  ;;  %v3038_v17 = vunpack.c.h.bf16 %v10754_v16 }
 0x28f   : > { %13698 = vst [vmem:[#allocation229_spill] sm:$0xff] %v10744_v61  ;;  %13699 = vst [vmem:[#allocation230_spill] sm:$0xff] %v10747_v59  ;;  %v2270_v12 = vadd.f32 %v2238_v13, %v1982_v43  ;;  %v2974_v25 = vmul.f32 %v1822_v32, %v10686_v22  ;;  %v2798_v29 = vmul.f32 %v2766_v27, %v10747_v59  ;;  %v3054_v6 = vunpack.c.h.bf16 %v10761_v63  ;;  %v10793_v13 = vld [vmem:[%s8326_s25 + $0x338] sm:$0xff] }
 0x290   : > { %v2286_v0 = vadd.f32 %v2254_v47, %v1998_v38  ;;  %v10773_v42 = vmul.f32 %v2958_v9, %v10710_v54  ;;  %v10780_v47 = vld [vmem:[%s8326_s25 + $0x2f8] sm:$0xff]  ;;  %v10784_v32 = vmul.f32 %v2958_v9, %v10693_v58  ;;  %13704 = vst [vmem:[#allocation235_spill] sm:$0xff] %v10793_v13 }
 0x291   : > { %v2558_v39 = vadd.f32 %v2526_v5, %v2270_v12  ;;  %v10776_v56 = vmul.f32 %v2974_v25, %v10713_v20  ;;  %v10787_v38 = vmul.f32 %v2974_v25, %v10695_v7  ;;  %v3310_v59 = vunpack.c.h.bf16 %v10780_v47  ;;  %v10799_v25 = vld [vmem:[%s8326_s25 + $0x378] sm:$0xff] }
 0x292   : > { %13700 = vst [vmem:[#allocation231_spill] sm:$0xff] %v10773_v42  ;;  %v2574_v43 = vadd.f32 %v2542_v34, %v2286_v0  ;;  %13702 = vst [vmem:[#allocation233_spill] sm:$0xff] %v10784_v32  ;;  %v3070_v27 = vmul.f32 %v3038_v17, %v10773_v42  ;;  %v3502_v17 = vmul.f32 %v10688_v31, %v10684_v46  ;;  %v10810_v9 = vld [vmem:[%s8326_s25 + $0x3b8] sm:$0xff] }
 0x293   : > { %13701 = vst [vmem:[#allocation232_spill] sm:$0xff] %v10776_v56  ;;  %13703 = vst [vmem:[#allocation234_spill] sm:$0xff] %v10787_v38  ;;  %v2814_v5 = vadd.f32 %v2782_v35, %v2558_v39  ;;  %v3086_v0 = vmul.f32 %v3054_v6, %v10776_v56  ;;  %v3326_v35 = vmul.f32 %v3294_v26, %v10784_v32  ;;  %v3582_v6 = vunpack.c.h.bf16 %v10793_v13  ;;  %v10813_v56 = vld [vmem:[%s8326_s25 + $0x3f8] sm:$0xff] }
 0x294   : > { %v2830_v34 = vadd.f32 %v2798_v29, %v2574_v43  ;;  %13705 = vst [vmem:[#allocation236_spill] sm:$0xff] %v10799_v25  ;;  %v3518_v12 = vmul.f32 %v10691_v21, %v10686_v22  ;;  %v3342_v29 = vmul.f32 %v3310_v59, %v10787_v38  ;;  %13706 = vst [vmem:[#allocation237_spill] sm:$0xff] %v10810_v9  ;;  %v3598_v21 = vunpack.c.h.bf16 %v10799_v25 }
 0x295   : > { %v3102_v39 = vadd.f32 %v3070_v27, %v2814_v5  ;;  %13707 = vst [vmem:[#allocation238_spill] sm:$0xff] %v10813_v56  ;;  %v10816_v26 = vmul.f32 %v3502_v17, %v10710_v54  ;;  %v10824_v59 = vmul.f32 %v3502_v17, %v10693_v58  ;;  %v3838_v54 = vunpack.c.h.bf16 %v10810_v9 }
 0x296   : > { %v3118_v42 = vadd.f32 %v3086_v0, %v2830_v34  ;;  %v10819_v31 = vmul.f32 %v3518_v12, %v10713_v20  ;;  %v10827_v27 = vmul.f32 %v3518_v12, %v10695_v7  ;;  %v1330_v58 = vrot.slane %v10303_v45, %v13511_v36 }
 0x297   : > { %v3358_v5 = vadd.f32 %v3326_v35, %v3102_v39  ;;  %13708 = vst [vmem:[#allocation239_spill] sm:$0xff] %v10816_v26  ;;  %13710 = vst [vmem:[#allocation241_spill] sm:$0xff] %v10824_v59  ;;  %v3614_v34 = vmul.f32 %v3582_v6, %v10816_v26  ;;  %v1080_v35 = vrot.slane %v10303_v45, %v13509_v52 }
 0x298   : > { %13709 = vst [vmem:[#allocation240_spill] sm:$0xff] %v10819_v31  ;;  %v3374_v22 = vadd.f32 %v3342_v29, %v3118_v42  ;;  %13711 = vst [vmem:[#allocation242_spill] sm:$0xff] %v10827_v27  ;;  %v3630_v39 = vmul.f32 %v3598_v21, %v10819_v31  ;;  %v3854_v42 = vunpack.c.h.bf16 %v10813_v56  ;;  %v3870_v12 = vmul.f32 %v3838_v54, %v10824_v59 }
 0x299   : > { %v3646_v7 = vadd.f32 %v3614_v34, %v3358_v5  ;;  %v1570_v17 = vrot.slane %v10303_v45, %v13512_v55  ;;  %v1088_v29 = vrot.slane %v10632_v18, %v13509_v52  ;;  %v1160_v20 = vrot.slane %v1080_v35, %v13509_v52 }
 0x29a   : > { %v3662_v6 = vadd.f32 %v3630_v39, %v3374_v22  ;;  %v3886_v21 = vmul.f32 %v3854_v42, %v10827_v27  ;;  %v1410_v0 = vrot.slane %v1330_v58, %v13511_v36 }
 0x29b   : > { %v3902_v46 = vadd.f32 %v3870_v12, %v3646_v7  ;;  %v1650_v43 = vrot.slane %v1570_v17, %v13512_v55  ;;  %v1168_v5 = vrot.slane %v1088_v29, %v13509_v52  ;;  %v1195_v45 = vmul.f32 %v13234_v23, %v1160_v20 }
 0x29c   : > { %v3918_v54 = vadd.f32 %v3886_v21, %v3662_v6  ;;  %v1211_v59 = vmul.f32 %v8909_v3, %v1160_v20  ;;  %v1435_v22 = vmul.f32 %v1410_v0, %v13234_v23  ;;  %v1451_v39 = vmul.f32 %v1410_v0, %v8909_v3 }
 0x29d   : > { %v1675_v42 = vmul.f32 %v1650_v43, %v13234_v23  ;;  %v1691_v35 = vmul.f32 %v1650_v43, %v8909_v3  ;;  %v10858_v58 = vmul.f32 %v13234_v23, %v1168_v5  ;;  %v1227_v12 = vfloor.f32 %v1195_v45 }
 0x29e   : > { %v7303_v7 = vpack.c.bf16 %v3918_v54, %v3902_v46  ;;  %v1243_v17 = vfloor.f32 %v1211_v59  ;;  %v1467_v29 = vfloor.f32 %v1435_v22  ;;  %v1483_v6 = vfloor.f32 %v1451_v39 }
 0x29f   : > { %v1707_v21 = vfloor.f32 %v1675_v42  ;;  %v1723_v34 = vfloor.f32 %v1691_v35  ;;  %v1213_v20 = vmul.f32 %v8909_v3, %v1168_v5  ;;  %v1259_v52 = vsub.f32 %v1195_v45, %v1227_v12 }
 0x2a0   : > { %7304 = vmatprep.subr.bf16.mxu1 %v7303_v7  ;;  %v1275_v27 = vsub.f32 %v1211_v59, %v1243_v17  ;;  %v1499_v0 = vsub.f32 %v1435_v22, %v1467_v29  ;;  %v1229_v31 = vfloor.f32 %v10858_v58  ;;  %v1515_v26 = vsub.f32 %v1451_v39, %v1483_v6 }
 0x2a1   : > { %v1739_v43 = vsub.f32 %v1675_v42, %v1707_v21  ;;  %v1755_v38 = vsub.f32 %v1691_v35, %v1723_v34  ;;  %v1245_v32 = vfloor.f32 %v1213_v20  ;;  %v1771_v61 = vsub.f32 1.0, %v1259_v52 }
 0x2a2   : > { %v1787_v46 = vsub.f32 1.0, %v1275_v27  ;;  %v1803_v54 = vsub.f32 1.0, %v1499_v0  ;;  %v3499_v49 = vmul.f32 %v1499_v0, %v1259_v52  ;;  %v1819_v14 = vsub.f32 1.0, %v1515_v26 }
 0x2a3   : > { %v1835_v56 = vsub.f32 1.0, %v1739_v43  ;;  %v1851_v9 = vsub.f32 1.0, %v1755_v38  ;;  %v3515_v25 = vmul.f32 %v1515_v26, %v1275_v27  ;;  %v2411_v5 = vmul.f32 %v1771_v61, %v1499_v0 }
 0x2a4   : > { %v1867_v13 = vmul.f32 %v1803_v54, %v1771_v61  ;;  %v2427_v7 = vmul.f32 %v1787_v46, %v1515_v26  ;;  %v2955_v45 = vmul.f32 %v1803_v54, %v1259_v52  ;;  %v1883_v59 = vmul.f32 %v1819_v14, %v1787_v46 }
 0x2a5   : > { %v2971_v22 = vmul.f32 %v1819_v14, %v1275_v27  ;;  %v10862_v12 = vmul.f32 %v3499_v49, %v1835_v56  ;;  %v10864_v39 = vmul.f32 %v3515_v25, %v1851_v9  ;;  %v10870_v35 = vmul.f32 %v2411_v5, %v1835_v56 }
 0x2a6   : > { %v10866_v34 = vmul.f32 %v1867_v13, %v1835_v56  ;;  %v10868_v42 = vmul.f32 %v1867_v13, %v1739_v43  ;;  %v10872_v17 = vmul.f32 %v2427_v7, %v1851_v9  ;;  %v10874_v29 = vmul.f32 %v1883_v59, %v1851_v9 }
 0x2a7   : > { %13712 = vst [vmem:[#allocation243_spill] sm:$0xff] %v10862_v12  ;;  %13713 = vst [vmem:[#allocation244_spill] sm:$0xff] %v10864_v39  ;;  %v10876_v6 = vmul.f32 %v1883_v59, %v1755_v38  ;;  %v10878_v61 = vmul.f32 %v2411_v5, %v1739_v43  ;;  %v10880_v52 = vmul.f32 %v2427_v7, %v1755_v38  ;;  %v13718_v14 = vunpack.c.l.bf16 %v10427_v50 }
 0x2a8   : > { %13714 = vst [vmem:[#allocation245_spill] sm:$0xff] %v10870_v35  ;;  %13715 = vst [vmem:[#allocation246_spill] sm:$0xff] %v10872_v17  ;;  %v13719_v13 = vunpack.c.l.bf16 %v10461_v48  ;;  %v13720_v21 = vunpack.c.l.bf16 %v10489_v4  ;;  %v13721_v46 = vunpack.c.l.bf16 %v10495_v19  ;;  %v13722_v5 = vunpack.c.l.bf16 %v10446_v37 }
 0x2a9   : > { %13716 = vst [vmem:[#allocation247_spill] sm:$0xff] %v10878_v61  ;;  %13717 = vst [vmem:[#allocation248_spill] sm:$0xff] %v10880_v52  ;;  %v1979_v26 = vmul.f32 %v13718_v14, %v10866_v34  ;;  %v13723_v50 = vunpack.c.l.bf16 %v10473_v2  ;;  %v13724_v48 = vunpack.c.l.bf16 %v10498_v57  ;;  %v13725_v4 = vunpack.c.l.bf16 %v10508_v62 }
 0x2aa   : > { %v2235_v27 = vmul.f32 %v13719_v13, %v10868_v42  ;;  %v2523_v0 = vmul.f32 %v13720_v21, %v10870_v35  ;;  %v2539_v54 = vmul.f32 %v13721_v46, %v10872_v17  ;;  %v1995_v7 = vmul.f32 %v13722_v5, %v10874_v29  ;;  %v13881_v17 = vld [vmem:[#allocation77_spill] sm:$0xff] }
 0x2ab   : > { %v2251_v59 = vmul.f32 %v13723_v50, %v10876_v6  ;;  %v2779_v14 = vmul.f32 %v13724_v48, %v10878_v61  ;;  %v2795_v13 = vmul.f32 %v13725_v4, %v10880_v52  ;;  %v10906_v35 = vmul.f32 %v2955_v45, %v1835_v56  ;;  %v13880_v52 = vld [vmem:[#allocation76_spill] sm:$0xff] }
 0x2ac   : > { %v2267_v21 = vadd.f32 %v2235_v27, %v1979_v26  ;;  %v10908_v19 = vmul.f32 %v2971_v22, %v1851_v9  ;;  %v10910_v46 = vmul.f32 %v2955_v45, %v1739_v43  ;;  %v10912_v5 = vmul.f32 %v2971_v22, %v1755_v38 }
 0x2ad   : > { %13726 = vst [vmem:[#allocation249_spill] sm:$0xff] %v10906_v35  ;;  %v2283_v37 = vadd.f32 %v2251_v59, %v1995_v7  ;;  %v13730_v2 = vunpack.c.l.bf16 %v10593_v41  ;;  %v13731_v57 = vunpack.c.l.bf16 %v10603_v28  ;;  %v13732_v56 = vunpack.c.l.bf16 %v10543_v60 }
 0x2ae   : > { %13727 = vst [vmem:[#allocation250_spill] sm:$0xff] %v10908_v19  ;;  %13728 = vst [vmem:[#allocation251_spill] sm:$0xff] %v10910_v46  ;;  %v2555_v62 = vadd.f32 %v2523_v0, %v2267_v21  ;;  %v13733_v9 = vunpack.c.l.bf16 %v10561_v53  ;;  %v13734_v22 = vunpack.c.l.bf16 %v10568_v15  ;;  %v13735_v41 = vunpack.c.l.bf16 %v10577_v24 }
 0x2af   : > { %13729 = vst [vmem:[#allocation252_spill] sm:$0xff] %v10912_v5  ;;  %v3611_v50 = vmul.f32 %v13730_v2, %v10862_v12  ;;  %v3627_v48 = vmul.f32 %v13731_v57, %v10864_v39  ;;  %v3067_v26 = vmul.f32 %v13732_v56, %v10906_v35  ;;  %v2571_v7 = vadd.f32 %v2539_v54, %v2283_v37  ;;  %v13876_v12 = vld [vmem:[#allocation73_spill] sm:$0xff] }
 0x2b0   : > { %v3083_v45 = vmul.f32 %v13733_v9, %v10908_v19  ;;  %v3323_v27 = vmul.f32 %v13734_v22, %v10910_v46  ;;  %v3339_v59 = vmul.f32 %v13735_v41, %v10912_v5  ;;  %v10932_v28 = vmul.f32 %v3499_v49, %v1739_v43  ;;  %v13741_v22 = vld [vmem:[#allocation100_spill] sm:$0xff] }
 0x2b1   : > { %v10934_v0 = vmul.f32 %v3515_v25, %v1755_v38  ;;  %v2811_v60 = vadd.f32 %v2779_v14, %v2555_v62  ;;  %v10937_v4 = vsub.f32 %v10858_v58, %v1229_v31  ;;  %v10939_v53 = vsub.f32 %v1213_v20, %v1245_v32  ;;  %v7566_v62 = vld [vmem:[%s8500_s7 + $0x40] sm:$0xff] }
 0x2b2   : > { %13736 = vst [vmem:[#allocation253_spill] sm:$0xff] %v10932_v28  ;;  %v13738_v15 = vrot.slane %v10632_v18, %v13511_v36  ;;  %v2827_v21 = vadd.f32 %v2795_v13, %v2571_v7  ;;  %v13739_v24 = vunpack.c.l.bf16 %v10618_v8  ;;  %v13740_v38 = vunpack.c.l.bf16 %v10621_v1  ;;  %v7565_v13 = vld [vmem:[%s8500_s7] sm:$0xff] }
 0x2b3   : > { %13737 = vst [vmem:[#allocation254_spill] sm:$0xff] %v10934_v0  ;;  %v1578_v31 = vrot.slane %v10632_v18, %v13512_v55  ;;  %v3099_v32 = vadd.f32 %v3067_v26, %v2811_v60  ;;  %v1789_v8 = vsub.f32 1.0, %v10939_v53  ;;  %v2048_v37 = vunpack.c.h.bf16 %v7565_v13  ;;  %v13742_v60 = vld [vmem:[#allocation106_spill] sm:$0xff] }
 0x2b4   : > { %v1418_v54 = vrot.slane %v13738_v15, %v13511_v36  ;;  %v3867_v49 = vmul.f32 %v13739_v24, %v10932_v28  ;;  %v3883_v25 = vmul.f32 %v13740_v38, %v10934_v0  ;;  %v1773_v36 = vsub.f32 1.0, %v10937_v4  ;;  %v7567_v24 = vld [vmem:[%s8500_s7 + $0x80] sm:$0xff] }
 0x2b5   : > { %v3115_v43 = vadd.f32 %v3083_v45, %v2827_v21  ;;  %v1658_v14 = vrot.slane %v1578_v31, %v13512_v55  ;;  %v3355_v2 = vadd.f32 %v3323_v27, %v3099_v32  ;;  %v2064_v18 = vunpack.c.h.bf16 %v7566_v62 }
 0x2b6   : > { %v1437_v58 = vmul.f32 %v1418_v54, %v13234_v23  ;;  %v1453_v20 = vmul.f32 %v1418_v54, %v8909_v3  ;;  %v10963_v7 = vmul.f32 %v2048_v37, %v13741_v22  ;;  %v2304_v38 = vunpack.c.h.bf16 %v7567_v24 }
 0x2b7   : > { %v3371_v56 = vadd.f32 %v3339_v59, %v3115_v43  ;;  %v1677_v26 = vmul.f32 %v1658_v14, %v13234_v23  ;;  %v1693_v9 = vmul.f32 %v1658_v14, %v8909_v3  ;;  %v3643_v45 = vadd.f32 %v3611_v50, %v3355_v2 }
 0x2b8   : > { %v1469_v1 = vfloor.f32 %v1437_v58  ;;  %v1485_v57 = vfloor.f32 %v1453_v20  ;;  %v10966_v15 = vmul.f32 %v2064_v18, %v13742_v60 }
 0x2b9   : > { %v3659_v27 = vadd.f32 %v3627_v48, %v3371_v56  ;;  %v1709_v54 = vfloor.f32 %v1677_v26  ;;  %v1725_v21 = vfloor.f32 %v1693_v9  ;;  %v3899_v31 = vadd.f32 %v3867_v49, %v3643_v45 }
 0x2ba   : > { %v1501_v55 = vsub.f32 %v1437_v58, %v1469_v1  ;;  %v1517_v41 = vsub.f32 %v1453_v20, %v1485_v57  ;;  %v13753_v45 = vunpack.c.l.bf16 %v10677_v40 }
 0x2bb   : > { %v3915_v43 = vadd.f32 %v3883_v25, %v3659_v27  ;;  %v1741_v3 = vsub.f32 %v1677_v26, %v1709_v54  ;;  %v1757_v14 = vsub.f32 %v1693_v9, %v1725_v21  ;;  %v13752_v9 = vunpack.c.l.bf16 %v10665_v11 }
 0x2bc   : > { %v1805_v59 = vsub.f32 1.0, %v1501_v55  ;;  %v1821_v32 = vsub.f32 1.0, %v1517_v41  ;;  %v2413_v23 = vmul.f32 %v1773_v36, %v1501_v55  ;;  %v2429_v13 = vmul.f32 %v1789_v8, %v1517_v41 }
 0x2bd   : > { %v7301_v2 = vpack.c.bf16 %v3915_v43, %v3899_v31  ;;  %v1837_v48 = vsub.f32 1.0, %v1741_v3  ;;  %v1853_v1 = vsub.f32 1.0, %v1757_v14  ;;  %v13754_v27 = vunpack.c.l.bf16 %v10706_v10  ;;  %v13760_v10 = vld [vmem:[#allocation222_spill] sm:$0xff] }
 0x2be   : > { %v1869_v37 = vmul.f32 %v1805_v59, %v1773_v36  ;;  %v1885_v50 = vmul.f32 %v1821_v32, %v1789_v8  ;;  %v2957_v58 = vmul.f32 %v1805_v59, %v10937_v4  ;;  %v2973_v20 = vmul.f32 %v1821_v32, %v10939_v53 }
 0x2bf   : > { %v10971_v57 = vmul.f32 %v2413_v23, %v1741_v3  ;;  %v10977_v18 = vmul.f32 %v2429_v13, %v1757_v14  ;;  %7302 = vmatpush1.bf16.msra.mxu0 %v7301_v2  ;;  %v10985_v56 = vmul.f32 %v2413_v23, %v1837_v48  ;;  %v10987_v26 = vmul.f32 %v2429_v13, %v1853_v1  ;;  %v13758_v23 = vld [vmem:[#allocation221_spill] sm:$0xff] }
 0x2c0   : > { %v10973_v62 = vmul.f32 %v1869_v37, %v1741_v3  ;;  %v10975_v49 = vmul.f32 %v1885_v50, %v1757_v14  ;;  %v10979_v25 = vmul.f32 %v2957_v58, %v1741_v3  ;;  %v10981_v36 = vmul.f32 %v1869_v37, %v1837_v48 }
 0x2c1   : > { %13743 = vst [vmem:[#allocation100_spill] sm:$0xff] %v10971_v57  ;;  %13746 = vst [vmem:[#allocation256_spill] sm:$0xff] %v10977_v18  ;;  %v10983_v8 = vmul.f32 %v1885_v50, %v1853_v1  ;;  %v2781_v54 = vmul.f32 %v13754_v27, %v10971_v57  ;;  %v13755_v21 = vunpack.c.l.bf16 %v10735_v33  ;;  %v13756_v31 = vunpack.c.l.bf16 %v10639_v30 }
 0x2c2   : > { %13744 = vst [vmem:[#allocation106_spill] sm:$0xff] %v10973_v62  ;;  %13745 = vst [vmem:[#allocation255_spill] sm:$0xff] %v10975_v49  ;;  %v2237_v22 = vmul.f32 %v13752_v9, %v10973_v62  ;;  %v2253_v60 = vmul.f32 %v13753_v45, %v10975_v49  ;;  %v13757_v11 = vunpack.c.l.bf16 %v10654_v51  ;;  %v13759_v40 = vunpack.c.l.bf16 %v13758_v23  ;;  %v13766_v9 = vld [vmem:[#allocation157_spill] sm:$0xff]  ;;  %v13870_v49 = vld [vmem:[#allocation63_spill] sm:$0xff] }
 0x2c3   : > { %13747 = vst [vmem:[#allocation257_spill] sm:$0xff] %v10979_v25  ;;  %13748 = vst [vmem:[#allocation258_spill] sm:$0xff] %v10981_v36  ;;  %v2797_v24 = vmul.f32 %v13755_v21, %v10977_v18  ;;  %v1981_v59 = vmul.f32 %v13756_v31, %v10981_v36  ;;  %v13761_v13 = vunpack.c.l.bf16 %v13760_v10  ;;  %v11013_v50 = vmul.f32 %v2957_v58, %v1837_v48  ;;  %v11367_v18 = vld [vmem:[%s8500_s7 + $0x218] sm:$0xff] }
 0x2c4   : > { %13749 = vst [vmem:[#allocation259_spill] sm:$0xff] %v10983_v8  ;;  %13750 = vst [vmem:[#allocation260_spill] sm:$0xff] %v10985_v56  ;;  %v1997_v32 = vmul.f32 %v13757_v11, %v10983_v8  ;;  %v2525_v43 = vmul.f32 %v13759_v40, %v10985_v56  ;;  %v11015_v33 = vmul.f32 %v2973_v20, %v1853_v1  ;;  %v13765_v30 = vunpack.c.l.bf16 %v10770_v44  ;;  %v13871_v8 = vld [vmem:[#allocation64_spill] sm:$0xff]  ;;  %v13872_v36 = vld [vmem:[#allocation65_spill] sm:$0xff] }
 0x2c5   : > { %13751 = vst [vmem:[#allocation261_spill] sm:$0xff] %v10987_v26  ;;  %v2541_v37 = vmul.f32 %v13761_v13, %v10987_v26  ;;  %13762 = vst [vmem:[#allocation221_spill] sm:$0xff] %v11013_v50  ;;  %v11017_v2 = vmul.f32 %v2973_v20, %v1757_v14  ;;  %7215 = vmatmul.mubr.msk.f32.vlgmr.msra.gmra.mrb[24].mxu0 %vm4059_vm0, %v13766_v9  ;;  %v2269_v45 = vadd.f32 %v2237_v22, %v1981_v59  ;;  %v13767_v11 = vmov 0.0   ;;  %v7568_v22 = vld [vmem:[%s8500_s7 + $0xc0] sm:$0xff]  ;;  %v13776_v13 = vld [vmem:[#allocation107_spill] sm:$0xff] }
 0x2c6   : > { %13763 = vst [vmem:[#allocation222_spill] sm:$0xff] %v11015_v33  ;;  %v3325_v51 = vmul.f32 %v13765_v30, %v10979_v25  ;;  %v2285_v27 = vadd.f32 %v2253_v60, %v1997_v32  ;;  %v3501_v21 = vmul.f32 %v1501_v55, %v10937_v4  ;;  %v3517_v31 = vmul.f32 %v1517_v41, %v10939_v53  ;;  %v13775_v32 = vld [vmem:[#allocation101_spill] sm:$0xff]  ;;  %v13780_v9 = vld [vmem:[#allocation236_spill] sm:$0xff]  ;;  %v13866_v25 = vld [vmem:[#allocation59_spill] sm:$0xff] }
 0x2c7   : > { %13764 = vst [vmem:[#allocation262_spill] sm:$0xff] %v11017_v2  ;;  %4676 = vmatprep.mubr.f32.mxu0 %v13767_v11  ;;  %v13768_v58 = vunpack.c.l.bf16 %v10754_v16  ;;  %v13769_v23 = vunpack.c.l.bf16 %v10761_v63  ;;  %v13770_v40 = vunpack.c.l.bf16 %v10780_v47  ;;  %v2320_v60 = vunpack.c.h.bf16 %v7568_v22  ;;  %v13777_v47 = vld [vmem:[#allocation207_spill] sm:$0xff]  ;;  %v11370_v26 = vld [vmem:[%s8500_s7 + $0x258] sm:$0xff] }
 0x2c8   : > { %v2557_v59 = vadd.f32 %v2525_v43, %v2269_v45  ;;  %v2573_v4 = vadd.f32 %v2541_v37, %v2285_v27  ;;  %v11037_v55 = vmul.f32 %v3501_v21, %v1837_v48  ;;  %v11039_v53 = vmul.f32 %v3517_v31, %v1853_v1  ;;  %v13778_v48 = vld [vmem:[#allocation235_spill] sm:$0xff] }
 0x2c9   : > { %v3069_v20 = vmul.f32 %v13768_v58, %v11013_v50  ;;  %v3085_v44 = vmul.f32 %v13769_v23, %v11015_v33  ;;  %v3341_v10 = vmul.f32 %v13770_v40, %v11017_v2  ;;  %v11041_v41 = vmul.f32 %v3501_v21, %v1741_v3  ;;  %7216 = vmatmul.mubr.msk.f32.gmra.mrb[26].mxu0 %vm4059_vm0, %v13777_v47 }
 0x2ca   : > { %13771 = vst [vmem:[#allocation157_spill] sm:$0xff] %v11037_v55  ;;  %13772 = vst [vmem:[#allocation263_spill] sm:$0xff] %v11039_v53  ;;  %v11043_v16 = vmul.f32 %v3517_v31, %v1757_v14  ;;  %v2336_v63 = vmul.f32 %v2304_v38, %v13775_v32  ;;  %v2352_v30 = vmul.f32 %v2320_v60, %v13776_v13  ;;  %v13779_v1 = vunpack.c.l.bf16 %v13778_v48  ;;  %v13782_v38 = vld [vmem:[#allocation237_spill] sm:$0xff]  ;;  %v13784_v31 = vld [vmem:[#allocation238_spill] sm:$0xff] }
 0x2cb   : > { %13773 = vst [vmem:[#allocation264_spill] sm:$0xff] %v11041_v41  ;;  %v2813_v43 = vadd.f32 %v2781_v54, %v2557_v59  ;;  %v2829_v37 = vadd.f32 %v2797_v24, %v2573_v4  ;;  %v13781_v14 = vunpack.c.l.bf16 %v13780_v9  ;;  %4682 = vmatprep.mubr.f32.mxu0 %v13767_v11  ;;  %v13783_v27 = vunpack.c.l.bf16 %v13782_v38  ;;  %v7569_v60 = vld [vmem:[%s8500_s7 + $0x100] sm:$0xff] }
 0x2cc   : > { %13774 = vst [vmem:[#allocation265_spill] sm:$0xff] %v11043_v16  ;;  %v3613_v3 = vmul.f32 %v13779_v1, %v11037_v55  ;;  %v13785_v54 = vunpack.c.l.bf16 %v13784_v31  ;;  %v2368_v58 = vadd.f32 %v2336_v63, %v10963_v7  ;;  %v2384_v23 = vadd.f32 %v2352_v30, %v10966_v15  ;;  %v7570_v4 = vld [vmem:[%s8500_s7 + $0x140] sm:$0xff]  ;;  %v13786_v31 = vld [vmem:[#allocation171_spill] sm:$0xff]  ;;  %v13788_v63 = vld [vmem:[#allocation108_spill] sm:$0xff] }
 0x2cd   : > { %v3629_v45 = vmul.f32 %v13781_v14, %v11039_v53  ;;  %v3869_v21 = vmul.f32 %v13783_v27, %v11041_v41  ;;  %v3101_v40 = vadd.f32 %v3069_v20, %v2813_v43  ;;  %v3117_v22 = vadd.f32 %v3085_v44, %v2829_v37  ;;  %v7571_v13 = vld [vmem:[%s8500_s7 + $0x180] sm:$0xff]  ;;  %7217 = vmatmul.mubr.msk.f32.gmra.mrb[28].mxu0 %vm4059_vm0, %v13786_v31  ;;  %v13789_v43 = vld [vmem:[#allocation103_spill] sm:$0xff] }
 0x2ce   : > { %v3885_v24 = vmul.f32 %v13785_v54, %v11043_v16  ;;  %v2592_v59 = vunpack.c.h.bf16 %v7569_v60  ;;  %v2608_v32 = vunpack.c.h.bf16 %v7570_v4  ;;  %v2848_v47 = vunpack.c.h.bf16 %v7571_v13  ;;  %v7572_v48 = vld [vmem:[%s8500_s7 + $0x1c0] sm:$0xff]  ;;  %4688 = vmatprep.mubr.f32.mxu0 %v13767_v11  ;;  %v13790_v54 = vld [vmem:[#allocation109_spill] sm:$0xff]  ;;  %v13791_v4 = vld [vmem:[#allocation104_spill] sm:$0xff] }
 0x2cf   : > { %v2864_v1 = vunpack.c.h.bf16 %v7572_v48  ;;  %v7573_v9 = vld [vmem:[%s8500_s7 + $0x200] sm:$0xff]  ;;  %v3357_v7 = vadd.f32 %v3325_v51, %v3101_v40  ;;  %v3373_v15 = vadd.f32 %v3341_v10, %v3117_v22 }
 0x2d0   : > { %v3136_v14 = vunpack.c.h.bf16 %v7573_v9  ;;  %v7574_v38 = vld [vmem:[%s8500_s7 + $0x240] sm:$0xff]  ;;  %v2640_v30 = vmul.f32 %v2608_v32, %v13788_v63  ;;  %v2880_v37 = vmul.f32 %v2848_v47, %v13789_v43  ;;  %v13793_v47 = vld [vmem:[#allocation172_spill] sm:$0xff] }
 0x2d1   : > { %v3152_v27 = vunpack.c.h.bf16 %v7574_v38  ;;  %v13787_v20 = vld [vmem:[#allocation102_spill] sm:$0xff]  ;;  %v2896_v60 = vmul.f32 %v2864_v1, %v13790_v54  ;;  %v3645_v38 = vadd.f32 %v3613_v3, %v3357_v7  ;;  %v3661_v31 = vadd.f32 %v3629_v45, %v3373_v15  ;;  %7218 = vmatmul.mubr.msk.f32.gmra.mrb[30].mxu0 %vm4059_vm0, %v13793_v47  ;;  %v13796_v15 = vld [vmem:[#allocation99_spill] sm:$0xff]  ;;  %v13800_v47 = vld [vmem:[#allocation117_spill] sm:$0xff] }
 0x2d2   : > { %v2624_v44 = vmul.f32 %v2592_v59, %v13787_v20  ;;  %v3168_v13 = vmul.f32 %v3136_v14, %v13791_v4  ;;  %v13792_v48 = vld [vmem:[#allocation110_spill] sm:$0xff]  ;;  %v2672_v10 = vadd.f32 %v2640_v30, %v2384_v23  ;;  %4952 = vmatprep.mubr.f32.mxu0 %v13767_v11 }
 0x2d3   : > { %v3184_v9 = vmul.f32 %v3152_v27, %v13792_v48  ;;  %v7575_v40 = vld [vmem:[%s8500_s7 + $0x280] sm:$0xff]  ;;  %v3901_v1 = vadd.f32 %v3869_v21, %v3645_v38  ;;  %v3917_v14 = vadd.f32 %v3885_v24, %v3661_v31  ;;  %v13795_v27 = vld [vmem:[#allocation112_spill] sm:$0xff]  ;;  %v7582_v31 = vld [vmem:[%s8500_s7 + $0x48] sm:$0xff] }
 0x2d4   : > { %v2656_v51 = vadd.f32 %v2624_v44, %v2368_v58  ;;  %v3392_v22 = vunpack.c.h.bf16 %v7575_v40  ;;  %v7576_v59 = vld [vmem:[%s8500_s7 + $0x2c0] sm:$0xff]  ;;  %v2928_v45 = vadd.f32 %v2896_v60, %v2672_v10  ;;  %v13794_v58 = vld [vmem:[#allocation111_spill] sm:$0xff] }
 0x2d5   : > { %v3408_v20 = vunpack.c.h.bf16 %v7576_v59  ;;  %v7577_v32 = vld [vmem:[%s8500_s7 + $0x300] sm:$0xff]  ;;  %v7305_v43 = vpack.c.bf16 %v3917_v14, %v3901_v1  ;;  %v7581_v60 = vld [vmem:[%s8500_s7 + $0x8] sm:$0xff]  ;;  %v13801_v14 = vld [vmem:[#allocation120_spill] sm:$0xff] }
 0x2d6   : > { %v3680_v63 = vunpack.c.h.bf16 %v7577_v32  ;;  %v7578_v16 = vld [vmem:[%s8500_s7 + $0x340] sm:$0xff]  ;;  %v2912_v3 = vadd.f32 %v2880_v37, %v2656_v51  ;;  %v3424_v23 = vmul.f32 %v3392_v22, %v13794_v58  ;;  %v3216_v21 = vadd.f32 %v3184_v9, %v2928_v45  ;;  %v7583_v10 = vld [vmem:[%s8500_s7 + $0x88] sm:$0xff] }
 0x2d7   : > { %v3696_v41 = vunpack.c.h.bf16 %v7578_v16  ;;  %v3440_v7 = vmul.f32 %v3408_v20, %v13795_v27  ;;  %v13797_v16 = vld [vmem:[#allocation113_spill] sm:$0xff]  ;;  %v7579_v4 = vld [vmem:[%s8500_s7 + $0x380] sm:$0xff]  ;;  %v2050_v38 = vunpack.c.h.bf16 %v7581_v60  ;;  %v2066_v51 = vunpack.c.h.bf16 %v7582_v31  ;;  %7306 = vmatpush1.bf16.msra.mxu1 %v7305_v43  ;;  %v7584_v20 = vld [vmem:[%s8500_s7 + $0xc8] sm:$0xff] }
 0x2d8   : > { %v3712_v44 = vmul.f32 %v3680_v63, %v13796_v15  ;;  %v3200_v54 = vadd.f32 %v3168_v13, %v2912_v3  ;;  %v3936_v24 = vunpack.c.h.bf16 %v7579_v4  ;;  %v7580_v37 = vld [vmem:[%s8500_s7 + $0x3c0] sm:$0xff]  ;;  %v2306_v40 = vunpack.c.h.bf16 %v7583_v10  ;;  %v7588_v60 = vld [vmem:[%s8500_s7 + $0x1c8] sm:$0xff] }
 0x2d9   : > { %v3728_v30 = vmul.f32 %v3696_v41, %v13797_v16  ;;  %v3952_v48 = vunpack.c.h.bf16 %v7580_v37  ;;  %v3472_v59 = vadd.f32 %v3440_v7, %v3216_v21  ;;  %v13798_v41 = vld [vmem:[#allocation105_spill] sm:$0xff]  ;;  %v2322_v9 = vunpack.c.h.bf16 %v7584_v20  ;;  %v13799_v32 = vld [vmem:[#allocation114_spill] sm:$0xff]  ;;  %v7586_v21 = vld [vmem:[%s8500_s7 + $0x148] sm:$0xff] }
 0x2da   : > { %v3456_v22 = vadd.f32 %v3424_v23, %v3200_v54  ;;  %v3968_v13 = vmul.f32 %v3936_v24, %v13798_v41  ;;  %v2082_v1 = vmul.f32 %v2050_v38, %v13800_v47  ;;  %v2098_v3 = vmul.f32 %v2066_v51, %v13801_v14  ;;  %v13802_v45 = vld [vmem:[#allocation118_spill] sm:$0xff]  ;;  %v13803_v16 = vld [vmem:[#allocation121_spill] sm:$0xff]  ;;  %v7585_v23 = vld [vmem:[%s8500_s7 + $0x108] sm:$0xff] }
 0x2db   : > { %v3984_v63 = vmul.f32 %v3952_v48, %v13799_v32  ;;  %v2338_v58 = vmul.f32 %v2306_v40, %v13802_v45  ;;  %v3760_v15 = vadd.f32 %v3728_v30, %v3472_v59  ;;  %v2354_v43 = vmul.f32 %v2322_v9, %v13803_v16  ;;  %v7587_v24 = vld [vmem:[%s8500_s7 + $0x188] sm:$0xff]  ;;  %v7589_v38 = vld [vmem:[%s12661_s4] sm:$0xff]  ;;  %v13809_v32 = vld [vmem:[#allocation116_spill] sm:$0xff] }
 0x2dc   : > { %v3744_v27 = vadd.f32 %v3712_v44, %v3456_v22  ;;  %v2594_v7 = vunpack.c.h.bf16 %v7585_v23  ;;  %v2610_v4 = vunpack.c.h.bf16 %v7586_v21  ;;  %v2850_v37 = vunpack.c.h.bf16 %v7587_v24  ;;  %7219 = vmatmul.mubr.msk.f32.vlgmr.msra.gmra.mrb[24].mxu1 %vm4059_vm0, %v7589_v38  ;;  %v13804_v51 = vld [vmem:[#allocation115_spill] sm:$0xff]  ;;  %v13806_v22 = vld [vmem:[#allocation57_spill] sm:$0xff]  ;;  %v13808_v20 = vld [vmem:[#allocation122_spill] sm:$0xff] }
 0x2dd   : > { %v2370_v54 = vadd.f32 %v2338_v58, %v2082_v1  ;;  %v2866_v48 = vunpack.c.h.bf16 %v7588_v60  ;;  %v4016_v30 = vadd.f32 %v3984_v63, %v3760_v15  ;;  %v2386_v31 = vadd.f32 %v2354_v43, %v2098_v3  ;;  %4765 = vmatprep.mubr.f32.mxu1 %v13767_v11  ;;  %v13805_v40 = vld [vmem:[#allocation39_spill] sm:$0xff]  ;;  %v13812_v38 = vld [vmem:[#allocation125_spill] sm:$0xff] }
 0x2de   : > { %v4000_v44 = vadd.f32 %v3968_v13, %v3744_v27  ;;  %v2626_v10 = vmul.f32 %v2594_v7, %v13804_v51  ;;  %v13807_v59 = vunpack.c.l.bf16 %v13806_v22  ;;  %v2642_v9 = vmul.f32 %v2610_v4, %v13808_v20  ;;  %v7590_v1 = vld [vmem:[%s8500_s7 + $0x208] sm:$0xff]  ;;  %v13813_v51 = vld [vmem:[#allocation124_spill] sm:$0xff] }
 0x2df   : > { %v2882_v47 = vmul.f32 %v2850_v37, %v13809_v32  ;;  %v3138_v14 = vunpack.c.h.bf16 %v7590_v1  ;;  %v7591_v3 = vld [vmem:[%s8500_s7 + $0x248] sm:$0xff] }
 0x2e0   : > { %v11115_v41 = vmul.f32 %v13807_v59, %v13805_v40  ;;  %v7307_v13 = vpack.c.bf16 %v4016_v30, %v4000_v44  ;;  %v2658_v63 = vadd.f32 %v2626_v10, %v2370_v54  ;;  %v3154_v45 = vunpack.c.h.bf16 %v7591_v3  ;;  %v7592_v58 = vld [vmem:[%s8500_s7 + $0x288] sm:$0xff]  ;;  %v13814_v40 = vld [vmem:[#allocation126_spill] sm:$0xff] }
 0x2e1   : > { %v3394_v27 = vunpack.c.h.bf16 %v7592_v58  ;;  %v2674_v15 = vadd.f32 %v2642_v9, %v2386_v31  ;;  %v13810_v16 = vld [vmem:[#allocation119_spill] sm:$0xff]  ;;  %v13818_v58 = vld [vmem:[#allocation128_spill] sm:$0xff] }
 0x2e2   : > { %v2898_v43 = vmul.f32 %v2866_v48, %v13810_v16  ;;  %v7593_v23 = vld [vmem:[%s8500_s7 + $0x2c8] sm:$0xff]  ;;  %7308 = vmatprep.subr.bf16.mxu0 %v7307_v13  ;;  %v2914_v54 = vadd.f32 %v2882_v47, %v2658_v63  ;;  %v3186_v44 = vmul.f32 %v3154_v45, %v13812_v38  ;;  %v13817_v63 = vld [vmem:[#allocation96_spill] sm:$0xff]  ;;  %v13824_v38 = vld [vmem:[#allocation97_spill] sm:$0xff] }
 0x2e3   : > { %v3410_v7 = vunpack.c.h.bf16 %v7593_v23  ;;  %v7594_v21 = vld [vmem:[%s8500_s7 + $0x308] sm:$0xff]  ;;  %v3426_v10 = vmul.f32 %v3394_v27, %v13813_v51  ;;  %v13821_v27 = vld [vmem:[#allocation32_spill] sm:$0xff] }
 0x2e4   : > { %v3682_v24 = vunpack.c.h.bf16 %v7594_v21  ;;  %v7595_v4 = vld [vmem:[%s12661_s4 + $0x8] sm:$0xff]  ;;  %v2930_v31 = vadd.f32 %v2898_v43, %v2674_v15  ;;  %v13822_v21 = vld [vmem:[#allocation33_spill] sm:$0xff] }
 0x2e5   : > { %7220 = vmatmul.mubr.msk.f32.gmra.mrb[26].mxu1 %vm4059_vm0, %v7595_v4  ;;  %v13811_v37 = vld [vmem:[#allocation123_spill] sm:$0xff]  ;;  %v3442_v22 = vmul.f32 %v3410_v7, %v13814_v40  ;;  %v2369_v7 = vadd.f32 %v13822_v21, %v13821_v27  ;;  %v11146_v4 = vld [vmem:[%s8500_s7 + $0x10] sm:$0xff]  ;;  %v13827_v40 = vld [vmem:[#allocation14_spill] sm:$0xff] }
 0x2e6   : > { %v3170_v60 = vmul.f32 %v3138_v14, %v13811_v37  ;;  %v7596_v30 = vld [vmem:[%s8500_s7 + $0x348] sm:$0xff]  ;;  %4771 = vmatprep.mubr.f32.mxu1 %v13767_v11  ;;  %v3218_v45 = vadd.f32 %v3186_v44, %v2930_v31  ;;  %v13823_v37 = vld [vmem:[#allocation129_spill] sm:$0xff]  ;;  %v13832_v21 = vld [vmem:[#allocation10_spill] sm:$0xff] }
 0x2e7   : > { %v3698_v48 = vunpack.c.h.bf16 %v7596_v30  ;;  %v7597_v59 = vld [vmem:[%s8500_s7 + $0x388] sm:$0xff]  ;;  %v13825_v30 = vld [vmem:[#allocation34_spill] sm:$0xff] }
 0x2e8   : > { %v3938_v20 = vunpack.c.h.bf16 %v7597_v59  ;;  %v3202_v9 = vadd.f32 %v3170_v60, %v2914_v54  ;;  %v13815_v32 = vld [vmem:[#allocation127_spill] sm:$0xff]  ;;  %v3474_v51 = vadd.f32 %v3442_v22, %v3218_v45  ;;  %v13833_v45 = vld [vmem:[#allocation28_spill] sm:$0xff] }
 0x2e9   : > { %v3714_v1 = vmul.f32 %v3682_v24, %v13815_v32  ;;  %v7598_v47 = vld [vmem:[%s8500_s7 + $0x3c8] sm:$0xff]  ;;  %v3730_v16 = vmul.f32 %v3698_v48, %v13818_v58  ;;  %v13828_v32 = vld [vmem:[#allocation20_spill] sm:$0xff] }
 0x2ea   : > { %v3954_v13 = vunpack.c.h.bf16 %v7598_v47  ;;  %v13816_v14 = vld [vmem:[#allocation15_spill] sm:$0xff]  ;;  %v3458_v54 = vadd.f32 %v3426_v10, %v3202_v9  ;;  %v3970_v60 = vmul.f32 %v3938_v20, %v13823_v37  ;;  %v11161_v58 = vld [vmem:[%s8500_s7 + $0x50] sm:$0xff]  ;;  %v13830_v9 = vld [vmem:[#allocation37_spill] sm:$0xff] }
 0x2eb   : > { %v2367_v3 = vadd.f32 %v13817_v63, %v13816_v14  ;;  %v13819_v23 = vld [vmem:[#allocation19_spill] sm:$0xff]  ;;  %v13829_v14 = vld [vmem:[#allocation30_spill] sm:$0xff]  ;;  %v3762_v27 = vadd.f32 %v3730_v16, %v3474_v51  ;;  %v2068_v16 = vunpack.c.h.bf16 %v11161_v58 }
 0x2ec   : > { %v13820_v15 = vld [vmem:[#allocation95_spill] sm:$0xff]  ;;  %v3986_v59 = vmul.f32 %v3954_v13, %v13827_v40  ;;  %v2657_v63 = vadd.f32 %v13829_v14, %v2369_v7  ;;  %v3746_v10 = vadd.f32 %v3714_v1, %v3458_v54  ;;  %v7600_v7 = vld [vmem:[%s12661_s4 + $0x18] sm:$0xff] }
 0x2ed   : > { %v2383_v43 = vadd.f32 %v13820_v15, %v13819_v23  ;;  %v7599_v24 = vld [vmem:[%s12661_s4 + $0x10] sm:$0xff]  ;;  %v2655_v44 = vadd.f32 %v13824_v38, %v2367_v3  ;;  %v2052_v15 = vunpack.c.h.bf16 %v11146_v4  ;;  %v13834_v1 = vld [vmem:[#allocation21_spill] sm:$0xff] }
 0x2ee   : > { %7221 = vmatmul.mubr.msk.f32.gmra.mrb[28].mxu1 %vm4059_vm0, %v7599_v24  ;;  %v13826_v48 = vld [vmem:[#allocation35_spill] sm:$0xff]  ;;  %v2913_v13 = vadd.f32 %v13833_v45, %v2657_v63  ;;  %v13835_v54 = vld [vmem:[#allocation36_spill] sm:$0xff]  ;;  %v13837_v40 = vld [vmem:[#allocation41_spill] sm:$0xff] }
 0x2ef   : > { %v2385_v31 = vadd.f32 %v13826_v48, %v13825_v30  ;;  %4777 = vmatprep.mubr.f32.mxu1 %v13767_v11  ;;  %v2671_v47 = vadd.f32 %v13828_v32, %v2383_v43  ;;  %v2911_v20 = vadd.f32 %v13830_v9, %v2655_v44  ;;  %v13831_v23 = vld [vmem:[#allocation31_spill] sm:$0xff]  ;;  %v11178_v44 = vld [vmem:[%s8500_s7 + $0x90] sm:$0xff]  ;;  %v4002_v30 = vadd.f32 %v3970_v60, %v3746_v10  ;;  %v13838_v14 = vld [vmem:[#allocation25_spill] sm:$0xff] }
 0x2f0   : > { %v4018_v48 = vadd.f32 %v3986_v59, %v3762_v27  ;;  %v3201_v32 = vadd.f32 %v13837_v40, %v2913_v13  ;;  %v13839_v9 = vld [vmem:[#allocation43_spill] sm:$0xff]  ;;  %v13843_v60 = vld [vmem:[#allocation38_spill] sm:$0xff]  ;;  %v2308_v10 = vunpack.c.h.bf16 %v11178_v44  ;;  %v11194_v27 = vld [vmem:[%s8500_s7 + $0x110] sm:$0xff] }
 0x2f1   : > { %v2673_v3 = vadd.f32 %v13831_v23, %v2385_v31  ;;  %v2927_v22 = vadd.f32 %v13832_v21, %v2671_v47  ;;  %v3199_v24 = vadd.f32 %v13834_v1, %v2911_v20  ;;  %v13836_v31 = vld [vmem:[#allocation22_spill] sm:$0xff]  ;;  %v11184_v47 = vld [vmem:[%s8500_s7 + $0xd0] sm:$0xff]  ;;  %v13842_v1 = vld [vmem:[#allocation23_spill] sm:$0xff] }
 0x2f2   : > { %7222 = vmatmul.mubr.msk.f32.gmra.mrb[30].mxu1 %vm4059_vm0, %v7600_v7  ;;  %v13840_v23 = vld [vmem:[#allocation50_spill] sm:$0xff]  ;;  %v7311_v7 = vpack.c.bf16 %v4018_v48, %v4002_v30  ;;  %v3457_v59 = vadd.f32 %v13843_v60, %v3201_v32  ;;  %v13848_v32 = vld [vmem:[#allocation45_spill] sm:$0xff]  ;;  %v11265_v38 = vld [vmem:[%s8500_s7 + $0x350] sm:$0xff] }
 0x2f3   : > { %v2929_v37 = vadd.f32 %v13835_v54, %v2673_v3  ;;  %5041 = vmatprep.mubr.f32.mxu1 %v13767_v11  ;;  %v3215_v51 = vadd.f32 %v13836_v31, %v2927_v22  ;;  %v3455_v63 = vadd.f32 %v13838_v14, %v3199_v24  ;;  %v2084_v3 = vmul.f32 %v2052_v15, %v13840_v23  ;;  %v13841_v21 = vld [vmem:[#allocation54_spill] sm:$0xff]  ;;  %v13845_v24 = vld [vmem:[#allocation51_spill] sm:$0xff] }
 0x2f4   : > { %v2100_v45 = vmul.f32 %v2068_v16, %v13841_v21  ;;  %v13844_v22 = vld [vmem:[#allocation26_spill] sm:$0xff]  ;;  %v2324_v15 = vunpack.c.h.bf16 %v11184_v47  ;;  %7312 = vmatprep.subr.bf16.mxu1 %v7311_v7  ;;  %v13846_v16 = vld [vmem:[#allocation27_spill] sm:$0xff]  ;;  %v2340_v14 = vmul.f32 %v2308_v10, %v13848_v32  ;;  %v11212_v7 = vld [vmem:[%s8500_s7 + $0x190] sm:$0xff] }
 0x2f5   : > { %v3217_v20 = vadd.f32 %v13839_v9, %v2929_v37  ;;  %v3471_v54 = vadd.f32 %v13842_v1, %v3215_v51  ;;  %v3743_v13 = vadd.f32 %v13844_v22, %v3455_v63  ;;  %v13847_v48 = vld [vmem:[#allocation42_spill] sm:$0xff]  ;;  %v11205_v9 = vld [vmem:[%s8500_s7 + $0x150] sm:$0xff]  ;;  %v2596_v22 = vunpack.c.h.bf16 %v11194_v27 }
 0x2f6   : > { %v3745_v51 = vadd.f32 %v13847_v48, %v3457_v59  ;;  %v13849_v63 = vld [vmem:[#allocation24_spill] sm:$0xff]  ;;  %v2372_v48 = vadd.f32 %v2340_v14, %v2084_v3  ;;  %v13862_v40 = vld [vmem:[#allocation18_spill] sm:$0xff] }
 0x2f7   : > { %v3473_v31 = vadd.f32 %v13845_v24, %v3217_v20  ;;  %v3759_v30 = vadd.f32 %v13846_v16, %v3471_v54  ;;  %v3999_v23 = vadd.f32 %v13849_v63, %v3743_v13  ;;  %v13850_v20 = vld [vmem:[#allocation47_spill] sm:$0xff]  ;;  %v13851_v1 = vld [vmem:[#allocation48_spill] sm:$0xff]  ;;  %v13852_v54 = vld [vmem:[#allocation29_spill] sm:$0xff] }
 0x2f8   : > { %v2356_v60 = vmul.f32 %v2324_v15, %v13851_v1  ;;  %v13853_v24 = vld [vmem:[#allocation44_spill] sm:$0xff]  ;;  %v2612_v15 = vunpack.c.h.bf16 %v11205_v9  ;;  %v13854_v63 = vld [vmem:[#allocation53_spill] sm:$0xff] }
 0x2f9   : > { %v3761_v21 = vadd.f32 %v13850_v20, %v3473_v31  ;;  %v4015_v59 = vadd.f32 %v13852_v54, %v3759_v30  ;;  %v4001_v16 = vadd.f32 %v13853_v24, %v3745_v51  ;;  %v11218_v32 = vld [vmem:[%s8500_s7 + $0x1d0] sm:$0xff]  ;;  %v2628_v20 = vmul.f32 %v2596_v22, %v13854_v63  ;;  %v4035_v30 = vld [vmem:[%s12662_s5] sm:$0xff] }
 0x2fa   : > { %v2388_v31 = vadd.f32 %v2356_v60, %v2100_v45  ;;  %v11224_v1 = vld [vmem:[%s8500_s7 + $0x210] sm:$0xff]  ;;  %4041 = vperm.xlu1 %7495, %v4035_v30   ;;  %v13855_v60 = vld [vmem:[#allocation58_spill] sm:$0xff]  ;;  %v2868_v24 = vunpack.c.h.bf16 %v11218_v32 }
 0x2fb   : > { %v4017_v13 = vadd.f32 %v11115_v41, %v3761_v21  ;;  %v7309_v51 = vpack.c.bf16 %v4015_v59, %v3999_v23  ;;  %v2852_v41 = vunpack.c.h.bf16 %v11212_v7  ;;  %v11233_v21 = vld [vmem:[%s8500_s7 + $0x250] sm:$0xff]  ;;  %v2644_v22 = vmul.f32 %v2612_v15, %v13855_v60  ;;  %v4036_v23 = vld [vmem:[%s12662_s5 + $0x8] sm:$0xff]  ;;  %v11253_v15 = vld [vmem:[%s12665_s8] sm:$0xff] }
 0x2fc   : > { %v2660_v54 = vadd.f32 %v2628_v20, %v2372_v48  ;;  %v11238_v63 = vld [vmem:[%s8500_s7 + $0x290] sm:$0xff]  ;;  %v13857_v30 = vld [vmem:[#allocation46_spill] sm:$0xff]  ;;  %v13858_v59 = vld [vmem:[#allocation55_spill] sm:$0xff] }
 0x2fd   : > { %v7313_v45 = vpack.c.bf16 %v4017_v13, %v4001_v16  ;;  %7310 = vmatpush1.bf16.msra.mxu0 %v7309_v51  ;;  %v13856_v14 = vld [vmem:[#allocation40_spill] sm:$0xff]  ;;  %v3140_v13 = vunpack.c.h.bf16 %v11224_v1  ;;  %v2676_v20 = vadd.f32 %v2644_v22, %v2388_v31  ;;  %v2900_v51 = vmul.f32 %v2868_v24, %v13857_v30 }
 0x2fe   : > { %v2884_v3 = vmul.f32 %v2852_v41, %v13856_v14  ;;  %v11248_v48 = vld [vmem:[%s8500_s7 + $0x2d0] sm:$0xff]  ;;  %v3156_v14 = vunpack.c.h.bf16 %v11233_v21  ;;  %v3396_v37 = vunpack.c.h.bf16 %v11238_v63  ;;  %4046 = vperm.xlu1 %7495, %v4036_v23  }
 0x2ff   : > { %7314 = vmatpush1.bf16.msra.mxu1 %v7313_v45  ;;  %v11259_v41 = vld [vmem:[%s8500_s7 + $0x310] sm:$0xff]  ;;  %v3172_v10 = vmul.f32 %v3140_v13, %v13858_v59  ;;  %v2932_v31 = vadd.f32 %v2900_v51, %v2676_v20  ;;  %v13859_v45 = vld [vmem:[#allocation17_spill] sm:$0xff]  ;;  %v3412_v30 = vunpack.c.h.bf16 %v11248_v48 }
 0x300   : > { %v2916_v16 = vadd.f32 %v2884_v3, %v2660_v54  ;;  %v3188_v22 = vmul.f32 %v3156_v14, %v13859_v45  ;;  %v11271_v60 = vld [vmem:[%s8500_s7 + $0x390] sm:$0xff]  ;;  %7223 = vmatmul.mubr.msk.f32.vlgmr.msra.gmra.mrb[32].mxu0 %vm4059_vm0, %v11253_v15  ;;  %v13860_v59 = vld [vmem:[#allocation49_spill] sm:$0xff]  ;;  %v3684_v20 = vunpack.c.h.bf16 %v11259_v41  ;;  %v11290_v14 = vld [vmem:[%s12665_s8 + $0x8] sm:$0xff] }
 0x301   : > { %v4038_v3 = vld [vmem:[%s12662_s5 + $0x18] sm:$0xff]  ;;  %v3428_v23 = vmul.f32 %v3396_v37, %v13860_v59  ;;  %4958 = vmatprep.mubr.f32.mxu0 %v13767_v11  ;;  %v3700_v59 = vunpack.c.h.bf16 %v11265_v38  ;;  %v3940_v55 = vunpack.c.h.bf16 %v11271_v60 }
 0x302   : > { %v3204_v54 = vadd.f32 %v3172_v10, %v2916_v16  ;;  %v11282_v51 = vld [vmem:[%s8500_s7 + $0x3d0] sm:$0xff]  ;;  %7227 = vmatmul.mubr.msk.f32.vlgmr.msra.gmra.mrb[32].mxu1 %vm4059_vm0, %v11253_v15  ;;  %v3220_v10 = vadd.f32 %v3188_v22, %v2932_v31  ;;  %v11296_v13 = vld [vmem:[%s8500_s7 + $0x18] sm:$0xff]  ;;  %v3716_v43 = vmul.f32 %v3684_v20, %v13862_v40  ;;  %4056 = vperm.xlu1 %7495, %v4038_v3  }
 0x303   : > { %v13861_v16 = vld [vmem:[#allocation52_spill] sm:$0xff]  ;;  %5047 = vmatprep.mubr.f32.mxu1 %v13767_v11  ;;  %v11303_v31 = vld [vmem:[%s8500_s7 + $0x58] sm:$0xff]  ;;  %v3956_v2 = vunpack.c.h.bf16 %v11282_v51  ;;  %v2054_v3 = vunpack.c.h.bf16 %v11296_v13 }
 0x304   : > { %v3444_v37 = vmul.f32 %v3412_v30, %v13861_v16  ;;  %v3460_v24 = vadd.f32 %v3428_v23, %v3204_v54  ;;  %v13863_v30 = vld [vmem:[#allocation62_spill] sm:$0xff]  ;;  %v11309_v54 = vld [vmem:[%s8500_s7 + $0x98] sm:$0xff]  ;;  %7224 = vmatmul.mubr.msk.f32.gmra.mrb[34].mxu0 %vm4059_vm0, %v11290_v14  ;;  %v13864_v23 = vld [vmem:[#allocation56_spill] sm:$0xff] }
 0x305   : > { %v3732_v16 = vmul.f32 %v3700_v59, %v13863_v30  ;;  %v3972_v20 = vmul.f32 %v3940_v55, %v13864_v23  ;;  %4964 = vmatprep.mubr.f32.mxu0 %v13767_v11  ;;  %v2070_v30 = vunpack.c.h.bf16 %v11303_v31  ;;  %v11331_v23 = vld [vmem:[%s8500_s7 + $0x118] sm:$0xff]  ;;  %v2086_v33 = vmul.f32 %v2054_v3, %v13866_v25 }
 0x306   : > { %v3476_v22 = vadd.f32 %v3444_v37, %v3220_v10  ;;  %v3748_v40 = vadd.f32 %v3716_v43, %v3460_v24  ;;  %v11317_v10 = vld [vmem:[%s8500_s7 + $0xd8] sm:$0xff]  ;;  %7228 = vmatmul.mubr.msk.f32.gmra.mrb[34].mxu1 %vm4059_vm0, %v11290_v14  ;;  %v11325_v37 = vld [vmem:[%s12665_s8 + $0x10] sm:$0xff]  ;;  %v2598_v3 = vunpack.c.h.bf16 %v11331_v23 }
 0x307   : > { %v13865_v24 = vld [vmem:[#allocation67_spill] sm:$0xff]  ;;  %v11334_v45 = vld [vmem:[%s8500_s7 + $0x158] sm:$0xff]  ;;  %5053 = vmatprep.mubr.f32.mxu1 %v13767_v11  ;;  %v2326_v57 = vunpack.c.h.bf16 %v11317_v10 }
 0x308   : > { %v3764_v43 = vadd.f32 %v3732_v16, %v3476_v22  ;;  %v3988_v55 = vmul.f32 %v3956_v2, %v13865_v24  ;;  %v4004_v53 = vadd.f32 %v3972_v20, %v3748_v40  ;;  %v2310_v22 = vunpack.c.h.bf16 %v11309_v54  ;;  %v11341_v16 = vld [vmem:[%s8500_s7 + $0x198] sm:$0xff]  ;;  %v13867_v24 = vld [vmem:[#allocation68_spill] sm:$0xff]  ;;  %7225 = vmatmul.mubr.msk.f32.gmra.mrb[36].mxu0 %vm4059_vm0, %v11325_v37 }
 0x309   : > { %v2102_v59 = vmul.f32 %v2070_v30, %v13867_v24  ;;  %v13868_v40 = vld [vmem:[#allocation60_spill] sm:$0xff]  ;;  %v2614_v50 = vunpack.c.h.bf16 %v11334_v45  ;;  %4970 = vmatprep.mubr.f32.mxu0 %v13767_v11  ;;  %v2854_v20 = vunpack.c.h.bf16 %v11341_v16  ;;  %v2630_v62 = vmul.f32 %v2598_v3, %v13870_v49 }
 0x30a   : > { %v4020_v2 = vadd.f32 %v3988_v55, %v3764_v43  ;;  %v2342_v25 = vmul.f32 %v2310_v22, %v13868_v40  ;;  %v11353_v43 = vld [vmem:[%s8500_s7 + $0x1d8] sm:$0xff]  ;;  %7229 = vmatmul.mubr.msk.f32.gmra.mrb[36].mxu1 %vm4059_vm0, %v11325_v37 }
 0x30b   : > { %v11361_v55 = vld [vmem:[%s12665_s8 + $0x18] sm:$0xff]  ;;  %5059 = vmatprep.mubr.f32.mxu1 %v13767_v11  ;;  %v2646_v0 = vmul.f32 %v2614_v50, %v13871_v8  ;;  %v2870_v40 = vunpack.c.h.bf16 %v11353_v43  ;;  %v2886_v28 = vmul.f32 %v2854_v20, %v13872_v36  ;;  %v3142_v50 = vunpack.c.h.bf16 %v11367_v18  ;;  %v13873_v36 = vld [vmem:[#allocation71_spill] sm:$0xff]  ;;  %v13874_v8 = vld [vmem:[#allocation74_spill] sm:$0xff] }
 0x30c   : > { %v7315_v30 = vpack.c.bf16 %v4020_v2, %v4004_v53  ;;  %v13869_v22 = vld [vmem:[#allocation69_spill] sm:$0xff]  ;;  %v2374_v56 = vadd.f32 %v2342_v25, %v2086_v33  ;;  %7226 = vmatmul.mubr.msk.f32.gmra.mrb[38].mxu0 %vm4059_vm0, %v11361_v55  ;;  %v3158_v33 = vunpack.c.h.bf16 %v11370_v26  ;;  %v13875_v53 = vld [vmem:[#allocation66_spill] sm:$0xff] }
 0x30d   : > { %v2358_v24 = vmul.f32 %v2326_v57, %v13869_v22  ;;  %v11377_v2 = vld [vmem:[%s8500_s7 + $0x298] sm:$0xff]  ;;  %5130 = vmatprep.mubr.f32.mxu0 %v13767_v11  ;;  %v2902_v20 = vmul.f32 %v2870_v40, %v13873_v36  ;;  %v3174_v22 = vmul.f32 %v3142_v50, %v13874_v8  ;;  %v13877_v50 = vld [vmem:[#allocation70_spill] sm:$0xff] }
 0x30e   : > { %7316 = vmatprep.subr.bf16.mxu0 %v7315_v30  ;;  %v2662_v49 = vadd.f32 %v2630_v62, %v2374_v56  ;;  %7230 = vmatmul.mubr.msk.f32.gmra.mrb[38].mxu1 %vm4059_vm0, %v11361_v55  ;;  %v3398_v62 = vunpack.c.h.bf16 %v11377_v2  ;;  %v11397_v56 = vld [vmem:[%s8500_s7 + $0x318] sm:$0xff]  ;;  %v3190_v39 = vmul.f32 %v3158_v33, %v13875_v53 }
 0x30f   : > { %v2390_v57 = vadd.f32 %v2358_v24, %v2102_v59  ;;  %v11388_v59 = vld [vmem:[%s8500_s7 + $0x2d8] sm:$0xff]  ;;  %5219 = vmatprep.mubr.f32.mxu1 %v13767_v11 }
 0x310   : > { %v11400_v30 = vld [vmem:[%s8500_s7 + $0x358] sm:$0xff]  ;;  %v2918_v24 = vadd.f32 %v2886_v28, %v2662_v49  ;;  %v3414_v3 = vunpack.c.h.bf16 %v11388_v59  ;;  %v3430_v5 = vmul.f32 %v3398_v62, %v13876_v12  ;;  %v3686_v28 = vunpack.c.h.bf16 %v11397_v56  ;;  %v13879_v12 = vld [vmem:[#allocation75_spill] sm:$0xff] }
 0x311   : > { %v2678_v25 = vadd.f32 %v2646_v0, %v2390_v57  ;;  %v11407_v57 = vld [vmem:[%s8500_s7 + $0x398] sm:$0xff]  ;;  %v3702_v49 = vunpack.c.h.bf16 %v11400_v30  ;;  %v13878_v0 = vld [vmem:[#allocation72_spill] sm:$0xff] }
 0x312   : > { %v3206_v46 = vadd.f32 %v3174_v22, %v2918_v24  ;;  %v11416_v8 = vld [vmem:[%s8500_s7 + $0x3d8] sm:$0xff]  ;;  %v3446_v33 = vmul.f32 %v3414_v3, %v13877_v50  ;;  %v3718_v35 = vmul.f32 %v3686_v28, %v13878_v0  ;;  %v13883_v50 = vld [vmem:[#allocation83_spill] sm:$0xff]  ;;  %v13886_v0 = vunpack.c.l.bf16 %v11178_v44 }
 0x313   : > { %v2934_v40 = vadd.f32 %v2902_v20, %v2678_v25  ;;  %v3942_v20 = vunpack.c.h.bf16 %v11407_v57  ;;  %v3734_v22 = vmul.f32 %v3702_v49, %v13879_v12  ;;  %v3958_v19 = vunpack.c.h.bf16 %v11416_v8  ;;  %v13887_v49 = vld [vmem:[#allocation84_spill] sm:$0xff] }
 0x314   : > { %v3462_v36 = vadd.f32 %v3430_v5, %v3206_v46  ;;  %v13884_v25 = vunpack.c.l.bf16 %v11161_v58  ;;  %v13885_v5 = vld [vmem:[#allocation78_spill] sm:$0xff]  ;;  %v13893_v44 = vunpack.c.l.bf16 %v11205_v9 }
 0x315   : > { %v3222_v53 = vadd.f32 %v3190_v39, %v2934_v40  ;;  %v3974_v61 = vmul.f32 %v3942_v20, %v13880_v52  ;;  %v13882_v39 = vunpack.c.l.bf16 %v11146_v4  ;;  %v2339_v28 = vmul.f32 %v13886_v0, %v13885_v5  ;;  %v13889_v20 = vld [vmem:[#allocation82_spill] sm:$0xff]  ;;  %v13894_v0 = vld [vmem:[#allocation80_spill] sm:$0xff] }
 0x316   : > { %v3750_v40 = vadd.f32 %v3718_v35, %v3462_v36  ;;  %v2099_v46 = vmul.f32 %v13884_v25, %v13883_v50  ;;  %v3957_v52 = vunpack.c.l.bf16 %v11416_v8  ;;  %v3990_v62 = vmul.f32 %v3958_v19, %v13889_v20  ;;  %v13890_v4 = vld [vmem:[#allocation86_spill] sm:$0xff] }
 0x317   : > { %v3478_v24 = vadd.f32 %v3446_v33, %v3222_v53  ;;  %v2083_v3 = vmul.f32 %v13882_v39, %v13881_v17  ;;  %v13888_v53 = vunpack.c.l.bf16 %v11184_v47  ;;  %v13891_v35 = vunpack.c.l.bf16 %v11194_v27  ;;  %v13892_v39 = vld [vmem:[#allocation87_spill] sm:$0xff] }
 0x318   : > { %v4006_v36 = vadd.f32 %v3974_v61, %v3750_v40  ;;  %v2643_v50 = vmul.f32 %v13893_v44, %v13892_v39  ;;  %v13895_v47 = vunpack.c.l.bf16 %v11212_v7  ;;  %v13899_v27 = vunpack.c.l.bf16 %v11224_v1  ;;  %v13900_v40 = vld [vmem:[#allocation92_spill] sm:$0xff]  ;;  %v13908_v44 = vld [vmem:[#allocation93_spill] sm:$0xff] }
 0x319   : > { %v2355_v33 = vmul.f32 %v13888_v53, %v13887_v49  ;;  %v3766_v12 = vadd.f32 %v3734_v22, %v3478_v24  ;;  %v2627_v17 = vmul.f32 %v13891_v35, %v13890_v4  ;;  %v2371_v58 = vadd.f32 %v2339_v28, %v2083_v3  ;;  %v13896_v24 = vld [vmem:[#allocation81_spill] sm:$0xff]  ;;  %v13898_v53 = vld [vmem:[#allocation88_spill] sm:$0xff]  ;;  %v13902_v28 = vld [vmem:[#allocation91_spill] sm:$0xff] }
 0x31a   : > { %v2883_v22 = vmul.f32 %v13895_v47, %v13894_v0  ;;  %v13897_v49 = vunpack.c.l.bf16 %v11218_v32  ;;  %v3171_v20 = vmul.f32 %v13899_v27, %v13898_v53  ;;  %v13905_v4 = vunpack.c.l.bf16 %v11248_v48  ;;  %v13906_v35 = vld [vmem:[#allocation89_spill] sm:$0xff]  ;;  %v13912_v47 = vld [vmem:[#allocation7_spill] sm:$0xff]  ;;  %v13918_v27 = vld [vmem:[#allocation130_spill] sm:$0xff] }
 0x31b   : > { %v2387_v25 = vadd.f32 %v2355_v33, %v2099_v46  ;;  %v4022_v5 = vadd.f32 %v3990_v62, %v3766_v12  ;;  %v2659_v61 = vadd.f32 %v2627_v17, %v2371_v58  ;;  %v13901_v46 = vunpack.c.l.bf16 %v11233_v21  ;;  %v13904_v12 = vld [vmem:[#allocation90_spill] sm:$0xff] }
 0x31c   : > { %v2899_v19 = vmul.f32 %v13897_v49, %v13896_v24  ;;  %v13903_v62 = vunpack.c.l.bf16 %v11238_v63  ;;  %v3443_v32 = vmul.f32 %v13905_v4, %v13904_v12  ;;  %v13907_v39 = vunpack.c.l.bf16 %v11259_v41  ;;  %v4853_v48 = vld [vmem:[%s12666_s9 + $0x8] sm:$0xff]  ;;  %v11479_v41 = vpop.f32.mrb[0].mxu0  ;;  %v11481_v24 = vpop.f32.mrb[0].mxu1 }
 0x31d   : > { %v2675_v3 = vadd.f32 %v2643_v50, %v2387_v25  ;;  %v3187_v9 = vmul.f32 %v13901_v46, %v13900_v40  ;;  %v7319_v7 = vpack.c.bf16 %v4022_v5, %v4006_v36  ;;  %v13909_v17 = vunpack.c.l.bf16 %v11265_v38  ;;  %v13910_v50 = vld [vmem:[#allocation85_spill] sm:$0xff]  ;;  %v13914_v38 = vld [vmem:[#allocation94_spill] sm:$0xff]  ;;  %4863 = vperm.xlu1 %7495, %v4853_v48  }
 0x31e   : > { %v3427_v33 = vmul.f32 %v13903_v62, %v13902_v28  ;;  %v3715_v1 = vmul.f32 %v13907_v39, %v13906_v35  ;;  %v2915_v25 = vadd.f32 %v2883_v22, %v2659_v61  ;;  %v13911_v0 = vunpack.c.l.bf16 %v11271_v60  ;;  %v11495_v28 = vpop.f32.mrb[1].mxu0  ;;  %v11497_v62 = vpop.f32.mrb[1].mxu1 }
 0x31f   : > { %v3731_v58 = vmul.f32 %v13909_v17, %v13908_v44  ;;  %v2931_v21 = vadd.f32 %v2899_v19, %v2675_v3  ;;  %v13913_v36 = vunpack.c.l.bf16 %v11296_v13  ;;  %7320 = vmatprep.subr.bf16.mxu1 %v7319_v7  ;;  %v13915_v22 = vunpack.c.l.bf16 %v11282_v51  ;;  %v13916_v19 = vld [vmem:[#allocation8_spill] sm:$0xff]  ;;  %v13920_v3 = vld [vmem:[#allocation131_spill] sm:$0xff]  ;;  %v13922_v51 = vld [vmem:[#allocation98_spill] sm:$0xff]  ;;  %v11507_v17 = vpop.f32.mrb[2].mxu1 }
 0x320   : > { %v3971_v63 = vmul.f32 %v13911_v0, %v13910_v50  ;;  %v13917_v60 = vunpack.c.l.bf16 %v11303_v31  ;;  %v13919_v13 = vunpack.c.l.bf16 %v11309_v54  ;;  %v13921_v40 = vunpack.c.l.bf16 %v11317_v10  ;;  %v13924_v31 = vld [vmem:[#allocation16_spill] sm:$0xff]  ;;  %v11505_v54 = vpop.f32.mrb[2].mxu0  ;;  %13927 = vst [vmem:[#allocation107_spill] sm:$0xff] %v11507_v17  ;;  %v14005_v17 = vld [vmem:[#allocation177_spill] sm:$0xff] }
 0x321   : > { %v2085_v5 = vmul.f32 %v13913_v36, %v13912_v47  ;;  %v3987_v49 = vmul.f32 %v13915_v22, %v13914_v38  ;;  %v3203_v7 = vadd.f32 %v3171_v20, %v2915_v25  ;;  %v3219_v12 = vadd.f32 %v3187_v9, %v2931_v21  ;;  %13926 = vst [vmem:[#allocation101_spill] sm:$0xff] %v11505_v54  ;;  %v13928_v0 = vld [vmem:[#allocation12_spill] sm:$0xff]  ;;  %v13930_v9 = vld [vmem:[#allocation13_spill] sm:$0xff]  ;;  %v11518_v21 = vpop.f32.mrb[3].mxu0  ;;  %v11520_v36 = vpop.f32.mrb[3].mxu1 }
 0x322   : > { %v2101_v53 = vmul.f32 %v13917_v60, %v13916_v19  ;;  %v2341_v61 = vmul.f32 %v13919_v13, %v13918_v27  ;;  %v2357_v46 = vmul.f32 %v13921_v40, %v13920_v3  ;;  %v13923_v4 = vunpack.c.l.bf16 %v11331_v23  ;;  %13932 = vst [vmem:[#allocation207_spill] sm:$0xff] %v11518_v21  ;;  %13933 = vst [vmem:[#allocation235_spill] sm:$0xff] %v11520_v36  ;;  %v13934_v38 = vld [vmem:[#allocation132_spill] sm:$0xff]  ;;  %v13936_v19 = vld [vmem:[#allocation133_spill] sm:$0xff]  ;;  %v11530_v27 = vpop.f32.mrb[4].mxu1 }
 0x323   : > { %v13925_v39 = vunpack.c.l.bf16 %v11334_v45  ;;  %v13929_v47 = vunpack.c.l.bf16 %v11341_v16  ;;  %v13931_v23 = vunpack.c.l.bf16 %v11353_v43  ;;  %v4855_v45 = vld [vmem:[%s12666_s9 + $0x18] sm:$0xff]  ;;  %v3459_v48 = vadd.f32 %v3427_v33, %v3203_v7  ;;  %13939 = vst [vmem:[#allocation237_spill] sm:$0xff] %v11530_v27  ;;  %v13940_v3 = vld [vmem:[#allocation134_spill] sm:$0xff] }
 0x324   : > { %v2629_v35 = vmul.f32 %v13923_v4, %v13922_v51  ;;  %v2373_v10 = vadd.f32 %v2341_v61, %v2085_v5  ;;  %v2389_v50 = vadd.f32 %v2357_v46, %v2101_v53  ;;  %v3475_v5 = vadd.f32 %v3443_v32, %v3219_v12  ;;  %v11528_v53 = vpop.f32.mrb[4].mxu0  ;;  %v13942_v32 = vld [vmem:[#allocation135_spill] sm:$0xff]  ;;  %v11539_v7 = vld [vmem:[%s8500_s7 + $0x20] sm:$0xff]  ;;  %4873 = vperm.xlu1 %7495, %v4855_v45  }
 0x325   : > { %v2645_v44 = vmul.f32 %v13925_v39, %v13924_v31  ;;  %v2885_v20 = vmul.f32 %v13929_v47, %v13928_v0  ;;  %v2901_v25 = vmul.f32 %v13931_v23, %v13930_v9  ;;  %v13935_v22 = vunpack.c.l.bf16 %v11367_v18  ;;  %13938 = vst [vmem:[#allocation236_spill] sm:$0xff] %v11528_v53  ;;  %v11541_v12 = vpop.f32.mrb[5].mxu0  ;;  %v13946_v31 = vld [vmem:[#allocation136_spill] sm:$0xff] }
 0x326   : > { %v13937_v60 = vunpack.c.l.bf16 %v11370_v26  ;;  %v2661_v13 = vadd.f32 %v2629_v35, %v2373_v10  ;;  %v13941_v40 = vunpack.c.l.bf16 %v11377_v2  ;;  %v13943_v46 = vunpack.c.l.bf16 %v11388_v59  ;;  %13944 = vst [vmem:[#allocation238_spill] sm:$0xff] %v11541_v12  ;;  %v11543_v26 = vpop.f32.mrb[5].mxu1  ;;  %v11554_v59 = vpop.f32.mrb[6].mxu0  ;;  %v13999_v12 = vld [vmem:[#allocation169_spill] sm:$0xff] }
 0x327   : > { %v3173_v16 = vmul.f32 %v13935_v22, %v13934_v38  ;;  %v2677_v61 = vadd.f32 %v2645_v44, %v2389_v50  ;;  %13945 = vst [vmem:[#allocation171_spill] sm:$0xff] %v11543_v26  ;;  %v3747_v51 = vadd.f32 %v3715_v1, %v3459_v48  ;;  %v3763_v4 = vadd.f32 %v3731_v58, %v3475_v5  ;;  %v13948_v44 = vld [vmem:[#allocation137_spill] sm:$0xff]  ;;  %v11552_v50 = vld [vmem:[%s8500_s7 + $0x60] sm:$0xff]  ;;  %v11556_v0 = vpop.f32.mrb[6].mxu1  ;;  %v11567_v38 = vpop.f32.mrb[7].mxu0 }
 0x328   : > { %v3189_v43 = vmul.f32 %v13937_v60, %v13936_v19  ;;  %v3429_v33 = vmul.f32 %v13941_v40, %v13940_v3  ;;  %v3445_v18 = vmul.f32 %v13943_v46, %v13942_v32  ;;  %v13947_v35 = vunpack.c.l.bf16 %v11397_v56  ;;  %13950 = vst [vmem:[#allocation102_spill] sm:$0xff] %v11554_v59  ;;  %13951 = vst [vmem:[#allocation108_spill] sm:$0xff] %v11556_v0  ;;  %v13952_v1 = vld [vmem:[#allocation138_spill] sm:$0xff]  ;;  %v13954_v56 = vld [vmem:[#allocation139_spill] sm:$0xff]  ;;  %v11569_v45 = vpop.f32.mrb[7].mxu1  ;;  %v11576_v60 = vpop.f32.mrb[8].mxu0 }
 0x329   : > { %v13949_v2 = vunpack.c.l.bf16 %v11400_v30  ;;  %v2917_v47 = vadd.f32 %v2885_v20, %v2661_v13  ;;  %v2933_v9 = vadd.f32 %v2901_v25, %v2677_v61  ;;  %v13953_v58 = vunpack.c.l.bf16 %v11407_v57  ;;  %v11565_v30 = vld [vmem:[%s8500_s7 + $0xa0] sm:$0xff]  ;;  %v5665_v5 = vld [vmem:[#allocation2] sm:$0x1]  ;;  %13955 = vst [vmem:[#allocation103_spill] sm:$0xff] %v11567_v38  ;;  %13956 = vst [vmem:[#allocation109_spill] sm:$0xff] %v11569_v45  ;;  %v11578_v8 = vpop.f32.mrb[8].mxu1 }
 0x32a   : > { %v3717_v39 = vmul.f32 %v13947_v35, %v13946_v31  ;;  %v3989_v48 = vmul.f32 %v3957_v52, %v13954_v56  ;;  %v4003_v22 = vadd.f32 %v3971_v63, %v3747_v51  ;;  %v4019_v19 = vadd.f32 %v3987_v49, %v3763_v4  ;;  %v11574_v25 = vld [vmem:[%s8500_s7 + $0xe0] sm:$0xff]  ;;  %13957 = vst [vmem:[#allocation104_spill] sm:$0xff] %v11576_v60  ;;  %v11585_v49 = vpop.f32.mrb[9].mxu0  ;;  %v11587_v40 = vpop.f32.mrb[9].mxu1  ;;  %v13973_v20 = vld [vmem:[#allocation144_spill] sm:$0xff]  ;;  %v11750_v60 = vld [vmem:[%s8500_s7 + $0x228] sm:$0xff] }
 0x32b   : > { %v3733_v10 = vmul.f32 %v13949_v2, %v13948_v44  ;;  %v3973_v23 = vmul.f32 %v13953_v58, %v13952_v1  ;;  %v2056_v57 = vunpack.c.h.bf16 %v11539_v7  ;;  %13958 = vst [vmem:[#allocation110_spill] sm:$0xff] %v11578_v8  ;;  %v3205_v52 = vadd.f32 %v3173_v16, %v2917_v47  ;;  %v11583_v63 = vld [vmem:[%s8500_s7 + $0x120] sm:$0xff]  ;;  %13959 = vst [vmem:[#allocation172_spill] sm:$0xff] %v11585_v49  ;;  %v11597_v35 = vpop.f32.mrb[10].mxu1  ;;  %v13964_v47 = vld [vmem:[#allocation143_spill] sm:$0xff] }
 0x32c   : > { %v3221_v13 = vadd.f32 %v3189_v43, %v2933_v9  ;;  %v2072_v3 = vunpack.c.h.bf16 %v11552_v50  ;;  %13960 = vst [vmem:[#allocation111_spill] sm:$0xff] %v11587_v40  ;;  %v7317_v32 = vpack.c.bf16 %v4019_v19, %v4003_v22  ;;  %v13961_v46 = vld [vmem:[#allocation142_spill] sm:$0xff]  ;;  %v2312_v31 = vunpack.c.h.bf16 %v11565_v30  ;;  %5668 = vperm.xlu1 %7495, %v5665_v5   ;;  %v11595_v43 = vpop.f32.mrb[10].mxu0  ;;  %13963 = vst [vmem:[#allocation99_spill] sm:$0xff] %v11597_v35  ;;  %v11606_v22 = vpop.f32.mrb[11].mxu1  ;;  %v13967_v19 = vld [vmem:[#allocation61_spill] sm:$0xff] }
 0x32d   : > { %v2088_v51 = vmul.f32 %v2056_v57, %v13961_v46  ;;  %v11593_v16 = vld [vmem:[%s8500_s7 + $0x160] sm:$0xff]  ;;  %13962 = vst [vmem:[#allocation112_spill] sm:$0xff] %v11595_v43  ;;  %v3461_v44 = vadd.f32 %v3429_v33, %v3205_v52  ;;  %v2328_v1 = vunpack.c.h.bf16 %v11574_v25  ;;  %v11604_v56 = vpop.f32.mrb[11].mxu0  ;;  %13966 = vst [vmem:[#allocation105_spill] sm:$0xff] %v11606_v22  ;;  %v11719_v40 = vld [vmem:[%s8500_s7 + $0x128] sm:$0xff] }
 0x32e   : > { %v3477_v2 = vadd.f32 %v3445_v18, %v3221_v13  ;;  %v2104_v9 = vmul.f32 %v2072_v3, %v13964_v47  ;;  %v11602_v58 = vld [vmem:[%s8500_s7 + $0x1a0] sm:$0xff]  ;;  %13965 = vst [vmem:[#allocation113_spill] sm:$0xff] %v11604_v56  ;;  %7318 = vmatpush1.bf16.msra.mxu0 %v7317_v32  ;;  %v2344_v57 = vmul.f32 %v2312_v31, %v13967_v19  ;;  %v2600_v18 = vunpack.c.h.bf16 %v11583_v63  ;;  %v11612_v52 = vpop.f32.mrb[12].mxu0  ;;  %v11614_v13 = vpop.f32.mrb[12].mxu1  ;;  %v13970_v47 = vld [vmem:[#allocation79_spill] sm:$0xff]  ;;  %v13994_v38 = vld [vmem:[#allocation161_spill] sm:$0xff] }
 0x32f   : > { %13968 = vst [vmem:[#allocation114_spill] sm:$0xff] %v11612_v52  ;;  %13969 = vst [vmem:[#allocation117_spill] sm:$0xff] %v11614_v13  ;;  %v3749_v3 = vadd.f32 %v3717_v39, %v3461_v44  ;;  %v2360_v4 = vmul.f32 %v2328_v1, %v13970_v47  ;;  %v2616_v32 = vunpack.c.h.bf16 %v11593_v16  ;;  %v11619_v61 = vld [vmem:[%s8500_s7 + $0x1e0] sm:$0xff]  ;;  %v11621_v5 = vpop.f32.mrb[13].mxu0  ;;  %v11623_v31 = vpop.f32.mrb[13].mxu1  ;;  %v2856_v13 = vunpack.c.h.bf16 %v11602_v58  ;;  %v11689_v56 = vld [vmem:[%s8500_s7 + $0x28] sm:$0xff] }
 0x330   : > { %v3765_v46 = vadd.f32 %v3733_v10, %v3477_v2  ;;  %13971 = vst [vmem:[#allocation120_spill] sm:$0xff] %v11621_v5  ;;  %13972 = vst [vmem:[#allocation118_spill] sm:$0xff] %v11623_v31  ;;  %v2376_v19 = vadd.f32 %v2344_v57, %v2088_v51  ;;  %v2632_v52 = vmul.f32 %v2600_v18, %v13973_v20  ;;  %v11629_v39 = vld [vmem:[%s8500_s7 + $0x220] sm:$0xff]  ;;  %v11631_v10 = vpop.f32.mrb[14].mxu0  ;;  %v11633_v44 = vpop.f32.mrb[14].mxu1  ;;  %v13976_v5 = vld [vmem:[#allocation145_spill] sm:$0xff]  ;;  %v2058_v35 = vunpack.c.h.bf16 %v11689_v56 }
 0x331   : > { %13974 = vst [vmem:[#allocation121_spill] sm:$0xff] %v11631_v10  ;;  %13975 = vst [vmem:[#allocation115_spill] sm:$0xff] %v11633_v44  ;;  %v4005_v2 = vadd.f32 %v3973_v23, %v3749_v3  ;;  %v2392_v47 = vadd.f32 %v2360_v4, %v2104_v9  ;;  %v2648_v31 = vmul.f32 %v2616_v32, %v13976_v5  ;;  %v11637_v51 = vld [vmem:[%s8500_s7 + $0x260] sm:$0xff]  ;;  %7231 = vmatmul.mubr.msk.f32.vlgmr.msra.gmra.mrb[40].mxu0 %vm4059_vm0, %v11253_v15  ;;  %v11641_v20 = vpop.f32.mrb[15].mxu0  ;;  %v11643_v57 = vpop.f32.mrb[15].mxu1  ;;  %v11722_v49 = vld [vmem:[%s8500_s7 + $0x168] sm:$0xff] }
 0x332   : > { %v4021_v1 = vadd.f32 %v3989_v48, %v3765_v46  ;;  %13977 = vst [vmem:[#allocation39_spill] sm:$0xff] %v11641_v20  ;;  %13978 = vst [vmem:[#allocation57_spill] sm:$0xff] %v11643_v57  ;;  %v2664_v18 = vadd.f32 %v2632_v52, %v2376_v19  ;;  %v2872_v23 = vunpack.c.h.bf16 %v11619_v61  ;;  %v13979_v48 = vld [vmem:[#allocation140_spill] sm:$0xff]  ;;  %v11649_v9 = vld [vmem:[%s8500_s7 + $0x2a0] sm:$0xff]  ;;  %5136 = vmatprep.mubr.f32.mxu0 %v13767_v11  ;;  %v3144_v32 = vunpack.c.h.bf16 %v11629_v39 }
 0x333   : > { %v2888_v4 = vmul.f32 %v2856_v13, %v13979_v48  ;;  %v2680_v3 = vadd.f32 %v2648_v31, %v2392_v47  ;;  %v11655_v57 = vld [vmem:[%s8500_s7 + $0x2e0] sm:$0xff]  ;;  %v13980_v52 = vld [vmem:[#allocation141_spill] sm:$0xff]  ;;  %v3160_v13 = vunpack.c.h.bf16 %v11637_v51  ;;  %v3400_v46 = vunpack.c.h.bf16 %v11649_v9  ;;  %v11744_v8 = vld [vmem:[%s8500_s7 + $0x1e8] sm:$0xff] }
 0x334   : > { %v7321_v5 = vpack.c.bf16 %v4021_v1, %v4005_v2  ;;  %v2904_v19 = vmul.f32 %v2872_v23, %v13980_v52  ;;  %v11661_v48 = vld [vmem:[%s8500_s7 + $0x320] sm:$0xff]  ;;  %v13982_v23 = vld [vmem:[#allocation147_spill] sm:$0xff]  ;;  %v3416_v52 = vunpack.c.h.bf16 %v11655_v57  ;;  %v2618_v20 = vunpack.c.h.bf16 %v11722_v49  ;;  %v13996_v59 = vld [vmem:[#allocation165_spill] sm:$0xff] }
 0x335   : > { %v2920_v33 = vadd.f32 %v2888_v4, %v2664_v18  ;;  %v13981_v31 = vld [vmem:[#allocation146_spill] sm:$0xff]  ;;  %7232 = vmatmul.mubr.msk.f32.gmra.mrb[42].mxu0 %vm4059_vm0, %v11290_v14  ;;  %v3192_v4 = vmul.f32 %v3160_v13, %v13982_v23  ;;  %v3688_v10 = vunpack.c.h.bf16 %v11661_v48  ;;  %v11753_v45 = vld [vmem:[%s8500_s7 + $0x268] sm:$0xff] }
 0x336   : > { %7322 = vmatpush1.bf16.msra.mxu1 %v7321_v5  ;;  %v3176_v1 = vmul.f32 %v3144_v32, %v13981_v31  ;;  %v11668_v44 = vld [vmem:[%s8500_s7 + $0x360] sm:$0xff]  ;;  %v2936_v18 = vadd.f32 %v2904_v19, %v2680_v3  ;;  %5142 = vmatprep.mubr.f32.mxu0 %v13767_v11  ;;  %v13983_v31 = vld [vmem:[#allocation148_spill] sm:$0xff]  ;;  %v13984_v19 = vld [vmem:[#allocation149_spill] sm:$0xff]  ;;  %v2650_v0 = vmul.f32 %v2618_v20, %v13994_v38  ;;  %v3146_v20 = vunpack.c.h.bf16 %v11750_v60 }
 0x337   : > { %v11676_v2 = vld [vmem:[%s8500_s7 + $0x3a0] sm:$0xff]  ;;  %v3432_v47 = vmul.f32 %v3400_v46, %v13983_v31  ;;  %v3448_v13 = vmul.f32 %v3416_v52, %v13984_v19  ;;  %v3704_v5 = vunpack.c.h.bf16 %v11668_v44  ;;  %v13986_v19 = vld [vmem:[#allocation151_spill] sm:$0xff]  ;;  %v13987_v31 = vld [vmem:[#allocation152_spill] sm:$0xff] }
 0x338   : > { %v3208_v32 = vadd.f32 %v3176_v1, %v2920_v33  ;;  %v11683_v22 = vld [vmem:[%s8500_s7 + $0x3e0] sm:$0xff]  ;;  %v3224_v3 = vadd.f32 %v3192_v4, %v2936_v18  ;;  %v3944_v18 = vunpack.c.h.bf16 %v11676_v2  ;;  %v11697_v4 = vld [vmem:[%s8500_s7 + $0x68] sm:$0xff] }
 0x339   : > { %7235 = vmatmul.mubr.msk.f32.vlgmr.msra.gmra.mrb[40].mxu1 %vm4059_vm0, %v11253_v15  ;;  %v13985_v46 = vld [vmem:[#allocation150_spill] sm:$0xff]  ;;  %7233 = vmatmul.mubr.msk.f32.gmra.mrb[44].mxu0 %vm4059_vm0, %v11325_v37  ;;  %v3736_v15 = vmul.f32 %v3704_v5, %v13986_v19  ;;  %v13988_v5 = vld [vmem:[#allocation153_spill] sm:$0xff]  ;;  %v2074_v43 = vunpack.c.h.bf16 %v11697_v4  ;;  %v13998_v38 = vld [vmem:[#allocation167_spill] sm:$0xff] }
 0x33a   : > { %v3464_v33 = vadd.f32 %v3432_v47, %v3208_v32  ;;  %v3720_v1 = vmul.f32 %v3688_v10, %v13985_v46  ;;  %5225 = vmatprep.mubr.f32.mxu1 %v13767_v11  ;;  %v3480_v52 = vadd.f32 %v3448_v13, %v3224_v3  ;;  %v3960_v10 = vunpack.c.h.bf16 %v11683_v22  ;;  %v11706_v32 = vld [vmem:[%s8500_s7 + $0xa8] sm:$0xff]  ;;  %5148 = vmatprep.mubr.f32.mxu0 %v13767_v11 }
 0x33b   : > { %v3976_v23 = vmul.f32 %v3944_v18, %v13987_v31  ;;  %v11713_v3 = vld [vmem:[%s8500_s7 + $0xe8] sm:$0xff]  ;;  %v2602_v47 = vunpack.c.h.bf16 %v11719_v40 }
 0x33c   : > { %v3752_v46 = vadd.f32 %v3720_v1, %v3464_v33  ;;  %v3768_v13 = vadd.f32 %v3736_v15, %v3480_v52  ;;  %v3992_v19 = vmul.f32 %v3960_v10, %v13988_v5  ;;  %v13989_v1 = vld [vmem:[#allocation158_spill] sm:$0xff]  ;;  %v2314_v52 = vunpack.c.h.bf16 %v11706_v32  ;;  %v11730_v15 = vld [vmem:[%s8500_s7 + $0x1a8] sm:$0xff] }
 0x33d   : > { %7236 = vmatmul.mubr.msk.f32.gmra.mrb[42].mxu1 %vm4059_vm0, %v11290_v14  ;;  %v2090_v31 = vmul.f32 %v2058_v35, %v13989_v1  ;;  %7234 = vmatmul.mubr.msk.f32.gmra.mrb[46].mxu0 %vm4059_vm0, %v11361_v55  ;;  %v13990_v5 = vld [vmem:[#allocation162_spill] sm:$0xff]  ;;  %v2330_v35 = vunpack.c.h.bf16 %v11713_v3 }
 0x33e   : > { %v4008_v33 = vadd.f32 %v3976_v23, %v3752_v46  ;;  %5231 = vmatprep.mubr.f32.mxu1 %v13767_v11  ;;  %v4024_v10 = vadd.f32 %v3992_v19, %v3768_v13  ;;  %v2106_v14 = vmul.f32 %v2074_v43, %v13990_v5  ;;  %5308 = vmatprep.mubr.f32.mxu0 %v13767_v11  ;;  %v13991_v46 = vld [vmem:[#allocation159_spill] sm:$0xff]  ;;  %v2858_v23 = vunpack.c.h.bf16 %v11730_v15  ;;  %v13995_v5 = vld [vmem:[#allocation164_spill] sm:$0xff] }
 0x33f   : > { %v2346_v1 = vmul.f32 %v2314_v52, %v13991_v46  ;;  %v13992_v19 = vld [vmem:[#allocation163_spill] sm:$0xff]  ;;  %v13993_v46 = vld [vmem:[#allocation160_spill] sm:$0xff] }
 0x340   : > { %v7323_v13 = vpack.c.bf16 %v4024_v10, %v4008_v33  ;;  %v2362_v43 = vmul.f32 %v2330_v35, %v13992_v19  ;;  %v2634_v18 = vmul.f32 %v2602_v47, %v13993_v46  ;;  %v11761_v10 = vld [vmem:[%s8500_s7 + $0x2a8] sm:$0xff]  ;;  %v3162_v47 = vunpack.c.h.bf16 %v11753_v45 }
 0x341   : > { %7237 = vmatmul.mubr.msk.f32.gmra.mrb[44].mxu1 %vm4059_vm0, %v11325_v37  ;;  %v2378_v52 = vadd.f32 %v2346_v1, %v2090_v31  ;;  %v2874_v37 = vunpack.c.h.bf16 %v11744_v8  ;;  %v2890_v31 = vmul.f32 %v2858_v23, %v13995_v5  ;;  %v11771_v46 = vld [vmem:[%s8500_s7 + $0x2e8] sm:$0xff]  ;;  %v13997_v5 = vld [vmem:[#allocation166_spill] sm:$0xff] }
 0x342   : > { %5237 = vmatprep.mubr.f32.mxu1 %v13767_v11  ;;  %7324 = vmatprep.subr.bf16.mxu0 %v7323_v13  ;;  %v2394_v35 = vadd.f32 %v2362_v43, %v2106_v14  ;;  %v3402_v43 = vunpack.c.h.bf16 %v11761_v10  ;;  %v11777_v19 = vld [vmem:[%s8500_s7 + $0x328] sm:$0xff]  ;;  %v3194_v26 = vmul.f32 %v3162_v47, %v13998_v38  ;;  %v3418_v14 = vunpack.c.h.bf16 %v11771_v46 }
 0x343   : > { %v2666_v1 = vadd.f32 %v2634_v18, %v2378_v52  ;;  %v2906_v13 = vmul.f32 %v2874_v37, %v13996_v59  ;;  %v11780_v23 = vld [vmem:[%s8500_s7 + $0x368] sm:$0xff]  ;;  %v3178_v52 = vmul.f32 %v3146_v20, %v13997_v5  ;;  %v3690_v38 = vunpack.c.h.bf16 %v11777_v19 }
 0x344   : > { %v2682_v33 = vadd.f32 %v2650_v0, %v2394_v35  ;;  %v11788_v59 = vld [vmem:[%s8500_s7 + $0x3a8] sm:$0xff]  ;;  %v3434_v27 = vmul.f32 %v3402_v43, %v13999_v12  ;;  %v3706_v20 = vunpack.c.h.bf16 %v11780_v23  ;;  %v14009_v0 = vld [vmem:[#allocation185_spill] sm:$0xff] }
 0x345   : > { %7238 = vmatmul.mubr.msk.f32.gmra.mrb[46].mxu1 %vm4059_vm0, %v11361_v55  ;;  %v2922_v18 = vadd.f32 %v2890_v31, %v2666_v1  ;;  %v11794_v55 = vpop.f32.mrb[16].mxu0  ;;  %v11800_v47 = vld [vmem:[%s8500_s7 + $0x3e8] sm:$0xff]  ;;  %v3946_v12 = vunpack.c.h.bf16 %v11788_v59 }
 0x346   : > { %5397 = vmatprep.mubr.f32.mxu1 %v13767_v11  ;;  %v2938_v35 = vadd.f32 %v2906_v13, %v2682_v33  ;;  %14000 = vst [vmem:[#allocation122_spill] sm:$0xff] %v11794_v55  ;;  %v11802_v5 = vpop.f32.mrb[17].mxu0  ;;  %v14002_v13 = vld [vmem:[#allocation170_spill] sm:$0xff]  ;;  %v14003_v55 = vld [vmem:[#allocation175_spill] sm:$0xff]  ;;  %v3962_v21 = vunpack.c.h.bf16 %v11800_v47 }
 0x347   : > { %v3210_v31 = vadd.f32 %v3178_v52, %v2922_v18  ;;  %14001 = vst [vmem:[#allocation116_spill] sm:$0xff] %v11802_v5  ;;  %v3450_v37 = vmul.f32 %v3418_v14, %v14002_v13  ;;  %v3722_v18 = vmul.f32 %v3690_v38, %v14003_v55  ;;  %v14004_v52 = vld [vmem:[#allocation176_spill] sm:$0xff]  ;;  %v3978_v54 = vmul.f32 %v3946_v12, %v14005_v17  ;;  %v14006_v5 = vld [vmem:[#allocation181_spill] sm:$0xff] }
 0x348   : > { %v3226_v33 = vadd.f32 %v3194_v26, %v2938_v35  ;;  %v3738_v1 = vmul.f32 %v3706_v20, %v14004_v52  ;;  %v14007_v26 = vunpack.c.l.bf16 %v11539_v7  ;;  %v11815_v35 = vpop.f32.mrb[18].mxu0  ;;  %v14012_v38 = vunpack.c.l.bf16 %v11565_v30  ;;  %v14019_v30 = vld [vmem:[#allocation184_spill] sm:$0xff] }
 0x349   : > { %v3466_v43 = vadd.f32 %v3434_v27, %v3210_v31  ;;  %14008 = vst [vmem:[#allocation119_spill] sm:$0xff] %v11815_v35  ;;  %v14010_v27 = vunpack.c.l.bf16 %v11552_v50  ;;  %v14011_v31 = vld [vmem:[#allocation182_spill] sm:$0xff]  ;;  %v11826_v17 = vpop.f32.mrb[19].mxu0  ;;  %v3961_v7 = vunpack.c.l.bf16 %v11800_v47  ;;  %v14024_v47 = vunpack.c.l.bf16 %v11619_v61 }
 0x34a   : > { %v3482_v36 = vadd.f32 %v3450_v37, %v3226_v33  ;;  %v2087_v14 = vmul.f32 %v14007_v26, %v14006_v5  ;;  %v2343_v20 = vmul.f32 %v14012_v38, %v14011_v31  ;;  %v14013_v37 = vld [vmem:[#allocation186_spill] sm:$0xff]  ;;  %v14014_v33 = vunpack.c.l.bf16 %v11574_v25  ;;  %14015 = vst [vmem:[#allocation123_spill] sm:$0xff] %v11826_v17 }
 0x34b   : > { %v3754_v13 = vadd.f32 %v3722_v18, %v3466_v43  ;;  %v2103_v55 = vmul.f32 %v14010_v27, %v14009_v0  ;;  %v14016_v5 = vld [vmem:[#allocation178_spill] sm:$0xff]  ;;  %v14017_v43 = vld [vmem:[#allocation183_spill] sm:$0xff]  ;;  %v14018_v18 = vunpack.c.l.bf16 %v11583_v63  ;;  %v14020_v31 = vunpack.c.l.bf16 %v11593_v16 }
 0x34c   : > { %v2359_v52 = vmul.f32 %v14014_v33, %v14013_v37  ;;  %v3770_v12 = vadd.f32 %v3738_v1, %v3482_v36  ;;  %v3994_v26 = vmul.f32 %v3962_v21, %v14016_v5  ;;  %v2375_v27 = vadd.f32 %v2343_v20, %v2087_v14  ;;  %v14021_v37 = vld [vmem:[#allocation187_spill] sm:$0xff]  ;;  %v14023_v1 = vld [vmem:[#allocation188_spill] sm:$0xff]  ;;  %v14025_v5 = vld [vmem:[#allocation189_spill] sm:$0xff] }
 0x34d   : > { %v2631_v50 = vmul.f32 %v14018_v18, %v14017_v43  ;;  %v4010_v0 = vadd.f32 %v3978_v54, %v3754_v13  ;;  %v2647_v38 = vmul.f32 %v14020_v31, %v14019_v30  ;;  %v14022_v33 = vunpack.c.l.bf16 %v11602_v58  ;;  %v11845_v54 = vpop.f32.mrb[20].mxu0  ;;  %v14033_v18 = vld [vmem:[#allocation192_spill] sm:$0xff]  ;;  %v14035_v31 = vld [vmem:[#allocation179_spill] sm:$0xff] }
 0x34e   : > { %v2391_v53 = vadd.f32 %v2359_v52, %v2103_v55  ;;  %v4026_v25 = vadd.f32 %v3994_v26, %v3770_v12  ;;  %v2903_v21 = vmul.f32 %v14024_v47, %v14023_v1  ;;  %v14026_v63 = vunpack.c.l.bf16 %v11629_v39  ;;  %14027 = vst [vmem:[#allocation125_spill] sm:$0xff] %v11845_v54  ;;  %v14028_v55 = vld [vmem:[#allocation190_spill] sm:$0xff]  ;;  %v14030_v52 = vld [vmem:[#allocation191_spill] sm:$0xff]  ;;  %v11853_v26 = vpop.f32.mrb[21].mxu0  ;;  %v14039_v1 = vld [vmem:[#allocation193_spill] sm:$0xff] }
 0x34f   : > { %v2887_v36 = vmul.f32 %v14022_v33, %v14021_v37  ;;  %v2663_v14 = vadd.f32 %v2631_v50, %v2375_v27  ;;  %v14029_v16 = vunpack.c.l.bf16 %v11637_v51  ;;  %v14031_v58 = vunpack.c.l.bf16 %v11649_v9  ;;  %14032 = vst [vmem:[#allocation124_spill] sm:$0xff] %v11853_v26  ;;  %v14108_v26 = vld [vmem:[#allocation226_spill] sm:$0xff]  ;;  %v14109_v54 = vld [vmem:[#allocation229_spill] sm:$0xff] }
 0x350   : > { %v3175_v43 = vmul.f32 %v14026_v63, %v14025_v5  ;;  %v2679_v13 = vadd.f32 %v2647_v38, %v2391_v53  ;;  %v7327_v61 = vpack.c.bf16 %v4026_v25, %v4010_v0  ;;  %v14034_v30 = vunpack.c.l.bf16 %v11655_v57  ;;  %v14037_v53 = vld [vmem:[#allocation180_spill] sm:$0xff]  ;;  %v14043_v57 = vld [vmem:[#allocation194_spill] sm:$0xff] }
 0x351   : > { %v3191_v20 = vmul.f32 %v14029_v16, %v14028_v55  ;;  %v3431_v12 = vmul.f32 %v14031_v58, %v14030_v52  ;;  %v14036_v37 = vunpack.c.l.bf16 %v11661_v48  ;;  %v14038_v27 = vunpack.c.l.bf16 %v11668_v44  ;;  %v14041_v5 = vld [vmem:[#allocation200_spill] sm:$0xff]  ;;  %v14045_v55 = vld [vmem:[#allocation201_spill] sm:$0xff]  ;;  %v11882_v58 = vpop.f32.mrb[22].mxu0 }
 0x352   : > { %v3447_v39 = vmul.f32 %v14034_v30, %v14033_v18  ;;  %v2919_v38 = vadd.f32 %v2887_v36, %v2663_v14  ;;  %v2935_v33 = vadd.f32 %v2903_v21, %v2679_v13  ;;  %v14040_v9 = vunpack.c.l.bf16 %v11676_v2  ;;  %7328 = vmatprep.subr.bf16.mxu1 %v7327_v61  ;;  %v14047_v52 = vld [vmem:[#allocation196_spill] sm:$0xff]  ;;  %v14049_v14 = vld [vmem:[#allocation197_spill] sm:$0xff]  ;;  %14051 = vst [vmem:[#allocation126_spill] sm:$0xff] %v11882_v58  ;;  %v14052_v18 = vld [vmem:[#allocation202_spill] sm:$0xff] }
 0x353   : > { %v3719_v50 = vmul.f32 %v14036_v37, %v14035_v31  ;;  %v3735_v51 = vmul.f32 %v14038_v27, %v14037_v53  ;;  %v14042_v0 = vunpack.c.l.bf16 %v11689_v56  ;;  %v14044_v63 = vunpack.c.l.bf16 %v11683_v22  ;;  %v14054_v31 = vld [vmem:[#allocation203_spill] sm:$0xff]  ;;  %v11890_v53 = vpop.f32.mrb[23].mxu0  ;;  %v12112_v58 = vld [vmem:[%s8500_s7 + $0x238] sm:$0xff] }
 0x354   : > { %v3975_v47 = vmul.f32 %v14040_v9, %v14039_v1  ;;  %v14046_v16 = vunpack.c.l.bf16 %v11697_v4  ;;  %v14048_v36 = vunpack.c.l.bf16 %v11706_v32  ;;  %v14050_v2 = vunpack.c.l.bf16 %v11713_v3  ;;  %14056 = vst [vmem:[#allocation127_spill] sm:$0xff] %v11890_v53  ;;  %v14057_v1 = vld [vmem:[#allocation195_spill] sm:$0xff] }
 0x355   : > { %v2089_v25 = vmul.f32 %v14042_v0, %v14041_v5  ;;  %v3991_v48 = vmul.f32 %v14044_v63, %v14043_v57  ;;  %v3207_v56 = vadd.f32 %v3175_v43, %v2919_v38  ;;  %v3223_v61 = vadd.f32 %v3191_v20, %v2935_v33  ;;  %v14059_v43 = vld [vmem:[#allocation198_spill] sm:$0xff]  ;;  %v14063_v57 = vld [vmem:[#allocation155_spill] sm:$0xff] }
 0x356   : > { %v2105_v44 = vmul.f32 %v14046_v16, %v14045_v55  ;;  %v2345_v21 = vmul.f32 %v14048_v36, %v14047_v52  ;;  %v2361_v13 = vmul.f32 %v14050_v2, %v14049_v14  ;;  %v14053_v22 = vunpack.c.l.bf16 %v11719_v40  ;;  %v14061_v5 = vld [vmem:[#allocation154_spill] sm:$0xff]  ;;  %v14067_v36 = vld [vmem:[#allocation156_spill] sm:$0xff] }
 0x357   : > { %v14055_v4 = vunpack.c.l.bf16 %v11722_v49  ;;  %v14058_v3 = vunpack.c.l.bf16 %v11730_v15  ;;  %v14060_v20 = vunpack.c.l.bf16 %v11744_v8  ;;  %v3463_v40 = vadd.f32 %v3431_v12, %v3207_v56  ;;  %v14065_v15 = vld [vmem:[#allocation199_spill] sm:$0xff]  ;;  %v14069_v14 = vld [vmem:[#allocation168_spill] sm:$0xff] }
 0x358   : > { %v2633_v30 = vmul.f32 %v14053_v22, %v14052_v18  ;;  %v2377_v32 = vadd.f32 %v2345_v21, %v2089_v25  ;;  %v2393_v27 = vadd.f32 %v2361_v13, %v2105_v44  ;;  %v3479_v33 = vadd.f32 %v3447_v39, %v3223_v61  ;;  %v11911_v39 = vld [vmem:[%s8500_s7 + $0x30] sm:$0xff] }
 0x359   : > { %v2649_v37 = vmul.f32 %v14055_v4, %v14054_v31  ;;  %v2889_v9 = vmul.f32 %v14058_v3, %v14057_v1  ;;  %v2905_v38 = vmul.f32 %v14060_v20, %v14059_v43  ;;  %v14062_v0 = vunpack.c.l.bf16 %v11750_v60  ;;  %v14071_v13 = vld [vmem:[#allocation204_spill] sm:$0xff]  ;;  %v14075_v4 = vld [vmem:[#allocation206_spill] sm:$0xff] }
 0x35a   : > { %v14064_v63 = vunpack.c.l.bf16 %v11753_v45  ;;  %v2665_v55 = vadd.f32 %v2633_v30, %v2377_v32  ;;  %v14066_v44 = vunpack.c.l.bf16 %v11761_v10  ;;  %v14068_v8 = vunpack.c.l.bf16 %v11771_v46  ;;  %v11920_v10 = vld [vmem:[%s8500_s7 + $0x70] sm:$0xff]  ;;  %v14073_v46 = vld [vmem:[#allocation205_spill] sm:$0xff] }
 0x35b   : > { %v3177_v49 = vmul.f32 %v14062_v0, %v14061_v5  ;;  %v2681_v16 = vadd.f32 %v2649_v37, %v2393_v27  ;;  %v3751_v60 = vadd.f32 %v3719_v50, %v3463_v40  ;;  %v3767_v21 = vadd.f32 %v3735_v51, %v3479_v33  ;;  %v11927_v51 = vld [vmem:[%s8500_s7 + $0xb0] sm:$0xff]  ;;  %v12079_v32 = vld [vmem:[%s8500_s7 + $0x178] sm:$0xff] }
 0x35c   : > { %v3193_v25 = vmul.f32 %v14064_v63, %v14063_v57  ;;  %v3433_v52 = vmul.f32 %v14066_v44, %v14065_v15  ;;  %v3449_v12 = vmul.f32 %v14068_v8, %v14067_v36  ;;  %v14070_v45 = vunpack.c.l.bf16 %v11777_v19  ;;  %v11932_v27 = vld [vmem:[%s8500_s7 + $0xf0] sm:$0xff]  ;;  %v14079_v57 = vld [vmem:[#allocation210_spill] sm:$0xff]  ;;  %v14080_v15 = vld [vmem:[#allocation173_spill] sm:$0xff] }
 0x35d   : > { %v14072_v56 = vunpack.c.l.bf16 %v11780_v23  ;;  %v2921_v18 = vadd.f32 %v2889_v9, %v2665_v55  ;;  %v2937_v22 = vadd.f32 %v2905_v38, %v2681_v16  ;;  %v14074_v30 = vunpack.c.l.bf16 %v11788_v59  ;;  %v11937_v43 = vld [vmem:[%s8500_s7 + $0x130] sm:$0xff]  ;;  %v12076_v9 = vld [vmem:[%s8500_s7 + $0x138] sm:$0xff] }
 0x35e   : > { %v3721_v2 = vmul.f32 %v14070_v45, %v14069_v14  ;;  %v3993_v50 = vmul.f32 %v3961_v7, %v14075_v4  ;;  %v4007_v19 = vadd.f32 %v3975_v47, %v3751_v60  ;;  %v4023_v37 = vadd.f32 %v3991_v48, %v3767_v21  ;;  %v11939_v7 = vpop.f32.mrb[16].mxu1  ;;  %v14077_v47 = vld [vmem:[#allocation209_spill] sm:$0xff]  ;;  %v11945_v33 = vld [vmem:[%s8500_s7 + $0x170] sm:$0xff] }
 0x35f   : > { %v3737_v61 = vmul.f32 %v14072_v56, %v14071_v13  ;;  %v3977_v31 = vmul.f32 %v14074_v30, %v14073_v46  ;;  %v2060_v23 = vunpack.c.h.bf16 %v11911_v39  ;;  %v3209_v1 = vadd.f32 %v3177_v49, %v2921_v18  ;;  %14076 = vst [vmem:[#allocation15_spill] sm:$0xff] %v11939_v7  ;;  %v11947_v5 = vpop.f32.mrb[17].mxu1  ;;  %v11952_v55 = vld [vmem:[%s8500_s7 + $0x1b0] sm:$0xff]  ;;  %v14115_v7 = vld [vmem:[#allocation239_spill] sm:$0xff] }
 0x360   : > { %v3225_v3 = vadd.f32 %v3193_v25, %v2937_v22  ;;  %v2076_v59 = vunpack.c.h.bf16 %v11920_v10  ;;  %v7325_v20 = vpack.c.bf16 %v4023_v37, %v4007_v19  ;;  %v2316_v40 = vunpack.c.h.bf16 %v11927_v51  ;;  %14078 = vst [vmem:[#allocation96_spill] sm:$0xff] %v11947_v5  ;;  %v11961_v45 = vld [vmem:[%s8500_s7 + $0x1f0] sm:$0xff]  ;;  %v11963_v13 = vpop.f32.mrb[18].mxu1  ;;  %v14083_v22 = vld [vmem:[#allocation211_spill] sm:$0xff] }
 0x361   : > { %v2092_v48 = vmul.f32 %v2060_v23, %v14077_v47  ;;  %v3465_v0 = vadd.f32 %v3433_v52, %v3209_v1  ;;  %v2332_v25 = vunpack.c.h.bf16 %v11932_v27  ;;  %v2604_v8 = vunpack.c.h.bf16 %v11937_v43  ;;  %14082 = vst [vmem:[#allocation128_spill] sm:$0xff] %v11963_v13  ;;  %v11969_v4 = vld [vmem:[%s8500_s7 + $0x230] sm:$0xff]  ;;  %v14100_v47 = vld [vmem:[#allocation219_spill] sm:$0xff]  ;;  %v14113_v13 = vld [vmem:[#allocation233_spill] sm:$0xff] }
 0x362   : > { %v3481_v49 = vadd.f32 %v3449_v12, %v3225_v3  ;;  %v2108_v63 = vmul.f32 %v2076_v59, %v14079_v57  ;;  %7326 = vmatpush1.bf16.msra.mxu0 %v7325_v20  ;;  %v2348_v44 = vmul.f32 %v2316_v40, %v14080_v15  ;;  %v14081_v12 = vld [vmem:[#allocation174_spill] sm:$0xff]  ;;  %v2620_v14 = vunpack.c.h.bf16 %v11945_v33  ;;  %v14085_v23 = vld [vmem:[#allocation212_spill] sm:$0xff]  ;;  %v12063_v57 = vld [vmem:[%s8500_s7 + $0xb8] sm:$0xff] }
 0x363   : > { %v3753_v60 = vadd.f32 %v3721_v2, %v3465_v0  ;;  %v2364_v21 = vmul.f32 %v2332_v25, %v14081_v12  ;;  %v2636_v46 = vmul.f32 %v2604_v8, %v14083_v22  ;;  %v2860_v30 = vunpack.c.h.bf16 %v11952_v55  ;;  %v11971_v2 = vpop.f32.mrb[19].mxu1  ;;  %v11975_v3 = vld [vmem:[%s8500_s7 + $0x270] sm:$0xff]  ;;  %v11980_v59 = vld [vmem:[%s12665_s8] sm:$0xff] }
 0x364   : > { %v3769_v52 = vadd.f32 %v3737_v61, %v3481_v49  ;;  %v2380_v56 = vadd.f32 %v2348_v44, %v2092_v48  ;;  %14084 = vst [vmem:[#allocation19_spill] sm:$0xff] %v11971_v2  ;;  %v2652_v1 = vmul.f32 %v2620_v14, %v14085_v23  ;;  %v11988_v40 = vld [vmem:[%s8500_s7 + $0x2b0] sm:$0xff]  ;;  %v11996_v15 = vpop.f32.mrb[20].mxu1  ;;  %v3164_v12 = vunpack.c.h.bf16 %v11975_v3  ;;  %v14090_v22 = vld [vmem:[#allocation213_spill] sm:$0xff]  ;;  %v14110_v2 = vld [vmem:[#allocation230_spill] sm:$0xff] }
 0x365   : > { %v4009_v61 = vadd.f32 %v3977_v31, %v3753_v60  ;;  %v2396_v37 = vadd.f32 %v2364_v21, %v2108_v63  ;;  %7239 = vmatmul.mubr.msk.f32.vlgmr.msra.gmra.mrb[48].mxu0 %vm4059_vm0, %v11980_v59  ;;  %v2876_v31 = vunpack.c.h.bf16 %v11961_v45  ;;  %v3148_v63 = vunpack.c.h.bf16 %v11969_v4  ;;  %v11994_v25 = vld [vmem:[%s8500_s7 + $0x2f0] sm:$0xff]  ;;  %14087 = vst [vmem:[#allocation95_spill] sm:$0xff] %v11996_v15  ;;  %v12004_v14 = vpop.f32.mrb[21].mxu1 }
 0x366   : > { %v4025_v19 = vadd.f32 %v3993_v50, %v3769_v52  ;;  %v2668_v20 = vadd.f32 %v2636_v46, %v2380_v56  ;;  %v14086_v50 = vld [vmem:[#allocation9_spill] sm:$0xff]  ;;  %5314 = vmatprep.mubr.f32.mxu0 %v13767_v11  ;;  %v14088_v44 = vld [vmem:[#allocation208_spill] sm:$0xff]  ;;  %14089 = vst [vmem:[#allocation32_spill] sm:$0xff] %v12004_v14  ;;  %v2622_v53 = vunpack.c.h.bf16 %v12079_v32 }
 0x367   : > { %v2892_v48 = vmul.f32 %v2860_v30, %v14086_v50  ;;  %v2684_v49 = vadd.f32 %v2652_v1, %v2396_v37  ;;  %v2908_v8 = vmul.f32 %v2876_v31, %v14088_v44  ;;  %v12002_v21 = vld [vmem:[%s8500_s7 + $0x330] sm:$0xff]  ;;  %v3180_v46 = vmul.f32 %v3148_v63, %v14090_v22  ;;  %v12016_v37 = vld [vmem:[%s12665_s8 + $0x8] sm:$0xff]  ;;  %v12115_v14 = vld [vmem:[%s8500_s7 + $0x278] sm:$0xff] }
 0x368   : > { %v7329_v0 = vpack.c.bf16 %v4025_v19, %v4009_v61  ;;  %v3404_v61 = vunpack.c.h.bf16 %v11988_v40  ;;  %v12011_v19 = vld [vmem:[%s8500_s7 + $0x370] sm:$0xff]  ;;  %14091 = vst [vmem:[#allocation33_spill] sm:$0xff] %v12016_v37  ;;  %v14092_v1 = vld [vmem:[#allocation214_spill] sm:$0xff]  ;;  %v3420_v50 = vunpack.c.h.bf16 %v11994_v25  ;;  %v14093_v63 = vld [vmem:[#allocation215_spill] sm:$0xff]  ;;  %v3692_v30 = vunpack.c.h.bf16 %v12002_v21 }
 0x369   : > { %v2924_v60 = vadd.f32 %v2892_v48, %v2668_v20  ;;  %7240 = vmatmul.mubr.msk.f32.gmra.mrb[50].mxu0 %vm4059_vm0, %v12016_v37  ;;  %v2940_v23 = vadd.f32 %v2908_v8, %v2684_v49  ;;  %v3196_v20 = vmul.f32 %v3164_v12, %v14092_v1  ;;  %v12024_v48 = vld [vmem:[%s8500_s7 + $0x3b0] sm:$0xff]  ;;  %v12033_v8 = vpop.f32.mrb[22].mxu1  ;;  %v3708_v52 = vunpack.c.h.bf16 %v12011_v19 }
 0x36a   : > { %7330 = vmatpush1.bf16.msra.mxu1 %v7329_v0  ;;  %5320 = vmatprep.mubr.f32.mxu0 %v13767_v11  ;;  %v3436_v44 = vmul.f32 %v3404_v61, %v14093_v63  ;;  %v12031_v49 = vld [vmem:[%s8500_s7 + $0x3f0] sm:$0xff]  ;;  %14094 = vst [vmem:[#allocation129_spill] sm:$0xff] %v12033_v8  ;;  %v14097_v63 = vld [vmem:[#allocation217_spill] sm:$0xff]  ;;  %v2654_v15 = vmul.f32 %v2622_v53, %v14108_v26  ;;  %v3150_v53 = vunpack.c.h.bf16 %v12112_v58 }
 0x36b   : > { %v3212_v0 = vadd.f32 %v3180_v46, %v2924_v60  ;;  %v3228_v12 = vadd.f32 %v3196_v20, %v2940_v23  ;;  %v14095_v1 = vld [vmem:[#allocation216_spill] sm:$0xff]  ;;  %v12039_v60 = vld [vmem:[%s8500_s7 + $0x38] sm:$0xff]  ;;  %v12043_v46 = vpop.f32.mrb[23].mxu1  ;;  %v3724_v22 = vmul.f32 %v3692_v30, %v14097_v63  ;;  %v3948_v23 = vunpack.c.h.bf16 %v12024_v48  ;;  %v14099_v30 = vld [vmem:[#allocation218_spill] sm:$0xff] }
 0x36c   : > { %v3452_v31 = vmul.f32 %v3420_v50, %v14095_v1  ;;  %14096 = vst [vmem:[#allocation97_spill] sm:$0xff] %v12043_v46  ;;  %v12049_v20 = vld [vmem:[%s8500_s7 + $0x78] sm:$0xff]  ;;  %v12055_v50 = vld [vmem:[%s12665_s8 + $0x10] sm:$0xff]  ;;  %v3964_v63 = vunpack.c.h.bf16 %v12031_v49  ;;  %v2062_v16 = vunpack.c.h.bf16 %v12039_v60  ;;  %v2606_v46 = vunpack.c.h.bf16 %v12076_v9 }
 0x36d   : > { %7243 = vmatmul.mubr.msk.f32.vlgmr.msra.gmra.mrb[48].mxu1 %vm4059_vm0, %v11980_v59  ;;  %v3468_v61 = vadd.f32 %v3436_v44, %v3212_v0  ;;  %14098 = vst [vmem:[#allocation34_spill] sm:$0xff] %v12055_v50  ;;  %7241 = vmatmul.mubr.msk.f32.gmra.mrb[52].mxu0 %vm4059_vm0, %v12055_v50  ;;  %v3740_v44 = vmul.f32 %v3708_v52, %v14099_v30  ;;  %v14101_v52 = vld [vmem:[#allocation220_spill] sm:$0xff]  ;;  %v2078_v38 = vunpack.c.h.bf16 %v12049_v20  ;;  %v12106_v8 = vld [vmem:[%s8500_s7 + $0x1f8] sm:$0xff] }
 0x36e   : > { %5403 = vmatprep.mubr.f32.mxu1 %v13767_v11  ;;  %v3484_v0 = vadd.f32 %v3452_v31, %v3228_v12  ;;  %5326 = vmatprep.mubr.f32.mxu0 %v13767_v11  ;;  %v3980_v18 = vmul.f32 %v3948_v23, %v14100_v47  ;;  %v12070_v31 = vld [vmem:[%s8500_s7 + $0xf8] sm:$0xff]  ;;  %v3996_v30 = vmul.f32 %v3964_v63, %v14101_v52  ;;  %v14105_v23 = vld [vmem:[#allocation224_spill] sm:$0xff] }
 0x36f   : > { %v3756_v56 = vadd.f32 %v3724_v22, %v3468_v61  ;;  %v14102_v22 = vld [vmem:[#allocation223_spill] sm:$0xff]  ;;  %v12093_v63 = vld [vmem:[%s12665_s8 + $0x18] sm:$0xff] }
 0x370   : > { %v3772_v12 = vadd.f32 %v3740_v44, %v3484_v0  ;;  %v2094_v61 = vmul.f32 %v2062_v16, %v14102_v22  ;;  %v2318_v0 = vunpack.c.h.bf16 %v12063_v57  ;;  %v12087_v44 = vld [vmem:[%s8500_s7 + $0x1b8] sm:$0xff]  ;;  %14103 = vst [vmem:[#allocation35_spill] sm:$0xff] %v12093_v63  ;;  %v2334_v22 = vunpack.c.h.bf16 %v12070_v31  ;;  %v14112_v26 = vld [vmem:[#allocation232_spill] sm:$0xff] }
 0x371   : > { %7244 = vmatmul.mubr.msk.f32.gmra.mrb[50].mxu1 %vm4059_vm0, %v12016_v37  ;;  %v4012_v47 = vadd.f32 %v3980_v18, %v3756_v56  ;;  %7242 = vmatmul.mubr.msk.f32.gmra.mrb[54].mxu0 %vm4059_vm0, %v12093_v63  ;;  %v14104_v18 = vld [vmem:[#allocation227_spill] sm:$0xff]  ;;  %v2862_v52 = vunpack.c.h.bf16 %v12087_v44 }
 0x372   : > { %5409 = vmatprep.mubr.f32.mxu1 %v13767_v11  ;;  %v4028_v16 = vadd.f32 %v3996_v30, %v3772_v12  ;;  %v2110_v56 = vmul.f32 %v2078_v38, %v14104_v18  ;;  %5486 = vmatprep.mubr.f32.mxu0 %v13767_v11  ;;  %v2350_v1 = vmul.f32 %v2318_v0, %v14105_v23  ;;  %v14106_v30 = vld [vmem:[#allocation228_spill] sm:$0xff]  ;;  %v14107_v0 = vld [vmem:[#allocation225_spill] sm:$0xff]  ;;  %v2878_v18 = vunpack.c.h.bf16 %v12106_v8 }
 0x373   : > { %v2366_v38 = vmul.f32 %v2334_v22, %v14106_v30  ;;  %v2638_v36 = vmul.f32 %v2606_v46, %v14107_v0  ;;  %v3166_v46 = vunpack.c.h.bf16 %v12115_v14  ;;  %v12133_v0 = vld [vmem:[%s8500_s7 + $0x2f8] sm:$0xff] }
 0x374   : > { %v7331_v12 = vpack.c.bf16 %v4028_v16, %v4012_v47  ;;  %v2382_v23 = vadd.f32 %v2350_v1, %v2094_v61  ;;  %v12123_v16 = vld [vmem:[%s8500_s7 + $0x2b8] sm:$0xff]  ;;  %v2894_v1 = vmul.f32 %v2862_v52, %v14109_v54  ;;  %v14111_v52 = vld [vmem:[#allocation231_spill] sm:$0xff] }
 0x375   : > { %7245 = vmatmul.mubr.msk.f32.gmra.mrb[52].mxu1 %vm4059_vm0, %v12055_v50  ;;  %v2398_v22 = vadd.f32 %v2366_v38, %v2110_v56  ;;  %v3406_v38 = vunpack.c.h.bf16 %v12123_v16  ;;  %v12139_v30 = vld [vmem:[%s8500_s7 + $0x338] sm:$0xff]  ;;  %v3198_v17 = vmul.f32 %v3166_v46, %v14112_v26  ;;  %v3422_v56 = vunpack.c.h.bf16 %v12133_v0 }
 0x376   : > { %5415 = vmatprep.mubr.f32.mxu1 %v13767_v11  ;;  %7332 = vmatprep.subr.bf16.mxu0 %v7331_v12  ;;  %v2670_v61 = vadd.f32 %v2638_v36, %v2382_v23  ;;  %v2910_v12 = vmul.f32 %v2878_v18, %v14110_v2  ;;  %v12142_v54 = vld [vmem:[%s8500_s7 + $0x378] sm:$0xff]  ;;  %v3182_v23 = vmul.f32 %v3150_v53, %v14111_v52  ;;  %v14114_v52 = vld [vmem:[#allocation234_spill] sm:$0xff] }
 0x377   : > { %v2686_v47 = vadd.f32 %v2654_v15, %v2398_v22  ;;  %v12150_v2 = vld [vmem:[%s8500_s7 + $0x3b8] sm:$0xff]  ;;  %v3438_v35 = vmul.f32 %v3406_v38, %v14113_v13  ;;  %v3710_v26 = vunpack.c.h.bf16 %v12142_v54  ;;  %v3454_v15 = vmul.f32 %v3422_v56, %v14114_v52  ;;  %v14116_v13 = vld [vmem:[#allocation240_spill] sm:$0xff] }
 0x378   : > { %v2926_v36 = vadd.f32 %v2894_v1, %v2670_v61  ;;  %v3694_v61 = vunpack.c.h.bf16 %v12139_v30  ;;  %v12160_v53 = vld [vmem:[%s8500_s7 + $0x3f8] sm:$0xff]  ;;  %v14119_v52 = vunpack.c.l.bf16 %v11920_v10 }
 0x379   : > { %7246 = vmatmul.mubr.msk.f32.gmra.mrb[54].mxu1 %vm4059_vm0, %v12093_v63  ;;  %v2942_v18 = vadd.f32 %v2910_v12, %v2686_v47  ;;  %v3709_v47 = vunpack.c.l.bf16 %v12142_v54  ;;  %v3950_v12 = vunpack.c.h.bf16 %v12150_v2  ;;  %v3742_v38 = vmul.f32 %v3710_v26, %v14116_v13  ;;  %v14117_v50 = vld [vmem:[#allocation241_spill] sm:$0xff]  ;;  %v14122_v26 = vld [vmem:[#allocation242_spill] sm:$0xff] }
 0x37a   : > { %5575 = vmatprep.mubr.f32.mxu1 %v13767_v11  ;;  %v3214_v5 = vadd.f32 %v3182_v23, %v2926_v36  ;;  %v3726_v63 = vmul.f32 %v3694_v61, %v14115_v7  ;;  %v3949_v36 = vunpack.c.l.bf16 %v12150_v2  ;;  %v3966_v1 = vunpack.c.h.bf16 %v12160_v53 }
 0x37b   : > { %v3230_v46 = vadd.f32 %v3198_v17, %v2942_v18  ;;  %v3982_v37 = vmul.f32 %v3950_v12, %v14117_v50  ;;  %v14118_v17 = vunpack.c.l.bf16 %v11911_v39  ;;  %v14120_v7 = vunpack.c.l.bf16 %v11927_v51  ;;  %v14123_v39 = vld [vmem:[#allocation245_spill] sm:$0xff]  ;;  %v14125_v12 = vld [vmem:[#allocation246_spill] sm:$0xff] }
 0x37c   : > { %v3470_v22 = vadd.f32 %v3438_v35, %v3214_v5  ;;  %v2107_v35 = vmul.f32 %v14119_v52, %v10874_v29  ;;  %v3965_v50 = vunpack.c.l.bf16 %v12160_v53  ;;  %v14126_v51 = vunpack.c.l.bf16 %v11945_v33 }
 0x37d   : > { %v3486_v23 = vadd.f32 %v3454_v15, %v3230_v46  ;;  %v2091_v56 = vmul.f32 %v14118_v17, %v10866_v34  ;;  %v2347_v5 = vmul.f32 %v14120_v7, %v10868_v42  ;;  %v14121_v15 = vunpack.c.l.bf16 %v11932_v27  ;;  %v14127_v17 = vld [vmem:[#allocation247_spill] sm:$0xff] }
 0x37e   : > { %v3758_v18 = vadd.f32 %v3726_v63, %v3470_v22  ;;  %v3998_v46 = vmul.f32 %v3966_v1, %v14122_v26  ;;  %v14124_v34 = vunpack.c.l.bf16 %v11937_v43  ;;  %v2651_v42 = vmul.f32 %v14126_v51, %v14125_v12  ;;  %v14135_v7 = vld [vmem:[#allocation251_spill] sm:$0xff]  ;;  %v14145_v51 = vld [vmem:[#allocation258_spill] sm:$0xff] }
 0x37f   : > { %v2363_v2 = vmul.f32 %v14121_v15, %v10876_v6  ;;  %v3774_v61 = vadd.f32 %v3742_v38, %v3486_v23  ;;  %v2379_v10 = vadd.f32 %v2347_v5, %v2091_v56  ;;  %v14128_v6 = vunpack.c.l.bf16 %v11952_v55  ;;  %v14129_v38 = vld [vmem:[#allocation248_spill] sm:$0xff]  ;;  %v14131_v23 = vld [vmem:[#allocation249_spill] sm:$0xff]  ;;  %v14139_v26 = vld [vmem:[#allocation243_spill] sm:$0xff] }
 0x380   : > { %v2635_v63 = vmul.f32 %v14124_v34, %v14123_v39  ;;  %v4014_v22 = vadd.f32 %v3982_v37, %v3758_v18  ;;  %v14130_v53 = vunpack.c.l.bf16 %v11961_v45  ;;  %v14132_v43 = vunpack.c.l.bf16 %v11969_v4  ;;  %v14133_v18 = vld [vmem:[#allocation250_spill] sm:$0xff]  ;;  %v14141_v39 = vld [vmem:[#allocation244_spill] sm:$0xff] }
 0x381   : > { %v2395_v29 = vadd.f32 %v2363_v2, %v2107_v35  ;;  %v4030_v13 = vadd.f32 %v3998_v46, %v3774_v61  ;;  %v2891_v27 = vmul.f32 %v14128_v6, %v14127_v17  ;;  %v14134_v35 = vunpack.c.l.bf16 %v11975_v3  ;;  %v14137_v2 = vld [vmem:[#allocation252_spill] sm:$0xff]  ;;  %v14149_v17 = vld [vmem:[#allocation259_spill] sm:$0xff] }
 0x382   : > { %v2907_v1 = vmul.f32 %v14130_v53, %v14129_v38  ;;  %v3179_v52 = vmul.f32 %v14132_v43, %v14131_v23  ;;  %v2667_v37 = vadd.f32 %v2635_v63, %v2379_v10  ;;  %v14136_v5 = vunpack.c.l.bf16 %v11988_v40  ;;  %v14151_v38 = vld [vmem:[#allocation106_spill] sm:$0xff]  ;;  %v12232_v43 = vpop.permute.xlu1 %4041 }
 0x383   : > { %v2683_v56 = vadd.f32 %v2651_v42, %v2395_v29  ;;  %v3195_v33 = vmul.f32 %v14134_v35, %v14133_v18  ;;  %v7335_v55 = vpack.c.bf16 %v4030_v13, %v4014_v22  ;;  %v14138_v61 = vunpack.c.l.bf16 %v11994_v25  ;;  %v14143_v29 = vld [vmem:[#allocation253_spill] sm:$0xff]  ;;  %v14147_v25 = vld [vmem:[#allocation254_spill] sm:$0xff] }
 0x384   : > { %v3435_v15 = vmul.f32 %v14136_v5, %v14135_v7  ;;  %v14140_v46 = vunpack.c.l.bf16 %v12002_v21  ;;  %v14142_v34 = vunpack.c.l.bf16 %v12011_v19  ;;  %v2923_v10 = vadd.f32 %v2891_v27, %v2667_v37  ;;  %v14157_v35 = vld [vmem:[#allocation261_spill] sm:$0xff] }
 0x385   : > { %v3451_v45 = vmul.f32 %v14138_v61, %v14137_v2  ;;  %v2939_v3 = vadd.f32 %v2907_v1, %v2683_v56  ;;  %v14144_v12 = vunpack.c.l.bf16 %v12024_v48  ;;  %v14146_v22 = vunpack.c.l.bf16 %v12039_v60  ;;  %7336 = vmatprep.subr.bf16.mxu1 %v7335_v55  ;;  %v14153_v1 = vld [vmem:[#allocation255_spill] sm:$0xff]  ;;  %v14155_v56 = vld [vmem:[#allocation260_spill] sm:$0xff] }
 0x386   : > { %v3723_v4 = vmul.f32 %v14140_v46, %v14139_v26  ;;  %v3739_v63 = vmul.f32 %v14142_v34, %v14141_v39  ;;  %v14148_v13 = vunpack.c.l.bf16 %v12031_v49  ;;  %v14150_v6 = vunpack.c.l.bf16 %v12049_v20  ;;  %v14163_v39 = vld [vmem:[#allocation221_spill] sm:$0xff] }
 0x387   : > { %v3979_v40 = vmul.f32 %v14144_v12, %v14143_v29  ;;  %v2093_v42 = vmul.f32 %v14146_v22, %v14145_v51  ;;  %v14152_v27 = vunpack.c.l.bf16 %v12063_v57  ;;  %v14154_v48 = vunpack.c.l.bf16 %v12070_v31  ;;  %v14159_v57 = vld [vmem:[#allocation100_spill] sm:$0xff]  ;;  %v14167_v51 = vld [vmem:[#allocation257_spill] sm:$0xff] }
 0x388   : > { %v3995_v21 = vmul.f32 %v14148_v13, %v14147_v25  ;;  %v2109_v19 = vmul.f32 %v14150_v6, %v14149_v17  ;;  %v3211_v60 = vadd.f32 %v3179_v52, %v2923_v10  ;;  %v3227_v37 = vadd.f32 %v3195_v33, %v2939_v3  ;;  %v14161_v31 = vld [vmem:[#allocation256_spill] sm:$0xff]  ;;  %v14165_v10 = vld [vmem:[#allocation222_spill] sm:$0xff]  ;;  %v14171_v13 = vld [vmem:[#allocation157_spill] sm:$0xff] }
 0x389   : > { %v2349_v53 = vmul.f32 %v14152_v27, %v14151_v38  ;;  %v2365_v23 = vmul.f32 %v14154_v48, %v14153_v1  ;;  %v14156_v49 = vunpack.c.l.bf16 %v12076_v9  ;;  %v14158_v20 = vunpack.c.l.bf16 %v12079_v32  ;;  %v14173_v6 = vld [vmem:[#allocation263_spill] sm:$0xff]  ;;  %v14174_v27 = vld [vmem:[#allocation264_spill] sm:$0xff]  ;;  %v12267_v1 = vpop.permute.xlu1 %4046 }
 0x38a   : > { %v14160_v2 = vunpack.c.l.bf16 %v12087_v44  ;;  %v14162_v26 = vunpack.c.l.bf16 %v12106_v8  ;;  %v3467_v52 = vadd.f32 %v3435_v15, %v3211_v60  ;;  %v3483_v33 = vadd.f32 %v3451_v45, %v3227_v37 }
 0x38b   : > { %v2637_v18 = vmul.f32 %v14156_v49, %v14155_v56  ;;  %v2653_v7 = vmul.f32 %v14158_v20, %v14157_v35  ;;  %v2381_v5 = vadd.f32 %v2349_v53, %v2093_v42  ;;  %v2397_v55 = vadd.f32 %v2365_v23, %v2109_v19  ;;  %v14169_v42 = vld [vmem:[#allocation262_spill] sm:$0xff]  ;;  %v14176_v56 = vld [vmem:[#allocation101_spill] sm:$0xff] }
 0x38c   : > { %v2893_v61 = vmul.f32 %v14160_v2, %v14159_v57  ;;  %v2909_v46 = vmul.f32 %v14162_v26, %v14161_v31  ;;  %v14164_v9 = vunpack.c.l.bf16 %v12112_v58  ;;  %v14166_v32 = vunpack.c.l.bf16 %v12115_v14 }
 0x38d   : > { %v2669_v29 = vadd.f32 %v2637_v18, %v2381_v5  ;;  %v2685_v12 = vadd.f32 %v2653_v7, %v2397_v55  ;;  %v14168_v44 = vunpack.c.l.bf16 %v12123_v16  ;;  %v14170_v8 = vunpack.c.l.bf16 %v12133_v0  ;;  %v14180_v55 = vld [vmem:[#allocation236_spill] sm:$0xff] }
 0x38e   : > { %v3181_v34 = vmul.f32 %v14164_v9, %v14163_v39  ;;  %v3197_v3 = vmul.f32 %v14166_v32, %v14165_v10  ;;  %v3755_v15 = vadd.f32 %v3723_v4, %v3467_v52  ;;  %v3771_v45 = vadd.f32 %v3739_v63, %v3483_v33  ;;  %v14181_v39 = vld [vmem:[#allocation237_spill] sm:$0xff] }
 0x38f   : > { %v3437_v22 = vmul.f32 %v14168_v44, %v14167_v51  ;;  %v3453_v25 = vmul.f32 %v14170_v8, %v14169_v42  ;;  %v14172_v58 = vunpack.c.l.bf16 %v12139_v30  ;;  %v3741_v14 = vmul.f32 %v3709_v47, %v14173_v6  ;;  %v14175_v47 = vld [vmem:[#allocation265_spill] sm:$0xff]  ;;  %v14182_v44 = vld [vmem:[#allocation238_spill] sm:$0xff]  ;;  %v14183_v42 = vld [vmem:[#allocation171_spill] sm:$0xff] }
 0x390   : > { %v2925_v19 = vadd.f32 %v2893_v61, %v2669_v29  ;;  %v2941_v38 = vadd.f32 %v2909_v46, %v2685_v12  ;;  %v3981_v53 = vmul.f32 %v3949_v36, %v14174_v27  ;;  %v4139_v16 = vadd.f32 %v11479_v41, %v12232_v43 }
 0x391   : > { %v3725_v17 = vmul.f32 %v14172_v58, %v14171_v13  ;;  %v4011_v0 = vadd.f32 %v3979_v40, %v3755_v15  ;;  %v4027_v4 = vadd.f32 %v3995_v21, %v3771_v45  ;;  %v4228_v63 = vadd.f32 %v11481_v24, %v12232_v43  ;;  %v12278_v21 = vpop.permute.xlu0 %4051  ;;  %v14184_v15 = vld [vmem:[#allocation102_spill] sm:$0xff]  ;;  %v14185_v13 = vld [vmem:[#allocation108_spill] sm:$0xff] }
 0x392   : > { %v4141_v30 = vadd.f32 %v11495_v28, %v12232_v43  ;;  %v3213_v48 = vadd.f32 %v3181_v34, %v2925_v19  ;;  %v3229_v54 = vadd.f32 %v3197_v3, %v2941_v38  ;;  %v3997_v23 = vmul.f32 %v3965_v50, %v14175_v47  ;;  %v14177_v28 = vld [vmem:[#allocation107_spill] sm:$0xff]  ;;  %v12290_v34 = vpop.permute.xlu1 %4056  ;;  %v14187_v38 = vld [vmem:[#allocation109_spill] sm:$0xff] }
 0x393   : > { %v4230_v36 = vadd.f32 %v11497_v62, %v12232_v43  ;;  %v7333_v60 = vpack.c.bf16 %v4027_v4, %v4011_v0  ;;  %v4784_v37 = vmax.f32 %v4139_v16, 0.0  ;;  %v4786_v41 = vmax.f32 %v4228_v63, 0.0  ;;  %v14178_v50 = vld [vmem:[#allocation207_spill] sm:$0xff]  ;;  %v14189_v0 = vld [vmem:[#allocation33_spill] sm:$0xff] }
 0x394   : > { %v4145_v40 = vadd.f32 %v14176_v56, %v12267_v1  ;;  %v3469_v49 = vadd.f32 %v3437_v22, %v3213_v48  ;;  %v3485_v24 = vadd.f32 %v3453_v25, %v3229_v54  ;;  %v4785_v18 = vmax.f32 %v4141_v30, 0.0  ;;  %v14179_v62 = vld [vmem:[#allocation235_spill] sm:$0xff]  ;;  %v14190_v48 = vld [vmem:[#allocation110_spill] sm:$0xff] }
 0x395   : > { %v4234_v35 = vadd.f32 %v14177_v28, %v12267_v1  ;;  %7334 = vmatpush1.bf16.msra.mxu0 %v7333_v60  ;;  %v4147_v7 = vadd.f32 %v14178_v50, %v12267_v1  ;;  %v4236_v5 = vadd.f32 %v14179_v62, %v12267_v1  ;;  %v4151_v57 = vadd.f32 %v14180_v55, %v12278_v21  ;;  %v14194_v50 = vld [vmem:[#allocation34_spill] sm:$0xff]  ;;  %v14195_v62 = vld [vmem:[#allocation99_spill] sm:$0xff]  ;;  %v14196_v55 = vld [vmem:[#allocation113_spill] sm:$0xff] }
 0x396   : > { %v4800_v20 = vmax.f32 %v4145_v40, 0.0  ;;  %v3757_v2 = vadd.f32 %v3725_v17, %v3469_v49  ;;  %v3773_v61 = vadd.f32 %v3741_v14, %v3485_v24  ;;  %v4787_v31 = vmax.f32 %v4230_v36, 0.0  ;;  %v14186_v17 = vld [vmem:[#allocation103_spill] sm:$0xff]  ;;  %v14191_v36 = vld [vmem:[#allocation172_spill] sm:$0xff] }
 0x397   : > { %v4802_v26 = vmax.f32 %v4234_v35, 0.0  ;;  %v4801_v52 = vmax.f32 %v4147_v7, 0.0  ;;  %v4803_v33 = vmax.f32 %v4236_v5, 0.0  ;;  %v4240_v9 = vadd.f32 %v14181_v39, %v12278_v21  ;;  %v14193_v35 = vld [vmem:[#allocation112_spill] sm:$0xff] }
 0x398   : > { %v7341_v46 = vpack.c.bf16 %v4800_v20, %v4784_v37  ;;  %v4013_v10 = vadd.f32 %v3981_v53, %v3757_v2  ;;  %v4029_v32 = vadd.f32 %v3997_v23, %v3773_v61  ;;  %7247 = vmatmul.mubr.msk.f32.vlgmr.msra.gmra.mrb[56].mxu0 %vm4059_vm0, %v11980_v59  ;;  %v4816_v29 = vmax.f32 %v4151_v57, 0.0  ;;  %v14188_v53 = vld [vmem:[#allocation104_spill] sm:$0xff]  ;;  %v14192_v37 = vld [vmem:[#allocation111_spill] sm:$0xff] }
 0x399   : > { %v7349_v3 = vpack.c.bf16 %v4802_v26, %v4786_v41  ;;  %5492 = vmatprep.mubr.f32.mxu0 %v13767_v11  ;;  %v7339_v12 = vpack.c.bf16 %v4801_v52, %v4785_v18  ;;  %v7347_v51 = vpack.c.bf16 %v4803_v33, %v4787_v31  ;;  %v4153_v22 = vadd.f32 %v14182_v44, %v12278_v21  ;;  %v14198_v26 = vld [vmem:[#allocation114_spill] sm:$0xff]  ;;  %v14199_v52 = vld [vmem:[#allocation117_spill] sm:$0xff]  ;;  %v14202_v44 = vld [vmem:[#allocation35_spill] sm:$0xff] }
 0x39a   : > { %v4242_v8 = vadd.f32 %v14183_v42, %v12278_v21  ;;  %v7337_v25 = vpack.c.bf16 %v4029_v32, %v4013_v10  ;;  %v4157_v45 = vadd.f32 %v14184_v15, %v12290_v34  ;;  %v4246_v58 = vadd.f32 %v14185_v13, %v12290_v34  ;;  %v14200_v32 = vld [vmem:[#allocation120_spill] sm:$0xff]  ;;  %v14203_v13 = vld [vmem:[#allocation121_spill] sm:$0xff] }
 0x39b   : > { %v4159_v6 = vadd.f32 %v14186_v17, %v12290_v34  ;;  %v4818_v14 = vmax.f32 %v4240_v9, 0.0  ;;  %v4817_v19 = vmax.f32 %v4153_v22, 0.0  ;;  %7340 = vmatprep.subr.bf16.mxu0 %v7339_v12  ;;  %v4248_v27 = vadd.f32 %v14187_v38, %v12290_v34  ;;  %v14201_v12 = vld [vmem:[#allocation118_spill] sm:$0xff]  ;;  %v14204_v17 = vld [vmem:[#allocation115_spill] sm:$0xff] }
 0x39c   : > { %v4317_v16 = vadd.f32 %v14188_v53, %v12232_v43  ;;  %7338 = vmatpush1.bf16.msra.mxu1 %v7337_v25  ;;  %7248 = vmatmul.mubr.msk.f32.gmra.mrb[58].mxu0 %vm4059_vm0, %v14189_v0  ;;  %v4832_v4 = vmax.f32 %v4157_v45, 0.0  ;;  %v4834_v63 = vmax.f32 %v4246_v58, 0.0  ;;  %v4406_v54 = vadd.f32 %v14190_v48, %v12232_v43  ;;  %v12349_v45 = vld [vmem:[%s12663_s6] sm:$0x1] }
 0x39d   : > { %v4833_v30 = vmax.f32 %v4159_v6, 0.0  ;;  %5498 = vmatprep.mubr.f32.mxu0 %v13767_v11  ;;  %v4819_v47 = vmax.f32 %v4242_v8, 0.0  ;;  %7348 = vmatprep.subr.bf16.mxu1 %v7347_v51  ;;  %v4835_v23 = vmax.f32 %v4248_v27, 0.0  ;;  %v4319_v60 = vadd.f32 %v14191_v36, %v12232_v43  ;;  %v14206_v27 = vld [vmem:[#allocation57_spill] sm:$0xff] }
 0x39e   : > { %v4408_v41 = vadd.f32 %v14192_v37, %v12232_v43  ;;  %v7345_v56 = vpack.c.bf16 %v4832_v4, %v4816_v29  ;;  %v7353_v40 = vpack.c.bf16 %v4834_v63, %v4818_v14  ;;  %7342 = vmatpush1.bf16.msra.mxu0 %v7341_v46  ;;  %v4788_v18 = vmax.f32 %v4317_v16, 0.0  ;;  %v14205_v14 = vld [vmem:[#allocation39_spill] sm:$0xff]  ;;  %v14207_v16 = vld [vmem:[#allocation122_spill] sm:$0xff]  ;;  %v14210_v37 = vld [vmem:[#allocation96_spill] sm:$0xff] }
 0x39f   : > { %v7343_v49 = vpack.c.bf16 %v4833_v30, %v4817_v19  ;;  %7251 = vmatmul.mubr.msk.f32.vlgmr.msra.gmra.mrb[56].mxu1 %vm4059_vm0, %v11980_v59  ;;  %v7351_v24 = vpack.c.bf16 %v4835_v23, %v4819_v47  ;;  %v4790_v28 = vmax.f32 %v4406_v54, 0.0  ;;  %v4323_v20 = vadd.f32 %v14193_v35, %v12267_v1  ;;  %v14197_v59 = vld [vmem:[#allocation105_spill] sm:$0xff]  ;;  %v14208_v4 = vld [vmem:[#allocation15_spill] sm:$0xff]  ;;  %v14209_v47 = vld [vmem:[#allocation116_spill] sm:$0xff] }
 0x3a0   : > { %5581 = vmatprep.mubr.f32.mxu1 %v13767_v11  ;;  %7249 = vmatmul.mubr.msk.f32.gmra.mrb[60].mxu0 %vm4059_vm0, %v14194_v50  ;;  %v4789_v7 = vmax.f32 %v4319_v60, 0.0  ;;  %v4412_v5 = vadd.f32 %v14195_v62, %v12267_v1  ;;  %v4325_v57 = vadd.f32 %v14196_v55, %v12267_v1  ;;  %v4414_v2 = vadd.f32 %v14197_v59, %v12267_v1 }
 0x3a1   : > { %5504 = vmatprep.mubr.f32.mxu0 %v13767_v11  ;;  %7350 = vmatpush1.bf16.msra.mxu1 %v7349_v3  ;;  %v4791_v61 = vmax.f32 %v4408_v41, 0.0  ;;  %v4804_v31 = vmax.f32 %v4323_v20, 0.0  ;;  %v4329_v46 = vadd.f32 %v14198_v26, %v12278_v21  ;;  %v4418_v33 = vadd.f32 %v14199_v52, %v12278_v21  ;;  %v14212_v20 = vld [vmem:[#allocation128_spill] sm:$0xff]  ;;  %v14215_v26 = vld [vmem:[#allocation125_spill] sm:$0xff] }
 0x3a2   : > { %v4806_v39 = vmax.f32 %v4412_v5, 0.0  ;;  %7344 = vmatprep.subr.bf16.mxu0 %v7343_v49  ;;  %7352 = vmatprep.subr.bf16.mxu1 %v7351_v24  ;;  %v4805_v9 = vmax.f32 %v4325_v57, 0.0  ;;  %v4807_v10 = vmax.f32 %v4414_v2, 0.0  ;;  %v4331_v29 = vadd.f32 %v14200_v32, %v12278_v21  ;;  %v14213_v5 = vld [vmem:[#allocation123_spill] sm:$0xff] }
 0x3a3   : > { %7252 = vmatmul.mubr.msk.f32.gmra.mrb[58].mxu1 %vm4059_vm0, %v14189_v0  ;;  %v7357_v3 = vpack.c.bf16 %v4804_v31, %v4788_v18  ;;  %7346 = vmatpush1.bf16.msra.mxu0 %v7345_v56  ;;  %v4420_v51 = vadd.f32 %v14201_v12, %v12278_v21  ;;  %v4820_v25 = vmax.f32 %v4329_v46, 0.0  ;;  %v4822_v15 = vmax.f32 %v4418_v33, 0.0  ;;  %v14214_v57 = vld [vmem:[#allocation19_spill] sm:$0xff]  ;;  %v14218_v12 = vld [vmem:[#allocation32_spill] sm:$0xff] }
 0x3a4   : > { %5587 = vmatprep.mubr.f32.mxu1 %v13767_v11  ;;  %7250 = vmatmul.mubr.msk.f32.gmra.mrb[62].mxu0 %vm4059_vm0, %v14202_v44  ;;  %v7365_v22 = vpack.c.bf16 %v4806_v39, %v4790_v28  ;;  %v7355_v42 = vpack.c.bf16 %v4805_v9, %v4789_v7  ;;  %v7363_v8 = vpack.c.bf16 %v4807_v10, %v4791_v61  ;;  %v4821_v38 = vmax.f32 %v4331_v29, 0.0  ;;  %v14211_v28 = vld [vmem:[#allocation119_spill] sm:$0xff]  ;;  %v14217_v10 = vld [vmem:[#allocation124_spill] sm:$0xff] }
 0x3a5   : > { %7354 = vmatpush1.bf16.msra.mxu1 %v7353_v40  ;;  %5743 = vmatprep.mubr.f32.mxu0 %v13767_v11  ;;  %v4335_v58 = vadd.f32 %v14203_v13, %v12290_v34  ;;  %v4424_v6 = vadd.f32 %v14204_v17, %v12290_v34  ;;  %v4337_v19 = vadd.f32 %v14205_v14, %v12290_v34  ;;  %v4823_v36 = vmax.f32 %v4420_v51, 0.0  ;;  %v14216_v39 = vld [vmem:[#allocation95_spill] sm:$0xff] }
 0x3a6   : > { %7356 = vmatprep.subr.bf16.mxu0 %v7355_v42  ;;  %7364 = vmatprep.subr.bf16.mxu1 %v7363_v8  ;;  %v4426_v53 = vadd.f32 %v14206_v27, %v12290_v34  ;;  %v4495_v0 = vadd.f32 %v14207_v16, %v12232_v43  ;;  %v4584_v63 = vadd.f32 %v14208_v4, %v12232_v43  ;;  %v14219_v8 = vld [vmem:[#allocation126_spill] sm:$0xff] }
 0x3a7   : > { %7253 = vmatmul.mubr.msk.f32.gmra.mrb[60].mxu1 %vm4059_vm0, %v14194_v50  ;;  %v4836_v30 = vmax.f32 %v4335_v58, 0.0  ;;  %v4838_v48 = vmax.f32 %v4424_v6, 0.0  ;;  %v4837_v54 = vmax.f32 %v4337_v19, 0.0  ;;  %v4497_v23 = vadd.f32 %v14209_v47, %v12232_v43  ;;  %v14221_v58 = vld [vmem:[#allocation127_spill] sm:$0xff]  ;;  %v14222_v6 = vld [vmem:[#allocation97_spill] sm:$0xff]  ;;  %v4672_v47 = vpop.f32.mrb[24].mxu0 }
 0x3a8   : > { %5593 = vmatprep.mubr.f32.mxu1 %v13767_v11  ;;  %7255 = vmatmul.mubr.msk.f32.vlgmr.msra.gmra.mrb[64].mxu0 %vm5675_vm1, %v12349_v45  ;;  %v4839_v60 = vmax.f32 %v4426_v53, 0.0  ;;  %v4586_v41 = vadd.f32 %v14210_v37, %v12232_v43  ;;  %v4792_v18 = vmax.f32 %v4495_v0, 0.0  ;;  %v4501_v35 = vadd.f32 %v14211_v28, %v12267_v1 }
 0x3a9   : > { %v7361_v56 = vpack.c.bf16 %v4836_v30, %v4820_v25  ;;  %v7369_v40 = vpack.c.bf16 %v4838_v48, %v4822_v15  ;;  %v7359_v49 = vpack.c.bf16 %v4837_v54, %v4821_v38  ;;  %7358 = vmatpush1.bf16.msra.mxu0 %v7357_v3  ;;  %5885 = vmatprep.mubr.f32.mxu0 %v13767_v11  ;;  %v4794_v7 = vmax.f32 %v4584_v63, 0.0  ;;  %v14220_v15 = vld [vmem:[#allocation129_spill] sm:$0xff] }
 0x3aa   : > { %v7367_v24 = vpack.c.bf16 %v4839_v60, %v4823_v36  ;;  %v4590_v50 = vadd.f32 %v14212_v20, %v12267_v1  ;;  %v4793_v62 = vmax.f32 %v4497_v23, 0.0  ;;  %v4503_v55 = vadd.f32 %v14213_v5, %v12267_v1  ;;  %v4674_v23 = vpop.f32.mrb[25].mxu0 }
 0x3ab   : > { %7254 = vmatmul.mubr.msk.f32.gmra.mrb[62].mxu1 %vm4059_vm0, %v14202_v44  ;;  %7360 = vmatprep.subr.bf16.mxu0 %v7359_v49  ;;  %v4592_v59 = vadd.f32 %v14214_v57, %v12267_v1  ;;  %v4795_v2 = vmax.f32 %v4586_v41, 0.0  ;;  %v4808_v61 = vmax.f32 %v4501_v35, 0.0  ;;  %v4507_v46 = vadd.f32 %v14215_v26, %v12278_v21  ;;  %v4678_v37 = vpop.f32.mrb[26].mxu0 }
 0x3ac   : > { %5814 = vmatprep.mubr.f32.mxu1 %v13767_v11  ;;  %v4810_v31 = vmax.f32 %v4590_v50, 0.0  ;;  %v4809_v52 = vmax.f32 %v4503_v55, 0.0  ;;  %v4596_v9 = vadd.f32 %v14216_v39, %v12278_v21  ;;  %v4509_v32 = vadd.f32 %v14217_v10, %v12278_v21 }
 0x3ad   : > { %v4811_v33 = vmax.f32 %v4592_v59, 0.0  ;;  %7362 = vmatpush1.bf16.msra.mxu0 %v7361_v56  ;;  %v7373_v29 = vpack.c.bf16 %v4808_v61, %v4792_v18  ;;  %v4598_v51 = vadd.f32 %v14218_v12, %v12278_v21  ;;  %v4513_v25 = vadd.f32 %v14219_v8, %v12290_v34  ;;  %v4680_v56 = vpop.f32.mrb[27].mxu0 }
 0x3ae   : > { %v7381_v3 = vpack.c.bf16 %v4810_v31, %v4794_v7  ;;  %v7371_v44 = vpack.c.bf16 %v4809_v52, %v4793_v62  ;;  %v4602_v13 = vadd.f32 %v14220_v15, %v12290_v34  ;;  %v4515_v17 = vadd.f32 %v14221_v58, %v12290_v34  ;;  %v4684_v35 = vpop.f32.mrb[28].mxu0 }
 0x3af   : > { %7256 = vmatmul.mubr.msk.f32.vlgmr.msra.gmra.mrb[64].mxu1 %vm5675_vm1, %v12349_v45  ;;  %v7379_v42 = vpack.c.bf16 %v4811_v33, %v4795_v2  ;;  %v4604_v14 = vadd.f32 %v14222_v6, %v12290_v34  ;;  %v4824_v19 = vmax.f32 %v4507_v46, 0.0  ;;  %v4826_v38 = vmax.f32 %v4596_v9, 0.0  ;;  %v4686_v50 = vpop.f32.mrb[29].mxu0  ;;  %v4761_v39 = vpop.f32.mrb[24].mxu1 }
 0x3b0   : > { %7366 = vmatpush1.bf16.msra.mxu1 %v7365_v22  ;;  %5956 = vmatprep.mubr.f32.mxu1 %v13767_v11  ;;  %v4825_v27 = vmax.f32 %v4509_v32, 0.0  ;;  %v4840_v53 = vmax.f32 %v4513_v25, 0.0  ;;  %v4827_v22 = vmax.f32 %v4598_v51, 0.0  ;;  %v4842_v16 = vmax.f32 %v4602_v13, 0.0  ;;  %v4690_v55 = vpop.f32.mrb[30].mxu0  ;;  %v4763_v9 = vpop.f32.mrb[25].mxu1 }
 0x3b1   : > { %7368 = vmatprep.subr.bf16.mxu1 %v7367_v24  ;;  %7257 = vmatmul.mubr.msk.f32.vlgmr.msra.gmra.mrb[66].mxu0 %vm5675_vm1, %v12349_v45  ;;  %v4841_v0 = vmax.f32 %v4515_v17, 0.0  ;;  %v4843_v4 = vmax.f32 %v4604_v14, 0.0  ;;  %v4673_v36 = vadd.f32 %v4672_v47, %v12232_v43  ;;  %v4675_v60 = vadd.f32 %v4674_v23, %v12232_v43  ;;  %v4692_v59 = vpop.f32.mrb[31].mxu0  ;;  %v12440_v47 = vpop.permute.xlu1 %4863 }
 0x3b2   : > { %7372 = vmatprep.subr.bf16.mxu0 %v7371_v44  ;;  %6027 = vmatprep.mubr.f32.mxu0 %v13767_v11  ;;  %v7377_v63 = vpack.c.bf16 %v4840_v53, %v4824_v19  ;;  %v7385_v30 = vpack.c.bf16 %v4842_v16, %v4826_v38  ;;  %v4679_v41 = vadd.f32 %v4678_v37, %v12267_v1 }
 0x3b3   : > { %7374 = vmatpush1.bf16.msra.mxu0 %v7373_v29  ;;  %v7375_v48 = vpack.c.bf16 %v4841_v0, %v4825_v27  ;;  %v7383_v54 = vpack.c.bf16 %v4843_v4, %v4827_v22  ;;  %v4796_v49 = vmax.f32 %v4673_v36, 0.0  ;;  %v4797_v18 = vmax.f32 %v4675_v60, 0.0 }
 0x3b4   : > { %7370 = vmatpush1.bf16.msra.mxu1 %v7369_v40  ;;  %v4681_v40 = vadd.f32 %v4680_v56, %v12267_v1  ;;  %v4812_v24 = vmax.f32 %v4679_v41, 0.0  ;;  %v4685_v62 = vadd.f32 %v4684_v35, %v12278_v21  ;;  %v4687_v5 = vadd.f32 %v4686_v50, %v12278_v21 }
 0x3b5   : > { %7380 = vmatprep.subr.bf16.mxu1 %v7379_v42  ;;  %7376 = vmatprep.subr.bf16.mxu0 %v7375_v48  ;;  %v4691_v57 = vadd.f32 %v4690_v55, %v12290_v34  ;;  %v4693_v2 = vadd.f32 %v4692_v59, %v12290_v34  ;;  %v4762_v10 = vadd.f32 %v4761_v39, %v12232_v43  ;;  %v12437_v48 = vpop.permute.xlu0 %4858 }
 0x3b6   : > { %v4813_v28 = vmax.f32 %v4681_v40, 0.0  ;;  %v7389_v20 = vpack.c.bf16 %v4812_v24, %v4796_v49  ;;  %v4828_v61 = vmax.f32 %v4685_v62, 0.0  ;;  %v4829_v26 = vmax.f32 %v4687_v5, 0.0 }
 0x3b7   : > { %7258 = vmatmul.mubr.msk.f32.vlgmr.msra.gmra.mrb[66].mxu1 %vm5675_vm1, %v12349_v45  ;;  %7378 = vmatpush1.bf16.msra.mxu0 %v7377_v63  ;;  %v4844_v31 = vmax.f32 %v4691_v57, 0.0  ;;  %v4845_v46 = vmax.f32 %v4693_v2, 0.0  ;;  %v4764_v32 = vadd.f32 %v4763_v9, %v12232_v43  ;;  %v4798_v44 = vmax.f32 %v4762_v10, 0.0  ;;  %v12452_v9 = vpop.permute.xlu1 %4873 }
 0x3b8   : > { %7382 = vmatpush1.bf16.msra.mxu1 %v7381_v3  ;;  %6098 = vmatprep.mubr.f32.mxu1 %v13767_v11  ;;  %v7387_v7 = vpack.c.bf16 %v4813_v28, %v4797_v18  ;;  %v4767_v29 = vpop.f32.mrb[26].mxu1 }
 0x3b9   : > { %7384 = vmatprep.subr.bf16.mxu1 %v7383_v54  ;;  %v7393_v52 = vpack.c.bf16 %v4844_v31, %v4828_v61  ;;  %v7391_v33 = vpack.c.bf16 %v4845_v46, %v4829_v26  ;;  %v4768_v3 = vadd.f32 %v4767_v29, %v12267_v1  ;;  %v4769_v12 = vpop.f32.mrb[27].mxu1  ;;  %v4799_v8 = vmax.f32 %v4764_v32, 0.0  ;;  %v12449_v31 = vpop.permute.xlu0 %4868 }
 0x3ba   : > { %7259 = vmatmul.mubr.msk.f32.vlgmr.msra.gmra.mrb[68].mxu0 %vm5675_vm1, %v12349_v45  ;;  %7388 = vmatprep.subr.bf16.mxu0 %v7387_v7  ;;  %v4770_v51 = vadd.f32 %v4769_v12, %v12267_v1 }
 0x3bb   : > { %6169 = vmatprep.mubr.f32.mxu0 %v13767_v11  ;;  %7390 = vmatpush1.bf16.msra.mxu0 %v7389_v20  ;;  %v4814_v42 = vmax.f32 %v4768_v3, 0.0 }
 0x3bc   : > { %7386 = vmatpush1.bf16.msra.mxu1 %v7385_v30  ;;  %7392 = vmatprep.subr.bf16.mxu0 %v7391_v33  ;;  %v4815_v25 = vmax.f32 %v4770_v51, 0.0 }
 0x3bd   : > { %v7397_v13 = vpack.c.bf16 %v4814_v42, %v4798_v44 }
 0x3be   : > { %v7395_v17 = vpack.c.bf16 %v4815_v25, %v4799_v8 }
 0x3bf   : > { %7260 = vmatmul.mubr.msk.f32.vlgmr.msra.gmra.mrb[68].mxu1 %vm5675_vm1, %v12349_v45  ;;  %7394 = vmatpush1.bf16.msra.mxu0 %v7393_v52 }
 0x3c0   : > { %6240 = vmatprep.mubr.f32.mxu1 %v13767_v11  ;;  %7396 = vmatprep.subr.bf16.mxu1 %v7395_v17 }
 0x3c1   : > { %v4773_v15 = vpop.f32.mrb[28].mxu1  ;;  %7398 = vmatpush1.bf16.msra.mxu1 %v7397_v13 }
 0x3c2   : > { %7261 = vmatmul.mubr.msk.f32.vlgmr.msra.gmra.mrb[70].mxu0 %vm5675_vm1, %v12349_v45  ;;  %v4775_v58 = vpop.f32.mrb[29].mxu1  ;;  %v4774_v43 = vadd.f32 %v4773_v15, %v12278_v21 }
 0x3c3   : > { %6325 = vmatprep.mubr.f32.mxu0 %v13767_v11  ;;  %v4776_v6 = vadd.f32 %v4775_v58, %v12278_v21 }
 0x3c4   : > { %v4830_v27 = vmax.f32 %v4774_v43, 0.0 }
 0x3c5   : > { %v4779_v14 = vpop.f32.mrb[30].mxu1  ;;  %v4831_v22 = vmax.f32 %v4776_v6, 0.0 }
 0x3c6   : > { %v4780_v19 = vadd.f32 %v4779_v14, %v12290_v34  ;;  %v4781_v38 = vpop.f32.mrb[31].mxu1 }
 0x3c7   : > { %v4782_v1 = vadd.f32 %v4781_v38, %v12290_v34 }
 0x3c8   : > { %v4846_v53 = vmax.f32 %v4780_v19, 0.0 }
 0x3c9   : > { %v4847_v16 = vmax.f32 %v4782_v1, 0.0 }
 0x3ca   : > { %v7401_v0 = vpack.c.bf16 %v4846_v53, %v4830_v27 }
 0x3cb   : > { %v7399_v4 = vpack.c.bf16 %v4847_v16, %v4831_v22  ;;  %v12464_v16 = vld [vmem:[%s12667_s10] sm:$0x1] }
 0x3cd   : > { %7400 = vmatprep.subr.bf16.mxu1 %v7399_v4 }
 0x3ce   : > { %7402 = vmatpush1.bf16.msra.mxu1 %v7401_v0 }
 0x3d1   : > { %7262 = vmatmul.mubr.msk.f32.vlgmr.msra.gmra.mrb[70].mxu1 %vm5675_vm1, %v12349_v45 }
 0x3d2   : > { %6396 = vmatprep.mubr.f32.mxu1 %v13767_v11 }
 0x3d3   : > { %v4954_v21 = vpop.f32.mrb[32].mxu0 }
 0x3d4   : > { %v4956_v30 = vpop.f32.mrb[33].mxu0  ;;  %v4955_v34 = vadd.f32 %v4954_v21, %v12437_v48 }
 0x3d5   : > { %v5043_v63 = vpop.f32.mrb[32].mxu1  ;;  %v4957_v36 = vadd.f32 %v4956_v30, %v12437_v48 }
 0x3d6   : > { %v5045_v54 = vpop.f32.mrb[33].mxu1  ;;  %v5044_v23 = vadd.f32 %v5043_v63, %v12437_v48  ;;  %v5600_v18 = vmax.f32 %v4955_v34, 0.0 }
 0x3d7   : > { %v4960_v60 = vpop.f32.mrb[34].mxu0  ;;  %v5046_v37 = vadd.f32 %v5045_v54, %v12437_v48  ;;  %v5601_v50 = vmax.f32 %v4957_v36, 0.0 }
 0x3d8   : > { %v4961_v45 = vadd.f32 %v4960_v60, %v12440_v47  ;;  %v4962_v56 = vpop.f32.mrb[35].mxu0  ;;  %v5602_v20 = vmax.f32 %v5044_v23, 0.0 }
 0x3d9   : > { %v5049_v41 = vpop.f32.mrb[34].mxu1  ;;  %v4963_v49 = vadd.f32 %v4962_v56, %v12440_v47  ;;  %v5603_v55 = vmax.f32 %v5046_v37, 0.0 }
 0x3da   : > { %v5050_v40 = vadd.f32 %v5049_v41, %v12440_v47  ;;  %v5051_v24 = vpop.f32.mrb[35].mxu1  ;;  %v5616_v28 = vmax.f32 %v4961_v45, 0.0 }
 0x3db   : > { %v5052_v35 = vadd.f32 %v5051_v24, %v12440_v47  ;;  %v5617_v62 = vmax.f32 %v4963_v49, 0.0  ;;  %v4966_v5 = vpop.f32.mrb[36].mxu0 }
 0x3dc   : > { %v5618_v7 = vmax.f32 %v5050_v40, 0.0  ;;  %v7405_v57 = vpack.c.bf16 %v5616_v28, %v5600_v18  ;;  %v4968_v61 = vpop.f32.mrb[37].mxu0  ;;  %v4967_v39 = vadd.f32 %v4966_v5, %v12449_v31 }
 0x3dd   : > { %v5619_v59 = vmax.f32 %v5052_v35, 0.0  ;;  %v5055_v2 = vpop.f32.mrb[36].mxu1  ;;  %v7403_v46 = vpack.c.bf16 %v5617_v62, %v5601_v50  ;;  %v4969_v32 = vadd.f32 %v4968_v61, %v12449_v31 }
 0x3de   : > { %v7413_v26 = vpack.c.bf16 %v5618_v7, %v5602_v20  ;;  %v5057_v52 = vpop.f32.mrb[37].mxu1  ;;  %v5056_v10 = vadd.f32 %v5055_v2, %v12449_v31  ;;  %v5632_v15 = vmax.f32 %v4967_v39, 0.0 }
 0x3df   : > { %v7411_v33 = vpack.c.bf16 %v5619_v59, %v5603_v55  ;;  %v4972_v29 = vpop.f32.mrb[38].mxu0  ;;  %7404 = vmatprep.subr.bf16.mxu0 %v7403_v46  ;;  %v5058_v3 = vadd.f32 %v5057_v52, %v12449_v31  ;;  %v5633_v43 = vmax.f32 %v4969_v32, 0.0 }
 0x3e0   : > { %v4973_v12 = vadd.f32 %v4972_v29, %v12452_v9  ;;  %v4974_v44 = vpop.f32.mrb[39].mxu0  ;;  %7406 = vmatpush1.bf16.msra.mxu0 %v7405_v57  ;;  %v5634_v17 = vmax.f32 %v5056_v10, 0.0 }
 0x3e1   : > { %v5061_v51 = vpop.f32.mrb[38].mxu1  ;;  %7412 = vmatprep.subr.bf16.mxu1 %v7411_v33  ;;  %v4975_v8 = vadd.f32 %v4974_v44, %v12452_v9  ;;  %v5635_v19 = vmax.f32 %v5058_v3, 0.0 }
 0x3e2   : > { %v5062_v42 = vadd.f32 %v5061_v51, %v12452_v9  ;;  %v5063_v25 = vpop.f32.mrb[39].mxu1  ;;  %7414 = vmatpush1.bf16.msra.mxu1 %v7413_v26  ;;  %v5648_v13 = vmax.f32 %v4973_v12, 0.0 }
 0x3e3   : > { %v5064_v58 = vadd.f32 %v5063_v25, %v12452_v9  ;;  %v5649_v14 = vmax.f32 %v4975_v8, 0.0 }
 0x3e4   : > { %v5650_v6 = vmax.f32 %v5062_v42, 0.0  ;;  %v7409_v38 = vpack.c.bf16 %v5648_v13, %v5632_v15 }
 0x3e5   : > { %v5651_v1 = vmax.f32 %v5064_v58, 0.0  ;;  %v7407_v53 = vpack.c.bf16 %v5649_v14, %v5633_v43 }
 0x3e6   : > { %v7417_v27 = vpack.c.bf16 %v5650_v6, %v5634_v17 }
 0x3e7   : > { %v7415_v22 = vpack.c.bf16 %v5651_v1, %v5635_v19  ;;  %7408 = vmatprep.subr.bf16.mxu0 %v7407_v53 }
 0x3e8   : > { %7410 = vmatpush1.bf16.msra.mxu0 %v7409_v38 }
 0x3e9   : > { %7416 = vmatprep.subr.bf16.mxu1 %v7415_v22 }
 0x3ea   : > { %7418 = vmatpush1.bf16.msra.mxu1 %v7417_v27 }
 0x3eb   : > { %7263 = vmatmul.mubr.msk.f32.vlgmr.msra.gmra.mrb[72].mxu0 %vm5675_vm1, %v12464_v16 }
 0x3ec   : > { %6467 = vmatprep.mubr.f32.mxu0 %v13767_v11 }
 0x3ed   : > { %7264 = vmatmul.mubr.msk.f32.vlgmr.msra.gmra.mrb[72].mxu1 %vm5675_vm1, %v12464_v16 }
 0x3ee   : > { %6538 = vmatprep.mubr.f32.mxu1 %v13767_v11 }
 0x404   : > { %v5132_v0 = vpop.f32.mrb[40].mxu0 }
 0x405   : > { %v5134_v4 = vpop.f32.mrb[41].mxu0  ;;  %v5133_v21 = vadd.f32 %v5132_v0, %v12437_v48 }
 0x406   : > { %v5135_v63 = vadd.f32 %v5134_v4, %v12437_v48 }
 0x407   : > { %v5604_v36 = vmax.f32 %v5133_v21, 0.0 }
 0x408   : > { %v5138_v30 = vpop.f32.mrb[42].mxu0  ;;  %v5605_v45 = vmax.f32 %v5135_v63, 0.0 }
 0x409   : > { %v5139_v54 = vadd.f32 %v5138_v30, %v12440_v47  ;;  %v5140_v34 = vpop.f32.mrb[43].mxu0 }
 0x40a   : > { %v5141_v23 = vadd.f32 %v5140_v34, %v12440_v47 }
 0x40b   : > { %v5620_v37 = vmax.f32 %v5139_v54, 0.0 }
 0x40c   : > { %v5221_v60 = vpop.f32.mrb[40].mxu1  ;;  %v5621_v56 = vmax.f32 %v5141_v23, 0.0  ;;  %v5144_v40 = vpop.f32.mrb[44].mxu0 }
 0x40d   : > { %v5223_v41 = vpop.f32.mrb[41].mxu1  ;;  %v7421_v49 = vpack.c.bf16 %v5620_v37, %v5604_v36  ;;  %v5146_v24 = vpop.f32.mrb[45].mxu0  ;;  %v5222_v18 = vadd.f32 %v5221_v60, %v12437_v48  ;;  %v5145_v50 = vadd.f32 %v5144_v40, %v12449_v31 }
 0x40e   : > { %v7419_v28 = vpack.c.bf16 %v5621_v56, %v5605_v45  ;;  %v5224_v35 = vadd.f32 %v5223_v41, %v12437_v48  ;;  %v5147_v5 = vadd.f32 %v5146_v24, %v12449_v31 }
 0x40f   : > { %v5606_v61 = vmax.f32 %v5222_v18, 0.0  ;;  %v5636_v39 = vmax.f32 %v5145_v50, 0.0 }
 0x410   : > { %v5227_v20 = vpop.f32.mrb[42].mxu1  ;;  %v5150_v55 = vpop.f32.mrb[46].mxu0  ;;  %7420 = vmatprep.subr.bf16.mxu0 %v7419_v28  ;;  %v5607_v52 = vmax.f32 %v5224_v35, 0.0  ;;  %v5637_v3 = vmax.f32 %v5147_v5, 0.0 }
 0x411   : > { %v5228_v7 = vadd.f32 %v5227_v20, %v12440_v47  ;;  %v5229_v62 = vpop.f32.mrb[43].mxu1  ;;  %v5151_v59 = vadd.f32 %v5150_v55, %v12452_v9  ;;  %v5152_v2 = vpop.f32.mrb[47].mxu0  ;;  %7422 = vmatpush1.bf16.msra.mxu0 %v7421_v49 }
 0x412   : > { %v5230_v57 = vadd.f32 %v5229_v62, %v12440_v47  ;;  %v5153_v46 = vadd.f32 %v5152_v2, %v12452_v9 }
 0x413   : > { %v5622_v26 = vmax.f32 %v5228_v7, 0.0  ;;  %v5652_v32 = vmax.f32 %v5151_v59, 0.0 }
 0x414   : > { %v5623_v33 = vmax.f32 %v5230_v57, 0.0  ;;  %v5233_v10 = vpop.f32.mrb[44].mxu1  ;;  %v5653_v51 = vmax.f32 %v5153_v46, 0.0 }
 0x415   : > { %v7429_v29 = vpack.c.bf16 %v5622_v26, %v5606_v61  ;;  %v5235_v12 = vpop.f32.mrb[45].mxu1  ;;  %v7425_v42 = vpack.c.bf16 %v5652_v32, %v5636_v39  ;;  %v5234_v8 = vadd.f32 %v5233_v10, %v12449_v31 }
 0x416   : > { %v7427_v44 = vpack.c.bf16 %v5623_v33, %v5607_v52  ;;  %v7423_v25 = vpack.c.bf16 %v5653_v51, %v5637_v3  ;;  %v5236_v15 = vadd.f32 %v5235_v12, %v12449_v31 }
 0x417   : > { %v5638_v6 = vmax.f32 %v5234_v8, 0.0 }
 0x418   : > { %v5239_v13 = vpop.f32.mrb[46].mxu1  ;;  %7428 = vmatprep.subr.bf16.mxu1 %v7427_v44  ;;  %7424 = vmatprep.subr.bf16.mxu0 %v7423_v25  ;;  %v5639_v19 = vmax.f32 %v5236_v15, 0.0 }
 0x419   : > { %v5240_v58 = vadd.f32 %v5239_v13, %v12452_v9  ;;  %v5241_v17 = vpop.f32.mrb[47].mxu1  ;;  %7430 = vmatpush1.bf16.msra.mxu1 %v7429_v29  ;;  %7426 = vmatpush1.bf16.msra.mxu0 %v7425_v42 }
 0x41a   : > { %v5242_v43 = vadd.f32 %v5241_v17, %v12452_v9 }
 0x41b   : > { %v5654_v14 = vmax.f32 %v5240_v58, 0.0 }
 0x41c   : > { %v5655_v38 = vmax.f32 %v5242_v43, 0.0  ;;  %7265 = vmatmul.mubr.msk.f32.vlgmr.msra.gmra.mrb[74].mxu0 %vm5675_vm1, %v12464_v16 }
 0x41d   : > { %v7433_v1 = vpack.c.bf16 %v5654_v14, %v5638_v6  ;;  %6609 = vmatprep.mubr.f32.mxu0 %v13767_v11 }
 0x41e   : > { %v7431_v27 = vpack.c.bf16 %v5655_v38, %v5639_v19 }
 0x420   : > { %7432 = vmatprep.subr.bf16.mxu1 %v7431_v27 }
 0x421   : > { %7434 = vmatpush1.bf16.msra.mxu1 %v7433_v1 }
 0x424   : > { %7266 = vmatmul.mubr.msk.f32.vlgmr.msra.gmra.mrb[74].mxu1 %vm5675_vm1, %v12464_v16 }
 0x425   : > { %6680 = vmatprep.mubr.f32.mxu1 %v13767_v11 }
 0x438   : > { %v5310_v53 = vpop.f32.mrb[48].mxu0 }
 0x439   : > { %v5312_v22 = vpop.f32.mrb[49].mxu0  ;;  %v5311_v0 = vadd.f32 %v5310_v53, %v12437_v48 }
 0x43a   : > { %v5313_v4 = vadd.f32 %v5312_v22, %v12437_v48 }
 0x43b   : > { %v5608_v34 = vmax.f32 %v5311_v0, 0.0 }
 0x43c   : > { %v5316_v21 = vpop.f32.mrb[50].mxu0  ;;  %v5609_v60 = vmax.f32 %v5313_v4, 0.0 }
 0x43d   : > { %v5317_v63 = vadd.f32 %v5316_v21, %v12440_v47  ;;  %v5318_v30 = vpop.f32.mrb[51].mxu0 }
 0x43e   : > { %v5319_v54 = vadd.f32 %v5318_v30, %v12440_v47 }
 0x43f   : > { %v5624_v36 = vmax.f32 %v5317_v63, 0.0 }
 0x440   : > { %v5399_v23 = vpop.f32.mrb[48].mxu1  ;;  %v5625_v45 = vmax.f32 %v5319_v54, 0.0  ;;  %v5322_v41 = vpop.f32.mrb[52].mxu0 }
 0x441   : > { %v5401_v37 = vpop.f32.mrb[49].mxu1  ;;  %v7437_v56 = vpack.c.bf16 %v5624_v36, %v5608_v34  ;;  %v5324_v40 = vpop.f32.mrb[53].mxu0  ;;  %v5400_v49 = vadd.f32 %v5399_v23, %v12437_v48  ;;  %v5323_v35 = vadd.f32 %v5322_v41, %v12449_v31 }
 0x442   : > { %v7435_v24 = vpack.c.bf16 %v5625_v45, %v5609_v60  ;;  %v5402_v18 = vadd.f32 %v5401_v37, %v12437_v48  ;;  %v5325_v7 = vadd.f32 %v5324_v40, %v12449_v31 }
 0x443   : > { %v5610_v59 = vmax.f32 %v5400_v49, 0.0  ;;  %v5640_v52 = vmax.f32 %v5323_v35, 0.0 }
 0x444   : > { %v5405_v28 = vpop.f32.mrb[50].mxu1  ;;  %v5328_v62 = vpop.f32.mrb[54].mxu0  ;;  %7436 = vmatprep.subr.bf16.mxu0 %v7435_v24  ;;  %v5611_v26 = vmax.f32 %v5402_v18, 0.0  ;;  %v5641_v32 = vmax.f32 %v5325_v7, 0.0 }
 0x445   : > { %v5406_v20 = vadd.f32 %v5405_v28, %v12440_v47  ;;  %v5407_v50 = vpop.f32.mrb[51].mxu1  ;;  %v5329_v55 = vadd.f32 %v5328_v62, %v12452_v9  ;;  %v5330_v57 = vpop.f32.mrb[55].mxu0  ;;  %7438 = vmatpush1.bf16.msra.mxu0 %v7437_v56 }
 0x446   : > { %v5408_v5 = vadd.f32 %v5407_v50, %v12440_v47  ;;  %v5331_v61 = vadd.f32 %v5330_v57, %v12452_v9 }
 0x447   : > { %v5626_v2 = vmax.f32 %v5406_v20, 0.0  ;;  %v5656_v39 = vmax.f32 %v5329_v55, 0.0 }
 0x448   : > { %v5627_v46 = vmax.f32 %v5408_v5, 0.0  ;;  %v5411_v33 = vpop.f32.mrb[52].mxu1  ;;  %v5657_v3 = vmax.f32 %v5331_v61, 0.0 }
 0x449   : > { %v7445_v10 = vpack.c.bf16 %v5626_v2, %v5610_v59  ;;  %v5413_v29 = vpop.f32.mrb[53].mxu1  ;;  %v7441_v51 = vpack.c.bf16 %v5656_v39, %v5640_v52  ;;  %v5412_v44 = vadd.f32 %v5411_v33, %v12449_v31 }
 0x44a   : > { %v7443_v12 = vpack.c.bf16 %v5627_v46, %v5611_v26  ;;  %v7439_v42 = vpack.c.bf16 %v5657_v3, %v5641_v32  ;;  %v5414_v8 = vadd.f32 %v5413_v29, %v12449_v31 }
 0x44b   : > { %v5642_v17 = vmax.f32 %v5412_v44, 0.0 }
 0x44c   : > { %v5417_v25 = vpop.f32.mrb[54].mxu1  ;;  %7444 = vmatprep.subr.bf16.mxu1 %v7443_v12  ;;  %7440 = vmatprep.subr.bf16.mxu0 %v7439_v42  ;;  %v5643_v6 = vmax.f32 %v5414_v8, 0.0 }
 0x44d   : > { %v5418_v15 = vadd.f32 %v5417_v25, %v12452_v9  ;;  %v5419_v13 = vpop.f32.mrb[55].mxu1  ;;  %7446 = vmatpush1.bf16.msra.mxu1 %v7445_v10  ;;  %7442 = vmatpush1.bf16.msra.mxu0 %v7441_v51 }
 0x44e   : > { %v5420_v58 = vadd.f32 %v5419_v13, %v12452_v9 }
 0x44f   : > { %v5658_v43 = vmax.f32 %v5418_v15, 0.0 }
 0x450   : > { %v5659_v14 = vmax.f32 %v5420_v58, 0.0  ;;  %7267 = vmatmul.mubr.msk.f32.vlgmr.msra.gmra.mrb[76].mxu0 %vm5675_vm1, %v12464_v16 }
 0x451   : > { %v7449_v19 = vpack.c.bf16 %v5658_v43, %v5642_v17  ;;  %6751 = vmatprep.mubr.f32.mxu0 %v13767_v11 }
 0x452   : > { %v7447_v38 = vpack.c.bf16 %v5659_v14, %v5643_v6 }
 0x454   : > { %7448 = vmatprep.subr.bf16.mxu1 %v7447_v38 }
 0x455   : > { %7450 = vmatpush1.bf16.msra.mxu1 %v7449_v19 }
 0x458   : > { %7268 = vmatmul.mubr.msk.f32.vlgmr.msra.gmra.mrb[76].mxu1 %vm5675_vm1, %v12464_v16 }
 0x459   : > { %6822 = vmatprep.mubr.f32.mxu1 %v13767_v11 }
 0x46b   : > { %v5488_v1 = vpop.f32.mrb[56].mxu0 }
 0x46c   : > { %v5490_v27 = vpop.f32.mrb[57].mxu0  ;;  %v5489_v53 = vadd.f32 %v5488_v1, %v12437_v48  ;;  %v5669_v1 = vpop.permute.xlu1 %5668 }
 0x46d   : > { %v5491_v22 = vadd.f32 %v5490_v27, %v12437_v48 }
 0x46e   : > { %v5612_v30 = vmax.f32 %v5489_v53, 0.0  ;;  %v14223_v53 = vld [vmem:[#allocation11_spill] sm:$0xff] }
 0x46f   : > { %v5494_v0 = vpop.f32.mrb[58].mxu0  ;;  %v5613_v23 = vmax.f32 %v5491_v22, 0.0  ;;  %v12545_v22 = vrot.slane %v5669_v1, %v14223_v53 }
 0x470   : > { %v5495_v4 = vadd.f32 %v5494_v0, %v12440_v47  ;;  %v5496_v21 = vpop.f32.mrb[59].mxu0 }
 0x471   : > { %v5497_v63 = vadd.f32 %v5496_v21, %v12440_v47 }
 0x472   : > { %v5577_v54 = vpop.f32.mrb[56].mxu1  ;;  %v5628_v34 = vmax.f32 %v5495_v4, 0.0 }
 0x473   : > { %v5579_v36 = vpop.f32.mrb[57].mxu1  ;;  %v5629_v60 = vmax.f32 %v5497_v63, 0.0  ;;  %v5500_v37 = vpop.f32.mrb[60].mxu0  ;;  %v5578_v41 = vadd.f32 %v5577_v54, %v12437_v48 }
 0x474   : > { %v7453_v11 = vpack.c.bf16 %v5628_v34, %v5612_v30  ;;  %v5502_v45 = vpop.f32.mrb[61].mxu0  ;;  %v5580_v40 = vadd.f32 %v5579_v36, %v12437_v48  ;;  %v5501_v24 = vadd.f32 %v5500_v37, %v12449_v31 }
 0x475   : > { %v7451_v56 = vpack.c.bf16 %v5629_v60, %v5613_v23  ;;  %v5503_v35 = vadd.f32 %v5502_v45, %v12449_v31  ;;  %v5614_v5 = vmax.f32 %v5578_v41, 0.0 }
 0x476   : > { %v5583_v49 = vpop.f32.mrb[58].mxu1  ;;  %v5615_v57 = vmax.f32 %v5580_v40, 0.0  ;;  %v5644_v2 = vmax.f32 %v5501_v24, 0.0  ;;  %v6252_v40 = vpop.permute.xlu0 %6251 }
 0x477   : > { %v5584_v18 = vadd.f32 %v5583_v49, %v12440_v47  ;;  %v5585_v28 = vpop.f32.mrb[59].mxu1  ;;  %v5506_v20 = vpop.f32.mrb[62].mxu0  ;;  %7452 = vmatprep.subr.bf16.mxu0 %v7451_v56  ;;  %v5645_v52 = vmax.f32 %v5503_v35, 0.0  ;;  %v12572_v49 = vrot.slane %v6252_v40, %v14223_v53 }
 0x478   : > { %v5586_v50 = vadd.f32 %v5585_v28, %v12440_v47  ;;  %v5507_v7 = vadd.f32 %v5506_v20, %v12452_v9  ;;  %v5508_v62 = vpop.f32.mrb[63].mxu0  ;;  %7454 = vmatpush1.bf16.msra.mxu0 %v7453_v11 }
 0x479   : > { %v5630_v55 = vmax.f32 %v5584_v18, 0.0  ;;  %v5509_v48 = vadd.f32 %v5508_v62, %v12452_v9 }
 0x47a   : > { %v5631_v59 = vmax.f32 %v5586_v50, 0.0  ;;  %v5589_v61 = vpop.f32.mrb[60].mxu1  ;;  %v5660_v26 = vmax.f32 %v5507_v7, 0.0 }
 0x47b   : > { %v7461_v46 = vpack.c.bf16 %v5630_v55, %v5614_v5  ;;  %v5591_v33 = vpop.f32.mrb[61].mxu1  ;;  %v5661_v39 = vmax.f32 %v5509_v48, 0.0  ;;  %v5745_v10 = vpop.f32.mrb[64].mxu0  ;;  %v5590_v3 = vadd.f32 %v5589_v61, %v12449_v31 }
 0x47c   : > { %v7459_v32 = vpack.c.bf16 %v5631_v59, %v5615_v57  ;;  %v7457_v47 = vpack.c.bf16 %v5660_v26, %v5644_v2  ;;  %v5747_v29 = vpop.f32.mrb[65].mxu0  ;;  %v5592_v51 = vadd.f32 %v5591_v33, %v12449_v31  ;;  %v5746_v62 = vadd.f32 %v5745_v10, %v12545_v22 }
 0x47d   : > { %v7455_v12 = vpack.c.bf16 %v5661_v39, %v5645_v52  ;;  %v5646_v15 = vmax.f32 %v5590_v3, 0.0  ;;  %v5748_v57 = vadd.f32 %v5747_v29, %v12545_v22 }
 0x47e   : > { %v5595_v44 = vpop.f32.mrb[62].mxu1  ;;  %7460 = vmatprep.subr.bf16.mxu1 %v7459_v32  ;;  %v5647_v58 = vmax.f32 %v5592_v51, 0.0 }
 0x47f   : > { %v5596_v42 = vadd.f32 %v5595_v44, %v12452_v9  ;;  %v5597_v8 = vpop.f32.mrb[63].mxu1  ;;  %7462 = vmatpush1.bf16.msra.mxu1 %v7461_v46  ;;  %7456 = vmatprep.subr.bf16.mxu0 %v7455_v12 }
 0x480   : > { %v5598_v25 = vadd.f32 %v5597_v8, %v12452_v9  ;;  %7458 = vmatpush1.bf16.msra.mxu0 %v7457_v47 }
 0x481   : > { %v5662_v13 = vmax.f32 %v5596_v42, 0.0 }
 0x482   : > { %v5663_v17 = vmax.f32 %v5598_v25, 0.0  ;;  %v5816_v43 = vpop.f32.mrb[64].mxu1 }
 0x483   : > { %v7465_v6 = vpack.c.bf16 %v5662_v13, %v5646_v15  ;;  %7269 = vmatmul.mubr.msk.f32.vlgmr.msra.gmra.mrb[78].mxu0 %vm5675_vm1, %v12464_v16  ;;  %v5818_v31 = vpop.f32.mrb[65].mxu1  ;;  %v5817_v48 = vadd.f32 %v5816_v43, %v12545_v22 }
 0x484   : > { %v7463_v14 = vpack.c.bf16 %v5663_v17, %v5647_v58  ;;  %v12534_v19 = vpop.f32.mrb[66].mxu0  ;;  %v5819_v61 = vadd.f32 %v5818_v31, %v12545_v22 }
 0x485   : > { %v12536_v38 = vpop.f32.mrb[67].mxu0 }
 0x486   : > { %7464 = vmatprep.subr.bf16.mxu1 %v7463_v14 }
 0x487   : > { %7466 = vmatpush1.bf16.msra.mxu1 %v7465_v6  ;;  %v7631_v6 = vmov 1983009808  }
 0x488   : > { %v7009_v31 = vunpack.c.l.s4 %v7631_v6 }
 0x48a   : > { %7270 = vmatmul.mubr.msk.f32.vlgmr.msra.gmra.mrb[78].mxu1 %vm5675_vm1, %v12464_v16  ;;  %v12540_v9 = vpop.f32.mrb[66].mxu1  ;;  %v7010_v14 = vunpack.c.0.s8 %v7009_v31 }
 0x48b   : > { %v12542_v27 = vpop.f32.mrb[67].mxu1 }
 0x48d   : > { %v6029_v0 = vpop.f32.mrb[68].mxu0 }
 0x48e   : > { %v12548_v4 = vadd.f32 %v6029_v0, %v12545_v22  ;;  %v6031_v21 = vpop.f32.mrb[69].mxu0  ;;  %v14224_v0 = vld [vmem:[#allocation6_spill] sm:$0xff] }
 0x48f   : > { %v12551_v63 = vadd.f32 %v6031_v21, %v12545_v22  ;;  %v12587_v21 = vsub.s32 %v7010_v14, %v14224_v0 }
 0x492   : > { %v6100_v30 = vpop.f32.mrb[68].mxu1 }
 0x493   : > { %v12554_v54 = vadd.f32 %v6100_v30, %v12545_v22  ;;  %v6102_v16 = vpop.f32.mrb[69].mxu1 }
 0x494   : > { %v12557_v34 = vadd.f32 %v6102_v16, %v12545_v22 }
 0x495   : > { %v6171_v23 = vpop.f32.mrb[70].mxu0 }
 0x496   : > { %v12560_v36 = vadd.f32 %v6171_v23, %v12545_v22  ;;  %v6173_v60 = vpop.f32.mrb[71].mxu0 }
 0x497   : > { %v12563_v37 = vadd.f32 %v6173_v60, %v12545_v22 }
 0x4a4   : > { %v6242_v11 = vpop.f32.mrb[70].mxu1 }
 0x4a5   : > { %v12566_v45 = vadd.f32 %v6242_v11, %v12545_v22  ;;  %v6244_v41 = vpop.f32.mrb[71].mxu1 }
 0x4a6   : > { %v12569_v56 = vadd.f32 %v6244_v41, %v12545_v22 }
 0x4be   : > { %v6327_v24 = vpop.f32.mrb[72].mxu0 }
 0x4bf   : > { %v6328_v18 = vadd.f32 %v6327_v24, %v12572_v49  ;;  %v6329_v35 = vpop.f32.mrb[73].mxu0 }
 0x4c0   : > { %v6398_v28 = vpop.f32.mrb[72].mxu1  ;;  %v6330_v50 = vadd.f32 %v6329_v35, %v12572_v49 }
 0x4c1   : > { %v6399_v20 = vadd.f32 %v6398_v28, %v12572_v49  ;;  %v6400_v7 = vpop.f32.mrb[73].mxu1  ;;  %v6845_v5 = vrot.slane %v6328_v18, 7 }
 0x4c2   : > { %v6401_v55 = vadd.f32 %v6400_v7, %v12572_v49  ;;  %v6846_v2 = vrot.slane %v6330_v50, 7  ;;  %v5890_v7 = vadd.f32 %v12536_v38, %v12545_v22 }
 0x4c3   : > { %v6847_v59 = vrot.slane %v6399_v20, 7  ;;  %v6878_v26 = vsel %vm6877_vm2, %v5746_v62, %v6845_v5  ;;  %v5888_v20 = vadd.f32 %v12534_v19, %v12545_v22  ;;  %v5959_v19 = vadd.f32 %v12540_v9, %v12545_v22 }
 0x4c4   : > { %v6848_v46 = vrot.slane %v6401_v55, 7  ;;  %v6894_v52 = vsub.f32 0.0, %v6878_v26  ;;  %v6879_v39 = vsel %vm6877_vm2, %v5748_v57, %v6846_v2 }
 0x4c5   : > { %v6880_v33 = vsel %vm6877_vm2, %v5817_v48, %v6847_v59  ;;  %v6895_v32 = vsub.f32 0.0, %v6879_v39 }
 0x4c6   : > { %v6896_v10 = vsub.f32 0.0, %v6880_v33  ;;  %v6881_v47 = vsel %vm6877_vm2, %v5819_v61, %v6848_v46  ;;  %v6910_v3 = vmul.f32 1.442695, %v6894_v52  ;;  %v5961_v33 = vadd.f32 %v12542_v27, %v12545_v22 }
 0x4c7   : > { %v6897_v12 = vsub.f32 0.0, %v6881_v47  ;;  %v6912_v29 = vmul.f32 1.442695, %v6895_v32 }
 0x4c8   : > { %v6914_v51 = vmul.f32 1.442695, %v6896_v10  ;;  %7496 = vpow2.f32 %v6910_v3 }
 0x4c9   : > { %v6916_v44 = vmul.f32 1.442695, %v6897_v12 }
 0x4ca   : > { %7498 = vpow2.f32 %v6914_v51 }
 0x4cb   : > { %7500 = vpow2.f32 %v6912_v29 }
 0x4cc   : > { %7502 = vpow2.f32 %v6916_v44 }
 0x4d2   : > { %v7497_v42 = vpop.eup %7496 }
 0x4d3   : > { %v6942_v25 = vadd.f32 1.0, %v7497_v42 }
 0x4d4   : > { %v7499_v8 = vpop.eup %7498 }
 0x4d5   : > { %v7501_v15 = vpop.eup %7500  ;;  %v6944_v13 = vadd.f32 1.0, %v7499_v8  ;;  %7504 = vrcp.f32 %v6942_v25 }
 0x4d6   : > { %v7503_v58 = vpop.eup %7502  ;;  %v6943_v17 = vadd.f32 1.0, %v7501_v15 }
 0x4d7   : > { %7506 = vrcp.f32 %v6944_v13  ;;  %v6945_v43 = vadd.f32 1.0, %v7503_v58 }
 0x4d8   : > { %7508 = vrcp.f32 %v6943_v17 }
 0x4d9   : > { %7510 = vrcp.f32 %v6945_v43 }
 0x4df   : > { %v7505_v1 = vpop.eup %7504 }
 0x4e1   : > { %v7507_v53 = vpop.eup %7506 }
 0x4e2   : > { %v7509_v30 = vpop.eup %7508 }
 0x4e3   : > { %v7511_v16 = vpop.eup %7510  ;;  %v7006_v23 = vcombine.low %v7505_v1, %v7509_v30 }
 0x4e4   : > { %v7007_v60 = vcombine.low %v7507_v53, %v7511_v16 }
 0x4e5   : > { %v7014_v11 = vrot.slane %v7006_v23, %v12587_v21 }
 0x4e6   : > { %v7021_v41 = vrot.slane %v7007_v60, %v12587_v21 }
 0x4e8   : > { %v7022_v40 = vcombine.low %v7014_v11, %v7021_v41 }
 0x4ea   : > { %7078 = vst [vmem:[%s12595_s14] sm:$0xff] %v7022_v40 }
 0x4ef   : > { %v6469_v24 = vpop.f32.mrb[74].mxu0 }
 0x4f0   : > { %v6470_v18 = vadd.f32 %v6469_v24, %v12572_v49  ;;  %v6471_v28 = vpop.f32.mrb[75].mxu0 }
 0x4f1   : > { %v6472_v35 = vadd.f32 %v6471_v28, %v12572_v49 }
 0x4f2   : > { %v6849_v50 = vrot.slane %v6470_v18, 7 }
 0x4f3   : > { %v6850_v62 = vrot.slane %v6472_v35, 7 }
 0x4f4   : > { %v6882_v5 = vsel %vm6877_vm2, %v5888_v20, %v6849_v50 }
 0x4f5   : > { %v6898_v55 = vsub.f32 0.0, %v6882_v5  ;;  %v6883_v48 = vsel %vm6877_vm2, %v5890_v7, %v6850_v62 }
 0x4f6   : > { %v6899_v59 = vsub.f32 0.0, %v6883_v48 }
 0x4f7   : > { %v6540_v57 = vpop.f32.mrb[74].mxu1  ;;  %v6918_v2 = vmul.f32 1.442695, %v6898_v55 }
 0x4f8   : > { %v6541_v61 = vadd.f32 %v6540_v57, %v12572_v49  ;;  %v6542_v26 = vpop.f32.mrb[75].mxu1  ;;  %v6920_v46 = vmul.f32 1.442695, %v6899_v59 }
 0x4f9   : > { %v6543_v52 = vadd.f32 %v6542_v26, %v12572_v49  ;;  %7512 = vpow2.f32 %v6918_v2 }
 0x4fa   : > { %v6851_v38 = vrot.slane %v6541_v61, 7  ;;  %7514 = vpow2.f32 %v6920_v46 }
 0x4fb   : > { %v6852_v39 = vrot.slane %v6543_v52, 7 }
 0x4fc   : > { %v6884_v10 = vsel %vm6877_vm2, %v5959_v19, %v6851_v38 }
 0x4fd   : > { %v6900_v32 = vsub.f32 0.0, %v6884_v10  ;;  %v6885_v47 = vsel %vm6877_vm2, %v5961_v33, %v6852_v39 }
 0x4fe   : > { %v6901_v3 = vsub.f32 0.0, %v6885_v47 }
 0x4ff   : > { %v6922_v12 = vmul.f32 1.442695, %v6900_v32 }
 0x500   : > { %v6924_v51 = vmul.f32 1.442695, %v6901_v3 }
 0x501   : > { %7516 = vpow2.f32 %v6922_v12 }
 0x502   : > { %7518 = vpow2.f32 %v6924_v51 }
 0x503   : > { %v7513_v29 = vpop.eup %7512 }
 0x504   : > { %v7515_v44 = vpop.eup %7514  ;;  %v6946_v9 = vadd.f32 1.0, %v7513_v29 }
 0x505   : > { %v6947_v42 = vadd.f32 1.0, %v7515_v44 }
 0x506   : > { %7520 = vrcp.f32 %v6946_v9 }
 0x507   : > { %7522 = vrcp.f32 %v6947_v42 }
 0x50b   : > { %v7517_v8 = vpop.eup %7516 }
 0x50c   : > { %v7519_v27 = vpop.eup %7518  ;;  %v6948_v22 = vadd.f32 1.0, %v7517_v8 }
 0x50d   : > { %v6949_v25 = vadd.f32 1.0, %v7519_v27 }
 0x50e   : > { %7524 = vrcp.f32 %v6948_v22 }
 0x50f   : > { %7526 = vrcp.f32 %v6949_v25 }
 0x510   : > { %v7521_v15 = vpop.eup %7520 }
 0x511   : > { %v7523_v13 = vpop.eup %7522 }
 0x512   : > { %v7023_v58 = vcombine.low %v7521_v15, %v7523_v13 }
 0x514   : > { %v7031_v6 = vrot.slane %v7023_v58, %v12587_v21 }
 0x518   : > { %v7525_v17 = vpop.eup %7524 }
 0x519   : > { %v7527_v43 = vpop.eup %7526 }
 0x51a   : > { %v7024_v31 = vcombine.low %v7525_v17, %v7527_v43 }
 0x51c   : > { %v7038_v14 = vrot.slane %v7024_v31, %v12587_v21 }
 0x51e   : > { %v7039_v1 = vcombine.low %v7031_v6, %v7038_v14 }
 0x520   : > { %7079 = vst [vmem:[%s12595_s14 + $0x8] sm:$0xff] %v7039_v1 }
 0x523   : > { %v6611_v53 = vpop.f32.mrb[76].mxu0 }
 0x524   : > { %v6612_v0 = vadd.f32 %v6611_v53, %v12572_v49  ;;  %v6613_v30 = vpop.f32.mrb[77].mxu0 }
 0x525   : > { %v6614_v16 = vadd.f32 %v6613_v30, %v12572_v49 }
 0x526   : > { %v6853_v23 = vrot.slane %v6612_v0, 7 }
 0x527   : > { %v6854_v60 = vrot.slane %v6614_v16, 7 }
 0x528   : > { %v6886_v11 = vsel %vm6877_vm2, %v12548_v4, %v6853_v23 }
 0x529   : > { %v6902_v41 = vsub.f32 0.0, %v6886_v11  ;;  %v6887_v40 = vsel %vm6877_vm2, %v12551_v63, %v6854_v60 }
 0x52a   : > { %v6903_v18 = vsub.f32 0.0, %v6887_v40 }
 0x52b   : > { %v6682_v24 = vpop.f32.mrb[76].mxu1  ;;  %v6926_v28 = vmul.f32 1.442695, %v6902_v41 }
 0x52c   : > { %v6683_v35 = vadd.f32 %v6682_v24, %v12572_v49  ;;  %v6684_v20 = vpop.f32.mrb[77].mxu1  ;;  %v6928_v50 = vmul.f32 1.442695, %v6903_v18 }
 0x52d   : > { %v6685_v7 = vadd.f32 %v6684_v20, %v12572_v49  ;;  %7528 = vpow2.f32 %v6926_v28 }
 0x52e   : > { %v6855_v62 = vrot.slane %v6683_v35, 7  ;;  %7530 = vpow2.f32 %v6928_v50 }
 0x52f   : > { %v6856_v5 = vrot.slane %v6685_v7, 7 }
 0x530   : > { %v6888_v4 = vsel %vm6877_vm2, %v12554_v54, %v6855_v62 }
 0x531   : > { %v6904_v55 = vsub.f32 0.0, %v6888_v4  ;;  %v6889_v63 = vsel %vm6877_vm2, %v12557_v34, %v6856_v5 }
 0x532   : > { %v6905_v48 = vsub.f32 0.0, %v6889_v63 }
 0x533   : > { %v6930_v57 = vmul.f32 1.442695, %v6904_v55 }
 0x534   : > { %v6932_v59 = vmul.f32 1.442695, %v6905_v48 }
 0x535   : > { %7532 = vpow2.f32 %v6930_v57 }
 0x536   : > { %7534 = vpow2.f32 %v6932_v59 }
 0x537   : > { %v7529_v2 = vpop.eup %7528 }
 0x538   : > { %v7531_v61 = vpop.eup %7530  ;;  %v6950_v26 = vadd.f32 1.0, %v7529_v2 }
 0x539   : > { %v6951_v46 = vadd.f32 1.0, %v7531_v61 }
 0x53a   : > { %7536 = vrcp.f32 %v6950_v26 }
 0x53b   : > { %7538 = vrcp.f32 %v6951_v46 }
 0x53f   : > { %v7533_v52 = vpop.eup %7532 }
 0x540   : > { %v7535_v19 = vpop.eup %7534  ;;  %v6952_v38 = vadd.f32 1.0, %v7533_v52 }
 0x541   : > { %v6953_v54 = vadd.f32 1.0, %v7535_v19 }
 0x542   : > { %7540 = vrcp.f32 %v6952_v38 }
 0x543   : > { %7542 = vrcp.f32 %v6953_v54 }
 0x544   : > { %v7537_v33 = vpop.eup %7536 }
 0x545   : > { %v7539_v34 = vpop.eup %7538 }
 0x546   : > { %v7040_v39 = vcombine.low %v7537_v33, %v7539_v34 }
 0x548   : > { %v7048_v47 = vrot.slane %v7040_v39, %v12587_v21 }
 0x54c   : > { %v7541_v10 = vpop.eup %7540 }
 0x54d   : > { %v7543_v32 = vpop.eup %7542 }
 0x54e   : > { %v7041_v3 = vcombine.low %v7541_v10, %v7543_v32 }
 0x550   : > { %v7055_v12 = vrot.slane %v7041_v3, %v12587_v21 }
 0x552   : > { %v7056_v51 = vcombine.low %v7048_v47, %v7055_v12 }
 0x554   : > { %7080 = vst [vmem:[%s12595_s14 + $0x10] sm:$0xff] %v7056_v51 }
 0x556   : > { %v6753_v29 = vpop.f32.mrb[78].mxu0 }
 0x557   : > { %v6754_v44 = vadd.f32 %v6753_v29, %v12572_v49  ;;  %v6755_v9 = vpop.f32.mrb[79].mxu0 }
 0x558   : > { %v6756_v42 = vadd.f32 %v6755_v9, %v12572_v49 }
 0x559   : > { %v6857_v8 = vrot.slane %v6754_v44, 7 }
 0x55a   : > { %v6858_v27 = vrot.slane %v6756_v42, 7 }
 0x55b   : > { %v6890_v22 = vsel %vm6877_vm2, %v12560_v36, %v6857_v8 }
 0x55c   : > { %v6906_v25 = vsub.f32 0.0, %v6890_v22  ;;  %v6891_v15 = vsel %vm6877_vm2, %v12563_v37, %v6858_v27 }
 0x55d   : > { %v6824_v13 = vpop.f32.mrb[78].mxu1  ;;  %v6907_v58 = vsub.f32 0.0, %v6891_v15 }
 0x55e   : > { %v6934_v17 = vmul.f32 1.442695, %v6906_v25  ;;  %v6825_v43 = vadd.f32 %v6824_v13, %v12572_v49  ;;  %v6826_v6 = vpop.f32.mrb[79].mxu1 }
 0x55f   : > { %v6936_v31 = vmul.f32 1.442695, %v6907_v58  ;;  %v6827_v14 = vadd.f32 %v6826_v6, %v12572_v49 }
 0x560   : > { %7544 = vpow2.f32 %v6934_v17  ;;  %v6859_v1 = vrot.slane %v6825_v43, 7 }
 0x561   : > { %7546 = vpow2.f32 %v6936_v31  ;;  %v6860_v53 = vrot.slane %v6827_v14, 7 }
 0x562   : > { %v6892_v36 = vsel %vm6877_vm2, %v12566_v45, %v6859_v1 }
 0x563   : > { %v6908_v0 = vsub.f32 0.0, %v6892_v36  ;;  %v6893_v37 = vsel %vm6877_vm2, %v12569_v56, %v6860_v53 }
 0x564   : > { %v6909_v30 = vsub.f32 0.0, %v6893_v37 }
 0x565   : > { %v6938_v16 = vmul.f32 1.442695, %v6908_v0 }
 0x566   : > { %v6940_v23 = vmul.f32 1.442695, %v6909_v30 }
 0x567   : > { %7548 = vpow2.f32 %v6938_v16 }
 0x568   : > { %7550 = vpow2.f32 %v6940_v23 }
 0x56a   : > { %v7545_v60 = vpop.eup %7544 }
 0x56b   : > { %v7547_v11 = vpop.eup %7546  ;;  %v6954_v41 = vadd.f32 1.0, %v7545_v60 }
 0x56c   : > { %v6955_v49 = vadd.f32 1.0, %v7547_v11 }
 0x56d   : > { %7552 = vrcp.f32 %v6954_v41 }
 0x56e   : > { %7554 = vrcp.f32 %v6955_v49 }
 0x571   : > { %v7549_v40 = vpop.eup %7548 }
 0x572   : > { %v7551_v24 = vpop.eup %7550  ;;  %v6956_v18 = vadd.f32 1.0, %v7549_v40 }
 0x573   : > { %v6957_v45 = vadd.f32 1.0, %v7551_v24 }
 0x574   : > { %7556 = vrcp.f32 %v6956_v18 }
 0x575   : > { %7558 = vrcp.f32 %v6957_v45 }
 0x577   : > { %v7553_v28 = vpop.eup %7552 }
 0x578   : > { %v7555_v56 = vpop.eup %7554 }
 0x579   : > { %v7057_v35 = vcombine.low %v7553_v28, %v7555_v56 }
 0x57b   : > { %v7065_v7 = vrot.slane %v7057_v35, %v12587_v21 }
 0x57e   : > { %v7557_v20 = vpop.eup %7556 }
 0x57f   : > { %v7559_v50 = vpop.eup %7558 }
 0x580   : > { %v7058_v62 = vcombine.low %v7557_v20, %v7559_v50 }
 0x582   : > { %v7072_v5 = vrot.slane %v7058_v62, %v12587_v21 }
 0x584   : > { %v7073_v4 = vcombine.low %v7065_v7, %v7072_v5 }
 0x586   : > { %7081 = vst [vmem:[%s12595_s14 + $0x18] sm:$0xff] %v7073_v4 }
 0x587 PF: > { %p23_p9 = scmp.ge.s32.totalorder %s7720_s11, 4   ;;  %s14225_s25 = smov %s7623_s26 }
 0x588   : > { %s14226_s26 = smov %s7729_s30  ;;  %s14227_s27 = smov %s7720_s11 }
 0x589   :  { %25 = sbr.rel (!%p23_p9) target bundleno = 5 (0x5), region = 160 }

</bundles_post_ra>
